<compile_context>
chip_gen: v6e
topology: v6e:2x2x1
jax: 0.10.0
libtpu: 0.0.40
codegen_flags: <defaults>
</compile_context>

<pallas_src>
import functools

import numpy as np
import jax
import jax.numpy as jnp
from jax.experimental import pallas as pl
from jax.experimental.pallas import tpu as pltpu

OC = 32          # every conv in BackboneRL has 32 output channels


# ----------------------------------------------------------------------------- kernel

def _conv_stage(act, sh_ref, m_ref, b_ref, *, H, W, out_bf16):
    """One conv(3x3, stride 2, pad 1) + ReLU on a VMEM-resident per-sample activation.

    act    : (H, W*C)   bf16, rows = h, lanes = (w, c)
    sh_ref : (3, Ho, H) bf16, 0/1 row selection per kh tap (pad+stride folded in)
    m_ref  : (3, W*C, Wo*OC) bf16, host-precomputed masked weights, kw taps folded in
    b_ref  : (1, Wo*OC) f32 bias (tiled along wo)
    returns: (Ho, Wo*OC) rows = ho, lanes = (wo, oc); bf16 (next stage) or f32 (FC)
    """
    acc = None
    for kh in range(3):                                   # static unroll (3 taps)
        # rows of the (implicitly zero-padded) input selected by this kh tap
        r = jnp.dot(sh_ref[kh], act,
                    preferred_element_type=jnp.float32).astype(jnp.bfloat16)
        part = jnp.dot(r, m_ref[kh], preferred_element_type=jnp.float32)
        acc = part if acc is None else acc + part
    out = jnp.maximum(acc + b_ref[...], 0.0)              # f32 VPU epilogue
    return out.astype(jnp.bfloat16) if out_bf16 else out


def _backbone_kernel(x_ref,
                     sh1, m1, b1,
                     sh2, m2, b2,
                     sh3, m3, b3,
                     wf_ref, bf_ref,
                     o_ref, *, H, W):
    act = x_ref[0]                                                    # (H, W*C1) bf16
    act = _conv_stage(act, sh1, m1, b1, H=H,      W=W,      out_bf16=True)
    act = _conv_stage(act, sh2, m2, b2, H=H // 2, W=W // 2, out_bf16=True)
    act = _conv_stage(act, sh3, m3, b3, H=H // 4, W=W // 4, out_bf16=False)  # f32

    # act: (8, 8*32) with rows=ho, lanes=(wo,oc).  FC fused here in f32 (accuracy);
    # fc weight rows were pre-permuted on the host to this (ho, wo, oc) order.
    Ho3 = H // 8
    chunk = (W // 8) * OC
    out = bf_ref[...]                                     # start from the bias (1, out)
    for ho in range(Ho3):                                 # static unroll, single store
        out = out + jnp.dot(act[ho:ho + 1, :],
                            wf_ref[ho * chunk:(ho + 1) * chunk, :],
                            preferred_element_type=jnp.float32)
    o_ref[0] = out


# ------------------------------------------------------------------ host-side helpers

def init_params(key, input_channels, output_dim):
    ks = jax.random.split(key, 8)

    def u(k, shape, fan_in):
        bound = 1.0 / np.sqrt(float(fan_in))
        return jax.random.uniform(k, shape, jnp.float32, -bound, bound)

    return {
        "w1": u(ks[0], (OC, input_channels, 3, 3), input_channels * 9),
        "b1": u(ks[1], (OC,), input_channels * 9),
        "w2": u(ks[2], (OC, OC, 3, 3), OC * 9),
        "b2": u(ks[3], (OC,), OC * 9),
        "w3": u(ks[4], (OC, OC, 3, 3), OC * 9),
        "b3": u(ks[5], (OC,), OC * 9),
        "wf": u(ks[6], (output_dim, 8 * 8 * OC), 8 * 8 * OC),
        "bf": u(ks[7], (output_dim,), 8 * 8 * OC),
    }


def _h_select(H):
    """(3, Ho, H) 0/1 matrices selecting input row h = 2*ho + kh - 1 (per sample)."""
    Ho = H // 2
    sh = np.zeros((3, Ho, H), np.float32)
    for kh in range(3):
        for ho in range(Ho):
            h = 2 * ho + kh - 1
            if 0 <= h < H:
                sh[kh, ho, h] = 1.0
    return sh


def _folded_weights(W, C, w):
    """(3, W*C, Wo*OC) masked+tiled weights with the three kw taps folded together:
       m[kh, w*C+c, wo*OC+oc] = weight[oc, c, kh, w-2*wo+1] if 0<=w-2*wo+1<=2 else 0."""
    Wo = W // 2
    wn = np.asarray(w, np.float32)                      # (OC, C, 3, 3)
    m = np.zeros((3, W * C, Wo * OC), np.float32)
    for kh in range(3):
        for kw in range(3):
            blk = wn[:, :, kh, kw].T                    # (C, OC)
            for wo in range(Wo):
                wi = 2 * wo + kw - 1
                if 0 <= wi < W:
                    m[kh, wi * C:(wi + 1) * C, wo * OC:(wo + 1) * OC] = blk
    return m


def _stage_consts(H, W, C, w, bias):
    Wo = W // 2
    sh = jnp.asarray(_h_select(H), jnp.bfloat16)                       # exact in bf16
    m = jnp.asarray(_folded_weights(W, C, w), jnp.bfloat16)
    brow = jnp.tile(jnp.asarray(bias, jnp.float32).reshape(1, OC), (1, Wo))
    return [sh, m, brow]


def prepare_params(params, input_channels, output_dim, height=64, width=64):
    """One-time preprocessing of the (PyTorch-layout) parameters into kernel operands."""
    assert height == 64 and width == 64, "fc layer requires the conv stack to end at 8x8x32"
    # Pad layer-1 input channels to a multiple of 8 (>=8) so W*C stays a multiple of 128.
    c1p = max(8, int(np.ceil(input_channels / 8)) * 8)
    w1 = np.asarray(params["w1"], np.float32)
    if c1p != input_channels:
        w1 = np.pad(w1, ((0, 0), (0, c1p - input_channels), (0, 0), (0, 0)))

    consts = []
    consts += _stage_consts(64, 64, c1p, w1, params["b1"])
    consts += _stage_consts(32, 32, OC, np.asarray(params["w2"]), params["b2"])
    consts += _stage_consts(16, 16, OC, np.asarray(params["w3"]), params["b3"])

    # fc weight with rows permuted to the kernel's (ho, wo, oc) feature order; kept f32.
    wfr = np.asarray(params["wf"], np.float32).reshape(output_dim, OC, 8, 8)
    wf_perm = np.transpose(wfr, (2, 3, 1, 0)).reshape(8 * 8 * OC, output_dim)
    return {
        "consts": consts,
        "wf": jnp.asarray(wf_perm, jnp.float32),
        "bf": jnp.asarray(params["bf"], jnp.float32).reshape(1, output_dim),
    }


def _const_spec(a):
    if a.ndim == 2:
        return pl.BlockSpec(a.shape, lambda b: (0, 0))
    return pl.BlockSpec(a.shape, lambda b: (0, 0, 0))


@jax.jit
def backbone_rl_forward(prepped, x):
    B, C, H, W = x.shape
    c1p = prepped["consts"][1].shape[1] // W          # padded layer-1 channels (static)
    out_dim = prepped["wf"].shape[1]

    xp = x if c1p == C else jnp.pad(x, ((0, 0), (0, c1p - C), (0, 0), (0, 0)))
    # NCHW -> per-sample rows=h, lanes=(w,c); cast to bf16 once on the host side.
    x3 = jnp.transpose(xp, (0, 2, 3, 1)).reshape(B, H, W * c1p).astype(jnp.bfloat16)

    consts = prepped["consts"]
    in_specs = [pl.BlockSpec((1, H, W * c1p), lambda b: (b, 0, 0))]
    in_specs += [_const_spec(a) for a in consts]
    in_specs += [_const_spec(prepped["wf"]), _const_spec(prepped["bf"])]

    kernel = functools.partial(_backbone_kernel, H=H, W=W)
    out = pl.pallas_call(
        kernel,
        grid=(B,),
        in_specs=in_specs,
        out_specs=pl.BlockSpec((1, 1, out_dim), lambda b: (b, 0, 0)),
        out_shape=jax.ShapeDtypeStruct((B, 1, out_dim), jnp.float32),
        compiler_params=pltpu.CompilerParams(
            dimension_semantics=("parallel",),
            vmem_limit_bytes=48 * 1024 * 1024),
        cost_estimate=pl.CostEstimate(flops=170_000_000 * B, transcendentals=0,
                                      bytes_accessed=8_000_000 + 70_000 * B),
    )(x3, *consts, prepped["wf"], prepped["bf"])
    return out[:, 0, :]


# ---------------------------------------------------------------------------- reference

def _reference_forward(params, x):
    def conv(h, w, b):
        y = jax.lax.conv_general_dilated(
            h, w, window_strides=(2, 2), padding=((1, 1), (1, 1)),
            dimension_numbers=("NCHW", "OIHW", "NCHW"))
        return jax.nn.relu(y + b.reshape(1, -1, 1, 1))

    h = conv(x, params["w1"], params["b1"])
    h = conv(h, params["w2"], params["b2"])
    h = conv(h, params["w3"], params["b3"])
    h = h.reshape(h.shape[0], -1)
    return h @ params["wf"].T + params["bf"]


if __name__ == "__main__":
    key = jax.random.PRNGKey(0)
    kx, kp = jax.random.split(key)
    # The fc layer fixes the conv-stack output at 8x8x32, so spatial input must be 64x64.
    B, C, H, W = 2, 4, 64, 64
    output_dim = 32
    x = jax.random.normal(kx, (B, C, H, W), jnp.float32)
    params = init_params(kp, C, output_dim)
    prepped = prepare_params(params, C, output_dim)

    out = jax.block_until_ready(backbone_rl_forward(prepped, x))

    ref = _reference_forward(params, x)
    assert out.shape == (B, output_dim)
    err = float(jnp.max(jnp.abs(out - ref)))
    # bf16 MXU operands in the conv stack -> tolerance loosened vs the pure-f32 version.
    assert err < 2e-2, err
    print("KERNEL_OK")
</pallas_src>

<mosaic_0001>
module attributes {stable_mosaic.version = 11 : i64} {
  func.func @_backbone_kernel(%arg0: i32, %arg1: memref<1x64x512xbf16, #tpu.memory_space<vmem>>, %arg2: memref<3x32x64xbf16, #tpu.memory_space<vmem>>, %arg3: memref<3x512x1024xbf16, #tpu.memory_space<vmem>>, %arg4: memref<1x1024xf32, #tpu.memory_space<vmem>>, %arg5: memref<3x16x32xbf16, #tpu.memory_space<vmem>>, %arg6: memref<3x1024x512xbf16, #tpu.memory_space<vmem>>, %arg7: memref<1x512xf32, #tpu.memory_space<vmem>>, %arg8: memref<3x8x16xbf16, #tpu.memory_space<vmem>>, %arg9: memref<3x512x256xbf16, #tpu.memory_space<vmem>>, %arg10: memref<1x256xf32, #tpu.memory_space<vmem>>, %arg11: memref<2048x32xf32, #tpu.memory_space<vmem>>, %arg12: memref<1x32xf32, #tpu.memory_space<vmem>>, %arg13: memref<1x1x32xf32, #tpu.memory_space<vmem>>) attributes {dimension_semantics = [#tpu.dimension_semantics<parallel>], iteration_bounds = array<i64: 2>, scalar_prefetch = 0 : i64, scratch_operands = 0 : i64, tpu.core_type = #tpu.core_type<tc>, window_params = [{transform_indices = @transform_0, window_bounds = array<i64: 1, 64, 512>}, {pipeline_mode = #tpu.pipeline_mode<synchronous>, transform_indices = @transform_1, window_bounds = array<i64: 3, 32, 64>}, {pipeline_mode = #tpu.pipeline_mode<synchronous>, transform_indices = @transform_2, window_bounds = array<i64: 3, 512, 1024>}, {pipeline_mode = #tpu.pipeline_mode<synchronous>, transform_indices = @transform_3, window_bounds = array<i64: 1, 1024>}, {pipeline_mode = #tpu.pipeline_mode<synchronous>, transform_indices = @transform_4, window_bounds = array<i64: 3, 16, 32>}, {pipeline_mode = #tpu.pipeline_mode<synchronous>, transform_indices = @transform_5, window_bounds = array<i64: 3, 1024, 512>}, {pipeline_mode = #tpu.pipeline_mode<synchronous>, transform_indices = @transform_6, window_bounds = array<i64: 1, 512>}, {pipeline_mode = #tpu.pipeline_mode<synchronous>, transform_indices = @transform_7, window_bounds = array<i64: 3, 8, 16>}, {pipeline_mode = #tpu.pipeline_mode<synchronous>, transform_indices = @transform_8, window_bounds = array<i64: 3, 512, 256>}, {pipeline_mode = #tpu.pipeline_mode<synchronous>, transform_indices = @transform_9, window_bounds = array<i64: 1, 256>}, {pipeline_mode = #tpu.pipeline_mode<synchronous>, transform_indices = @transform_10, window_bounds = array<i64: 2048, 32>}, {pipeline_mode = #tpu.pipeline_mode<synchronous>, transform_indices = @transform_11, window_bounds = array<i64: 1, 32>}, {transform_indices = @transform_12, window_bounds = array<i64: 1, 1, 32>}]} {
    %c0 = arith.constant 0 : index
    %c0_0 = arith.constant 0 : index
    %c0_1 = arith.constant 0 : index
    %0 = vector.load %arg1[%c0, %c0_0, %c0_1] : memref<1x64x512xbf16, #tpu.memory_space<vmem>>, vector<1x64x512xbf16>
    %1 = vector.shape_cast %0 : vector<1x64x512xbf16> to vector<64x512xbf16>
    %c0_2 = arith.constant 0 : index
    %c0_3 = arith.constant 0 : index
    %c0_4 = arith.constant 0 : index
    %2 = vector.load %arg2[%c0_2, %c0_3, %c0_4] : memref<3x32x64xbf16, #tpu.memory_space<vmem>>, vector<1x32x64xbf16>
    %3 = vector.shape_cast %2 : vector<1x32x64xbf16> to vector<32x64xbf16>
    %cst = arith.constant dense<0.000000e+00> : vector<32x512xf32>
    %4 = tpu.matmul %3, %1, %cst {dimension_numbers = #tpu.dot_dimension_numbers<[1], [0], [0], [1], [0, 0, 1, 1], [], []>} : vector<32x64xbf16>, vector<64x512xbf16>, vector<32x512xf32> -> vector<32x512xf32>
    %5 = arith.truncf %4 : vector<32x512xf32> to vector<32x512xbf16>
    %c0_5 = arith.constant 0 : index
    %c0_6 = arith.constant 0 : index
    %c0_7 = arith.constant 0 : index
    %6 = vector.load %arg3[%c0_5, %c0_6, %c0_7] : memref<3x512x1024xbf16, #tpu.memory_space<vmem>>, vector<1x512x1024xbf16>
    %7 = vector.shape_cast %6 : vector<1x512x1024xbf16> to vector<512x1024xbf16>
    %cst_8 = arith.constant dense<0.000000e+00> : vector<32x1024xf32>
    %8 = tpu.matmul %5, %7, %cst_8 {dimension_numbers = #tpu.dot_dimension_numbers<[1], [0], [0], [1], [0, 0, 1, 1], [], []>} : vector<32x512xbf16>, vector<512x1024xbf16>, vector<32x1024xf32> -> vector<32x1024xf32>
    %c1 = arith.constant 1 : index
    %c0_9 = arith.constant 0 : index
    %c0_10 = arith.constant 0 : index
    %9 = vector.load %arg2[%c1, %c0_9, %c0_10] : memref<3x32x64xbf16, #tpu.memory_space<vmem>>, vector<1x32x64xbf16>
    %10 = vector.shape_cast %9 : vector<1x32x64xbf16> to vector<32x64xbf16>
    %cst_11 = arith.constant dense<0.000000e+00> : vector<32x512xf32>
    %11 = tpu.matmul %10, %1, %cst_11 {dimension_numbers = #tpu.dot_dimension_numbers<[1], [0], [0], [1], [0, 0, 1, 1], [], []>} : vector<32x64xbf16>, vector<64x512xbf16>, vector<32x512xf32> -> vector<32x512xf32>
    %12 = arith.truncf %11 : vector<32x512xf32> to vector<32x512xbf16>
    %c1_12 = arith.constant 1 : index
    %c0_13 = arith.constant 0 : index
    %c0_14 = arith.constant 0 : index
    %13 = vector.load %arg3[%c1_12, %c0_13, %c0_14] : memref<3x512x1024xbf16, #tpu.memory_space<vmem>>, vector<1x512x1024xbf16>
    %14 = vector.shape_cast %13 : vector<1x512x1024xbf16> to vector<512x1024xbf16>
    %cst_15 = arith.constant dense<0.000000e+00> : vector<32x1024xf32>
    %15 = tpu.matmul %12, %14, %cst_15 {dimension_numbers = #tpu.dot_dimension_numbers<[1], [0], [0], [1], [0, 0, 1, 1], [], []>} : vector<32x512xbf16>, vector<512x1024xbf16>, vector<32x1024xf32> -> vector<32x1024xf32>
    %16 = arith.addf %8, %15 : vector<32x1024xf32>
    %c2 = arith.constant 2 : index
    %c0_16 = arith.constant 0 : index
    %c0_17 = arith.constant 0 : index
    %17 = vector.load %arg2[%c2, %c0_16, %c0_17] : memref<3x32x64xbf16, #tpu.memory_space<vmem>>, vector<1x32x64xbf16>
    %18 = vector.shape_cast %17 : vector<1x32x64xbf16> to vector<32x64xbf16>
    %cst_18 = arith.constant dense<0.000000e+00> : vector<32x512xf32>
    %19 = tpu.matmul %18, %1, %cst_18 {dimension_numbers = #tpu.dot_dimension_numbers<[1], [0], [0], [1], [0, 0, 1, 1], [], []>} : vector<32x64xbf16>, vector<64x512xbf16>, vector<32x512xf32> -> vector<32x512xf32>
    %20 = arith.truncf %19 : vector<32x512xf32> to vector<32x512xbf16>
    %c2_19 = arith.constant 2 : index
    %c0_20 = arith.constant 0 : index
    %c0_21 = arith.constant 0 : index
    %21 = vector.load %arg3[%c2_19, %c0_20, %c0_21] : memref<3x512x1024xbf16, #tpu.memory_space<vmem>>, vector<1x512x1024xbf16>
    %22 = vector.shape_cast %21 : vector<1x512x1024xbf16> to vector<512x1024xbf16>
    %cst_22 = arith.constant dense<0.000000e+00> : vector<32x1024xf32>
    %23 = tpu.matmul %20, %22, %cst_22 {dimension_numbers = #tpu.dot_dimension_numbers<[1], [0], [0], [1], [0, 0, 1, 1], [], []>} : vector<32x512xbf16>, vector<512x1024xbf16>, vector<32x1024xf32> -> vector<32x1024xf32>
    %24 = arith.addf %16, %23 : vector<32x1024xf32>
    %c0_23 = arith.constant 0 : index
    %c0_24 = arith.constant 0 : index
    %25 = vector.load %arg4[%c0_23, %c0_24] : memref<1x1024xf32, #tpu.memory_space<vmem>>, vector<1x1024xf32>
    %26 = vector.broadcast %25 : vector<1x1024xf32> to vector<32x1024xf32>
    %27 = arith.addf %24, %26 : vector<32x1024xf32>
    %cst_25 = arith.constant 0.000000e+00 : f32
    %28 = vector.broadcast %cst_25 : f32 to vector<32x1024xf32>
    %29 = arith.maximumf %27, %28 : vector<32x1024xf32>
    %30 = arith.truncf %29 : vector<32x1024xf32> to vector<32x1024xbf16>
    %c0_26 = arith.constant 0 : index
    %c0_27 = arith.constant 0 : index
    %c0_28 = arith.constant 0 : index
    %31 = vector.load %arg5[%c0_26, %c0_27, %c0_28] : memref<3x16x32xbf16, #tpu.memory_space<vmem>>, vector<1x16x32xbf16>
    %32 = vector.shape_cast %31 : vector<1x16x32xbf16> to vector<16x32xbf16>
    %cst_29 = arith.constant dense<0.000000e+00> : vector<16x1024xf32>
    %33 = tpu.matmul %32, %30, %cst_29 {dimension_numbers = #tpu.dot_dimension_numbers<[1], [0], [0], [1], [0, 0, 1, 1], [], []>} : vector<16x32xbf16>, vector<32x1024xbf16>, vector<16x1024xf32> -> vector<16x1024xf32>
    %34 = arith.truncf %33 : vector<16x1024xf32> to vector<16x1024xbf16>
    %c0_30 = arith.constant 0 : index
    %c0_31 = arith.constant 0 : index
    %c0_32 = arith.constant 0 : index
    %35 = vector.load %arg6[%c0_30, %c0_31, %c0_32] : memref<3x1024x512xbf16, #tpu.memory_space<vmem>>, vector<1x1024x512xbf16>
    %36 = vector.shape_cast %35 : vector<1x1024x512xbf16> to vector<1024x512xbf16>
    %cst_33 = arith.constant dense<0.000000e+00> : vector<16x512xf32>
    %37 = tpu.matmul %34, %36, %cst_33 {dimension_numbers = #tpu.dot_dimension_numbers<[1], [0], [0], [1], [0, 0, 1, 1], [], []>} : vector<16x1024xbf16>, vector<1024x512xbf16>, vector<16x512xf32> -> vector<16x512xf32>
    %c1_34 = arith.constant 1 : index
    %c0_35 = arith.constant 0 : index
    %c0_36 = arith.constant 0 : index
    %38 = vector.load %arg5[%c1_34, %c0_35, %c0_36] : memref<3x16x32xbf16, #tpu.memory_space<vmem>>, vector<1x16x32xbf16>
    %39 = vector.shape_cast %38 : vector<1x16x32xbf16> to vector<16x32xbf16>
    %cst_37 = arith.constant dense<0.000000e+00> : vector<16x1024xf32>
    %40 = tpu.matmul %39, %30, %cst_37 {dimension_numbers = #tpu.dot_dimension_numbers<[1], [0], [0], [1], [0, 0, 1, 1], [], []>} : vector<16x32xbf16>, vector<32x1024xbf16>, vector<16x1024xf32> -> vector<16x1024xf32>
    %41 = arith.truncf %40 : vector<16x1024xf32> to vector<16x1024xbf16>
    %c1_38 = arith.constant 1 : index
    %c0_39 = arith.constant 0 : index
    %c0_40 = arith.constant 0 : index
    %42 = vector.load %arg6[%c1_38, %c0_39, %c0_40] : memref<3x1024x512xbf16, #tpu.memory_space<vmem>>, vector<1x1024x512xbf16>
    %43 = vector.shape_cast %42 : vector<1x1024x512xbf16> to vector<1024x512xbf16>
    %cst_41 = arith.constant dense<0.000000e+00> : vector<16x512xf32>
    %44 = tpu.matmul %41, %43, %cst_41 {dimension_numbers = #tpu.dot_dimension_numbers<[1], [0], [0], [1], [0, 0, 1, 1], [], []>} : vector<16x1024xbf16>, vector<1024x512xbf16>, vector<16x512xf32> -> vector<16x512xf32>
    %45 = arith.addf %37, %44 : vector<16x512xf32>
    %c2_42 = arith.constant 2 : index
    %c0_43 = arith.constant 0 : index
    %c0_44 = arith.constant 0 : index
    %46 = vector.load %arg5[%c2_42, %c0_43, %c0_44] : memref<3x16x32xbf16, #tpu.memory_space<vmem>>, vector<1x16x32xbf16>
    %47 = vector.shape_cast %46 : vector<1x16x32xbf16> to vector<16x32xbf16>
    %cst_45 = arith.constant dense<0.000000e+00> : vector<16x1024xf32>
    %48 = tpu.matmul %47, %30, %cst_45 {dimension_numbers = #tpu.dot_dimension_numbers<[1], [0], [0], [1], [0, 0, 1, 1], [], []>} : vector<16x32xbf16>, vector<32x1024xbf16>, vector<16x1024xf32> -> vector<16x1024xf32>
    %49 = arith.truncf %48 : vector<16x1024xf32> to vector<16x1024xbf16>
    %c2_46 = arith.constant 2 : index
    %c0_47 = arith.constant 0 : index
    %c0_48 = arith.constant 0 : index
    %50 = vector.load %arg6[%c2_46, %c0_47, %c0_48] : memref<3x1024x512xbf16, #tpu.memory_space<vmem>>, vector<1x1024x512xbf16>
    %51 = vector.shape_cast %50 : vector<1x1024x512xbf16> to vector<1024x512xbf16>
    %cst_49 = arith.constant dense<0.000000e+00> : vector<16x512xf32>
    %52 = tpu.matmul %49, %51, %cst_49 {dimension_numbers = #tpu.dot_dimension_numbers<[1], [0], [0], [1], [0, 0, 1, 1], [], []>} : vector<16x1024xbf16>, vector<1024x512xbf16>, vector<16x512xf32> -> vector<16x512xf32>
    %53 = arith.addf %45, %52 : vector<16x512xf32>
    %c0_50 = arith.constant 0 : index
    %c0_51 = arith.constant 0 : index
    %54 = vector.load %arg7[%c0_50, %c0_51] : memref<1x512xf32, #tpu.memory_space<vmem>>, vector<1x512xf32>
    %55 = vector.broadcast %54 : vector<1x512xf32> to vector<16x512xf32>
    %56 = arith.addf %53, %55 : vector<16x512xf32>
    %cst_52 = arith.constant 0.000000e+00 : f32
    %57 = vector.broadcast %cst_52 : f32 to vector<16x512xf32>
    %58 = arith.maximumf %56, %57 : vector<16x512xf32>
    %59 = arith.truncf %58 : vector<16x512xf32> to vector<16x512xbf16>
    %c0_53 = arith.constant 0 : index
    %c0_54 = arith.constant 0 : index
    %c0_55 = arith.constant 0 : index
    %60 = vector.load %arg8[%c0_53, %c0_54, %c0_55] : memref<3x8x16xbf16, #tpu.memory_space<vmem>>, vector<1x8x16xbf16>
    %61 = vector.shape_cast %60 : vector<1x8x16xbf16> to vector<8x16xbf16>
    %cst_56 = arith.constant dense<0.000000e+00> : vector<8x512xf32>
    %62 = tpu.matmul %61, %59, %cst_56 {dimension_numbers = #tpu.dot_dimension_numbers<[1], [0], [0], [1], [0, 0, 1, 1], [], []>} : vector<8x16xbf16>, vector<16x512xbf16>, vector<8x512xf32> -> vector<8x512xf32>
    %63 = arith.truncf %62 : vector<8x512xf32> to vector<8x512xbf16>
    %c0_57 = arith.constant 0 : index
    %c0_58 = arith.constant 0 : index
    %c0_59 = arith.constant 0 : index
    %64 = vector.load %arg9[%c0_57, %c0_58, %c0_59] : memref<3x512x256xbf16, #tpu.memory_space<vmem>>, vector<1x512x256xbf16>
    %65 = vector.shape_cast %64 : vector<1x512x256xbf16> to vector<512x256xbf16>
    %cst_60 = arith.constant dense<0.000000e+00> : vector<8x256xf32>
    %66 = tpu.matmul %63, %65, %cst_60 {dimension_numbers = #tpu.dot_dimension_numbers<[1], [0], [0], [1], [0, 0, 1, 1], [], []>} : vector<8x512xbf16>, vector<512x256xbf16>, vector<8x256xf32> -> vector<8x256xf32>
    %c1_61 = arith.constant 1 : index
    %c0_62 = arith.constant 0 : index
    %c0_63 = arith.constant 0 : index
    %67 = vector.load %arg8[%c1_61, %c0_62, %c0_63] : memref<3x8x16xbf16, #tpu.memory_space<vmem>>, vector<1x8x16xbf16>
    %68 = vector.shape_cast %67 : vector<1x8x16xbf16> to vector<8x16xbf16>
    %cst_64 = arith.constant dense<0.000000e+00> : vector<8x512xf32>
    %69 = tpu.matmul %68, %59, %cst_64 {dimension_numbers = #tpu.dot_dimension_numbers<[1], [0], [0], [1], [0, 0, 1, 1], [], []>} : vector<8x16xbf16>, vector<16x512xbf16>, vector<8x512xf32> -> vector<8x512xf32>
    %70 = arith.truncf %69 : vector<8x512xf32> to vector<8x512xbf16>
    %c1_65 = arith.constant 1 : index
    %c0_66 = arith.constant 0 : index
    %c0_67 = arith.constant 0 : index
    %71 = vector.load %arg9[%c1_65, %c0_66, %c0_67] : memref<3x512x256xbf16, #tpu.memory_space<vmem>>, vector<1x512x256xbf16>
    %72 = vector.shape_cast %71 : vector<1x512x256xbf16> to vector<512x256xbf16>
    %cst_68 = arith.constant dense<0.000000e+00> : vector<8x256xf32>
    %73 = tpu.matmul %70, %72, %cst_68 {dimension_numbers = #tpu.dot_dimension_numbers<[1], [0], [0], [1], [0, 0, 1, 1], [], []>} : vector<8x512xbf16>, vector<512x256xbf16>, vector<8x256xf32> -> vector<8x256xf32>
    %74 = arith.addf %66, %73 : vector<8x256xf32>
    %c2_69 = arith.constant 2 : index
    %c0_70 = arith.constant 0 : index
    %c0_71 = arith.constant 0 : index
    %75 = vector.load %arg8[%c2_69, %c0_70, %c0_71] : memref<3x8x16xbf16, #tpu.memory_space<vmem>>, vector<1x8x16xbf16>
    %76 = vector.shape_cast %75 : vector<1x8x16xbf16> to vector<8x16xbf16>
    %cst_72 = arith.constant dense<0.000000e+00> : vector<8x512xf32>
    %77 = tpu.matmul %76, %59, %cst_72 {dimension_numbers = #tpu.dot_dimension_numbers<[1], [0], [0], [1], [0, 0, 1, 1], [], []>} : vector<8x16xbf16>, vector<16x512xbf16>, vector<8x512xf32> -> vector<8x512xf32>
    %78 = arith.truncf %77 : vector<8x512xf32> to vector<8x512xbf16>
    %c2_73 = arith.constant 2 : index
    %c0_74 = arith.constant 0 : index
    %c0_75 = arith.constant 0 : index
    %79 = vector.load %arg9[%c2_73, %c0_74, %c0_75] : memref<3x512x256xbf16, #tpu.memory_space<vmem>>, vector<1x512x256xbf16>
    %80 = vector.shape_cast %79 : vector<1x512x256xbf16> to vector<512x256xbf16>
    %cst_76 = arith.constant dense<0.000000e+00> : vector<8x256xf32>
    %81 = tpu.matmul %78, %80, %cst_76 {dimension_numbers = #tpu.dot_dimension_numbers<[1], [0], [0], [1], [0, 0, 1, 1], [], []>} : vector<8x512xbf16>, vector<512x256xbf16>, vector<8x256xf32> -> vector<8x256xf32>
    %82 = arith.addf %74, %81 : vector<8x256xf32>
    %c0_77 = arith.constant 0 : index
    %c0_78 = arith.constant 0 : index
    %83 = vector.load %arg10[%c0_77, %c0_78] : memref<1x256xf32, #tpu.memory_space<vmem>>, vector<1x256xf32>
    %84 = vector.broadcast %83 : vector<1x256xf32> to vector<8x256xf32>
    %85 = arith.addf %82, %84 : vector<8x256xf32>
    %cst_79 = arith.constant 0.000000e+00 : f32
    %86 = vector.broadcast %cst_79 : f32 to vector<8x256xf32>
    %87 = arith.maximumf %85, %86 : vector<8x256xf32>
    %c0_80 = arith.constant 0 : index
    %c0_81 = arith.constant 0 : index
    %88 = vector.load %arg12[%c0_80, %c0_81] : memref<1x32xf32, #tpu.memory_space<vmem>>, vector<1x32xf32>
    %89 = vector.extract_strided_slice %87 {offsets = [0, 0], sizes = [1, 256], strides = [1, 1]} : vector<8x256xf32> to vector<1x256xf32>
    %c0_82 = arith.constant 0 : index
    %c0_83 = arith.constant 0 : index
    %90 = vector.load %arg11[%c0_82, %c0_83] : memref<2048x32xf32, #tpu.memory_space<vmem>>, vector<256x32xf32>
    %cst_84 = arith.constant dense<0.000000e+00> : vector<1x32xf32>
    %91 = tpu.matmul %89, %90, %cst_84 {dimension_numbers = #tpu.dot_dimension_numbers<[1], [0], [0], [1], [0, 0, 1, 1], [], []>} : vector<1x256xf32>, vector<256x32xf32>, vector<1x32xf32> -> vector<1x32xf32>
    %92 = arith.addf %88, %91 : vector<1x32xf32>
    %93 = vector.extract_strided_slice %87 {offsets = [1, 0], sizes = [1, 256], strides = [1, 1]} : vector<8x256xf32> to vector<1x256xf32>
    %c256 = arith.constant 256 : index
    %c0_85 = arith.constant 0 : index
    %94 = vector.load %arg11[%c256, %c0_85] : memref<2048x32xf32, #tpu.memory_space<vmem>>, vector<256x32xf32>
    %cst_86 = arith.constant dense<0.000000e+00> : vector<1x32xf32>
    %95 = tpu.matmul %93, %94, %cst_86 {dimension_numbers = #tpu.dot_dimension_numbers<[1], [0], [0], [1], [0, 0, 1, 1], [], []>} : vector<1x256xf32>, vector<256x32xf32>, vector<1x32xf32> -> vector<1x32xf32>
    %96 = arith.addf %92, %95 : vector<1x32xf32>
    %97 = vector.extract_strided_slice %87 {offsets = [2, 0], sizes = [1, 256], strides = [1, 1]} : vector<8x256xf32> to vector<1x256xf32>
    %c512 = arith.constant 512 : index
    %c0_87 = arith.constant 0 : index
    %98 = vector.load %arg11[%c512, %c0_87] : memref<2048x32xf32, #tpu.memory_space<vmem>>, vector<256x32xf32>
    %cst_88 = arith.constant dense<0.000000e+00> : vector<1x32xf32>
    %99 = tpu.matmul %97, %98, %cst_88 {dimension_numbers = #tpu.dot_dimension_numbers<[1], [0], [0], [1], [0, 0, 1, 1], [], []>} : vector<1x256xf32>, vector<256x32xf32>, vector<1x32xf32> -> vector<1x32xf32>
    %100 = arith.addf %96, %99 : vector<1x32xf32>
    %101 = vector.extract_strided_slice %87 {offsets = [3, 0], sizes = [1, 256], strides = [1, 1]} : vector<8x256xf32> to vector<1x256xf32>
    %c768 = arith.constant 768 : index
    %c0_89 = arith.constant 0 : index
    %102 = vector.load %arg11[%c768, %c0_89] : memref<2048x32xf32, #tpu.memory_space<vmem>>, vector<256x32xf32>
    %cst_90 = arith.constant dense<0.000000e+00> : vector<1x32xf32>
    %103 = tpu.matmul %101, %102, %cst_90 {dimension_numbers = #tpu.dot_dimension_numbers<[1], [0], [0], [1], [0, 0, 1, 1], [], []>} : vector<1x256xf32>, vector<256x32xf32>, vector<1x32xf32> -> vector<1x32xf32>
    %104 = arith.addf %100, %103 : vector<1x32xf32>
    %105 = vector.extract_strided_slice %87 {offsets = [4, 0], sizes = [1, 256], strides = [1, 1]} : vector<8x256xf32> to vector<1x256xf32>
    %c1024 = arith.constant 1024 : index
    %c0_91 = arith.constant 0 : index
    %106 = vector.load %arg11[%c1024, %c0_91] : memref<2048x32xf32, #tpu.memory_space<vmem>>, vector<256x32xf32>
    %cst_92 = arith.constant dense<0.000000e+00> : vector<1x32xf32>
    %107 = tpu.matmul %105, %106, %cst_92 {dimension_numbers = #tpu.dot_dimension_numbers<[1], [0], [0], [1], [0, 0, 1, 1], [], []>} : vector<1x256xf32>, vector<256x32xf32>, vector<1x32xf32> -> vector<1x32xf32>
    %108 = arith.addf %104, %107 : vector<1x32xf32>
    %109 = vector.extract_strided_slice %87 {offsets = [5, 0], sizes = [1, 256], strides = [1, 1]} : vector<8x256xf32> to vector<1x256xf32>
    %c1280 = arith.constant 1280 : index
    %c0_93 = arith.constant 0 : index
    %110 = vector.load %arg11[%c1280, %c0_93] : memref<2048x32xf32, #tpu.memory_space<vmem>>, vector<256x32xf32>
    %cst_94 = arith.constant dense<0.000000e+00> : vector<1x32xf32>
    %111 = tpu.matmul %109, %110, %cst_94 {dimension_numbers = #tpu.dot_dimension_numbers<[1], [0], [0], [1], [0, 0, 1, 1], [], []>} : vector<1x256xf32>, vector<256x32xf32>, vector<1x32xf32> -> vector<1x32xf32>
    %112 = arith.addf %108, %111 : vector<1x32xf32>
    %113 = vector.extract_strided_slice %87 {offsets = [6, 0], sizes = [1, 256], strides = [1, 1]} : vector<8x256xf32> to vector<1x256xf32>
    %c1536 = arith.constant 1536 : index
    %c0_95 = arith.constant 0 : index
    %114 = vector.load %arg11[%c1536, %c0_95] : memref<2048x32xf32, #tpu.memory_space<vmem>>, vector<256x32xf32>
    %cst_96 = arith.constant dense<0.000000e+00> : vector<1x32xf32>
    %115 = tpu.matmul %113, %114, %cst_96 {dimension_numbers = #tpu.dot_dimension_numbers<[1], [0], [0], [1], [0, 0, 1, 1], [], []>} : vector<1x256xf32>, vector<256x32xf32>, vector<1x32xf32> -> vector<1x32xf32>
    %116 = arith.addf %112, %115 : vector<1x32xf32>
    %117 = vector.extract_strided_slice %87 {offsets = [7, 0], sizes = [1, 256], strides = [1, 1]} : vector<8x256xf32> to vector<1x256xf32>
    %c1792 = arith.constant 1792 : index
    %c0_97 = arith.constant 0 : index
    %118 = vector.load %arg11[%c1792, %c0_97] : memref<2048x32xf32, #tpu.memory_space<vmem>>, vector<256x32xf32>
    %cst_98 = arith.constant dense<0.000000e+00> : vector<1x32xf32>
    %119 = tpu.matmul %117, %118, %cst_98 {dimension_numbers = #tpu.dot_dimension_numbers<[1], [0], [0], [1], [0, 0, 1, 1], [], []>} : vector<1x256xf32>, vector<256x32xf32>, vector<1x32xf32> -> vector<1x32xf32>
    %120 = arith.addf %116, %119 : vector<1x32xf32>
    %c0_99 = arith.constant 0 : index
    %c0_100 = arith.constant 0 : index
    %c0_101 = arith.constant 0 : index
    %121 = vector.load %arg13[%c0_99, %c0_100, %c0_101] : memref<1x1x32xf32, #tpu.memory_space<vmem>>, vector<1x1x32xf32>
    %122 = vector.shape_cast %121 : vector<1x1x32xf32> to vector<1x32xf32>
    %123 = vector.shape_cast %120 : vector<1x32xf32> to vector<1x1x32xf32>
    tpu.vector_store %arg13[%c0_99, %c0_100, %c0_101], %123 {strides = array<i32>} : memref<1x1x32xf32, #tpu.memory_space<vmem>>, vector<1x1x32xf32>,
    return
  }
  func.func @transform_0(%arg0: i32) -> (i32, i32, i32) {
    %c0_i32 = arith.constant 0 : i32
    %c0_i32_0 = arith.constant 0 : i32
    %c0_i32_1 = arith.constant 0 : i32
    return %arg0, %c0_i32, %c0_i32_0 : i32, i32, i32
  }
  func.func @transform_1(%arg0: i32) -> (i32, i32, i32) {
    %c0_i32 = arith.constant 0 : i32
    %c0_i32_0 = arith.constant 0 : i32
    %c0_i32_1 = arith.constant 0 : i32
    %c0_i32_2 = arith.constant 0 : i32
    return %c0_i32, %c0_i32_0, %c0_i32_1 : i32, i32, i32
  }
  func.func @transform_2(%arg0: i32) -> (i32, i32, i32) {
    %c0_i32 = arith.constant 0 : i32
    %c0_i32_0 = arith.constant 0 : i32
    %c0_i32_1 = arith.constant 0 : i32
    %c0_i32_2 = arith.constant 0 : i32
    return %c0_i32, %c0_i32_0, %c0_i32_1 : i32, i32, i32
  }
  func.func @transform_3(%arg0: i32) -> (i32, i32) {
    %c0_i32 = arith.constant 0 : i32
    %c0_i32_0 = arith.constant 0 : i32
    %c0_i32_1 = arith.constant 0 : i32
    return %c0_i32, %c0_i32_0 : i32, i32
  }
  func.func @transform_4(%arg0: i32) -> (i32, i32, i32) {
    %c0_i32 = arith.constant 0 : i32
    %c0_i32_0 = arith.constant 0 : i32
    %c0_i32_1 = arith.constant 0 : i32
    %c0_i32_2 = arith.constant 0 : i32
    return %c0_i32, %c0_i32_0, %c0_i32_1 : i32, i32, i32
  }
  func.func @transform_5(%arg0: i32) -> (i32, i32, i32) {
    %c0_i32 = arith.constant 0 : i32
    %c0_i32_0 = arith.constant 0 : i32
    %c0_i32_1 = arith.constant 0 : i32
    %c0_i32_2 = arith.constant 0 : i32
    return %c0_i32, %c0_i32_0, %c0_i32_1 : i32, i32, i32
  }
  func.func @transform_6(%arg0: i32) -> (i32, i32) {
    %c0_i32 = arith.constant 0 : i32
    %c0_i32_0 = arith.constant 0 : i32
    %c0_i32_1 = arith.constant 0 : i32
    return %c0_i32, %c0_i32_0 : i32, i32
  }
  func.func @transform_7(%arg0: i32) -> (i32, i32, i32) {
    %c0_i32 = arith.constant 0 : i32
    %c0_i32_0 = arith.constant 0 : i32
    %c0_i32_1 = arith.constant 0 : i32
    %c0_i32_2 = arith.constant 0 : i32
    return %c0_i32, %c0_i32_0, %c0_i32_1 : i32, i32, i32
  }
  func.func @transform_8(%arg0: i32) -> (i32, i32, i32) {
    %c0_i32 = arith.constant 0 : i32
    %c0_i32_0 = arith.constant 0 : i32
    %c0_i32_1 = arith.constant 0 : i32
    %c0_i32_2 = arith.constant 0 : i32
    return %c0_i32, %c0_i32_0, %c0_i32_1 : i32, i32, i32
  }
  func.func @transform_9(%arg0: i32) -> (i32, i32) {
    %c0_i32 = arith.constant 0 : i32
    %c0_i32_0 = arith.constant 0 : i32
    %c0_i32_1 = arith.constant 0 : i32
    return %c0_i32, %c0_i32_0 : i32, i32
  }
  func.func @transform_10(%arg0: i32) -> (i32, i32) {
    %c0_i32 = arith.constant 0 : i32
    %c0_i32_0 = arith.constant 0 : i32
    %c0_i32_1 = arith.constant 0 : i32
    return %c0_i32, %c0_i32_0 : i32, i32
  }
  func.func @transform_11(%arg0: i32) -> (i32, i32) {
    %c0_i32 = arith.constant 0 : i32
    %c0_i32_0 = arith.constant 0 : i32
    %c0_i32_1 = arith.constant 0 : i32
    return %c0_i32, %c0_i32_0 : i32, i32
  }
  func.func @transform_12(%arg0: i32) -> (i32, i32, i32) {
    %c0_i32 = arith.constant 0 : i32
    %c0_i32_0 = arith.constant 0 : i32
    %c0_i32_1 = arith.constant 0 : i32
    return %arg0, %c0_i32, %c0_i32_0 : i32, i32, i32
  }
}

</mosaic_0001>

<bundles_post_ra>
// kernel: backbone_rl_forward.1
= control target key start
LH: loop header
LB: loop body
LE: loop exit
PB: predicated region body
PF: predicated region fallthrough
CT: control target
= control target key end

     0   :  { %17 = vsyncpa [#allocation3], 0  ;;  %s22812_s0 = inlined_call_operand.vmem [shape: bf16[2,64,512], index: 0, kind: input, shape index: {}]   ;;  %s22813_s1 = inlined_call_operand.hbm [shape: bf16[3,32,64], index: 1, kind: input, shape index: {}]   ;;  %s22814_s2 = inlined_call_operand.hbm [shape: bf16[3,512,1024], index: 2, kind: input, shape index: {}]   ;;  %s22815_s3 = inlined_call_operand.hbm [shape: f32[1,1024], index: 3, kind: input, shape index: {}]   ;;  %s22816_s4 = inlined_call_operand.hbm [shape: bf16[3,16,32], index: 4, kind: input, shape index: {}]   ;;  %s22817_s5 = inlined_call_operand.hbm [shape: bf16[3,1024,512], index: 5, kind: input, shape index: {}]   ;;  %s22818_s6 = inlined_call_operand.hbm [shape: f32[1,512], index: 6, kind: input, shape index: {}]   ;;  %s22819_s7 = inlined_call_operand.hbm [shape: bf16[3,8,16], index: 7, kind: input, shape index: {}]   ;;  %s22820_s8 = inlined_call_operand.vmem [shape: bf16[3,512,256], index: 8, kind: input, shape index: {}]   ;;  %s22821_s9 = inlined_call_operand.hbm [shape: f32[1,256], index: 9, kind: input, shape index: {}]   ;;  %s22822_s10 = inlined_call_operand.vmem [shape: f32[2048,32], index: 10, kind: input, shape index: {}]   ;;  %s22823_s11 = inlined_call_operand.hbm [shape: f32[1,32], index: 11, kind: input, shape index: {}]   ;;  %s22824_s12 = inlined_call_operand.hbm [shape: f32[2,1,32], index: 12, kind: output, shape index: {}]  }
   0x1   :  { %18 = vsyncpa [#allocation6], 0 }
   0x2   :  { %19 = vsyncpa [#allocation9], 0 }
   0x3   :  { %20 = vsyncpa [#allocation12], 0 }
   0x4   :  { %21 = vsyncpa [#allocation15], 0 }
   0x5   :  { %22 = vsyncpa [#allocation4], 0 }
   0x6   :  { %24 = vsyncpa [#allocation4 + $0x1], 0  ;;  %s20284_s21 = smov 0   ;;  %s20286_s22 = smov 0  }
   0x7   :  { %s20288_s23 = smov 0   ;;  %s20290_s24 = smov 0  }
   0x8 LB: > { %22837 = sst [smem:[#allocation24_spill]] %s20188_s21  ;;  %s20305_s25 = sadd.s32 4294967295, %s20200_s24   ;;  %s20200_s24 = sphi %s20290_s24, %s22923_s24   ;;  %s20196_s23 = sphi %s20288_s23, %s22925_s23   ;;  %s20192_s22 = sphi %s20286_s22, %s22927_s22   ;;  %s20188_s21 = sphi %s20284_s21, %s22926_s21  }
   0x9   : > { %22838 = sst [smem:[#allocation25_spill]] %s20196_s23  ;;  %s16041_s26 = sadd.s32 4294967294, %s20200_s24  }
   0xa   : > { %s20309_s27 = sadd.s32 1, %s20200_s24   ;;  %s294_s28 = sadd.s32 1, %s20196_s23 }
   0xb   : > { %22839 = sst [smem:[#allocation26_spill]] %s20309_s27  ;;  %s291_s29 = ssub.s32 %s20200_s24, %s20309_s27 }
   0xc   : > { %p304_p0 = scmp.ne.s32.totalorder %s20196_s23, %s20192_s22  ;;  %p292_p1 = scmp.eq.s32.totalorder %s291_s29, 0 }
   0xd   : > { %p305_p2 = scmp.eq.s32.totalorder %s20305_s25, 1  ;;  %p310_p3 = scmp.ne.s32.totalorder %s20192_s22, %s20188_s21 }
   0xe   : > { %p311_p4 = scmp.eq.s32.totalorder %s16041_s26, 1  ;;  %p16042_p7 = scmp.ge.s32.totalorder %s20200_s24, 1 }
   0xf   : > { %s20320_s30 = scalar_select %p292_p1, %s20196_s23, %s294_s28  }
  0x10   : > { %p20322_p5 = por %p305_p2, %p304_p0  ;;  %p20326_p6 = por %p311_p4, %p310_p3 }
  0x11   : > { %22840 = sst [smem:[#allocation27_spill]] %s20320_s30  ;;  %p318_p8 = scmp.lt.s32.totalorder %s20200_s24, 3 }
  0x12   : > { %s22841_s13 = scalar_select %p20322_p5, 1, 0 }
  0x13   : > { %s22842_s14 = scalar_select %p20326_p6, 1, 0 }
  0x14   : > { %p22830_p9 = scmp.eq.s32.totalorder %s20305_s25, 0  ;;  %p20333_p10 = pnand %p16042_p7, %p318_p8 }
  0x15   : > { %22843 = sst [smem:[#allocation28_spill]] %s22842_s14  ;;  %s20202_s16 = smov [#allocation5]  }
  0x16   : > { %s22844_s15 = scalar_select %p20333_p10, 1, 0 }
  0x17   : > { %s343_s17 = sshll.u32 %s20202_s16, 4  ;;  %p18298_p11 = pneg %p20333_p10  ;;  %s344_s17 = int_to_ptr.vmem [resolvable:$true] %s343_s17 }
  0x18   : > { %s20203_s19 = smov [#allocation8]   ;;  %s19897_s28 = scalar_lea.vmem %s344_s17, 98304 }
  0x19   : > { %p20341_p12 = pnand %p22830_p9, %p18298_p11  ;;  %s367_s20 = sshll.u32 %s20203_s19, 4  ;;  %s368_s20 = int_to_ptr.vmem [resolvable:$true] %s367_s20 }
  0x1a   : > { %p19898_p0 = scmp.ne.s32.totalorder %s344_s17, %s19897_s28  ;;  %p19905_p3 = scmp.lt.s32.totalorder %s344_s17, %s344_s17 }
  0x1b   : > { %p20347_p13 = pneg %p20341_p12  ;;  %p19906_p4 = scmp.lt.s32.totalorder %s19897_s28, %s19897_s28 }
  0x1d   : > { %p19900_p1 = pnand %p19898_p0, %p20347_p13  ;;  %p19907_p7 = por %p19906_p4, %p19905_p3 }
  0x1f   : > { %p19901_p2 = pneg %p19900_p1 }
  0x21   : > { %p19908_p8 = pnand %p19907_p7, %p19901_p2 }
  0x23   : > { %19911 = shalt.err (!%p19908_p8)
}
  0x24   : > { %s20204_s29 = smov 512   ;;  %s20205_s16 = smov 32  }
  0x25   : > { %18304 = dma.hbm_to_vmem [thread:$0]  (!%p20341_p12), %s22814_s2, 98304, %s344_s17, [#allocation6], %s20204_s29, %s20204_s29, %s20205_s16  }
  0x26   : > { %s20206_s23 = smov [#allocation11]   ;;  %s19923_s14 = scalar_lea.vmem %s368_s20, 384 }
  0x27   : > { %s394_s27 = sshll.u32 %s20206_s23, 4  ;;  %p19924_p11 = scmp.ne.s32.totalorder %s368_s20, %s19923_s14  ;;  %s395_s27 = int_to_ptr.vmem [resolvable:$true] %s394_s27 }
  0x28   : > { %p19931_p3 = scmp.lt.s32.totalorder %s368_s20, %s368_s20  ;;  %p19932_p2 = scmp.lt.s32.totalorder %s19923_s14, %s19923_s14 }
  0x29   : > { %p19926_p0 = pnand %p19924_p11, %p20347_p13 }
  0x2a   : > { %p19933_p4 = por %p19932_p2, %p19931_p3 }
  0x2b   : > { %p19927_p1 = pneg %p19926_p0 }
  0x2d   : > { %p19934_p7 = pnand %p19933_p4, %p19927_p1 }
  0x2f   : > { %19937 = shalt.err (!%p19934_p7)
}
  0x30   : > { %s22833_s28 = smov 64   ;;  %s22834_s21 = smov 4  }
  0x31   : > { %18310 = dma.hbm_to_vmem [thread:$0]  (!%p20341_p12), %s22816_s4, 384, %s368_s20, [#allocation9], %s22833_s28, %s22833_s28, %s22834_s21  }
  0x32   : > { %s19949_s17 = scalar_lea.vmem %s395_s27, 64  ;;  %p19957_p1 = scmp.lt.s32.totalorder %s395_s27, %s395_s27 }
  0x33   : > { %p19950_p8 = scmp.ne.s32.totalorder %s395_s27, %s19949_s17  ;;  %p19958_p3 = scmp.lt.s32.totalorder %s19949_s17, %s19949_s17 }
  0x35   : > { %p19952_p11 = pnand %p19950_p8, %p20347_p13  ;;  %p19959_p2 = por %p19958_p3, %p19957_p1 }
  0x37   : > { %p19953_p0 = pneg %p19952_p11 }
  0x39   : > { %p19960_p4 = pnand %p19959_p2, %p19953_p0 }
  0x3b   : > { %19963 = shalt.err (!%p19960_p4)
}
  0x3c   : > { %18316 = dma.hbm_to_vmem [thread:$0]  (!%p20341_p12), %s22818_s6, 64, %s395_s27, [#allocation12]  }
  0x3d   : > { %s20209_s16 = smov [#allocation14]   ;;  %s20210_s19 = smov [#allocation2]  }
  0x3e   : > { %s421_s20 = sshll.u32 %s20209_s16, 4  ;;  %s330_s30 = sshll.u32 %s20210_s19, 4  ;;  %s422_s20 = int_to_ptr.vmem [resolvable:$true] %s421_s20  ;;  %s331_s30 = int_to_ptr.vmem [resolvable:$true] %s330_s30 }
  0x3f   : > { %s19975_s23 = scalar_lea.vmem %s422_s20, 32  ;;  %p19983_p1 = scmp.lt.s32.totalorder %s422_s20, %s422_s20 }
  0x40   : > { %p19976_p7 = scmp.ne.s32.totalorder %s422_s20, %s19975_s23  ;;  %p19984_p0 = scmp.lt.s32.totalorder %s19975_s23, %s19975_s23 }
  0x42   : > { %p19978_p8 = pnand %p19976_p7, %p20347_p13  ;;  %p19985_p3 = por %p19984_p0, %p19983_p1 }
  0x44   : > { %p19979_p11 = pneg %p19978_p8 }
  0x46   : > { %p19986_p2 = pnand %p19985_p3, %p19979_p11 }
  0x48   : > { %19989 = shalt.err (!%p19986_p2)
}
  0x49   : > { %18322 = dma.hbm_to_vmem [thread:$0]  (!%p20341_p12), %s22821_s9, 32, %s422_s20, [#allocation15]  }
  0x4a   : > { %s20001_s27 = scalar_lea.vmem %s331_s30, 768  ;;  %p20009_p7 = scmp.lt.s32.totalorder %s331_s30, %s331_s30 }
  0x4b   : > { %p20002_p4 = scmp.ne.s32.totalorder %s331_s30, %s20001_s27  ;;  %p20010_p8 = scmp.lt.s32.totalorder %s20001_s27, %s20001_s27 }
  0x4d   : > { %p20004_p9 = pnand %p20002_p4, %p20347_p13  ;;  %p20011_p5 = por %p20010_p8, %p20009_p7 }
  0x4f   : > { %p20005_p6 = pneg %p20004_p9 }
  0x51   : > { %p20012_p10 = pnand %p20011_p5, %p20005_p6 }
  0x53   : > { %20015 = shalt.err (!%p20012_p10)
}
  0x54   : > { %18301 = dma.hbm_to_vmem [thread:$0]  (!%p20341_p12), %s22813_s1, 768, %s331_s30, [#allocation3], %s22833_s28, %s22833_s28, %s22834_s21  }
  0x55   : > { %s20211_s20 = smov [#allocation7]   ;;  %s20212_s23 = smov [#allocation10]  }
  0x56   : > { %s357_s19 = sshll.u32 %s20211_s20, 4  ;;  %s380_s17 = sshll.u32 %s20212_s23, 4  ;;  %s358_s19 = int_to_ptr.vmem [resolvable:$true] %s357_s19  ;;  %s381_s17 = int_to_ptr.vmem [resolvable:$true] %s380_s17 }
  0x57   : > { %s20027_s14 = scalar_lea.vmem %s358_s19, 128  ;;  %p20035_p10 = scmp.lt.s32.totalorder %s358_s19, %s358_s19 }
  0x58   : > { %p20028_p9 = scmp.ne.s32.totalorder %s358_s19, %s20027_s14  ;;  %p20036_p11 = scmp.lt.s32.totalorder %s20027_s14, %s20027_s14 }
  0x5a   : > { %p20030_p5 = pnand %p20028_p9, %p20347_p13  ;;  %p20037_p1 = por %p20036_p11, %p20035_p10 }
  0x5c   : > { %p20031_p6 = pneg %p20030_p5 }
  0x5e   : > { %p20038_p0 = pnand %p20037_p1, %p20031_p6 }
  0x60   : > { %20041 = shalt.err (!%p20038_p0)
}
  0x61   : > { %18307 = dma.hbm_to_vmem [thread:$0]  (!%p20341_p12), %s22815_s3, 128, %s358_s19, [#allocation6]  }
  0x62   : > { %s20053_s30 = scalar_lea.vmem %s381_s17, 98304  ;;  %p20061_p7 = scmp.lt.s32.totalorder %s381_s17, %s381_s17 }
  0x63   : > { %p20054_p3 = scmp.ne.s32.totalorder %s381_s17, %s20053_s30  ;;  %p20062_p8 = scmp.lt.s32.totalorder %s20053_s30, %s20053_s30 }
  0x65   : > { %p20056_p2 = pnand %p20054_p3, %p20347_p13  ;;  %p20063_p9 = por %p20062_p8, %p20061_p7 }
  0x67   : > { %p20057_p4 = pneg %p20056_p2 }
  0x69   : > { %p20064_p5 = pnand %p20063_p9, %p20057_p4 }
  0x6b   : > { %20067 = shalt.err (!%p20064_p5)
}
  0x6c   : > { %s20213_s16 = smov 256   ;;  %s20214_s20 = smov 16  }
  0x6d   : > { %18313 = dma.hbm_to_vmem [thread:$0]  (!%p20341_p12), %s22817_s5, 98304, %s381_s17, [#allocation9], %s20213_s16, %s20213_s16, %s20214_s20  }
  0x6e   : > { %s20215_s19 = smov [#allocation13]   ;;  %s20216_s29 = smov [#allocation16]  }
  0x6f   : > { %s404_s27 = sshll.u32 %s20215_s19, 4  ;;  %s435_s28 = sshll.u32 %s20216_s29, 4  ;;  %s405_s27 = int_to_ptr.vmem [resolvable:$true] %s404_s27  ;;  %s436_s28 = int_to_ptr.vmem [resolvable:$true] %s435_s28 }
  0x70   : > { %s20079_s21 = scalar_lea.vmem %s405_s27, 192  ;;  %p20087_p1 = scmp.lt.s32.totalorder %s405_s27, %s405_s27 }
  0x71   : > { %p20080_p6 = scmp.ne.s32.totalorder %s405_s27, %s20079_s21  ;;  %p20088_p0 = scmp.lt.s32.totalorder %s20079_s21, %s20079_s21 }
  0x73   : > { %p20082_p10 = pnand %p20080_p6, %p20347_p13  ;;  %p20089_p3 = por %p20088_p0, %p20087_p1 }
  0x75   : > { %p20083_p11 = pneg %p20082_p10 }
  0x77   : > { %p20090_p2 = pnand %p20089_p3, %p20083_p11 }
  0x79   : > { %20093 = shalt.err (!%p20090_p2)
}
  0x7a   : > { %s22847_s30 = smov 4   ;;  %s22848_s23 = smov 64  }
  0x7b   : > { %18319 = dma.hbm_to_vmem [thread:$0]  (!%p20341_p12), %s22819_s7, 192, %s405_s27, [#allocation12], %s22848_s23, %s22848_s23, %s22847_s30  }
  0x7c   : > { %s20105_s20 = scalar_lea.vmem %s436_s28, 16  ;;  %s20112_s21 = scalar_lea.vmem %s436_s28, 32 }
  0x7d   : > { %p20106_p4 = scmp.ne.s32.totalorder %s436_s28, %s20105_s20  ;;  %p20113_p9 = scmp.lt.s32.totalorder %s436_s28, %s436_s28 }
  0x7e   : > { %p20114_p5 = scmp.lt.s32.totalorder %s20112_s21, %s20105_s20 }
  0x7f   : > { %p20108_p7 = pnand %p20106_p4, %p20347_p13 }
  0x80   : > { %p20115_p6 = por %p20114_p5, %p20113_p9 }
  0x81   : > { %p20109_p8 = pneg %p20108_p7 }
  0x83   : > { %p20116_p10 = pnand %p20115_p6, %p20109_p8 }
  0x85   : > { %20119 = shalt.err (!%p20116_p10)
}
  0x86   : > { %18325 = dma.hbm_to_vmem [thread:$0]  (!%p20341_p12), %s22823_s11, 16, %s436_s28, [#allocation15]  }
  0x87   : > { %p22849_p11 = scmp.ne.s32.totalorder %s22844_s15, 0 }
  0x89   : > { %456 = sbr.rel (%p22849_p11) target bundleno = 3758 (0xeae), region = 68 }
  0x8e   : > { %p22850_p1 = scmp.eq.s32.totalorder %s20305_s25, 0 }
  0x90   : > { %20163 = dma.done.wait (%p22850_p1), [#allocation3], 768   ;;  %p22851_p13 = pmov %p22850_p1 }
  0x91   : > { %p22852_p0 = pmov %p22850_p1 }
  0x92   : > { %20165 = vsyncadd (%p22851_p13), [#allocation3], 4294966528 }
  0x93   : > { %20167 = dma.done.wait (%p22852_p0), [#allocation6], 98432   ;;  %p22853_p3 = pmov %p22852_p0 }
  0x94   : > { %p22854_p2 = pmov %p22852_p0 }
  0x95   : > { %20169 = vsyncadd (%p22853_p3), [#allocation6], 4294868864 }
  0x96   : > { %20171 = dma.done.wait (%p22854_p2), [#allocation9], 98688   ;;  %p22855_p12 = pmov %p22852_p0 }
  0x97   : > { %p22856_p4 = pmov %p22852_p0 }
  0x98   : > { %20173 = vsyncadd (%p22855_p12), [#allocation9], 4294868608 }
  0x99   : > { %20175 = dma.done.wait (%p22856_p4), [#allocation12], 256   ;;  %p22857_p7 = pmov %p22852_p0 }
  0x9a   : > { %p22858_p8 = pmov %p22852_p0 }
  0x9b   : > { %20177 = vsyncadd (%p22857_p7), [#allocation12], 4294967040 }
  0x9c   : > { %20179 = dma.done.wait (%p22858_p8), [#allocation15], 48   ;;  %p22859_p9 = pmov %p22852_p0 }
  0x9d   : > { %p529_p5 = scmp.lt.s32.totalorder %s20305_s25, 1  ;;  %v22835_v0 = vmov 0   ;;  %v18421_v17 = vld [vmem:[#allocation2] sm:$0xff]   ;;  %vm645_vm0 = vcmask 523264   ;;  %v18422_v18 = vld [vmem:[#allocation2 + $0x8] sm:$0xff]   ;;  %v1214_v19 = vld [vmem:[#allocation5 + $0x9c0] sm:$0xff] }
  0x9e   : > { %20181 = vsyncadd (%p22859_p9), [#allocation15], 4294967248  ;;  %684 = vmatprep.mubr.bf16.mxu0 %v22835_v0  ;;  %737 = vmatprep.mubr.bf16.mxu1 %v22835_v0  ;;  %v1218_v20 = vld [vmem:[#allocation5 + $0x9e0] sm:$0xff]  ;;  %v18424_v38 = vld [vmem:[#allocation2 + $0x18] sm:$0xff]   ;;  %vm7079_vm1 = vcmask 261120   ;;  %vm13338_vm2 = vcmask 130048  }
  0x9f   : > { %s530_s15 = scalar_select %p529_p5, %s20305_s25, 1  ;;  %v1342_v21 = vld [vmem:[#allocation5 + $0xdc0] sm:$0xff]  ;;  %v16150_v24 = vcombine.high %v1214_v19, %v1218_v20  ;;  %v16149_v30 = vcombine.low %v1214_v19, %v1218_v20  ;;  %vm15883_vm3 = vcmask 253952  }
  0xa0   : > { %v1346_v22 = vld [vmem:[#allocation5 + $0xde0] sm:$0xff]  ;;  %s527_s29 = sand.u32 1, %s20192_s22   ;;  %s17976_s30 = sshll.u32 %s20305_s25, 4 }
  0xa1   : > { %s17979_s18 = sshll.u32 %s530_s15, 7  ;;  %v18423_v23 = vld [vmem:[#allocation2 + $0x10] sm:$0xff]   ;;  %v16278_v25 = vcombine.high %v1342_v21, %v1346_v22  ;;  %v16277_v31 = vcombine.low %v1342_v21, %v1346_v22  ;;  %s528_s23 = scalar_lea.vmem [#allocation17], %s527_s29 }
  0xa2   : > { %s20452_s27 = scalar_lea.vmem %s22812_s0, %s17979_s18  ;;  %v1206_v26 = vld [vmem:[#allocation5 + $0x980] sm:$0xff]  ;;  %s15898_s17 = sshll.u32 %s528_s23, 4  ;;  %s15899_s17 = int_to_ptr.vmem [resolvable:$true] %s15898_s17 }
  0xa3   : > { %v18397_v1 = vld [vmem:[%s20452_s27 + $0x64] ss:$16 sps:$4 sm:$0xff]   ;;  %v18399_v2 = vld [vmem:[%s20452_s27 + $0x6c] ss:$16 sps:$4 sm:$0xff]   ;;  %v18401_v3 = vld [vmem:[%s20452_s27 + $0x60] ss:$16 sps:$4 sm:$0xff]   ;;  %s15896_s21 = scalar_lea.hbm %s22824_s12, %s17976_s30 }
  0xa4   : > { %660 = vmatprep.subr.bf16.mxu0 %v18397_v1  ;;  %v18402_v4 = vld [vmem:[%s20452_s27 + $0x68] ss:$16 sps:$4 sm:$0xff]   ;;  %713 = vmatprep.subr.bf16.mxu1 %v18399_v2  ;;  %v18403_v5 = vld [vmem:[%s20452_s27 + $0x44] ss:$16 sps:$4 sm:$0xff]   ;;  %v18405_v6 = vld [vmem:[%s20452_s27 + $0x4c] ss:$16 sps:$4 sm:$0xff]  }
  0xa5   : > { %661 = vmatpush1.bf16.msra.mxu0 %v18401_v3  ;;  %714 = vmatpush1.bf16.msra.mxu1 %v18402_v4  ;;  %v18407_v7 = vld [vmem:[%s20452_s27 + $0x40] ss:$16 sps:$4 sm:$0xff]   ;;  %v18408_v8 = vld [vmem:[%s20452_s27 + $0x48] ss:$16 sps:$4 sm:$0xff]   ;;  %v18409_v9 = vld [vmem:[%s20452_s27 + $0x24] ss:$16 sps:$4 sm:$0xff]  }
  0xa6   : > { %662 = vmatprep.subr.bf16.mxu0 %v18403_v5  ;;  %715 = vmatprep.subr.bf16.mxu1 %v18405_v6  ;;  %v18411_v10 = vld [vmem:[%s20452_s27 + $0x2c] ss:$16 sps:$4 sm:$0xff]   ;;  %v18413_v11 = vld [vmem:[%s20452_s27 + $0x20] ss:$16 sps:$4 sm:$0xff]   ;;  %v18414_v12 = vld [vmem:[%s20452_s27 + $0x28] ss:$16 sps:$4 sm:$0xff]  }
  0xa7   : > { %v18415_v13 = vld [vmem:[%s20452_s27 + $0x4] ss:$16 sps:$4 sm:$0xff]   ;;  %v18417_v14 = vld [vmem:[%s20452_s27 + $0xc] ss:$16 sps:$4 sm:$0xff]   ;;  %v18419_v15 = vld [vmem:[%s20452_s27] ss:$16 sps:$4 sm:$0xff]  }
  0xa8   : > { %v18420_v16 = vld [vmem:[%s20452_s27 + $0x8] ss:$16 sps:$4 sm:$0xff]   ;;  %v1210_v27 = vld [vmem:[#allocation5 + $0x9a0] sm:$0xff]  ;;  %s15886_s14 = scalar_lea.sflag [#allocation4], %s527_s29  ;;  %s20120_s19 = scalar_lea.vmem %s15899_s17, 16 }
  0xa9   : > { %663 = vmatpush1.bf16.msra.mxu0 %v18407_v7  ;;  %716 = vmatpush1.bf16.msra.mxu1 %v18408_v8  ;;  %v1334_v28 = vld [vmem:[#allocation5 + $0xd80] sm:$0xff]  ;;  %v16142_v36 = vcombine.high %v1206_v26, %v1210_v27  ;;  %v16141_v39 = vcombine.low %v1206_v26, %v1210_v27  ;;  %p20121_p6 = scmp.ne.s32.totalorder %s15899_s17, %s20120_s19  ;;  %p22919_p10 = scmp.ne.s32.totalorder %s22841_s13, 0 }
  0xaa   : > { %664 = vmatprep.subr.bf16.mxu0 %v18409_v9  ;;  %717 = vmatprep.subr.bf16.mxu1 %v18411_v10  ;;  %v1338_v29 = vld [vmem:[#allocation5 + $0xda0] sm:$0xff]  ;;  %s20218_s15 = smov [#allocation17]  }
  0xab   : > { %v1198_v32 = vld [vmem:[#allocation5 + $0x940] sm:$0xff]  ;;  %v16270_v37 = vcombine.high %v1334_v28, %v1338_v29  ;;  %v16269_v40 = vcombine.low %v1334_v28, %v1338_v29  ;;  %p20122_p11 = pnand %p20121_p6, %p22919_p10  ;;  %s20124_s25 = sshll.u32 %s20218_s15, 4  ;;  %s20125_s25 = int_to_ptr.vmem [resolvable:$false] %s20124_s25 }
  0xac   : > { %v1202_v33 = vld [vmem:[#allocation5 + $0x960] sm:$0xff]  ;;  %s20126_s18 = scalar_lea.vmem %s20125_s25, 32  ;;  %p20127_p13 = scmp.lt.s32.totalorder %s15899_s17, %s20125_s25 }
  0xad   : > { %665 = vmatpush1.bf16.msra.mxu0 %v18413_v11  ;;  %718 = vmatpush1.bf16.msra.mxu1 %v18414_v12  ;;  %v1326_v34 = vld [vmem:[#allocation5 + $0xd40] sm:$0xff]  ;;  %v16134_v45 = vcombine.high %v1198_v32, %v1202_v33  ;;  %v16133_v47 = vcombine.low %v1198_v32, %v1202_v33  ;;  %p20123_p1 = pneg %p20122_p11  ;;  %p20128_p0 = scmp.lt.s32.totalorder %s20126_s18, %s20120_s19 }
  0xae   : > { %666 = vmatprep.subr.bf16.mxu0 %v18415_v13  ;;  %719 = vmatprep.subr.bf16.mxu1 %v18417_v14  ;;  %v1330_v35 = vld [vmem:[#allocation5 + $0xd60] sm:$0xff] }
  0xaf   : > { %v1190_v41 = vld [vmem:[#allocation5 + $0x900] sm:$0xff]  ;;  %v16262_v46 = vcombine.high %v1326_v34, %v1330_v35  ;;  %v16261_v48 = vcombine.low %v1326_v34, %v1330_v35  ;;  %p20129_p3 = por %p20128_p0, %p20127_p13 }
  0xb0   : > { %v1194_v42 = vld [vmem:[#allocation5 + $0x920] sm:$0xff] }
  0xb1   : > { %667 = vmatpush1.bf16.msra.mxu0 %v18419_v15  ;;  %720 = vmatpush1.bf16.msra.mxu1 %v18420_v16  ;;  %v1318_v43 = vld [vmem:[#allocation5 + $0xd00] sm:$0xff]  ;;  %v16126_v53 = vcombine.high %v1190_v41, %v1194_v42  ;;  %v16125_v55 = vcombine.low %v1190_v41, %v1194_v42  ;;  %p20130_p2 = pnand %p20129_p3, %p20123_p1 }
  0xb2   : > { %1051 = vmatprep.subr.bf16.mxu0 %v18397_v1  ;;  %1104 = vmatprep.subr.bf16.mxu1 %v18399_v2  ;;  %v1322_v44 = vld [vmem:[#allocation5 + $0xd20] sm:$0xff] }
  0xb3   : > { %v1182_v49 = vld [vmem:[#allocation5 + $0x8c0] sm:$0xff]  ;;  %v16254_v54 = vcombine.high %v1318_v43, %v1322_v44  ;;  %v16253_v56 = vcombine.low %v1318_v43, %v1322_v44 }
  0xb4   : > { %16083 = vmatmul.mubr.msk.bf16.vlgmr.msra.gmra.mxu0 %vm645_vm0, %v18421_v17  ;;  %16085 = vmatmul.mubr.msk.bf16.vlgmr.msra.gmra.mxu1 %vm645_vm0, %v18421_v17  ;;  %v1186_v50 = vld [vmem:[#allocation5 + $0x8e0] sm:$0xff] }
  0xb5   : > { %1052 = vmatpush1.bf16.msra.mxu0 %v18401_v3  ;;  %1105 = vmatpush1.bf16.msra.mxu1 %v18402_v4  ;;  %v1310_v51 = vld [vmem:[#allocation5 + $0xcc0] sm:$0xff]  ;;  %v16118_v61 = vcombine.high %v1182_v49, %v1186_v50  ;;  %v16117_v63 = vcombine.low %v1182_v49, %v1186_v50 }
  0xb6   : > { %1053 = vmatprep.subr.bf16.mxu0 %v18403_v5  ;;  %1106 = vmatprep.subr.bf16.mxu1 %v18405_v6  ;;  %v1314_v52 = vld [vmem:[#allocation5 + $0xce0] sm:$0xff] }
  0xb7   : > { %694 = vmatprep.mubr.bf16.mxu0 %v22835_v0  ;;  %747 = vmatprep.mubr.bf16.mxu1 %v22835_v0  ;;  %v1174_v57 = vld [vmem:[#allocation5 + $0x880] sm:$0xff]  ;;  %v16246_v62 = vcombine.high %v1310_v51, %v1314_v52  ;;  %v16245_v1 = vcombine.low %v1310_v51, %v1314_v52 }
  0xb8   : > { %v1178_v58 = vld [vmem:[#allocation5 + $0x8a0] sm:$0xff] }
  0xb9   : > { %1054 = vmatpush1.bf16.msra.mxu0 %v18407_v7  ;;  %1107 = vmatpush1.bf16.msra.mxu1 %v18408_v8  ;;  %v1302_v59 = vld [vmem:[#allocation5 + $0xc80] sm:$0xff]  ;;  %v16110_v6 = vcombine.high %v1174_v57, %v1178_v58  ;;  %v16109_v8 = vcombine.low %v1174_v57, %v1178_v58 }
  0xba   : > { %1055 = vmatprep.subr.bf16.mxu0 %v18409_v9  ;;  %1108 = vmatprep.subr.bf16.mxu1 %v18411_v10  ;;  %v1306_v60 = vld [vmem:[#allocation5 + $0xca0] sm:$0xff] }
  0xbb   : > { %v1166_v2 = vld [vmem:[#allocation5 + $0x840] sm:$0xff]  ;;  %v16238_v7 = vcombine.high %v1302_v59, %v1306_v60  ;;  %v16237_v9 = vcombine.low %v1302_v59, %v1306_v60 }
  0xbc   : > { %16084 = vmatmul.mubr.msk.bf16.gmra.mxu0 %vm645_vm0, %v18422_v18  ;;  %16086 = vmatmul.mubr.msk.bf16.gmra.mxu1 %vm645_vm0, %v18422_v18  ;;  %v1170_v3 = vld [vmem:[#allocation5 + $0x860] sm:$0xff] }
  0xbd   : > { %1056 = vmatpush1.bf16.msra.mxu0 %v18413_v11  ;;  %1109 = vmatpush1.bf16.msra.mxu1 %v18414_v12  ;;  %v1294_v4 = vld [vmem:[#allocation5 + $0xc40] sm:$0xff] }
  0xbe   : > { %1057 = vmatprep.subr.bf16.mxu0 %v18415_v13  ;;  %1110 = vmatprep.subr.bf16.mxu1 %v18417_v14  ;;  %v1298_v5 = vld [vmem:[#allocation5 + $0xc60] sm:$0xff]  ;;  %v16102_v14 = vcombine.high %v1166_v2, %v1170_v3 }
  0xbf   : > { %1075 = vmatprep.mubr.bf16.mxu0 %v22835_v0  ;;  %1128 = vmatprep.mubr.bf16.mxu1 %v22835_v0  ;;  %v1158_v10 = vld [vmem:[#allocation5 + $0x800] sm:$0xff]  ;;  %v16229_v17 = vcombine.low %v1294_v4, %v1298_v5 }
  0xc0   : > { %v1162_v11 = vld [vmem:[#allocation5 + $0x820] sm:$0xff] }
  0xc1   : > { %1058 = vmatpush1.bf16.msra.mxu0 %v18419_v15  ;;  %1111 = vmatpush1.bf16.msra.mxu1 %v18420_v16  ;;  %v1286_v12 = vld [vmem:[#allocation5 + $0xc00] sm:$0xff]  ;;  %v16230_v15 = vcombine.high %v1294_v4, %v1298_v5  ;;  %v16101_v16 = vcombine.low %v1166_v2, %v1170_v3  ;;  %v16094_v22 = vcombine.high %v1158_v10, %v1162_v11 }
  0xc2   : > { %2694 = vmatprep.subr.bf16.mxu0 %v16150_v24  ;;  %2747 = vmatprep.subr.bf16.mxu1 %v16278_v25  ;;  %v1290_v13 = vld [vmem:[#allocation5 + $0xc20] sm:$0xff]  ;;  %v16093_v24 = vcombine.low %v1158_v10, %v1162_v11 }
  0xc3   : > { %v1278_v18 = vld [vmem:[#allocation5 + $0xbc0] sm:$0xff]  ;;  %v16221_v25 = vcombine.low %v1286_v12, %v1290_v13 }
  0xc4   : > { %16089 = vmatmul.mubr.msk.bf16.vlgmr.msra.gmra.mxu0 %vm645_vm0, %v18423_v23  ;;  %16091 = vmatmul.mubr.msk.bf16.vlgmr.msra.gmra.mxu1 %vm645_vm0, %v18423_v23  ;;  %v1282_v19 = vld [vmem:[#allocation5 + $0xbe0] sm:$0xff]  ;;  %v16222_v23 = vcombine.high %v1286_v12, %v1290_v13 }
  0xc5   : > { %1085 = vmatprep.mubr.bf16.mxu0 %v22835_v0  ;;  %1138 = vmatprep.mubr.bf16.mxu1 %v22835_v0  ;;  %v1406_v20 = vld [vmem:[#allocation5 + $0xfc0] sm:$0xff]  ;;  %v16213_v32 = vcombine.low %v1278_v18, %v1282_v19  ;;  %v929_v0 = vld [vmem:[#allocation5 + $0x518] sm:$0xff] }
  0xc6   : > { %2695 = vmatpush1.bf16.msra.mxu0 %v16149_v30  ;;  %2748 = vmatpush1.bf16.msra.mxu1 %v16277_v31  ;;  %v1410_v21 = vld [vmem:[#allocation5 + $0xfe0] sm:$0xff]  ;;  %v16214_v30 = vcombine.high %v1278_v18, %v1282_v19 }
  0xc7   : > { %2696 = vmatprep.subr.bf16.mxu0 %v16142_v36  ;;  %2749 = vmatprep.subr.bf16.mxu1 %v16270_v37  ;;  %v1270_v26 = vld [vmem:[#allocation5 + $0xb80] sm:$0xff]  ;;  %v16342_v31 = vcombine.high %v1406_v20, %v1410_v21  ;;  %v16341_v33 = vcombine.low %v1406_v20, %v1410_v21 }
  0xc8   : > { %v1274_v27 = vld [vmem:[#allocation5 + $0xba0] sm:$0xff] }
  0xc9   : > { %v1398_v28 = vld [vmem:[#allocation5 + $0xf80] sm:$0xff]  ;;  %v16206_v34 = vcombine.high %v1270_v26, %v1274_v27  ;;  %v16205_v36 = vcombine.low %v1270_v26, %v1274_v27  ;;  %v1347_v27 = vld [vmem:[#allocation5 + $0xde8] sm:$0xff] }
  0xca   : > { %2697 = vmatpush1.bf16.msra.mxu0 %v16141_v39  ;;  %2750 = vmatpush1.bf16.msra.mxu1 %v16269_v40  ;;  %v1402_v29 = vld [vmem:[#allocation5 + $0xfa0] sm:$0xff] }
  0xcb   : > { %2698 = vmatprep.subr.bf16.mxu0 %v16134_v45  ;;  %2751 = vmatprep.subr.bf16.mxu1 %v16262_v46  ;;  %v16334_v35 = vcombine.high %v1398_v28, %v1402_v29  ;;  %v16333_v37 = vcombine.low %v1398_v28, %v1402_v29  ;;  %v1266_v39 = vld [vmem:[#allocation5 + $0xb60] sm:$0xff] }
  0xcc   : > { %16090 = vmatmul.mubr.msk.bf16.gmra.mxu0 %vm645_vm0, %v18424_v38  ;;  %16092 = vmatmul.mubr.msk.bf16.gmra.mxu1 %vm645_vm0, %v18424_v38  ;;  %v1262_v38 = vld [vmem:[#allocation5 + $0xb40] sm:$0xff] }
  0xcd   : > { %v1390_v40 = vld [vmem:[#allocation5 + $0xf40] sm:$0xff]  ;;  %v16198_v41 = vcombine.high %v1262_v38, %v1266_v39  ;;  %v16197_v43 = vcombine.low %v1262_v38, %v1266_v39 }
  0xce   : > { %2699 = vmatpush1.bf16.msra.mxu0 %v16133_v47  ;;  %2752 = vmatpush1.bf16.msra.mxu1 %v16261_v48  ;;  %v1394_v42 = vld [vmem:[#allocation5 + $0xf60] sm:$0xff] }
  0xcf   : > { %2700 = vmatprep.subr.bf16.mxu0 %v16126_v53  ;;  %2753 = vmatprep.subr.bf16.mxu1 %v16254_v54  ;;  %v16325_v44 = vcombine.low %v1390_v40, %v1394_v42  ;;  %v16326_v45 = vcombine.high %v1390_v40, %v1394_v42  ;;  %v1254_v46 = vld [vmem:[#allocation5 + $0xb00] sm:$0xff] }
  0xd0   : > { %v1258_v47 = vld [vmem:[#allocation5 + $0xb20] sm:$0xff] }
  0xd1   : > { %v1382_v48 = vld [vmem:[#allocation5 + $0xf00] sm:$0xff]  ;;  %v16190_v49 = vcombine.high %v1254_v46, %v1258_v47  ;;  %v16189_v51 = vcombine.low %v1254_v46, %v1258_v47 }
  0xd2   : > { %2701 = vmatpush1.bf16.msra.mxu0 %v16125_v55  ;;  %2754 = vmatpush1.bf16.msra.mxu1 %v16253_v56  ;;  %v1386_v50 = vld [vmem:[#allocation5 + $0xf20] sm:$0xff] }
  0xd3   : > { %2702 = vmatprep.subr.bf16.mxu0 %v16118_v61  ;;  %2755 = vmatprep.subr.bf16.mxu1 %v16246_v62  ;;  %v16317_v52 = vcombine.low %v1382_v48, %v1386_v50  ;;  %v16318_v53 = vcombine.high %v1382_v48, %v1386_v50  ;;  %v1246_v54 = vld [vmem:[#allocation5 + $0xac0] sm:$0xff] }
  0xd4   : > { %v1250_v55 = vld [vmem:[#allocation5 + $0xae0] sm:$0xff] }
  0xd5   : > { %v1374_v56 = vld [vmem:[#allocation5 + $0xec0] sm:$0xff]  ;;  %v16182_v57 = vcombine.high %v1246_v54, %v1250_v55  ;;  %v16181_v59 = vcombine.low %v1246_v54, %v1250_v55 }
  0xd6   : > { %2703 = vmatpush1.bf16.msra.mxu0 %v16117_v63  ;;  %2756 = vmatpush1.bf16.msra.mxu1 %v16245_v1  ;;  %v1378_v58 = vld [vmem:[#allocation5 + $0xee0] sm:$0xff] }
  0xd7   : > { %2704 = vmatprep.subr.bf16.mxu0 %v16110_v6  ;;  %2757 = vmatprep.subr.bf16.mxu1 %v16238_v7  ;;  %v16309_v60 = vcombine.low %v1374_v56, %v1378_v58  ;;  %v16310_v61 = vcombine.high %v1374_v56, %v1378_v58  ;;  %v1238_v62 = vld [vmem:[#allocation5 + $0xa80] sm:$0xff]  ;;  %v1211_v58 = vld [vmem:[#allocation5 + $0x9a8] sm:$0xff] }
  0xd8   : > { %v1242_v63 = vld [vmem:[#allocation5 + $0xaa0] sm:$0xff] }
  0xd9   : > { %v1366_v1 = vld [vmem:[#allocation5 + $0xe80] sm:$0xff]  ;;  %v16174_v2 = vcombine.high %v1238_v62, %v1242_v63  ;;  %v16173_v4 = vcombine.low %v1238_v62, %v1242_v63 }
  0xda   : > { %2705 = vmatpush1.bf16.msra.mxu0 %v16109_v8  ;;  %2758 = vmatpush1.bf16.msra.mxu1 %v16237_v9  ;;  %v1370_v3 = vld [vmem:[#allocation5 + $0xea0] sm:$0xff] }
  0xdb   : > { %2706 = vmatprep.subr.bf16.mxu0 %v16102_v14  ;;  %2759 = vmatprep.subr.bf16.mxu1 %v16230_v15  ;;  %v16301_v5 = vcombine.low %v1366_v1, %v1370_v3  ;;  %v16302_v6 = vcombine.high %v1366_v1, %v1370_v3  ;;  %v1230_v7 = vld [vmem:[#allocation5 + $0xa40] sm:$0xff] }
  0xdc   : > { %v1234_v8 = vld [vmem:[#allocation5 + $0xa60] sm:$0xff] }
  0xdd   : > { %v1358_v9 = vld [vmem:[#allocation5 + $0xe40] sm:$0xff]  ;;  %v16166_v10 = vcombine.high %v1230_v7, %v1234_v8  ;;  %v16165_v12 = vcombine.low %v1230_v7, %v1234_v8  ;;  %v1199_v8 = vld [vmem:[#allocation5 + $0x948] sm:$0xff] }
  0xde   : > { %2707 = vmatpush1.bf16.msra.mxu0 %v16101_v16  ;;  %2760 = vmatpush1.bf16.msra.mxu1 %v16229_v17  ;;  %v1362_v11 = vld [vmem:[#allocation5 + $0xe60] sm:$0xff] }
  0xdf   : > { %2708 = vmatprep.subr.bf16.mxu0 %v16094_v22  ;;  %2761 = vmatprep.subr.bf16.mxu1 %v16222_v23  ;;  %v16293_v13 = vcombine.low %v1358_v9, %v1362_v11  ;;  %v16294_v14 = vcombine.high %v1358_v9, %v1362_v11  ;;  %v1222_v15 = vld [vmem:[#allocation5 + $0xa00] sm:$0xff]  ;;  %v1215_v23 = vld [vmem:[#allocation5 + $0x9c8] sm:$0xff] }
  0xe0   : > { %v1226_v16 = vld [vmem:[#allocation5 + $0xa20] sm:$0xff]  ;;  %v1203_v9 = vld [vmem:[#allocation5 + $0x968] sm:$0xff] }
  0xe1   : > { %v1350_v17 = vld [vmem:[#allocation5 + $0xe00] sm:$0xff]  ;;  %v16158_v18 = vcombine.high %v1222_v15, %v1226_v16  ;;  %v16157_v20 = vcombine.low %v1222_v15, %v1226_v16  ;;  %v1331_v11 = vld [vmem:[#allocation5 + $0xd68] sm:$0xff] }
  0xe2   : > { %2709 = vmatpush1.bf16.msra.mxu0 %v16093_v24  ;;  %2762 = vmatpush1.bf16.msra.mxu1 %v16221_v25  ;;  %v1354_v19 = vld [vmem:[#allocation5 + $0xe20] sm:$0xff]  ;;  %v1219_v24 = vld [vmem:[#allocation5 + $0x9e8] sm:$0xff] }
  0xe3   : > { %2710 = vmatprep.subr.bf16.mxu0 %v16214_v30  ;;  %2763 = vmatprep.subr.bf16.mxu1 %v16342_v31  ;;  %v16285_v21 = vcombine.low %v1350_v17, %v1354_v19  ;;  %v16286_v22 = vcombine.high %v1350_v17, %v1354_v19  ;;  %v1343_v25 = vld [vmem:[#allocation5 + $0xdc8] sm:$0xff]  ;;  %v16152_v26 = vcombine.high %v1215_v23, %v1219_v24 }
  0xe4   : > { %v16151_v28 = vcombine.low %v1215_v23, %v1219_v24  ;;  %v16279_v29 = vcombine.low %v1343_v25, %v1347_v27  ;;  %v16280_v30 = vcombine.high %v1343_v25, %v1347_v27  ;;  %v16135_v27 = vcombine.low %v1199_v8, %v1203_v9 }
  0xe6   : > { %2711 = vmatpush2.bf16.msra.mxu0 %v16213_v32  ;;  %2764 = vmatpush2.bf16.msra.mxu1 %v16341_v33 }
  0xe7   : > { %2712 = vmatprep.subr.bf16.mxu0 %v16206_v34  ;;  %2765 = vmatprep.subr.bf16.mxu1 %v16334_v35 }
  0xea   : > { %2713 = vmatpush2.bf16.msra.mxu0 %v16205_v36  ;;  %2766 = vmatpush2.bf16.msra.mxu1 %v16333_v37 }
  0xeb   : > { %2714 = vmatprep.subr.bf16.mxu0 %v16198_v41  ;;  %2767 = vmatprep.subr.bf16.mxu1 %v16326_v45 }
  0xee   : > { %2715 = vmatpush2.bf16.msra.mxu0 %v16197_v43  ;;  %2768 = vmatpush2.bf16.msra.mxu1 %v16325_v44 }
  0xef   : > { %2716 = vmatprep.subr.bf16.mxu0 %v16190_v49  ;;  %2769 = vmatprep.subr.bf16.mxu1 %v16318_v53 }
  0xf2   : > { %2717 = vmatpush2.bf16.msra.mxu0 %v16189_v51  ;;  %2770 = vmatpush2.bf16.msra.mxu1 %v16317_v52 }
  0xf3   : > { %2718 = vmatprep.subr.bf16.mxu0 %v16182_v57  ;;  %2771 = vmatprep.subr.bf16.mxu1 %v16310_v61  ;;  %v1207_v57 = vld [vmem:[#allocation5 + $0x988] sm:$0xff] }
  0xf6   : > { %2719 = vmatpush2.bf16.msra.mxu0 %v16181_v59  ;;  %2772 = vmatpush2.bf16.msra.mxu1 %v16309_v60  ;;  %v1335_v59 = vld [vmem:[#allocation5 + $0xd88] sm:$0xff] }
  0xf7   : > { %2720 = vmatprep.subr.bf16.mxu0 %v16174_v2  ;;  %2773 = vmatprep.subr.bf16.mxu1 %v16302_v6  ;;  %v1339_v60 = vld [vmem:[#allocation5 + $0xda8] sm:$0xff]  ;;  %v16144_v6 = vcombine.high %v1207_v57, %v1211_v58 }
  0xf8   : > { %v16272_v7 = vcombine.high %v1335_v59, %v1339_v60  ;;  %v16271_v15 = vcombine.low %v1335_v59, %v1339_v60  ;;  %v1167_v60 = vld [vmem:[#allocation5 + $0x848] sm:$0xff] }
  0xfa   : > { %2721 = vmatpush2.bf16.msra.mxu0 %v16173_v4  ;;  %2774 = vmatpush2.bf16.msra.mxu1 %v16301_v5 }
  0xfb   : > { %2722 = vmatprep.subr.bf16.mxu0 %v16166_v10  ;;  %2775 = vmatprep.subr.bf16.mxu1 %v16294_v14  ;;  %v1327_v10 = vld [vmem:[#allocation5 + $0xd48] sm:$0xff]  ;;  %v16143_v14 = vcombine.low %v1207_v57, %v1211_v58 }
  0xfc   : > { %v16264_v19 = vcombine.high %v1327_v10, %v1331_v11  ;;  %v1307_v57 = vld [vmem:[#allocation5 + $0xca8] sm:$0xff] }
  0xfe   : > { %2723 = vmatpush2.bf16.msra.mxu0 %v16165_v12  ;;  %2776 = vmatpush2.bf16.msra.mxu1 %v16293_v13 }
  0xff   : > { %2724 = vmatprep.subr.bf16.mxu0 %v16158_v18  ;;  %2777 = vmatprep.subr.bf16.mxu1 %v16286_v22  ;;  %v16136_v18 = vcombine.high %v1199_v8, %v1203_v9  ;;  %v1319_v22 = vld [vmem:[#allocation5 + $0xd08] sm:$0xff] }
 0x100   : > { %v1159_v9 = vld [vmem:[#allocation5 + $0x808] sm:$0xff] }
 0x102   : > { %2725 = vmatpush2.bf16.msra.mxu0 %v16157_v20  ;;  %2778 = vmatpush2.bf16.msra.mxu1 %v16285_v21  ;;  %v1191_v20 = vld [vmem:[#allocation5 + $0x908] sm:$0xff] }
 0x103   : > { %2800 = vmatprep.subr.bf16.mxu0 %v16152_v26  ;;  %2853 = vmatprep.subr.bf16.mxu1 %v16280_v30  ;;  %v1195_v21 = vld [vmem:[#allocation5 + $0x928] sm:$0xff] }
 0x174   : > { %v686_v31 = vpop.f32.mrf.mxu0  ;;  %v739_v32 = vpop.f32.mrf.mxu1 }
 0x176   : > { %v20484_v33 = vpop.f32.mrf.mxu0  ;;  %v20486_v34 = vpop.f32.mrf.mxu1 }
 0x178   : > { %v690_v35 = vpop.f32.mrf.mxu0  ;;  %v743_v36 = vpop.f32.mrf.mxu1 }
 0x179   : > { %v20488_v37 = vpack.c.bf16 %v690_v35, %v686_v31  ;;  %v20490_v38 = vpack.c.bf16 %v743_v36, %v739_v32  ;;  %v16263_v31 = vcombine.low %v1327_v10, %v1331_v11  ;;  %v1183_v32 = vld [vmem:[#allocation5 + $0x8c8] sm:$0xff]  ;;  %v16128_v35 = vcombine.high %v1191_v20, %v1195_v21 }
 0x17a   : > { %v20492_v39 = vpop.f32.mrf.mxu0  ;;  %v20494_v40 = vpop.f32.mrf.mxu1 }
 0x17c   : > { %v696_v41 = vpop.f32.mrf.mxu0  ;;  %v749_v42 = vpop.f32.mrf.mxu1 }
 0x17e   : > { %v20496_v43 = vpop.f32.mrf.mxu0  ;;  %v20498_v44 = vpop.f32.mrf.mxu1 }
 0x180   : > { %v700_v45 = vpop.f32.mrf.mxu0  ;;  %v753_v46 = vpop.f32.mrf.mxu1 }
 0x181   : > { %v20500_v47 = vpack.c.bf16 %v700_v45, %v696_v41  ;;  %v20502_v48 = vpack.c.bf16 %v753_v46, %v749_v42  ;;  %v1187_v41 = vld [vmem:[#allocation5 + $0x8e8] sm:$0xff]  ;;  %v16127_v46 = vcombine.low %v1191_v20, %v1195_v21 }
 0x182   : > { %v20504_v49 = vpop.f32.mrf.mxu0  ;;  %v20506_v50 = vpop.f32.mrf.mxu1  ;;  %v1311_v42 = vld [vmem:[#allocation5 + $0xcc8] sm:$0xff]  ;;  %v16119_v58 = vcombine.low %v1183_v32, %v1187_v41 }
 0x183   : > { %v1315_v45 = vld [vmem:[#allocation5 + $0xce8] sm:$0xff] }
 0x184   : > { %v1077_v51 = vpop.f32.mrf.mxu0  ;;  %v1130_v52 = vpop.f32.mrf.mxu1  ;;  %v16247_v59 = vcombine.low %v1311_v42, %v1315_v45  ;;  %v1283_v20 = vld [vmem:[#allocation5 + $0xbe8] sm:$0xff] }
 0x185   : > { %v1407_v21 = vld [vmem:[#allocation5 + $0xfc8] sm:$0xff] }
 0x186   : > { %v1079_v53 = vpop.f32.mrf.mxu0  ;;  %v1132_v54 = vpop.f32.mrf.mxu1 }
 0x188   : > { %v1081_v55 = vpop.f32.mrf.mxu0  ;;  %v1134_v56 = vpop.f32.mrf.mxu1 }
 0x189   : > { %v20512_v2 = vpack.c.bf16 %v1081_v55, %v1077_v51  ;;  %v20514_v3 = vpack.c.bf16 %v1134_v56, %v1130_v52  ;;  %v1175_v52 = vld [vmem:[#allocation5 + $0x888] sm:$0xff] }
 0x18a   : > { %v1083_v61 = vpop.f32.mrf.mxu0  ;;  %v1136_v62 = vpop.f32.mrf.mxu1  ;;  %v1179_v55 = vld [vmem:[#allocation5 + $0x8a8] sm:$0xff] }
 0x18b   : > { %v20508_v63 = vpack.c.bf16 %v1083_v61, %v1079_v53  ;;  %v20510_v1 = vpack.c.bf16 %v1136_v62, %v1132_v54  ;;  %v16120_v53 = vcombine.high %v1183_v32, %v1187_v41  ;;  %v16248_v54 = vcombine.high %v1311_v42, %v1315_v45  ;;  %v1303_v56 = vld [vmem:[#allocation5 + $0xc88] sm:$0xff] }
 0x18c   : > { %v1087_v4 = vpop.f32.mrf.mxu0  ;;  %v1140_v5 = vpop.f32.mrf.mxu1  ;;  %v16112_v61 = vcombine.high %v1175_v52, %v1179_v55  ;;  %v16240_v62 = vcombine.high %v1303_v56, %v1307_v57  ;;  %v16239_v8 = vcombine.low %v1303_v56, %v1307_v57  ;;  %v1275_v32 = vld [vmem:[#allocation5 + $0xba8] sm:$0xff] }
 0x18d   : > { %2726 = vmatprep.mubr.bf16.mxu0 %v20508_v63  ;;  %2779 = vmatprep.mubr.bf16.mxu1 %v20510_v1  ;;  %v1263_v45 = vld [vmem:[#allocation5 + $0xb48] sm:$0xff] }
 0x18e   : > { %v1089_v12 = vpop.f32.mrf.mxu0  ;;  %v1142_v13 = vpop.f32.mrf.mxu1  ;;  %2727 = vmatmul.mubr.bf16.vlgmr.msra.gmra.mxu0 %v20512_v2  ;;  %2780 = vmatmul.mubr.bf16.vlgmr.msra.gmra.mxu1 %v20514_v3  ;;  %v1255_v57 = vld [vmem:[#allocation5 + $0xb08] sm:$0xff] }
 0x18f   : > { %2801 = vmatpush1.bf16.msra.mxu0 %v16151_v28  ;;  %2854 = vmatpush1.bf16.msra.mxu1 %v16279_v29  ;;  %v1323_v28 = vld [vmem:[#allocation5 + $0xd28] sm:$0xff] }
 0x190   : > { %v1091_v16 = vpop.f32.mrf.mxu0  ;;  %v1144_v17 = vpop.f32.mrf.mxu1  ;;  %2802 = vmatprep.subr.bf16.mxu0 %v16144_v6  ;;  %2855 = vmatprep.subr.bf16.mxu1 %v16272_v7  ;;  %v16256_v36 = vcombine.high %v1319_v22, %v1323_v28  ;;  %v16255_v51 = vcombine.low %v1319_v22, %v1323_v28  ;;  %v1299_v6 = vld [vmem:[#allocation5 + $0xc68] sm:$0xff]  ;;  %v16111_v7 = vcombine.low %v1175_v52, %v1179_v55 }
 0x191   : > { %v20520_v23 = vpack.c.bf16 %v1091_v16, %v1087_v4  ;;  %v20522_v24 = vpack.c.bf16 %v1144_v17, %v1140_v5  ;;  %v1171_v4 = vld [vmem:[#allocation5 + $0x868] sm:$0xff] }
 0x192   : > { %v1093_v25 = vpop.f32.mrf.mxu0  ;;  %v1146_v26 = vpop.f32.mrf.mxu1  ;;  %v1295_v5 = vld [vmem:[#allocation5 + $0xc48] sm:$0xff]  ;;  %v16104_v10 = vcombine.high %v1167_v60, %v1171_v4 }
 0x193   : > { %v20524_v29 = vpack.c.bf16 %v1093_v25, %v1089_v12  ;;  %v20526_v30 = vpack.c.bf16 %v1146_v26, %v1142_v13  ;;  %2803 = vmatpush1.bf16.msra.mxu0 %v16143_v14  ;;  %2856 = vmatpush1.bf16.msra.mxu1 %v16271_v15  ;;  %v16232_v11 = vcombine.high %v1295_v5, %v1299_v6  ;;  %v1163_v12 = vld [vmem:[#allocation5 + $0x828] sm:$0xff] }
 0x194   : > { %2804 = vmatprep.subr.bf16.mxu0 %v16136_v18  ;;  %2857 = vmatprep.subr.bf16.mxu1 %v16264_v19  ;;  %v1287_v13 = vld [vmem:[#allocation5 + $0xc08] sm:$0xff]  ;;  %v16103_v15 = vcombine.low %v1167_v60, %v1171_v4  ;;  %v16231_v16 = vcombine.low %v1295_v5, %v1299_v6  ;;  %v16096_v18 = vcombine.high %v1159_v9, %v1163_v12 }
 0x195   : > { %2736 = vmatprep.mubr.bf16.mxu0 %v20524_v29  ;;  %2789 = vmatprep.mubr.bf16.mxu1 %v20526_v30  ;;  %v1291_v14 = vld [vmem:[#allocation5 + $0xc28] sm:$0xff]  ;;  %v16095_v25 = vcombine.low %v1159_v9, %v1163_v12 }
 0x196   : > { %2737 = vmatmul.mubr.bf16.gmra.mxu0 %v20520_v23  ;;  %2790 = vmatmul.mubr.bf16.gmra.mxu1 %v20522_v24  ;;  %v1279_v17 = vld [vmem:[#allocation5 + $0xbc8] sm:$0xff]  ;;  %v16224_v19 = vcombine.high %v1287_v13, %v1291_v14  ;;  %v16223_v26 = vcombine.low %v1287_v13, %v1291_v14 }
 0x197   : > { %2805 = vmatpush1.bf16.msra.mxu0 %v16135_v27  ;;  %2858 = vmatpush1.bf16.msra.mxu1 %v16263_v31  ;;  %v1411_v22 = vld [vmem:[#allocation5 + $0xfe8] sm:$0xff]  ;;  %v16216_v28 = vcombine.high %v1279_v17, %v1283_v20  ;;  %v16215_v41 = vcombine.low %v1279_v17, %v1283_v20 }
 0x198   : > { %2832 = vmatprep.mubr.bf16.mxu0 %v20508_v63  ;;  %2885 = vmatprep.mubr.bf16.mxu1 %v20510_v1  ;;  %v1271_v27 = vld [vmem:[#allocation5 + $0xb88] sm:$0xff]  ;;  %v16344_v31 = vcombine.high %v1407_v21, %v1411_v22  ;;  %v16343_v42 = vcombine.low %v1407_v21, %v1411_v22 }
 0x199   : > { %2806 = vmatprep.subr.bf16.mxu0 %v16128_v35  ;;  %2859 = vmatprep.subr.bf16.mxu1 %v16256_v36  ;;  %v1399_v35 = vld [vmem:[#allocation5 + $0xf88] sm:$0xff]  ;;  %v16207_v55 = vcombine.low %v1271_v27, %v1275_v32 }
 0x19a   : > { %v1403_v36 = vld [vmem:[#allocation5 + $0xfa8] sm:$0xff] }
 0x19b   : > { %2807 = vmatpush1.bf16.msra.mxu0 %v16127_v46  ;;  %2860 = vmatpush1.bf16.msra.mxu1 %v16255_v51  ;;  %v16208_v46 = vcombine.high %v1271_v27, %v1275_v32  ;;  %v16336_v51 = vcombine.high %v1399_v35, %v1403_v36  ;;  %v1267_v52 = vld [vmem:[#allocation5 + $0xb68] sm:$0xff]  ;;  %v16335_v56 = vcombine.low %v1399_v35, %v1403_v36 }
 0x19c   : > { %2808 = vmatprep.subr.bf16.mxu0 %v16120_v53  ;;  %2861 = vmatprep.subr.bf16.mxu1 %v16248_v54  ;;  %v1391_v53 = vld [vmem:[#allocation5 + $0xf48] sm:$0xff]  ;;  %v16199_v4 = vcombine.low %v1263_v45, %v1267_v52 }
 0x19d   : > { %v1395_v54 = vld [vmem:[#allocation5 + $0xf68] sm:$0xff] }
 0x19e   : > { %v1259_v60 = vld [vmem:[#allocation5 + $0xb28] sm:$0xff]  ;;  %v16327_v5 = vcombine.low %v1391_v53, %v1395_v54 }
 0x19f   : > { %2809 = vmatpush1.bf16.msra.mxu0 %v16119_v58  ;;  %2862 = vmatpush1.bf16.msra.mxu1 %v16247_v59  ;;  %v16200_v58 = vcombine.high %v1263_v45, %v1267_v52  ;;  %v16328_v59 = vcombine.high %v1391_v53, %v1395_v54  ;;  %v1247_v6 = vld [vmem:[#allocation5 + $0xac8] sm:$0xff]  ;;  %v16191_v12 = vcombine.low %v1255_v57, %v1259_v60  ;;  %v1216_v54 = vld [vmem:[#allocation5 + $0x9d0] sm:$0xff] }
 0x1a0   : > { %2810 = vmatprep.subr.bf16.mxu0 %v16112_v61  ;;  %2863 = vmatprep.subr.bf16.mxu1 %v16240_v62  ;;  %v1383_v61 = vld [vmem:[#allocation5 + $0xf08] sm:$0xff] }
 0x1a1   : > { %v1387_v62 = vld [vmem:[#allocation5 + $0xf28] sm:$0xff] }
 0x1a2   : > { %v1251_v9 = vld [vmem:[#allocation5 + $0xae8] sm:$0xff]  ;;  %v16319_v13 = vcombine.low %v1383_v61, %v1387_v62 }
 0x1a3   : > { %2811 = vmatpush1.bf16.msra.mxu0 %v16111_v7  ;;  %2864 = vmatpush1.bf16.msra.mxu1 %v16239_v8  ;;  %v16192_v7 = vcombine.high %v1255_v57, %v1259_v60  ;;  %v16320_v8 = vcombine.high %v1383_v61, %v1387_v62  ;;  %v1239_v14 = vld [vmem:[#allocation5 + $0xa88] sm:$0xff]  ;;  %v16183_v20 = vcombine.low %v1247_v6, %v1251_v9  ;;  %v1220_v57 = vld [vmem:[#allocation5 + $0x9f0] sm:$0xff] }
 0x1a4   : > { %2812 = vmatprep.subr.bf16.mxu0 %v16104_v10  ;;  %2865 = vmatprep.subr.bf16.mxu1 %v16232_v11  ;;  %v1375_v10 = vld [vmem:[#allocation5 + $0xec8] sm:$0xff]  ;;  %v16154_v62 = vcombine.high %v1216_v54, %v1220_v57 }
 0x1a5   : > { %v1379_v11 = vld [vmem:[#allocation5 + $0xee8] sm:$0xff] }
 0x1a6   : > { %v1243_v17 = vld [vmem:[#allocation5 + $0xaa8] sm:$0xff]  ;;  %v16311_v21 = vcombine.low %v1375_v10, %v1379_v11 }
 0x1a7   : > { %2813 = vmatpush1.bf16.msra.mxu0 %v16103_v15  ;;  %2866 = vmatpush1.bf16.msra.mxu1 %v16231_v16  ;;  %v16184_v15 = vcombine.high %v1247_v6, %v1251_v9  ;;  %v16312_v16 = vcombine.high %v1375_v10, %v1379_v11  ;;  %v1231_v22 = vld [vmem:[#allocation5 + $0xa48] sm:$0xff]  ;;  %v16175_v32 = vcombine.low %v1239_v14, %v1243_v17  ;;  %v1212_v6 = vld [vmem:[#allocation5 + $0x9b0] sm:$0xff] }
 0x1a8   : > { %2814 = vmatprep.subr.bf16.mxu0 %v16096_v18  ;;  %2867 = vmatprep.subr.bf16.mxu1 %v16224_v19  ;;  %v1367_v18 = vld [vmem:[#allocation5 + $0xe88] sm:$0xff]  ;;  %v16153_v9 = vcombine.low %v1216_v54, %v1220_v57  ;;  %v1180_v54 = vld [vmem:[#allocation5 + $0x8b0] sm:$0xff] }
 0x1a9   : > { %v1371_v19 = vld [vmem:[#allocation5 + $0xea8] sm:$0xff] }
 0x1aa   : > { %v1235_v27 = vld [vmem:[#allocation5 + $0xa68] sm:$0xff]  ;;  %v16303_v35 = vcombine.low %v1367_v18, %v1371_v19 }
 0x1ab   : > { %2815 = vmatpush1.bf16.msra.mxu0 %v16095_v25  ;;  %2868 = vmatpush1.bf16.msra.mxu1 %v16223_v26  ;;  %v16176_v25 = vcombine.high %v1239_v14, %v1243_v17  ;;  %v16304_v26 = vcombine.high %v1367_v18, %v1371_v19  ;;  %v1223_v36 = vld [vmem:[#allocation5 + $0xa08] sm:$0xff]  ;;  %v16167_v52 = vcombine.low %v1231_v22, %v1235_v27  ;;  %v1204_v14 = vld [vmem:[#allocation5 + $0x970] sm:$0xff] }
 0x1ac   : > { %2816 = vmatprep.subr.bf16.mxu0 %v16216_v28  ;;  %2869 = vmatprep.subr.bf16.mxu1 %v16344_v31  ;;  %v1359_v28 = vld [vmem:[#allocation5 + $0xe48] sm:$0xff]  ;;  %v1192_v19 = vld [vmem:[#allocation5 + $0x910] sm:$0xff] }
 0x1ad   : > { %v1363_v31 = vld [vmem:[#allocation5 + $0xe68] sm:$0xff] }
 0x1ae   : > { %v1227_v45 = vld [vmem:[#allocation5 + $0xa28] sm:$0xff]  ;;  %v16295_v53 = vcombine.low %v1359_v28, %v1363_v31 }
 0x1af   : > { %2817 = vmatpush2.bf16.msra.mxu0 %v16215_v41  ;;  %2870 = vmatpush2.bf16.msra.mxu1 %v16343_v42  ;;  %v16168_v41 = vcombine.high %v1231_v22, %v1235_v27  ;;  %v16296_v42 = vcombine.high %v1359_v28, %v1363_v31  ;;  %v16159_v60 = vcombine.low %v1223_v36, %v1227_v45  ;;  %v1196_v22 = vld [vmem:[#allocation5 + $0x930] sm:$0xff] }
 0x1b0   : > { %2818 = vmatprep.subr.bf16.mxu0 %v16208_v46  ;;  %2871 = vmatprep.subr.bf16.mxu1 %v16336_v51  ;;  %v1351_v46 = vld [vmem:[#allocation5 + $0xe08] sm:$0xff]  ;;  %v1184_v31 = vld [vmem:[#allocation5 + $0x8d0] sm:$0xff] }
 0x1b1   : > { %v1355_v51 = vld [vmem:[#allocation5 + $0xe28] sm:$0xff] }
 0x1b2   : > { %v16287_v61 = vcombine.low %v1351_v46, %v1355_v51 }
 0x1b3   : > { %2819 = vmatpush2.bf16.msra.mxu0 %v16207_v55  ;;  %2872 = vmatpush2.bf16.msra.mxu1 %v16335_v56  ;;  %v16160_v55 = vcombine.high %v1223_v36, %v1227_v45  ;;  %v16288_v56 = vcombine.high %v1351_v46, %v1355_v51  ;;  %v1188_v36 = vld [vmem:[#allocation5 + $0x8f0] sm:$0xff]  ;;  %v16129_v45 = vcombine.low %v1192_v19, %v1196_v22 }
 0x1b4   : > { %2820 = vmatprep.subr.bf16.mxu0 %v16200_v58  ;;  %2873 = vmatprep.subr.bf16.mxu1 %v16328_v59  ;;  %v1344_v58 = vld [vmem:[#allocation5 + $0xdd0] sm:$0xff]  ;;  %v16121_v57 = vcombine.low %v1184_v31, %v1188_v36 }
 0x1b5   : > { %v1348_v59 = vld [vmem:[#allocation5 + $0xdf0] sm:$0xff] }
 0x1b6   : > { %v16281_v10 = vcombine.low %v1344_v58, %v1348_v59  ;;  %v1176_v51 = vld [vmem:[#allocation5 + $0x890] sm:$0xff] }
 0x1b7   : > { %2821 = vmatpush2.bf16.msra.mxu0 %v16199_v4  ;;  %2874 = vmatpush2.bf16.msra.mxu1 %v16327_v5  ;;  %v16282_v4 = vcombine.high %v1344_v58, %v1348_v59  ;;  %v1208_v5 = vld [vmem:[#allocation5 + $0x990] sm:$0xff] }
 0x1b8   : > { %2822 = vmatprep.subr.bf16.mxu0 %v16192_v7  ;;  %2875 = vmatprep.subr.bf16.mxu1 %v16320_v8  ;;  %v1336_v7 = vld [vmem:[#allocation5 + $0xd90] sm:$0xff]  ;;  %v16146_v11 = vcombine.high %v1208_v5, %v1212_v6  ;;  %v16145_v17 = vcombine.low %v1208_v5, %v1212_v6  ;;  %v16113_v6 = vcombine.low %v1176_v51, %v1180_v54 }
 0x1b9   : > { %v1340_v8 = vld [vmem:[#allocation5 + $0xdb0] sm:$0xff] }
 0x1ba   : > { %v16273_v18 = vcombine.low %v1336_v7, %v1340_v8  ;;  %v1168_v59 = vld [vmem:[#allocation5 + $0x850] sm:$0xff] }
 0x1bb   : > { %2823 = vmatpush2.bf16.msra.mxu0 %v16191_v12  ;;  %2876 = vmatpush2.bf16.msra.mxu1 %v16319_v13  ;;  %v16274_v12 = vcombine.high %v1336_v7, %v1340_v8  ;;  %v1200_v13 = vld [vmem:[#allocation5 + $0x950] sm:$0xff] }
 0x1bc   : > { %2824 = vmatprep.subr.bf16.mxu0 %v16184_v15  ;;  %2877 = vmatprep.subr.bf16.mxu1 %v16312_v16  ;;  %v1328_v15 = vld [vmem:[#allocation5 + $0xd50] sm:$0xff]  ;;  %v16137_v27 = vcombine.low %v1200_v13, %v1204_v14 }
 0x1bd   : > { %v1332_v16 = vld [vmem:[#allocation5 + $0xd70] sm:$0xff] }
 0x1be   : > { %v16265_v28 = vcombine.low %v1328_v15, %v1332_v16  ;;  %v1300_v5 = vld [vmem:[#allocation5 + $0xc70] sm:$0xff] }
 0x1bf   : > { %2825 = vmatpush2.bf16.msra.mxu0 %v16183_v20  ;;  %2878 = vmatpush2.bf16.msra.mxu1 %v16311_v21  ;;  %v16138_v20 = vcombine.high %v1200_v13, %v1204_v14  ;;  %v16266_v21 = vcombine.high %v1328_v15, %v1332_v16  ;;  %v1160_v8 = vld [vmem:[#allocation5 + $0x810] sm:$0xff] }
 0x1c0   : > { %2826 = vmatprep.subr.bf16.mxu0 %v16176_v25  ;;  %2879 = vmatprep.subr.bf16.mxu1 %v16304_v26  ;;  %v1320_v25 = vld [vmem:[#allocation5 + $0xd10] sm:$0xff] }
 0x1c1   : > { %v1324_v26 = vld [vmem:[#allocation5 + $0xd30] sm:$0xff] }
 0x1c2   : > { %v16257_v46 = vcombine.low %v1320_v25, %v1324_v26  ;;  %v1292_v13 = vld [vmem:[#allocation5 + $0xc30] sm:$0xff] }
 0x1c3   : > { %2827 = vmatpush2.bf16.msra.mxu0 %v16175_v32  ;;  %2880 = vmatpush2.bf16.msra.mxu1 %v16303_v35  ;;  %v16130_v32 = vcombine.high %v1192_v19, %v1196_v22  ;;  %v16258_v35 = vcombine.high %v1320_v25, %v1324_v26  ;;  %v1280_v16 = vld [vmem:[#allocation5 + $0xbd0] sm:$0xff] }
 0x1c4   : > { %2828 = vmatprep.subr.bf16.mxu0 %v16168_v41  ;;  %2881 = vmatprep.subr.bf16.mxu1 %v16296_v42  ;;  %v1312_v41 = vld [vmem:[#allocation5 + $0xcd0] sm:$0xff] }
 0x1c5   : > { %v1316_v42 = vld [vmem:[#allocation5 + $0xcf0] sm:$0xff] }
 0x1c6   : > { %v16249_v58 = vcombine.low %v1312_v41, %v1316_v42  ;;  %v1284_v19 = vld [vmem:[#allocation5 + $0xbf0] sm:$0xff] }
 0x1c7   : > { %2829 = vmatpush2.bf16.msra.mxu0 %v16167_v52  ;;  %2882 = vmatpush2.bf16.msra.mxu1 %v16295_v53  ;;  %v16122_v52 = vcombine.high %v1184_v31, %v1188_v36  ;;  %v16250_v53 = vcombine.high %v1312_v41, %v1316_v42  ;;  %v1272_v26 = vld [vmem:[#allocation5 + $0xb90] sm:$0xff]  ;;  %v16217_v36 = vcombine.low %v1280_v16, %v1284_v19 }
 0x1c8   : > { %2830 = vmatprep.subr.bf16.mxu0 %v16160_v55  ;;  %2883 = vmatprep.subr.bf16.mxu1 %v16288_v56  ;;  %v1304_v55 = vld [vmem:[#allocation5 + $0xc90] sm:$0xff] }
 0x1c9   : > { %v1308_v56 = vld [vmem:[#allocation5 + $0xcb0] sm:$0xff] }
 0x1ca   : > { %v16241_v7 = vcombine.low %v1304_v55, %v1308_v56  ;;  %v1276_v31 = vld [vmem:[#allocation5 + $0xbb0] sm:$0xff] }
 0x1cb   : > { %2831 = vmatpush2.bf16.msra.mxu0 %v16159_v60  ;;  %2884 = vmatpush2.bf16.msra.mxu1 %v16287_v61  ;;  %v16114_v60 = vcombine.high %v1176_v51, %v1180_v54  ;;  %v16242_v61 = vcombine.high %v1304_v55, %v1308_v56  ;;  %v1264_v42 = vld [vmem:[#allocation5 + $0xb50] sm:$0xff]  ;;  %v16209_v54 = vcombine.low %v1272_v26, %v1276_v31 }
 0x1cc   : > { %2906 = vmatprep.subr.bf16.mxu0 %v16154_v62  ;;  %2959 = vmatprep.subr.bf16.mxu1 %v16282_v4  ;;  %v1172_v62 = vld [vmem:[#allocation5 + $0x870] sm:$0xff] }
 0x1cd   : > { %v1296_v4 = vld [vmem:[#allocation5 + $0xc50] sm:$0xff]  ;;  %v16105_v14 = vcombine.low %v1168_v59, %v1172_v62 }
 0x1ce   : > { %2833 = vmatmul.mubr.bf16.vlgmr.msra.gmra.mxu0 %v20512_v2  ;;  %2886 = vmatmul.mubr.bf16.vlgmr.msra.gmra.mxu1 %v20514_v3  ;;  %v16233_v15 = vcombine.low %v1296_v4, %v1300_v5  ;;  %v1268_v51 = vld [vmem:[#allocation5 + $0xb70] sm:$0xff] }
 0x1cf   : > { %2842 = vmatprep.mubr.bf16.mxu0 %v20524_v29  ;;  %2895 = vmatprep.mubr.bf16.mxu1 %v20526_v30  ;;  %v1256_v56 = vld [vmem:[#allocation5 + $0xb10] sm:$0xff] }
 0x1d0   : > { %2907 = vmatpush1.bf16.msra.mxu0 %v16153_v9  ;;  %2960 = vmatpush1.bf16.msra.mxu1 %v16281_v10  ;;  %v16106_v9 = vcombine.high %v1168_v59, %v1172_v62  ;;  %v16234_v10 = vcombine.high %v1296_v4, %v1300_v5  ;;  %v1260_v59 = vld [vmem:[#allocation5 + $0xb30] sm:$0xff]  ;;  %v16201_v62 = vcombine.low %v1264_v42, %v1268_v51 }
 0x1d1   : > { %2908 = vmatprep.subr.bf16.mxu0 %v16146_v11  ;;  %2961 = vmatprep.subr.bf16.mxu1 %v16274_v12  ;;  %v1164_v11 = vld [vmem:[#allocation5 + $0x830] sm:$0xff] }
 0x1d2   : > { %v1288_v12 = vld [vmem:[#allocation5 + $0xc10] sm:$0xff]  ;;  %v16097_v22 = vcombine.low %v1160_v8, %v1164_v11 }
 0x1d3   : > { %v16225_v25 = vcombine.low %v1288_v12, %v1292_v13  ;;  %v1248_v5 = vld [vmem:[#allocation5 + $0xad0] sm:$0xff] }
 0x1d4   : > { %2909 = vmatpush1.bf16.msra.mxu0 %v16145_v17  ;;  %2962 = vmatpush1.bf16.msra.mxu1 %v16273_v18  ;;  %v16098_v17 = vcombine.high %v1160_v8, %v1164_v11  ;;  %v16226_v18 = vcombine.high %v1288_v12, %v1292_v13  ;;  %v1252_v8 = vld [vmem:[#allocation5 + $0xaf0] sm:$0xff]  ;;  %v16193_v11 = vcombine.low %v1256_v56, %v1260_v59 }
 0x1d5   : > { %2910 = vmatprep.subr.bf16.mxu0 %v16138_v20  ;;  %2963 = vmatprep.subr.bf16.mxu1 %v16266_v21  ;;  %v1408_v20 = vld [vmem:[#allocation5 + $0xfd0] sm:$0xff] }
 0x1d6   : > { %2843 = vmatmul.mubr.bf16.gmra.mxu0 %v20520_v23  ;;  %2896 = vmatmul.mubr.bf16.gmra.mxu1 %v20522_v24  ;;  %v1412_v21 = vld [vmem:[#allocation5 + $0xff0] sm:$0xff] }
 0x1d7   : > { %2938 = vmatprep.mubr.bf16.mxu0 %v20508_v63  ;;  %2991 = vmatprep.mubr.bf16.mxu1 %v20510_v1  ;;  %v16345_v41 = vcombine.low %v1408_v20, %v1412_v21  ;;  %v1240_v13 = vld [vmem:[#allocation5 + $0xa90] sm:$0xff] }
 0x1d8   : > { %2911 = vmatpush1.bf16.msra.mxu0 %v16137_v27  ;;  %2964 = vmatpush1.bf16.msra.mxu1 %v16265_v28  ;;  %v16218_v27 = vcombine.high %v1280_v16, %v1284_v19  ;;  %v16346_v28 = vcombine.high %v1408_v20, %v1412_v21  ;;  %v1244_v16 = vld [vmem:[#allocation5 + $0xab0] sm:$0xff]  ;;  %v16185_v19 = vcombine.low %v1248_v5, %v1252_v8 }
 0x1d9   : > { %2912 = vmatprep.subr.bf16.mxu0 %v16130_v32  ;;  %2965 = vmatprep.subr.bf16.mxu1 %v16258_v35  ;;  %v1400_v32 = vld [vmem:[#allocation5 + $0xf90] sm:$0xff] }
 0x1da   : > { %v1404_v35 = vld [vmem:[#allocation5 + $0xfb0] sm:$0xff] }
 0x1db   : > { %v16337_v55 = vcombine.low %v1400_v32, %v1404_v35  ;;  %v1232_v21 = vld [vmem:[#allocation5 + $0xa50] sm:$0xff] }
 0x1dc   : > { %2913 = vmatpush1.bf16.msra.mxu0 %v16129_v45  ;;  %2966 = vmatpush1.bf16.msra.mxu1 %v16257_v46  ;;  %v16210_v45 = vcombine.high %v1272_v26, %v1276_v31  ;;  %v16338_v46 = vcombine.high %v1400_v32, %v1404_v35  ;;  %v1236_v26 = vld [vmem:[#allocation5 + $0xa70] sm:$0xff]  ;;  %v16177_v31 = vcombine.low %v1240_v13, %v1244_v16 }
 0x1dd   : > { %2914 = vmatprep.subr.bf16.mxu0 %v16122_v52  ;;  %2967 = vmatprep.subr.bf16.mxu1 %v16250_v53  ;;  %v1392_v52 = vld [vmem:[#allocation5 + $0xf50] sm:$0xff] }
 0x1de   : > { %v1396_v53 = vld [vmem:[#allocation5 + $0xf70] sm:$0xff] }
 0x1df   : > { %v16329_v4 = vcombine.low %v1392_v52, %v1396_v53  ;;  %v1224_v35 = vld [vmem:[#allocation5 + $0xa10] sm:$0xff] }
 0x1e0   : > { %2915 = vmatpush1.bf16.msra.mxu0 %v16121_v57  ;;  %2968 = vmatpush1.bf16.msra.mxu1 %v16249_v58  ;;  %v16202_v57 = vcombine.high %v1264_v42, %v1268_v51  ;;  %v16330_v58 = vcombine.high %v1392_v52, %v1396_v53  ;;  %v1228_v42 = vld [vmem:[#allocation5 + $0xa30] sm:$0xff]  ;;  %v16169_v51 = vcombine.low %v1232_v21, %v1236_v26  ;;  %v1217_v53 = vld [vmem:[#allocation5 + $0x9d8] sm:$0xff] }
 0x1e1   : > { %2916 = vmatprep.subr.bf16.mxu0 %v16114_v60  ;;  %2969 = vmatprep.subr.bf16.mxu1 %v16242_v61  ;;  %v1384_v60 = vld [vmem:[#allocation5 + $0xf10] sm:$0xff] }
 0x1e2   : > { %v1388_v61 = vld [vmem:[#allocation5 + $0xf30] sm:$0xff] }
 0x1e3   : > { %v16321_v12 = vcombine.low %v1384_v60, %v1388_v61 }
 0x1e4   : > { %2917 = vmatpush1.bf16.msra.mxu0 %v16113_v6  ;;  %2970 = vmatpush1.bf16.msra.mxu1 %v16241_v7  ;;  %v16194_v6 = vcombine.high %v1256_v56, %v1260_v59  ;;  %v16322_v7 = vcombine.high %v1384_v60, %v1388_v61  ;;  %v1221_v56 = vld [vmem:[#allocation5 + $0x9f8] sm:$0xff]  ;;  %v16161_v59 = vcombine.low %v1224_v35, %v1228_v42 }
 0x1e5   : > { %2918 = vmatprep.subr.bf16.mxu0 %v16106_v9  ;;  %2971 = vmatprep.subr.bf16.mxu1 %v16234_v10  ;;  %v1376_v9 = vld [vmem:[#allocation5 + $0xed0] sm:$0xff]  ;;  %v16156_v61 = vcombine.high %v1217_v53, %v1221_v56 }
 0x1e6   : > { %v1380_v10 = vld [vmem:[#allocation5 + $0xef0] sm:$0xff] }
 0x1e7   : > { %v16313_v20 = vcombine.low %v1376_v9, %v1380_v10 }
 0x1e8   : > { %2919 = vmatpush1.bf16.msra.mxu0 %v16105_v14  ;;  %2972 = vmatpush1.bf16.msra.mxu1 %v16233_v15  ;;  %v16186_v14 = vcombine.high %v1248_v5, %v1252_v8  ;;  %v16314_v15 = vcombine.high %v1376_v9, %v1380_v10  ;;  %v1213_v5 = vld [vmem:[#allocation5 + $0x9b8] sm:$0xff]  ;;  %v16155_v8 = vcombine.low %v1217_v53, %v1221_v56 }
 0x1e9   : > { %2920 = vmatprep.subr.bf16.mxu0 %v16098_v17  ;;  %2973 = vmatprep.subr.bf16.mxu1 %v16226_v18  ;;  %v1368_v17 = vld [vmem:[#allocation5 + $0xe90] sm:$0xff]  ;;  %v1181_v53 = vld [vmem:[#allocation5 + $0x8b8] sm:$0xff] }
 0x1ea   : > { %v1372_v18 = vld [vmem:[#allocation5 + $0xeb0] sm:$0xff] }
 0x1eb   : > { %v16305_v32 = vcombine.low %v1368_v17, %v1372_v18 }
 0x1ec   : > { %2921 = vmatpush1.bf16.msra.mxu0 %v16097_v22  ;;  %2974 = vmatpush1.bf16.msra.mxu1 %v16225_v25  ;;  %v16178_v22 = vcombine.high %v1240_v13, %v1244_v16  ;;  %v16306_v25 = vcombine.high %v1368_v17, %v1372_v18  ;;  %v1205_v13 = vld [vmem:[#allocation5 + $0x978] sm:$0xff] }
 0x1ed   : > { %2922 = vmatprep.subr.bf16.mxu0 %v16218_v27  ;;  %2975 = vmatprep.subr.bf16.mxu1 %v16346_v28  ;;  %v1360_v27 = vld [vmem:[#allocation5 + $0xe50] sm:$0xff]  ;;  %v1193_v18 = vld [vmem:[#allocation5 + $0x918] sm:$0xff] }
 0x1ee   : > { %v1364_v28 = vld [vmem:[#allocation5 + $0xe70] sm:$0xff] }
 0x1ef   : > { %v16297_v52 = vcombine.low %v1360_v27, %v1364_v28 }
 0x1f0   : > { %2923 = vmatpush2.bf16.msra.mxu0 %v16217_v36  ;;  %2976 = vmatpush2.bf16.msra.mxu1 %v16345_v41  ;;  %v16170_v36 = vcombine.high %v1232_v21, %v1236_v26  ;;  %v16298_v41 = vcombine.high %v1360_v27, %v1364_v28  ;;  %v1197_v21 = vld [vmem:[#allocation5 + $0x938] sm:$0xff] }
 0x1f1   : > { %2924 = vmatprep.subr.bf16.mxu0 %v16210_v45  ;;  %2977 = vmatprep.subr.bf16.mxu1 %v16338_v46  ;;  %v1352_v45 = vld [vmem:[#allocation5 + $0xe10] sm:$0xff]  ;;  %v1185_v28 = vld [vmem:[#allocation5 + $0x8d8] sm:$0xff] }
 0x1f2   : > { %v1356_v46 = vld [vmem:[#allocation5 + $0xe30] sm:$0xff] }
 0x1f3   : > { %v16289_v60 = vcombine.low %v1352_v45, %v1356_v46 }
 0x1f4   : > { %2925 = vmatpush2.bf16.msra.mxu0 %v16209_v54  ;;  %2978 = vmatpush2.bf16.msra.mxu1 %v16337_v55  ;;  %v16162_v54 = vcombine.high %v1224_v35, %v1228_v42  ;;  %v16290_v55 = vcombine.high %v1352_v45, %v1356_v46  ;;  %v1189_v35 = vld [vmem:[#allocation5 + $0x8f8] sm:$0xff]  ;;  %v16131_v42 = vcombine.low %v1193_v18, %v1197_v21 }
 0x1f5   : > { %2926 = vmatprep.subr.bf16.mxu0 %v16202_v57  ;;  %2979 = vmatprep.subr.bf16.mxu1 %v16330_v58  ;;  %v1345_v57 = vld [vmem:[#allocation5 + $0xdd8] sm:$0xff]  ;;  %v16123_v56 = vcombine.low %v1185_v28, %v1189_v35 }
 0x1f6   : > { %v1349_v58 = vld [vmem:[#allocation5 + $0xdf8] sm:$0xff] }
 0x1f7   : > { %v16283_v9 = vcombine.low %v1345_v57, %v1349_v58  ;;  %v1177_v46 = vld [vmem:[#allocation5 + $0x898] sm:$0xff] }
 0x1f8   : > { %2927 = vmatpush2.bf16.msra.mxu0 %v16201_v62  ;;  %2980 = vmatpush2.bf16.msra.mxu1 %v16329_v4  ;;  %v16284_v62 = vcombine.high %v1345_v57, %v1349_v58  ;;  %v1209_v4 = vld [vmem:[#allocation5 + $0x998] sm:$0xff] }
 0x1f9   : > { %2928 = vmatprep.subr.bf16.mxu0 %v16194_v6  ;;  %2981 = vmatprep.subr.bf16.mxu1 %v16322_v7  ;;  %v1337_v6 = vld [vmem:[#allocation5 + $0xd98] sm:$0xff]  ;;  %v16148_v10 = vcombine.high %v1209_v4, %v1213_v5  ;;  %v16147_v16 = vcombine.low %v1209_v4, %v1213_v5 }
 0x1fa   : > { %v1341_v7 = vld [vmem:[#allocation5 + $0xdb8] sm:$0xff] }
 0x1fb   : > { %v16275_v17 = vcombine.low %v1337_v6, %v1341_v7  ;;  %v1169_v58 = vld [vmem:[#allocation5 + $0x858] sm:$0xff] }
 0x1fc   : > { %2929 = vmatpush2.bf16.msra.mxu0 %v16193_v11  ;;  %2982 = vmatpush2.bf16.msra.mxu1 %v16321_v12  ;;  %v16276_v11 = vcombine.high %v1337_v6, %v1341_v7  ;;  %v1201_v12 = vld [vmem:[#allocation5 + $0x958] sm:$0xff] }
 0x1fd   : > { %2930 = vmatprep.subr.bf16.mxu0 %v16186_v14  ;;  %2983 = vmatprep.subr.bf16.mxu1 %v16314_v15  ;;  %v1329_v14 = vld [vmem:[#allocation5 + $0xd58] sm:$0xff]  ;;  %v16139_v26 = vcombine.low %v1201_v12, %v1205_v13 }
 0x1fe   : > { %v1333_v15 = vld [vmem:[#allocation5 + $0xd78] sm:$0xff] }
 0x1ff   : > { %v16267_v27 = vcombine.low %v1329_v14, %v1333_v15  ;;  %v1161_v5 = vld [vmem:[#allocation5 + $0x818] sm:$0xff] }
 0x200   : > { %2931 = vmatpush2.bf16.msra.mxu0 %v16185_v19  ;;  %2984 = vmatpush2.bf16.msra.mxu1 %v16313_v20  ;;  %v16140_v19 = vcombine.high %v1201_v12, %v1205_v13  ;;  %v16268_v20 = vcombine.high %v1329_v14, %v1333_v15  ;;  %v1281_v13 = vld [vmem:[#allocation5 + $0xbd8] sm:$0xff] }
 0x201   : > { %2932 = vmatprep.subr.bf16.mxu0 %v16178_v22  ;;  %2985 = vmatprep.subr.bf16.mxu1 %v16306_v25  ;;  %v1321_v22 = vld [vmem:[#allocation5 + $0xd18] sm:$0xff] }
 0x202   : > { %v1325_v25 = vld [vmem:[#allocation5 + $0xd38] sm:$0xff] }
 0x203   : > { %v16259_v45 = vcombine.low %v1321_v22, %v1325_v25 }
 0x204   : > { %2933 = vmatpush2.bf16.msra.mxu0 %v16177_v31  ;;  %2986 = vmatpush2.bf16.msra.mxu1 %v16305_v32  ;;  %v16132_v31 = vcombine.high %v1193_v18, %v1197_v21  ;;  %v16260_v32 = vcombine.high %v1321_v22, %v1325_v25  ;;  %v1413_v18 = vld [vmem:[#allocation5 + $0xff8] sm:$0xff] }
 0x205   : > { %2934 = vmatprep.subr.bf16.mxu0 %v16170_v36  ;;  %2987 = vmatprep.subr.bf16.mxu1 %v16298_v41  ;;  %v1313_v36 = vld [vmem:[#allocation5 + $0xcd8] sm:$0xff] }
 0x206   : > { %v1317_v41 = vld [vmem:[#allocation5 + $0xcf8] sm:$0xff] }
 0x207   : > { %v16251_v57 = vcombine.low %v1313_v36, %v1317_v41  ;;  %v1273_v21 = vld [vmem:[#allocation5 + $0xb98] sm:$0xff] }
 0x208   : > { %2935 = vmatpush2.bf16.msra.mxu0 %v16169_v51  ;;  %2988 = vmatpush2.bf16.msra.mxu1 %v16297_v52  ;;  %v16124_v51 = vcombine.high %v1185_v28, %v1189_v35  ;;  %v16252_v52 = vcombine.high %v1313_v36, %v1317_v41  ;;  %v1405_v28 = vld [vmem:[#allocation5 + $0xfb8] sm:$0xff] }
 0x209   : > { %2936 = vmatprep.subr.bf16.mxu0 %v16162_v54  ;;  %2989 = vmatprep.subr.bf16.mxu1 %v16290_v55  ;;  %v1305_v54 = vld [vmem:[#allocation5 + $0xc98] sm:$0xff] }
 0x20a   : > { %v1309_v55 = vld [vmem:[#allocation5 + $0xcb8] sm:$0xff] }
 0x20b   : > { %v16243_v4 = vcombine.low %v1305_v54, %v1309_v55  ;;  %v1265_v35 = vld [vmem:[#allocation5 + $0xb58] sm:$0xff] }
 0x20c   : > { %2937 = vmatpush2.bf16.msra.mxu0 %v16161_v59  ;;  %2990 = vmatpush2.bf16.msra.mxu1 %v16289_v60  ;;  %v1173_v59 = vld [vmem:[#allocation5 + $0x878] sm:$0xff] }
 0x20d   : > { %3012 = vmatprep.subr.bf16.mxu0 %v16156_v61  ;;  %3065 = vmatprep.subr.bf16.mxu1 %v16284_v62  ;;  %v1297_v60 = vld [vmem:[#allocation5 + $0xc58] sm:$0xff]  ;;  %v16115_v62 = vcombine.low %v1177_v46, %v1181_v53  ;;  %v16108_v6 = vcombine.high %v1169_v58, %v1173_v59 }
 0x20e   : > { %v1301_v61 = vld [vmem:[#allocation5 + $0xc78] sm:$0xff] }
 0x20f   : > { %2939 = vmatmul.mubr.bf16.vlgmr.msra.gmra.mxu0 %v20512_v2  ;;  %2992 = vmatmul.mubr.bf16.vlgmr.msra.gmra.mxu1 %v20514_v3  ;;  %v16236_v7 = vcombine.high %v1297_v60, %v1301_v61  ;;  %v16235_v12 = vcombine.low %v1297_v60, %v1301_v61 }
 0x210   : > { %2948 = vmatprep.mubr.bf16.mxu0 %v20524_v29  ;;  %3001 = vmatprep.mubr.bf16.mxu1 %v20526_v30 }
 0x211   : > { %3013 = vmatpush1.bf16.msra.mxu0 %v16155_v8  ;;  %3066 = vmatpush1.bf16.msra.mxu1 %v16283_v9  ;;  %v1165_v8 = vld [vmem:[#allocation5 + $0x838] sm:$0xff] }
 0x212   : > { %3014 = vmatprep.subr.bf16.mxu0 %v16148_v10  ;;  %3067 = vmatprep.subr.bf16.mxu1 %v16276_v11  ;;  %v1289_v9 = vld [vmem:[#allocation5 + $0xc18] sm:$0xff]  ;;  %v16107_v11 = vcombine.low %v1169_v58, %v1173_v59  ;;  %v16100_v14 = vcombine.high %v1161_v5, %v1165_v8 }
 0x213   : > { %v1293_v10 = vld [vmem:[#allocation5 + $0xc38] sm:$0xff] }
 0x214   : > { %v16228_v15 = vcombine.high %v1289_v9, %v1293_v10  ;;  %v1389_v58 = vld [vmem:[#allocation5 + $0xf38] sm:$0xff] }
 0x215   : > { %3015 = vmatpush1.bf16.msra.mxu0 %v16147_v16  ;;  %3068 = vmatpush1.bf16.msra.mxu1 %v16275_v17  ;;  %v1285_v16 = vld [vmem:[#allocation5 + $0xbf8] sm:$0xff] }
 0x216   : > { %3016 = vmatprep.subr.bf16.mxu0 %v16140_v19  ;;  %3069 = vmatprep.subr.bf16.mxu1 %v16268_v20  ;;  %v1409_v17 = vld [vmem:[#allocation5 + $0xfd8] sm:$0xff]  ;;  %v16099_v19 = vcombine.low %v1161_v5, %v1165_v8  ;;  %v16227_v20 = vcombine.low %v1289_v9, %v1293_v10  ;;  %v16220_v22 = vcombine.high %v1281_v13, %v1285_v16 }
 0x217   : > { %2949 = vmatmul.mubr.bf16.gmra.mxu0 %v20520_v23  ;;  %3002 = vmatmul.mubr.bf16.gmra.mxu1 %v20522_v24  ;;  %v16348_v25 = vcombine.high %v1409_v17, %v1413_v18  ;;  %v1249_v59 = vld [vmem:[#allocation5 + $0xad8] sm:$0xff] }
 0x218   : > { %3044 = vmatprep.mubr.bf16.mxu0 %v20508_v63  ;;  %3097 = vmatprep.mubr.bf16.mxu1 %v20510_v1  ;;  %v16116_v63 = vcombine.high %v1177_v46, %v1181_v53  ;;  %v16244_v1 = vcombine.high %v1305_v54, %v1309_v55  ;;  %v1397_v46 = vld [vmem:[#allocation5 + $0xf78] sm:$0xff] }
 0x219   : > { %3017 = vmatpush1.bf16.msra.mxu0 %v16139_v26  ;;  %3070 = vmatpush1.bf16.msra.mxu1 %v16267_v27  ;;  %v1277_v26 = vld [vmem:[#allocation5 + $0xbb8] sm:$0xff] }
 0x21a   : > { %3018 = vmatprep.subr.bf16.mxu0 %v16132_v31  ;;  %3071 = vmatprep.subr.bf16.mxu1 %v16260_v32  ;;  %v1401_v27 = vld [vmem:[#allocation5 + $0xf98] sm:$0xff]  ;;  %v16219_v31 = vcombine.low %v1281_v13, %v1285_v16  ;;  %v16347_v32 = vcombine.low %v1409_v17, %v1413_v18  ;;  %v16212_v36 = vcombine.high %v1273_v21, %v1277_v26 }
 0x21b   : > { %v16340_v41 = vcombine.high %v1401_v27, %v1405_v28  ;;  %v1257_v53 = vld [vmem:[#allocation5 + $0xb18] sm:$0xff] }
 0x21c   : > { %v1381_v5 = vld [vmem:[#allocation5 + $0xef8] sm:$0xff] }
 0x21d   : > { %3019 = vmatpush1.bf16.msra.mxu0 %v16131_v42  ;;  %3072 = vmatpush1.bf16.msra.mxu1 %v16259_v45  ;;  %v1269_v42 = vld [vmem:[#allocation5 + $0xb78] sm:$0xff] }
 0x21e   : > { %3020 = vmatprep.subr.bf16.mxu0 %v16124_v51  ;;  %3073 = vmatprep.subr.bf16.mxu1 %v16252_v52  ;;  %v1393_v45 = vld [vmem:[#allocation5 + $0xf58] sm:$0xff]  ;;  %v16211_v51 = vcombine.low %v1273_v21, %v1277_v26  ;;  %v16339_v52 = vcombine.low %v1401_v27, %v1405_v28  ;;  %v16204_v54 = vcombine.high %v1265_v35, %v1269_v42 }
 0x21f   : > { %v16332_v55 = vcombine.high %v1393_v45, %v1397_v46  ;;  %v1241_v8 = vld [vmem:[#allocation5 + $0xa98] sm:$0xff] }
 0x220   : > { %v1373_v13 = vld [vmem:[#allocation5 + $0xeb8] sm:$0xff] }
 0x221   : > { %3021 = vmatpush1.bf16.msra.mxu0 %v16123_v56  ;;  %3074 = vmatpush1.bf16.msra.mxu1 %v16251_v57  ;;  %v1261_v56 = vld [vmem:[#allocation5 + $0xb38] sm:$0xff] }
 0x222   : > { %3022 = vmatprep.subr.bf16.mxu0 %v16116_v63  ;;  %3075 = vmatprep.subr.bf16.mxu1 %v16244_v1  ;;  %v1385_v57 = vld [vmem:[#allocation5 + $0xf18] sm:$0xff]  ;;  %v16203_v63 = vcombine.low %v1265_v35, %v1269_v42  ;;  %v16331_v1 = vcombine.low %v1393_v45, %v1397_v46  ;;  %v16196_v60 = vcombine.high %v1257_v53, %v1261_v56  ;;  %v822_v42 = vld [vmem:[#allocation5 + $0x1c0] sm:$0xff] }
 0x223   : > { %v16324_v61 = vcombine.high %v1385_v57, %v1389_v58  ;;  %v1233_v16 = vld [vmem:[#allocation5 + $0xa58] sm:$0xff] }
 0x224   : > { %v1365_v21 = vld [vmem:[#allocation5 + $0xe78] sm:$0xff] }
 0x225   : > { %3023 = vmatpush1.bf16.msra.mxu0 %v16115_v62  ;;  %3076 = vmatpush1.bf16.msra.mxu1 %v16243_v4  ;;  %v1253_v62 = vld [vmem:[#allocation5 + $0xaf8] sm:$0xff] }
 0x226   : > { %3024 = vmatprep.subr.bf16.mxu0 %v16108_v6  ;;  %3077 = vmatprep.subr.bf16.mxu1 %v16236_v7  ;;  %v1377_v4 = vld [vmem:[#allocation5 + $0xed8] sm:$0xff]  ;;  %v16195_v6 = vcombine.low %v1257_v53, %v1261_v56  ;;  %v16323_v7 = vcombine.low %v1385_v57, %v1389_v58  ;;  %v16188_v9 = vcombine.high %v1249_v59, %v1253_v62  ;;  %v954_v53 = vld [vmem:[#allocation5 + $0x5e0] sm:$0xff] }
 0x227   : > { %v16316_v10 = vcombine.high %v1377_v4, %v1381_v5  ;;  %v1225_v26 = vld [vmem:[#allocation5 + $0xa18] sm:$0xff]  ;;  %v814_v58 = vld [vmem:[#allocation5 + $0x180] sm:$0xff] }
 0x228   : > { %v1357_v35 = vld [vmem:[#allocation5 + $0xe38] sm:$0xff] }
 0x229   : > { %3025 = vmatpush1.bf16.msra.mxu0 %v16107_v11  ;;  %3078 = vmatpush1.bf16.msra.mxu1 %v16235_v12  ;;  %v1245_v11 = vld [vmem:[#allocation5 + $0xab8] sm:$0xff] }
 0x22a   : > { %3026 = vmatprep.subr.bf16.mxu0 %v16100_v14  ;;  %3079 = vmatprep.subr.bf16.mxu1 %v16228_v15  ;;  %v1369_v12 = vld [vmem:[#allocation5 + $0xe98] sm:$0xff]  ;;  %v16187_v14 = vcombine.low %v1249_v59, %v1253_v62  ;;  %v16315_v15 = vcombine.low %v1377_v4, %v1381_v5  ;;  %v16180_v17 = vcombine.high %v1241_v8, %v1245_v11  ;;  %v946_v59 = vld [vmem:[#allocation5 + $0x5a0] sm:$0xff] }
 0x22b   : > { %v16308_v18 = vcombine.high %v1369_v12, %v1373_v13 }
 0x22d   : > { %3027 = vmatpush1.bf16.msra.mxu0 %v16099_v19  ;;  %3080 = vmatpush1.bf16.msra.mxu1 %v16227_v20  ;;  %v1237_v19 = vld [vmem:[#allocation5 + $0xa78] sm:$0xff] }
 0x22e   : > { %3028 = vmatprep.subr.bf16.mxu0 %v16220_v22  ;;  %3081 = vmatprep.subr.bf16.mxu1 %v16348_v25  ;;  %v1361_v20 = vld [vmem:[#allocation5 + $0xe58] sm:$0xff]  ;;  %v16179_v22 = vcombine.low %v1241_v8, %v1245_v11  ;;  %v16307_v25 = vcombine.low %v1369_v12, %v1373_v13  ;;  %v16172_v27 = vcombine.high %v1233_v16, %v1237_v19  ;;  %v806_v8 = vld [vmem:[#allocation5 + $0x140] sm:$0xff] }
 0x22f   : > { %v16300_v28 = vcombine.high %v1361_v20, %v1365_v21  ;;  %v938_v13 = vld [vmem:[#allocation5 + $0x560] sm:$0xff] }
 0x231   : > { %3029 = vmatpush2.bf16.msra.mxu0 %v16219_v31  ;;  %3082 = vmatpush2.bf16.msra.mxu1 %v16347_v32  ;;  %v1229_v31 = vld [vmem:[#allocation5 + $0xa38] sm:$0xff] }
 0x232   : > { %3030 = vmatprep.subr.bf16.mxu0 %v16212_v36  ;;  %3083 = vmatprep.subr.bf16.mxu1 %v16340_v41  ;;  %v1353_v32 = vld [vmem:[#allocation5 + $0xe18] sm:$0xff]  ;;  %v16171_v36 = vcombine.low %v1233_v16, %v1237_v19  ;;  %v16299_v41 = vcombine.low %v1361_v20, %v1365_v21  ;;  %v16164_v45 = vcombine.high %v1225_v26, %v1229_v31  ;;  %v798_v19 = vld [vmem:[#allocation5 + $0x100] sm:$0xff] }
 0x233   : > { %v16292_v46 = vcombine.high %v1353_v32, %v1357_v35 }
 0x235   : > { %3031 = vmatpush2.bf16.msra.mxu0 %v16211_v51  ;;  %3084 = vmatpush2.bf16.msra.mxu1 %v16339_v52  ;;  %v826_v51 = vld [vmem:[#allocation5 + $0x1e0] sm:$0xff] }
 0x236   : > { %3032 = vmatprep.subr.bf16.mxu0 %v16204_v54  ;;  %3085 = vmatprep.subr.bf16.mxu1 %v16332_v55  ;;  %v950_v52 = vld [vmem:[#allocation5 + $0x5c0] sm:$0xff]  ;;  %v16163_v54 = vcombine.low %v1225_v26, %v1229_v31  ;;  %v16291_v55 = vcombine.low %v1353_v32, %v1357_v35  ;;  %v16406_v56 = vcombine.high %v822_v42, %v826_v51 }
 0x237   : > { %v16534_v57 = vcombine.high %v950_v52, %v954_v53  ;;  %v20566_v26 = vpack.c.bf16 %v20492_v39, %v20484_v33  ;;  %v790_v32 = vld [vmem:[#allocation5 + $0xc0] sm:$0xff] }
 0x238   : > { %v794_v33 = vld [vmem:[#allocation5 + $0xe0] sm:$0xff] }
 0x239   : > { %3033 = vmatpush2.bf16.msra.mxu0 %v16203_v63  ;;  %3086 = vmatpush2.bf16.msra.mxu1 %v16331_v1  ;;  %v818_v63 = vld [vmem:[#allocation5 + $0x1a0] sm:$0xff] }
 0x23a   : > { %3034 = vmatprep.subr.bf16.mxu0 %v16196_v60  ;;  %3087 = vmatprep.subr.bf16.mxu1 %v16324_v61  ;;  %v942_v1 = vld [vmem:[#allocation5 + $0x580] sm:$0xff]  ;;  %v16405_v60 = vcombine.low %v822_v42, %v826_v51  ;;  %v16533_v61 = vcombine.low %v950_v52, %v954_v53 }
 0x23b   : > { %v16525_v16 = vcombine.low %v942_v1, %v946_v59  ;;  %v922_v39 = vld [vmem:[#allocation5 + $0x4e0] sm:$0xff] }
 0x23d   : > { %3035 = vmatpush2.bf16.msra.mxu0 %v16195_v6  ;;  %3088 = vmatpush2.bf16.msra.mxu1 %v16323_v7  ;;  %v16398_v6 = vcombine.high %v814_v58, %v818_v63  ;;  %v16526_v7 = vcombine.high %v942_v1, %v946_v59  ;;  %v914_v1 = vld [vmem:[#allocation5 + $0x4a0] sm:$0xff]  ;;  %v16373_v59 = vcombine.low %v790_v32, %v794_v33 }
 0x23e   : > { %3036 = vmatprep.subr.bf16.mxu0 %v16188_v9  ;;  %3089 = vmatprep.subr.bf16.mxu1 %v16316_v10  ;;  %v810_v9 = vld [vmem:[#allocation5 + $0x160] sm:$0xff] }
 0x23f   : > { %v934_v10 = vld [vmem:[#allocation5 + $0x540] sm:$0xff] }
 0x240   : > { %v16518_v20 = vcombine.high %v934_v10, %v938_v13  ;;  %v16517_v31 = vcombine.low %v934_v10, %v938_v13 }
 0x241   : > { %3037 = vmatpush2.bf16.msra.mxu0 %v16187_v14  ;;  %3090 = vmatpush2.bf16.msra.mxu1 %v16315_v15  ;;  %v16397_v15 = vcombine.low %v814_v58, %v818_v63  ;;  %v786_v58 = vld [vmem:[#allocation5 + $0xa0] sm:$0xff] }
 0x242   : > { %3038 = vmatprep.subr.bf16.mxu0 %v16180_v17  ;;  %3091 = vmatprep.subr.bf16.mxu1 %v16308_v18  ;;  %v910_v63 = vld [vmem:[#allocation5 + $0x480] sm:$0xff] }
 0x243   : > { %v16493_v10 = vcombine.low %v910_v63, %v914_v1 }
 0x245   : > { %3039 = vmatpush2.bf16.msra.mxu0 %v16179_v22  ;;  %3092 = vmatpush2.bf16.msra.mxu1 %v16307_v25  ;;  %v926_v22 = vld [vmem:[#allocation5 + $0x500] sm:$0xff] }
 0x246   : > { %3040 = vmatprep.subr.bf16.mxu0 %v16172_v27  ;;  %3093 = vmatprep.subr.bf16.mxu1 %v16300_v28  ;;  %v930_v25 = vld [vmem:[#allocation5 + $0x520] sm:$0xff]  ;;  %v20570_v27 = vpack.c.bf16 %v20494_v40, %v20486_v34  ;;  %v16389_v28 = vcombine.low %v806_v8, %v810_v9 }
 0x247   : > { %v16510_v42 = vcombine.high %v926_v22, %v930_v25  ;;  %v918_v34 = vld [vmem:[#allocation5 + $0x4c0] sm:$0xff]  ;;  %v16509_v53 = vcombine.low %v926_v22, %v930_v25 }
 0x248   : > { %v890_v22 = vld [vmem:[#allocation5 + $0x3e0] sm:$0xff] }
 0x249   : > { %3041 = vmatpush2.bf16.msra.mxu0 %v16171_v36  ;;  %3094 = vmatpush2.bf16.msra.mxu1 %v16299_v41  ;;  %v1014_v25 = vld [vmem:[#allocation5 + $0x7c0] sm:$0xff] }
 0x24a   : > { %3042 = vmatprep.subr.bf16.mxu0 %v16164_v45  ;;  %3095 = vmatprep.subr.bf16.mxu1 %v16292_v46 }
 0x24d   : > { %3043 = vmatpush2.bf16.msra.mxu0 %v16163_v54  ;;  %3096 = vmatpush2.bf16.msra.mxu1 %v16291_v55  ;;  %v782_v54 = vld [vmem:[#allocation5 + $0x80] sm:$0xff] }
 0x24e   : > { %4398 = vmatprep.subr.bf16.mxu0 %v16406_v56  ;;  %4451 = vmatprep.subr.bf16.mxu1 %v16534_v57  ;;  %v2728_v62 = vpop.f32.mrf.mxu0  ;;  %v2781_v4 = vpop.f32.mrf.mxu1  ;;  %v16502_v56 = vcombine.high %v918_v34, %v922_v39 }
 0x24f   : > { %v20550_v5 = vadd.f32 %v2781_v4, %v2728_v62  ;;  %v16366_v62 = vcombine.high %v782_v54, %v786_v58  ;;  %v16494_v4 = vcombine.high %v910_v63, %v914_v1 }
 0x250   : > { %3045 = vmatmul.mubr.bf16.vlgmr.msra.gmra.mxu0 %v20512_v2  ;;  %3098 = vmatmul.mubr.bf16.vlgmr.msra.gmra.mxu1 %v20514_v3  ;;  %v2730_v11 = vpop.f32.mrf.mxu0  ;;  %v2783_v12 = vpop.f32.mrf.mxu1  ;;  %v16390_v3 = vcombine.high %v806_v8, %v810_v9  ;;  %v906_v8 = vld [vmem:[#allocation5 + $0x460] sm:$0xff]  ;;  %v16365_v9 = vcombine.low %v782_v54, %v786_v58 }
 0x251   : > { %3054 = vmatprep.mubr.bf16.mxu0 %v20524_v29  ;;  %3107 = vmatprep.mubr.bf16.mxu1 %v20526_v30  ;;  %v20556_v14 = vadd.f32 %v2783_v12, %v2730_v11  ;;  %v802_v30 = vld [vmem:[#allocation5 + $0x120] sm:$0xff] }
 0x252   : > { %4399 = vmatpush1.bf16.msra.mxu0 %v16405_v60  ;;  %4452 = vmatpush1.bf16.msra.mxu1 %v16533_v61  ;;  %v2732_v17 = vpop.f32.mrf.mxu0  ;;  %v2785_v18 = vpop.f32.mrf.mxu1  ;;  %v16382_v41 = vcombine.high %v798_v19, %v802_v30  ;;  %v16381_v52 = vcombine.low %v798_v19, %v802_v30  ;;  %v16501_v60 = vcombine.low %v918_v34, %v922_v39  ;;  %v774_v61 = vld [vmem:[#allocation5 + $0x40] sm:$0xff] }
 0x253   : > { %4400 = vmatprep.subr.bf16.mxu0 %v16398_v6  ;;  %4453 = vmatprep.subr.bf16.mxu1 %v16526_v7  ;;  %v20558_v2 = vadd.f32 %v2785_v18, %v2732_v17  ;;  %v778_v6 = vld [vmem:[#allocation5 + $0x60] sm:$0xff] }
 0x254   : > { %v20560_v21 = vpop.f32.mrf.mxu0  ;;  %v20562_v29 = vpop.f32.mrf.mxu1  ;;  %v902_v7 = vld [vmem:[#allocation5 + $0x440] sm:$0xff]  ;;  %v16358_v12 = vcombine.high %v774_v61, %v778_v6  ;;  %v16357_v18 = vcombine.low %v774_v61, %v778_v6 }
 0x255   : > { %v766_v11 = vld [vmem:[#allocation5] sm:$0xff]  ;;  %v16486_v13 = vcombine.high %v902_v7, %v906_v8  ;;  %v16485_v19 = vcombine.low %v902_v7, %v906_v8 }
 0x256   : > { %4401 = vmatpush1.bf16.msra.mxu0 %v16397_v15  ;;  %4454 = vmatpush1.bf16.msra.mxu1 %v16525_v16  ;;  %v2738_v35 = vpop.f32.mrf.mxu0  ;;  %v2791_v36 = vpop.f32.mrf.mxu1  ;;  %v770_v15 = vld [vmem:[#allocation5 + $0x20] sm:$0xff] }
 0x257   : > { %4402 = vmatprep.subr.bf16.mxu0 %v16390_v3  ;;  %4455 = vmatprep.subr.bf16.mxu1 %v16518_v20  ;;  %v20572_v45 = vadd.f32 %v2791_v36, %v2738_v35  ;;  %v894_v16 = vld [vmem:[#allocation5 + $0x400] sm:$0xff]  ;;  %v16350_v20 = vcombine.high %v766_v11, %v770_v15 }
 0x258   : > { %3055 = vmatmul.mubr.bf16.gmra.mxu0 %v20520_v23  ;;  %3108 = vmatmul.mubr.bf16.gmra.mxu1 %v20522_v24  ;;  %v2740_v40 = vpop.f32.mrf.mxu0  ;;  %v2793_v46 = vpop.f32.mrf.mxu1  ;;  %v16374_v24 = vcombine.high %v790_v32, %v794_v33  ;;  %v898_v17 = vld [vmem:[#allocation5 + $0x420] sm:$0xff] }
 0x259   : > { %4430 = vmatprep.mubr.bf16.mxu0 %v20566_v26  ;;  %4483 = vmatprep.mubr.bf16.mxu1 %v20570_v27  ;;  %v20578_v51 = vadd.f32 %v2793_v46, %v2740_v40  ;;  %v886_v3 = vld [vmem:[#allocation5 + $0x3c0] sm:$0xff]  ;;  %v16478_v30 = vcombine.high %v894_v16, %v898_v17  ;;  %v16477_v32 = vcombine.low %v894_v16, %v898_v17 }
 0x25a   : > { %4403 = vmatpush1.bf16.msra.mxu0 %v16389_v28  ;;  %4456 = vmatpush1.bf16.msra.mxu1 %v16517_v31  ;;  %v2742_v55 = vpop.f32.mrf.mxu0  ;;  %v2795_v23 = vpop.f32.mrf.mxu1  ;;  %v1018_v28 = vld [vmem:[#allocation5 + $0x7e0] sm:$0xff]  ;;  %v16349_v31 = vcombine.low %v766_v11, %v770_v15  ;;  %v16470_v36 = vcombine.high %v886_v3, %v890_v22  ;;  %v16469_v39 = vcombine.low %v886_v3, %v890_v22 }
 0x25b   : > { %4404 = vmatprep.subr.bf16.mxu0 %v16382_v41  ;;  %4457 = vmatprep.subr.bf16.mxu1 %v16510_v42  ;;  %v20580_v57 = vadd.f32 %v2795_v23, %v2742_v55  ;;  %v878_v35 = vld [vmem:[#allocation5 + $0x380] sm:$0xff]  ;;  %v16598_v41 = vcombine.high %v1014_v25, %v1018_v28  ;;  %v16597_v40 = vcombine.low %v1014_v25, %v1018_v28 }
 0x25c   : > { %v882_v42 = vld [vmem:[#allocation5 + $0x3a0] sm:$0xff] }
 0x25d   : > { %v1006_v33 = vld [vmem:[#allocation5 + $0x780] sm:$0xff] }
 0x25e   : > { %4405 = vmatpush1.bf16.msra.mxu0 %v16381_v52  ;;  %4458 = vmatpush1.bf16.msra.mxu1 %v16509_v53  ;;  %v1010_v34 = vld [vmem:[#allocation5 + $0x7a0] sm:$0xff]  ;;  %v16462_v52 = vcombine.high %v878_v35, %v882_v42 }
 0x25f   : > { %4406 = vmatprep.subr.bf16.mxu0 %v16374_v24  ;;  %4459 = vmatprep.subr.bf16.mxu1 %v16502_v56  ;;  %v870_v46 = vld [vmem:[#allocation5 + $0x340] sm:$0xff]  ;;  %v16590_v53 = vcombine.high %v1006_v33, %v1010_v34  ;;  %v16461_v24 = vcombine.low %v878_v35, %v882_v42  ;;  %v16589_v56 = vcombine.low %v1006_v33, %v1010_v34 }
 0x260   : > { %v874_v54 = vld [vmem:[#allocation5 + $0x360] sm:$0xff] }
 0x261   : > { %v998_v55 = vld [vmem:[#allocation5 + $0x740] sm:$0xff]  ;;  %v16454_v63 = vcombine.high %v870_v46, %v874_v54 }
 0x262   : > { %4407 = vmatpush1.bf16.msra.mxu0 %v16373_v59  ;;  %4460 = vmatpush1.bf16.msra.mxu1 %v16501_v60  ;;  %v1002_v23 = vld [vmem:[#allocation5 + $0x760] sm:$0xff] }
 0x263   : > { %4408 = vmatprep.subr.bf16.mxu0 %v16366_v62  ;;  %4461 = vmatprep.subr.bf16.mxu1 %v16494_v4  ;;  %v862_v58 = vld [vmem:[#allocation5 + $0x300] sm:$0xff]  ;;  %v16582_v1 = vcombine.high %v998_v55, %v1002_v23  ;;  %v16453_v62 = vcombine.low %v870_v46, %v874_v54  ;;  %v16581_v4 = vcombine.low %v998_v55, %v1002_v23  ;;  %v823_v23 = vld [vmem:[#allocation5 + $0x1c8] sm:$0xff] }
 0x264   : > { %v866_v59 = vld [vmem:[#allocation5 + $0x320] sm:$0xff] }
 0x265   : > { %v990_v60 = vld [vmem:[#allocation5 + $0x700] sm:$0xff]  ;;  %v16446_v7 = vcombine.high %v862_v58, %v866_v59 }
 0x266   : > { %4409 = vmatpush1.bf16.msra.mxu0 %v16365_v9  ;;  %4462 = vmatpush1.bf16.msra.mxu1 %v16493_v10  ;;  %v994_v61 = vld [vmem:[#allocation5 + $0x720] sm:$0xff] }
 0x267   : > { %4410 = vmatprep.subr.bf16.mxu0 %v16358_v12  ;;  %4463 = vmatprep.subr.bf16.mxu1 %v16486_v13  ;;  %v854_v6 = vld [vmem:[#allocation5 + $0x2c0] sm:$0xff]  ;;  %v16574_v8 = vcombine.high %v990_v60, %v994_v61  ;;  %v16445_v12 = vcombine.low %v862_v58, %v866_v59  ;;  %v16573_v13 = vcombine.low %v990_v60, %v994_v61  ;;  %v955_v58 = vld [vmem:[#allocation5 + $0x5e8] sm:$0xff]  ;;  %v20582_v61 = vpop.f32.mrf.mxu0 }
 0x268   : > { %v858_v9 = vld [vmem:[#allocation5 + $0x2e0] sm:$0xff] }
 0x269   : > { %v982_v10 = vld [vmem:[#allocation5 + $0x6c0] sm:$0xff]  ;;  %v16438_v16 = vcombine.high %v854_v6, %v858_v9 }
 0x26a   : > { %4411 = vmatpush1.bf16.msra.mxu0 %v16357_v18  ;;  %4464 = vmatpush1.bf16.msra.mxu1 %v16485_v19  ;;  %v986_v11 = vld [vmem:[#allocation5 + $0x6e0] sm:$0xff] }
 0x26b   : > { %4412 = vmatprep.subr.bf16.mxu0 %v16350_v20  ;;  %4465 = vmatprep.subr.bf16.mxu1 %v16478_v30  ;;  %v846_v15 = vld [vmem:[#allocation5 + $0x280] sm:$0xff]  ;;  %v16566_v17 = vcombine.high %v982_v10, %v986_v11  ;;  %v16437_v20 = vcombine.low %v854_v6, %v858_v9  ;;  %v16565_v30 = vcombine.low %v982_v10, %v986_v11  ;;  %v819_v6 = vld [vmem:[#allocation5 + $0x1a8] sm:$0xff] }
 0x26c   : > { %v850_v18 = vld [vmem:[#allocation5 + $0x2a0] sm:$0xff] }
 0x26d   : > { %v974_v19 = vld [vmem:[#allocation5 + $0x680] sm:$0xff]  ;;  %v16430_v25 = vcombine.high %v846_v15, %v850_v18 }
 0x26e   : > { %4413 = vmatpush1.bf16.msra.mxu0 %v16349_v31  ;;  %4466 = vmatpush1.bf16.msra.mxu1 %v16477_v32  ;;  %v978_v3 = vld [vmem:[#allocation5 + $0x6a0] sm:$0xff] }
 0x26f   : > { %4414 = vmatprep.subr.bf16.mxu0 %v16470_v36  ;;  %4467 = vmatprep.subr.bf16.mxu1 %v16598_v41  ;;  %v838_v22 = vld [vmem:[#allocation5 + $0x240] sm:$0xff]  ;;  %v16558_v28 = vcombine.high %v974_v19, %v978_v3  ;;  %v16429_v36 = vcombine.low %v846_v15, %v850_v18  ;;  %v16557_v41 = vcombine.low %v974_v19, %v978_v3 }
 0x270   : > { %v842_v31 = vld [vmem:[#allocation5 + $0x260] sm:$0xff]  ;;  %v20590_v15 = vpack.c.bf16 %v20504_v49, %v20496_v43 }
 0x271   : > { %v966_v32 = vld [vmem:[#allocation5 + $0x640] sm:$0xff]  ;;  %v16422_v33 = vcombine.high %v838_v22, %v842_v31 }
 0x272   : > { %4415 = vmatpush2.bf16.msra.mxu0 %v16469_v39  ;;  %4468 = vmatpush2.bf16.msra.mxu1 %v16597_v40  ;;  %v970_v35 = vld [vmem:[#allocation5 + $0x660] sm:$0xff] }
 0x273   : > { %4416 = vmatprep.subr.bf16.mxu0 %v16462_v52  ;;  %4469 = vmatprep.subr.bf16.mxu1 %v16590_v53  ;;  %v830_v42 = vld [vmem:[#allocation5 + $0x200] sm:$0xff]  ;;  %v16550_v34 = vcombine.high %v966_v32, %v970_v35  ;;  %v16421_v52 = vcombine.low %v838_v22, %v842_v31  ;;  %v16549_v53 = vcombine.low %v966_v32, %v970_v35  ;;  %v811_v22 = vld [vmem:[#allocation5 + $0x168] sm:$0xff] }
 0x274   : > { %v834_v39 = vld [vmem:[#allocation5 + $0x220] sm:$0xff] }
 0x275   : > { %v958_v40 = vld [vmem:[#allocation5 + $0x600] sm:$0xff]  ;;  %v16414_v54 = vcombine.high %v830_v42, %v834_v39 }
 0x276   : > { %4417 = vmatpush2.bf16.msra.mxu0 %v16461_v24  ;;  %4470 = vmatpush2.bf16.msra.mxu1 %v16589_v56  ;;  %v962_v46 = vld [vmem:[#allocation5 + $0x620] sm:$0xff]  ;;  %v827_v24 = vld [vmem:[#allocation5 + $0x1e8] sm:$0xff] }
 0x277   : > { %4418 = vmatprep.subr.bf16.mxu0 %v16454_v63  ;;  %4471 = vmatprep.subr.bf16.mxu1 %v16582_v1  ;;  %v16542_v55 = vcombine.high %v958_v40, %v962_v46  ;;  %v951_v56 = vld [vmem:[#allocation5 + $0x5c8] sm:$0xff]  ;;  %v16413_v63 = vcombine.low %v830_v42, %v834_v39  ;;  %v16541_v1 = vcombine.low %v958_v40, %v962_v46 }
 0x278   : > { %v16408_v59 = vcombine.high %v823_v23, %v827_v24  ;;  %v16536_v60 = vcombine.high %v951_v56, %v955_v58  ;;  %v799_v42 = vld [vmem:[#allocation5 + $0x108] sm:$0xff] }
 0x279   : > { %v931_v39 = vld [vmem:[#allocation5 + $0x528] sm:$0xff] }
 0x27a   : > { %4419 = vmatpush2.bf16.msra.mxu0 %v16453_v62  ;;  %4472 = vmatpush2.bf16.msra.mxu1 %v16581_v4  ;;  %v20584_v62 = vpop.f32.mrf.mxu1  ;;  %v815_v4 = vld [vmem:[#allocation5 + $0x188] sm:$0xff] }
 0x27b   : > { %4420 = vmatprep.subr.bf16.mxu0 %v16446_v7  ;;  %4473 = vmatprep.subr.bf16.mxu1 %v16574_v8  ;;  %v943_v7 = vld [vmem:[#allocation5 + $0x588] sm:$0xff]  ;;  %v16400_v19 = vcombine.high %v815_v4, %v819_v6 }
 0x27c   : > { %v947_v8 = vld [vmem:[#allocation5 + $0x5a8] sm:$0xff] }
 0x27d   : > { %v16528_v3 = vcombine.high %v943_v7, %v947_v8  ;;  %v16527_v31 = vcombine.low %v943_v7, %v947_v8 }
 0x27e   : > { %4421 = vmatpush2.bf16.msra.mxu0 %v16445_v12  ;;  %4474 = vmatpush2.bf16.msra.mxu1 %v16573_v13  ;;  %v16407_v12 = vcombine.low %v823_v23, %v827_v24  ;;  %v16535_v13 = vcombine.low %v951_v56, %v955_v58  ;;  %v791_v58 = vld [vmem:[#allocation5 + $0xc8] sm:$0xff] }
 0x27f   : > { %4422 = vmatprep.subr.bf16.mxu0 %v16438_v16  ;;  %4475 = vmatprep.subr.bf16.mxu1 %v16566_v17  ;;  %v20594_v16 = vpack.c.bf16 %v20506_v50, %v20498_v44  ;;  %v16399_v50 = vcombine.low %v815_v4, %v819_v6 }
 0x282   : > { %4423 = vmatpush2.bf16.msra.mxu0 %v16437_v20  ;;  %4476 = vmatpush2.bf16.msra.mxu1 %v16565_v30  ;;  %v807_v20 = vld [vmem:[#allocation5 + $0x148] sm:$0xff] }
 0x283   : > { %4424 = vmatprep.subr.bf16.mxu0 %v16430_v25  ;;  %4477 = vmatprep.subr.bf16.mxu1 %v16558_v28  ;;  %v935_v25 = vld [vmem:[#allocation5 + $0x548] sm:$0xff] }
 0x284   : > { %v939_v28 = vld [vmem:[#allocation5 + $0x568] sm:$0xff] }
 0x286   : > { %4425 = vmatpush2.bf16.msra.mxu0 %v16429_v36  ;;  %4478 = vmatpush2.bf16.msra.mxu1 %v16557_v41  ;;  %v16392_v36 = vcombine.high %v807_v20, %v811_v22  ;;  %v16520_v41 = vcombine.high %v935_v25, %v939_v28 }
 0x287   : > { %4426 = vmatprep.subr.bf16.mxu0 %v16422_v33  ;;  %4479 = vmatprep.subr.bf16.mxu1 %v16550_v34  ;;  %v803_v33 = vld [vmem:[#allocation5 + $0x128] sm:$0xff] }
 0x288   : > { %v927_v34 = vld [vmem:[#allocation5 + $0x508] sm:$0xff]  ;;  %v16384_v24 = vcombine.high %v799_v42, %v803_v33  ;;  %v16383_v8 = vcombine.low %v799_v42, %v803_v33 }
 0x289   : > { %v16512_v56 = vcombine.high %v927_v34, %v931_v39  ;;  %v767_v33 = vld [vmem:[#allocation5 + $0x8] sm:$0xff] }
 0x28a   : > { %4427 = vmatpush2.bf16.msra.mxu0 %v16421_v52  ;;  %4480 = vmatpush2.bf16.msra.mxu1 %v16549_v53  ;;  %v16391_v53 = vcombine.low %v807_v20, %v811_v22 }
 0x28b   : > { %4428 = vmatprep.subr.bf16.mxu0 %v16414_v54  ;;  %4481 = vmatprep.subr.bf16.mxu1 %v16542_v55  ;;  %v16519_v54 = vcombine.low %v935_v25, %v939_v28  ;;  %v775_v28 = vld [vmem:[#allocation5 + $0x48] sm:$0xff] }
 0x28e   : > { %4429 = vmatpush2.bf16.msra.mxu0 %v16413_v63  ;;  %4482 = vmatpush2.bf16.msra.mxu1 %v16541_v1  ;;  %v2834_v9 = vpop.f32.mrf.mxu0  ;;  %v2887_v10 = vpop.f32.mrf.mxu1  ;;  %v795_v1 = vld [vmem:[#allocation5 + $0xe8] sm:$0xff] }
 0x28f   : > { %v20586_v11 = vadd.f32 %v2887_v10, %v2834_v9  ;;  %4504 = vmatprep.subr.bf16.mxu0 %v16408_v59  ;;  %4557 = vmatprep.subr.bf16.mxu1 %v16536_v60  ;;  %v919_v59 = vld [vmem:[#allocation5 + $0x4c8] sm:$0xff]  ;;  %v16511_v9 = vcombine.low %v927_v34, %v931_v39  ;;  %v16376_v10 = vcombine.high %v791_v58, %v795_v1 }
 0x290   : > { %v2836_v17 = vpop.f32.mrf.mxu0  ;;  %v2889_v18 = vpop.f32.mrf.mxu1  ;;  %v923_v60 = vld [vmem:[#allocation5 + $0x4e8] sm:$0xff] }
 0x291   : > { %4431 = vmatmul.mubr.bf16.vlgmr.msra.gmra.mxu0 %v20488_v37  ;;  %4484 = vmatmul.mubr.bf16.vlgmr.msra.gmra.mxu1 %v20490_v38  ;;  %v20598_v30 = vadd.f32 %v2889_v18, %v2836_v17  ;;  %v787_v17 = vld [vmem:[#allocation5 + $0xa8] sm:$0xff]  ;;  %v16503_v20 = vcombine.low %v919_v59, %v923_v60 }
 0x292   : > { %4440 = vmatprep.mubr.bf16.mxu0 %v20590_v15  ;;  %4493 = vmatprep.mubr.bf16.mxu1 %v20594_v16  ;;  %v2838_v43 = vpop.f32.mrf.mxu0  ;;  %v2891_v44 = vpop.f32.mrf.mxu1  ;;  %v911_v18 = vld [vmem:[#allocation5 + $0x488] sm:$0xff] }
 0x293   : > { %4505 = vmatpush1.bf16.msra.mxu0 %v16407_v12  ;;  %4558 = vmatpush1.bf16.msra.mxu1 %v16535_v13  ;;  %v20602_v49 = vadd.f32 %v2891_v44, %v2838_v43  ;;  %v16504_v12 = vcombine.high %v919_v59, %v923_v60  ;;  %v783_v13 = vld [vmem:[#allocation5 + $0x88] sm:$0xff] }
 0x294   : > { %4506 = vmatprep.subr.bf16.mxu0 %v16400_v19  ;;  %4559 = vmatprep.subr.bf16.mxu1 %v16528_v3  ;;  %v20604_v32 = vpop.f32.mrf.mxu0  ;;  %v20606_v35 = vpop.f32.mrf.mxu1  ;;  %v915_v19 = vld [vmem:[#allocation5 + $0x4a8] sm:$0xff]  ;;  %v16375_v3 = vcombine.low %v791_v58, %v795_v1  ;;  %v16368_v22 = vcombine.high %v783_v13, %v787_v17 }
 0x295   : > { %v16496_v25 = vcombine.high %v911_v18, %v915_v19  ;;  %v779_v43 = vld [vmem:[#allocation5 + $0x68] sm:$0xff] }
 0x296   : > { %v2844_v40 = vpop.f32.mrf.mxu0  ;;  %v2897_v46 = vpop.f32.mrf.mxu1  ;;  %v903_v44 = vld [vmem:[#allocation5 + $0x448] sm:$0xff] }
 0x297   : > { %4507 = vmatpush1.bf16.msra.mxu0 %v16399_v50  ;;  %4560 = vmatpush1.bf16.msra.mxu1 %v16527_v31  ;;  %v20608_v52 = vadd.f32 %v2897_v46, %v2844_v40  ;;  %v907_v50 = vld [vmem:[#allocation5 + $0x468] sm:$0xff]  ;;  %v16367_v31 = vcombine.low %v783_v13, %v787_v17  ;;  %v16359_v46 = vcombine.low %v775_v28, %v779_v43 }
 0x298   : > { %4508 = vmatprep.subr.bf16.mxu0 %v16392_v36  ;;  %4561 = vmatprep.subr.bf16.mxu1 %v16520_v41  ;;  %v2846_v55 = vpop.f32.mrf.mxu0  ;;  %v2899_v23 = vpop.f32.mrf.mxu1  ;;  %v16495_v36 = vcombine.low %v911_v18, %v915_v19  ;;  %v16360_v41 = vcombine.high %v775_v28, %v779_v43  ;;  %v16488_v42 = vcombine.high %v903_v44, %v907_v50  ;;  %v771_v34 = vld [vmem:[#allocation5 + $0x28] sm:$0xff] }
 0x299   : > { %4441 = vmatmul.mubr.bf16.gmra.mxu0 %v20500_v47  ;;  %4494 = vmatmul.mubr.bf16.gmra.mxu1 %v20502_v48  ;;  %v20612_v63 = vadd.f32 %v2899_v23, %v2846_v55  ;;  %v895_v39 = vld [vmem:[#allocation5 + $0x408] sm:$0xff]  ;;  %v16351_v1 = vcombine.low %v767_v33, %v771_v34 }
 0x29a   : > { %4536 = vmatprep.mubr.bf16.mxu0 %v20566_v26  ;;  %4589 = vmatprep.mubr.bf16.mxu1 %v20570_v27  ;;  %v2848_v4 = vpop.f32.mrf.mxu0  ;;  %v2901_v6 = vpop.f32.mrf.mxu1  ;;  %v899_v40 = vld [vmem:[#allocation5 + $0x428] sm:$0xff] }
 0x29b   : > { %4509 = vmatpush1.bf16.msra.mxu0 %v16391_v53  ;;  %4562 = vmatpush1.bf16.msra.mxu1 %v16519_v54  ;;  %v20616_v7 = vadd.f32 %v2901_v6, %v2848_v4  ;;  %v16487_v53 = vcombine.low %v903_v44, %v907_v50  ;;  %v16352_v54 = vcombine.high %v767_v33, %v771_v34  ;;  %v887_v23 = vld [vmem:[#allocation5 + $0x3c8] sm:$0xff] }
 0x29c   : > { %4510 = vmatprep.subr.bf16.mxu0 %v16384_v24  ;;  %4563 = vmatprep.subr.bf16.mxu1 %v16512_v56  ;;  %v16480_v55 = vcombine.high %v895_v39, %v899_v40  ;;  %v891_v24 = vld [vmem:[#allocation5 + $0x3e8] sm:$0xff]  ;;  %v16479_v59 = vcombine.low %v895_v39, %v899_v40 }
 0x29d   : > { %v1015_v56 = vld [vmem:[#allocation5 + $0x7c8] sm:$0xff]  ;;  %v16472_v60 = vcombine.high %v887_v23, %v891_v24 }
 0x29e   : > { %v1019_v58 = vld [vmem:[#allocation5 + $0x7e8] sm:$0xff] }
 0x29f   : > { %4511 = vmatpush1.bf16.msra.mxu0 %v16383_v8  ;;  %4564 = vmatpush1.bf16.msra.mxu1 %v16511_v9  ;;  %v16600_v4 = vcombine.high %v1015_v56, %v1019_v58  ;;  %v879_v6 = vld [vmem:[#allocation5 + $0x388] sm:$0xff]  ;;  %v16599_v13 = vcombine.low %v1015_v56, %v1019_v58 }
 0x2a0   : > { %4512 = vmatprep.subr.bf16.mxu0 %v16376_v10  ;;  %4565 = vmatprep.subr.bf16.mxu1 %v16504_v12  ;;  %v883_v8 = vld [vmem:[#allocation5 + $0x3a8] sm:$0xff]  ;;  %v16471_v12 = vcombine.low %v887_v23, %v891_v24 }
 0x2a1   : > { %v1007_v9 = vld [vmem:[#allocation5 + $0x788] sm:$0xff]  ;;  %v16464_v17 = vcombine.high %v879_v6, %v883_v8 }
 0x2a2   : > { %v1011_v10 = vld [vmem:[#allocation5 + $0x7a8] sm:$0xff] }
 0x2a3   : > { %4513 = vmatpush1.bf16.msra.mxu0 %v16375_v3  ;;  %4566 = vmatpush1.bf16.msra.mxu1 %v16503_v20  ;;  %v16592_v18 = vcombine.high %v1007_v9, %v1011_v10  ;;  %v871_v19 = vld [vmem:[#allocation5 + $0x348] sm:$0xff]  ;;  %v16591_v28 = vcombine.low %v1007_v9, %v1011_v10 }
 0x2a4   : > { %4514 = vmatprep.subr.bf16.mxu0 %v16368_v22  ;;  %4567 = vmatprep.subr.bf16.mxu1 %v16496_v25  ;;  %v875_v3 = vld [vmem:[#allocation5 + $0x368] sm:$0xff]  ;;  %v16463_v25 = vcombine.low %v879_v6, %v883_v8 }
 0x2a5   : > { %v999_v20 = vld [vmem:[#allocation5 + $0x748] sm:$0xff]  ;;  %v16456_v43 = vcombine.high %v871_v19, %v875_v3 }
 0x2a6   : > { %v1003_v22 = vld [vmem:[#allocation5 + $0x768] sm:$0xff] }
 0x2a7   : > { %4515 = vmatpush1.bf16.msra.mxu0 %v16367_v31  ;;  %4568 = vmatpush1.bf16.msra.mxu1 %v16495_v36  ;;  %v16584_v44 = vcombine.high %v999_v20, %v1003_v22  ;;  %v863_v50 = vld [vmem:[#allocation5 + $0x308] sm:$0xff]  ;;  %v16583_v33 = vcombine.low %v999_v20, %v1003_v22 }
 0x2a8   : > { %4516 = vmatprep.subr.bf16.mxu0 %v16360_v41  ;;  %4569 = vmatprep.subr.bf16.mxu1 %v16488_v42  ;;  %v867_v31 = vld [vmem:[#allocation5 + $0x328] sm:$0xff]  ;;  %v16455_v42 = vcombine.low %v871_v19, %v875_v3 }
 0x2a9   : > { %v991_v36 = vld [vmem:[#allocation5 + $0x708] sm:$0xff]  ;;  %v16448_v34 = vcombine.high %v863_v50, %v867_v31 }
 0x2aa   : > { %v995_v41 = vld [vmem:[#allocation5 + $0x728] sm:$0xff] }
 0x2ab   : > { %4517 = vmatpush1.bf16.msra.mxu0 %v16359_v46  ;;  %4570 = vmatpush1.bf16.msra.mxu1 %v16487_v53  ;;  %v16576_v39 = vcombine.high %v991_v36, %v995_v41  ;;  %v855_v40 = vld [vmem:[#allocation5 + $0x2c8] sm:$0xff]  ;;  %v16575_v23 = vcombine.low %v991_v36, %v995_v41  ;;  %v824_v41 = vld [vmem:[#allocation5 + $0x1d0] sm:$0xff] }
 0x2ac   : > { %4518 = vmatprep.subr.bf16.mxu0 %v16352_v54  ;;  %4571 = vmatprep.subr.bf16.mxu1 %v16480_v55  ;;  %v859_v46 = vld [vmem:[#allocation5 + $0x2e8] sm:$0xff]  ;;  %v16447_v55 = vcombine.low %v863_v50, %v867_v31 }
 0x2ad   : > { %v983_v53 = vld [vmem:[#allocation5 + $0x6c8] sm:$0xff]  ;;  %v16440_v24 = vcombine.high %v855_v40, %v859_v46 }
 0x2ae   : > { %v987_v54 = vld [vmem:[#allocation5 + $0x6e8] sm:$0xff] }
 0x2af   : > { %4519 = vmatpush1.bf16.msra.mxu0 %v16351_v1  ;;  %4572 = vmatpush1.bf16.msra.mxu1 %v16479_v59  ;;  %v16568_v56 = vcombine.high %v983_v53, %v987_v54  ;;  %v847_v58 = vld [vmem:[#allocation5 + $0x288] sm:$0xff]  ;;  %v16567_v6 = vcombine.low %v983_v53, %v987_v54  ;;  %v20618_v54 = vpop.f32.mrf.mxu0 }
 0x2b0   : > { %4520 = vmatprep.subr.bf16.mxu0 %v16472_v60  ;;  %4573 = vmatprep.subr.bf16.mxu1 %v16600_v4  ;;  %v851_v1 = vld [vmem:[#allocation5 + $0x2a8] sm:$0xff]  ;;  %v16439_v4 = vcombine.low %v855_v40, %v859_v46 }
 0x2b1   : > { %v975_v59 = vld [vmem:[#allocation5 + $0x688] sm:$0xff]  ;;  %v16432_v8 = vcombine.high %v847_v58, %v851_v1 }
 0x2b2   : > { %v979_v60 = vld [vmem:[#allocation5 + $0x6a8] sm:$0xff] }
 0x2b3   : > { %4521 = vmatpush2.bf16.msra.mxu0 %v16471_v12  ;;  %4574 = vmatpush2.bf16.msra.mxu1 %v16599_v13  ;;  %v16560_v9 = vcombine.high %v975_v59, %v979_v60  ;;  %v839_v10 = vld [vmem:[#allocation5 + $0x248] sm:$0xff]  ;;  %v16559_v19 = vcombine.low %v975_v59, %v979_v60 }
 0x2b4   : > { %4522 = vmatprep.subr.bf16.mxu0 %v16464_v17  ;;  %4575 = vmatprep.subr.bf16.mxu1 %v16592_v18  ;;  %v843_v12 = vld [vmem:[#allocation5 + $0x268] sm:$0xff]  ;;  %v16431_v18 = vcombine.low %v847_v58, %v851_v1  ;;  %v948_v58 = vld [vmem:[#allocation5 + $0x5b0] sm:$0xff] }
 0x2b5   : > { %v967_v13 = vld [vmem:[#allocation5 + $0x648] sm:$0xff]  ;;  %v16424_v3 = vcombine.high %v839_v10, %v843_v12 }
 0x2b6   : > { %v971_v17 = vld [vmem:[#allocation5 + $0x668] sm:$0xff] }
 0x2b7   : > { %4523 = vmatpush2.bf16.msra.mxu0 %v16463_v25  ;;  %4576 = vmatpush2.bf16.msra.mxu1 %v16591_v28  ;;  %v16552_v20 = vcombine.high %v967_v13, %v971_v17  ;;  %v831_v22 = vld [vmem:[#allocation5 + $0x208] sm:$0xff]  ;;  %v16551_v50 = vcombine.low %v967_v13, %v971_v17  ;;  %v808_v13 = vld [vmem:[#allocation5 + $0x150] sm:$0xff] }
 0x2b8   : > { %4524 = vmatprep.subr.bf16.mxu0 %v16456_v43  ;;  %4577 = vmatprep.subr.bf16.mxu1 %v16584_v44  ;;  %v835_v25 = vld [vmem:[#allocation5 + $0x228] sm:$0xff]  ;;  %v16423_v44 = vcombine.low %v839_v10, %v843_v12 }
 0x2b9   : > { %v959_v28 = vld [vmem:[#allocation5 + $0x608] sm:$0xff]  ;;  %v16416_v31 = vcombine.high %v831_v22, %v835_v25 }
 0x2ba   : > { %v963_v43 = vld [vmem:[#allocation5 + $0x628] sm:$0xff] }
 0x2bb   : > { %4525 = vmatpush2.bf16.msra.mxu0 %v16455_v42  ;;  %4578 = vmatpush2.bf16.msra.mxu1 %v16583_v33  ;;  %v16544_v36 = vcombine.high %v959_v28, %v963_v43  ;;  %v828_v42 = vld [vmem:[#allocation5 + $0x1f0] sm:$0xff]  ;;  %v16543_v40 = vcombine.low %v959_v28, %v963_v43 }
 0x2bc   : > { %4526 = vmatprep.subr.bf16.mxu0 %v16448_v34  ;;  %4579 = vmatprep.subr.bf16.mxu1 %v16576_v39  ;;  %v952_v33 = vld [vmem:[#allocation5 + $0x5d0] sm:$0xff]  ;;  %v16415_v39 = vcombine.low %v831_v22, %v835_v25  ;;  %v16410_v46 = vcombine.high %v824_v41, %v828_v42 }
 0x2bd   : > { %v956_v34 = vld [vmem:[#allocation5 + $0x5f0] sm:$0xff] }
 0x2be   : > { %v16538_v53 = vcombine.high %v952_v33, %v956_v34 }
 0x2bf   : > { %4527 = vmatpush2.bf16.msra.mxu0 %v16447_v55  ;;  %4580 = vmatpush2.bf16.msra.mxu1 %v16575_v23  ;;  %v20620_v55 = vpop.f32.mrf.mxu1  ;;  %v816_v23 = vld [vmem:[#allocation5 + $0x190] sm:$0xff] }
 0x2c0   : > { %4528 = vmatprep.subr.bf16.mxu0 %v16440_v24  ;;  %4581 = vmatprep.subr.bf16.mxu1 %v16568_v56  ;;  %v820_v24 = vld [vmem:[#allocation5 + $0x1b0] sm:$0xff] }
 0x2c1   : > { %v944_v56 = vld [vmem:[#allocation5 + $0x590] sm:$0xff]  ;;  %v16402_v10 = vcombine.high %v816_v23, %v820_v24  ;;  %v16401_v28 = vcombine.low %v816_v23, %v820_v24 }
 0x2c2   : > { %v16530_v12 = vcombine.high %v944_v56, %v948_v58  ;;  %v16529_v43 = vcombine.low %v944_v56, %v948_v58 }
 0x2c3   : > { %4529 = vmatpush2.bf16.msra.mxu0 %v16439_v4  ;;  %4582 = vmatpush2.bf16.msra.mxu1 %v16567_v6  ;;  %v16409_v4 = vcombine.low %v824_v41, %v828_v42  ;;  %v16537_v6 = vcombine.low %v952_v33, %v956_v34  ;;  %v800_v41 = vld [vmem:[#allocation5 + $0x110] sm:$0xff] }
 0x2c4   : > { %4530 = vmatprep.subr.bf16.mxu0 %v16432_v8  ;;  %4583 = vmatprep.subr.bf16.mxu1 %v16560_v9  ;;  %v804_v42 = vld [vmem:[#allocation5 + $0x130] sm:$0xff] }
 0x2c5   : > { %v928_v33 = vld [vmem:[#allocation5 + $0x510] sm:$0xff]  ;;  %v16386_v58 = vcombine.high %v800_v41, %v804_v42 }
 0x2c6   : > { %v932_v34 = vld [vmem:[#allocation5 + $0x530] sm:$0xff] }
 0x2c7   : > { %4531 = vmatpush2.bf16.msra.mxu0 %v16431_v18  ;;  %4584 = vmatpush2.bf16.msra.mxu1 %v16559_v19  ;;  %v812_v18 = vld [vmem:[#allocation5 + $0x170] sm:$0xff] }
 0x2c8   : > { %4532 = vmatprep.subr.bf16.mxu0 %v16424_v3  ;;  %4585 = vmatprep.subr.bf16.mxu1 %v16552_v20  ;;  %v936_v19 = vld [vmem:[#allocation5 + $0x550] sm:$0xff] }
 0x2c9   : > { %v940_v3 = vld [vmem:[#allocation5 + $0x570] sm:$0xff] }
 0x2ca   : > { %v16521_v23 = vcombine.low %v936_v19, %v940_v3 }
 0x2cb   : > { %4533 = vmatpush2.bf16.msra.mxu0 %v16423_v44  ;;  %4586 = vmatpush2.bf16.msra.mxu1 %v16551_v50 }
 0x2cc   : > { %4534 = vmatprep.subr.bf16.mxu0 %v16416_v31  ;;  %4587 = vmatprep.subr.bf16.mxu1 %v16544_v36  ;;  %v16394_v31 = vcombine.high %v808_v13, %v812_v18  ;;  %v16522_v36 = vcombine.high %v936_v19, %v940_v3  ;;  %v16513_v19 = vcombine.low %v928_v33, %v932_v34 }
 0x2cf   : > { %4535 = vmatpush2.bf16.msra.mxu0 %v16415_v39  ;;  %4588 = vmatpush2.bf16.msra.mxu1 %v16543_v40  ;;  %v2940_v1 = vpop.f32.mrf.mxu0  ;;  %v2993_v59 = vpop.f32.mrf.mxu1 }
 0x2d0   : > { %v20622_v60 = vadd.f32 %v2993_v59, %v2940_v1  ;;  %4610 = vmatprep.subr.bf16.mxu0 %v16410_v46  ;;  %4663 = vmatprep.subr.bf16.mxu1 %v16538_v53  ;;  %v16393_v53 = vcombine.low %v808_v13, %v812_v18  ;;  %v16514_v1 = vcombine.high %v928_v33, %v932_v34  ;;  %v792_v59 = vld [vmem:[#allocation5 + $0xd0] sm:$0xff] }
 0x2d1   : > { %v2942_v8 = vpop.f32.mrf.mxu0  ;;  %v2995_v9 = vpop.f32.mrf.mxu1  ;;  %v16385_v18 = vcombine.low %v800_v41, %v804_v42  ;;  %v904_v41 = vld [vmem:[#allocation5 + $0x450] sm:$0xff] }
 0x2d2   : > { %4537 = vmatmul.mubr.bf16.vlgmr.msra.gmra.mxu0 %v20488_v37  ;;  %4590 = vmatmul.mubr.bf16.vlgmr.msra.gmra.mxu1 %v20490_v38  ;;  %v20626_v17 = vadd.f32 %v2995_v9, %v2942_v8  ;;  %v920_v8 = vld [vmem:[#allocation5 + $0x4d0] sm:$0xff] }
 0x2d3   : > { %4546 = vmatprep.mubr.bf16.mxu0 %v20590_v15  ;;  %4599 = vmatprep.mubr.bf16.mxu1 %v20594_v16  ;;  %v2944_v20 = vpop.f32.mrf.mxu0  ;;  %v2997_v22 = vpop.f32.mrf.mxu1  ;;  %v924_v9 = vld [vmem:[#allocation5 + $0x4f0] sm:$0xff] }
 0x2d4   : > { %4611 = vmatpush1.bf16.msra.mxu0 %v16409_v4  ;;  %4664 = vmatpush1.bf16.msra.mxu1 %v16537_v6  ;;  %v20630_v25 = vadd.f32 %v2997_v22, %v2944_v20  ;;  %v796_v6 = vld [vmem:[#allocation5 + $0xf0] sm:$0xff]  ;;  %v16506_v20 = vcombine.high %v920_v8, %v924_v9 }
 0x2d5   : > { %4612 = vmatprep.subr.bf16.mxu0 %v16402_v10  ;;  %4665 = vmatprep.subr.bf16.mxu1 %v16530_v12  ;;  %v20632_v44 = vpop.f32.mrf.mxu0  ;;  %v20634_v50 = vpop.f32.mrf.mxu1  ;;  %v16378_v3 = vcombine.high %v792_v59, %v796_v6  ;;  %v784_v22 = vld [vmem:[#allocation5 + $0x90] sm:$0xff] }
 0x2d6   : > { %22860 = vst [vmem:[#allocation29_spill] sm:$0xff] %v20632_v44  ;;  %22861 = vst [vmem:[#allocation30_spill] sm:$0xff] %v20634_v50  ;;  %v908_v42 = vld [vmem:[#allocation5 + $0x470] sm:$0xff] }
 0x2d7   : > { %v2950_v39 = vpop.f32.mrf.mxu0  ;;  %v3003_v40 = vpop.f32.mrf.mxu1 }
 0x2d8   : > { %4613 = vmatpush1.bf16.msra.mxu0 %v16401_v28  ;;  %4666 = vmatpush1.bf16.msra.mxu1 %v16529_v43  ;;  %v20636_v46 = vadd.f32 %v3003_v40, %v2950_v39  ;;  %v788_v28 = vld [vmem:[#allocation5 + $0xb0] sm:$0xff]  ;;  %v16505_v39 = vcombine.low %v920_v8, %v924_v9  ;;  %v16489_v9 = vcombine.low %v904_v41, %v908_v42 }
 0x2d9   : > { %4614 = vmatprep.subr.bf16.mxu0 %v16394_v31  ;;  %4667 = vmatprep.subr.bf16.mxu1 %v16522_v36  ;;  %v2952_v24 = vpop.f32.mrf.mxu0  ;;  %v3005_v56 = vpop.f32.mrf.mxu1  ;;  %v912_v43 = vld [vmem:[#allocation5 + $0x490] sm:$0xff]  ;;  %v16377_v36 = vcombine.low %v792_v59, %v796_v6  ;;  %v16370_v40 = vcombine.high %v784_v22, %v788_v28  ;;  %v16369_v33 = vcombine.low %v784_v22, %v788_v28 }
 0x2da   : > { %4547 = vmatmul.mubr.bf16.gmra.mxu0 %v20500_v47  ;;  %4600 = vmatmul.mubr.bf16.gmra.mxu1 %v20502_v48  ;;  %v20640_v4 = vadd.f32 %v3005_v56, %v2952_v24  ;;  %v916_v31 = vld [vmem:[#allocation5 + $0x4b0] sm:$0xff] }
 0x2db   : > { %4642 = vmatprep.mubr.bf16.mxu0 %v20566_v26  ;;  %4695 = vmatprep.mubr.bf16.mxu1 %v20570_v27  ;;  %v2954_v10 = vpop.f32.mrf.mxu0  ;;  %v3007_v12 = vpop.f32.mrf.mxu1  ;;  %v780_v24 = vld [vmem:[#allocation5 + $0x70] sm:$0xff]  ;;  %v16497_v34 = vcombine.low %v912_v43, %v916_v31 }
 0x2dc   : > { %4615 = vmatpush1.bf16.msra.mxu0 %v16393_v53  ;;  %4668 = vmatpush1.bf16.msra.mxu1 %v16521_v23  ;;  %v20644_v13 = vadd.f32 %v3007_v12, %v2954_v10  ;;  %v16498_v53 = vcombine.high %v912_v43, %v916_v31  ;;  %v776_v23 = vld [vmem:[#allocation5 + $0x50] sm:$0xff] }
 0x2dd   : > { %4616 = vmatprep.subr.bf16.mxu0 %v16386_v58  ;;  %4669 = vmatprep.subr.bf16.mxu1 %v16514_v1  ;;  %v16362_v56 = vcombine.high %v776_v23, %v780_v24  ;;  %v16490_v58 = vcombine.high %v904_v41, %v908_v42  ;;  %v768_v1 = vld [vmem:[#allocation5 + $0x10] sm:$0xff]  ;;  %v16361_v8 = vcombine.low %v776_v23, %v780_v24 }
 0x2de   : > { %v772_v10 = vld [vmem:[#allocation5 + $0x30] sm:$0xff] }
 0x2df   : > { %v896_v59 = vld [vmem:[#allocation5 + $0x410] sm:$0xff]  ;;  %v16354_v12 = vcombine.high %v768_v1, %v772_v10  ;;  %v16353_v28 = vcombine.low %v768_v1, %v772_v10 }
 0x2e0   : > { %4617 = vmatpush1.bf16.msra.mxu0 %v16385_v18  ;;  %4670 = vmatpush1.bf16.msra.mxu1 %v16513_v19  ;;  %v900_v6 = vld [vmem:[#allocation5 + $0x430] sm:$0xff] }
 0x2e1   : > { %4618 = vmatprep.subr.bf16.mxu0 %v16378_v3  ;;  %4671 = vmatprep.subr.bf16.mxu1 %v16506_v20  ;;  %v16482_v18 = vcombine.high %v896_v59, %v900_v6  ;;  %v888_v19 = vld [vmem:[#allocation5 + $0x3d0] sm:$0xff]  ;;  %v16481_v43 = vcombine.low %v896_v59, %v900_v6 }
 0x2e2   : > { %v892_v3 = vld [vmem:[#allocation5 + $0x3f0] sm:$0xff] }
 0x2e3   : > { %v1016_v20 = vld [vmem:[#allocation5 + $0x7d0] sm:$0xff]  ;;  %v16474_v31 = vcombine.high %v888_v19, %v892_v3  ;;  %v16473_v24 = vcombine.low %v888_v19, %v892_v3 }
 0x2e4   : > { %4619 = vmatpush1.bf16.msra.mxu0 %v16377_v36  ;;  %4672 = vmatpush1.bf16.msra.mxu1 %v16505_v39  ;;  %v1020_v22 = vld [vmem:[#allocation5 + $0x7f0] sm:$0xff] }
 0x2e5   : > { %4620 = vmatprep.subr.bf16.mxu0 %v16370_v40  ;;  %4673 = vmatprep.subr.bf16.mxu1 %v16498_v53  ;;  %v16602_v36 = vcombine.high %v1016_v20, %v1020_v22  ;;  %v880_v39 = vld [vmem:[#allocation5 + $0x390] sm:$0xff]  ;;  %v16601_v41 = vcombine.low %v1016_v20, %v1020_v22 }
 0x2e6   : > { %v884_v40 = vld [vmem:[#allocation5 + $0x3b0] sm:$0xff] }
 0x2e7   : > { %v1008_v53 = vld [vmem:[#allocation5 + $0x790] sm:$0xff]  ;;  %v16466_v42 = vcombine.high %v880_v39, %v884_v40  ;;  %v16465_v10 = vcombine.low %v880_v39, %v884_v40 }
 0x2e8   : > { %4621 = vmatpush1.bf16.msra.mxu0 %v16369_v33  ;;  %4674 = vmatpush1.bf16.msra.mxu1 %v16497_v34  ;;  %v1012_v23 = vld [vmem:[#allocation5 + $0x7b0] sm:$0xff] }
 0x2e9   : > { %4622 = vmatprep.subr.bf16.mxu0 %v16362_v56  ;;  %4675 = vmatprep.subr.bf16.mxu1 %v16490_v58  ;;  %v16594_v33 = vcombine.high %v1008_v53, %v1012_v23  ;;  %v872_v34 = vld [vmem:[#allocation5 + $0x350] sm:$0xff]  ;;  %v16593_v59 = vcombine.low %v1008_v53, %v1012_v23 }
 0x2ea   : > { %v876_v56 = vld [vmem:[#allocation5 + $0x370] sm:$0xff] }
 0x2eb   : > { %v1000_v58 = vld [vmem:[#allocation5 + $0x750] sm:$0xff]  ;;  %v16458_v6 = vcombine.high %v872_v34, %v876_v56  ;;  %v16457_v3 = vcombine.low %v872_v34, %v876_v56 }
 0x2ec   : > { %4623 = vmatpush1.bf16.msra.mxu0 %v16361_v8  ;;  %4676 = vmatpush1.bf16.msra.mxu1 %v16489_v9  ;;  %v1004_v1 = vld [vmem:[#allocation5 + $0x770] sm:$0xff] }
 0x2ed   : > { %4624 = vmatprep.subr.bf16.mxu0 %v16354_v12  ;;  %4677 = vmatprep.subr.bf16.mxu1 %v16482_v18  ;;  %v16586_v8 = vcombine.high %v1000_v58, %v1004_v1  ;;  %v864_v9 = vld [vmem:[#allocation5 + $0x310] sm:$0xff]  ;;  %v16585_v20 = vcombine.low %v1000_v58, %v1004_v1 }
 0x2ee   : > { %v868_v12 = vld [vmem:[#allocation5 + $0x330] sm:$0xff] }
 0x2ef   : > { %v992_v18 = vld [vmem:[#allocation5 + $0x710] sm:$0xff]  ;;  %v16450_v22 = vcombine.high %v864_v9, %v868_v12  ;;  %v16449_v40 = vcombine.low %v864_v9, %v868_v12 }
 0x2f0   : > { %4625 = vmatpush1.bf16.msra.mxu0 %v16353_v28  ;;  %4678 = vmatpush1.bf16.msra.mxu1 %v16481_v43  ;;  %v996_v19 = vld [vmem:[#allocation5 + $0x730] sm:$0xff] }
 0x2f1   : > { %4626 = vmatprep.subr.bf16.mxu0 %v16474_v31  ;;  %4679 = vmatprep.subr.bf16.mxu1 %v16602_v36  ;;  %v16578_v28 = vcombine.high %v992_v18, %v996_v19  ;;  %v856_v43 = vld [vmem:[#allocation5 + $0x2d0] sm:$0xff]  ;;  %v16577_v53 = vcombine.low %v992_v18, %v996_v19 }
 0x2f2   : > { %v860_v31 = vld [vmem:[#allocation5 + $0x2f0] sm:$0xff] }
 0x2f3   : > { %v984_v36 = vld [vmem:[#allocation5 + $0x6d0] sm:$0xff]  ;;  %v16442_v23 = vcombine.high %v856_v43, %v860_v31  ;;  %v16441_v56 = vcombine.low %v856_v43, %v860_v31 }
 0x2f4   : > { %4627 = vmatpush2.bf16.msra.mxu0 %v16473_v24  ;;  %4680 = vmatpush2.bf16.msra.mxu1 %v16601_v41  ;;  %v988_v39 = vld [vmem:[#allocation5 + $0x6f0] sm:$0xff] }
 0x2f5   : > { %4628 = vmatprep.subr.bf16.mxu0 %v16466_v42  ;;  %4681 = vmatprep.subr.bf16.mxu1 %v16594_v33  ;;  %v16570_v24 = vcombine.high %v984_v36, %v988_v39  ;;  %v848_v41 = vld [vmem:[#allocation5 + $0x290] sm:$0xff]  ;;  %v16569_v58 = vcombine.low %v984_v36, %v988_v39 }
 0x2f6   : > { %v852_v42 = vld [vmem:[#allocation5 + $0x2b0] sm:$0xff] }
 0x2f7   : > { %v976_v33 = vld [vmem:[#allocation5 + $0x690] sm:$0xff]  ;;  %v16434_v1 = vcombine.high %v848_v41, %v852_v42  ;;  %v16433_v12 = vcombine.low %v848_v41, %v852_v42  ;;  %v957_v41 = vld [vmem:[#allocation5 + $0x5f8] sm:$0xff] }
 0x2f8   : > { %4629 = vmatpush2.bf16.msra.mxu0 %v16465_v10  ;;  %4682 = vmatpush2.bf16.msra.mxu1 %v16593_v59  ;;  %v980_v34 = vld [vmem:[#allocation5 + $0x6b0] sm:$0xff] }
 0x2f9   : > { %4630 = vmatprep.subr.bf16.mxu0 %v16458_v6  ;;  %4683 = vmatprep.subr.bf16.mxu1 %v16586_v8  ;;  %v16562_v10 = vcombine.high %v976_v33, %v980_v34  ;;  %v840_v59 = vld [vmem:[#allocation5 + $0x250] sm:$0xff]  ;;  %v16561_v18 = vcombine.low %v976_v33, %v980_v34 }
 0x2fa   : > { %v844_v6 = vld [vmem:[#allocation5 + $0x270] sm:$0xff] }
 0x2fb   : > { %v968_v8 = vld [vmem:[#allocation5 + $0x650] sm:$0xff]  ;;  %v16426_v19 = vcombine.high %v840_v59, %v844_v6  ;;  %v16425_v31 = vcombine.low %v840_v59, %v844_v6  ;;  %v821_v59 = vld [vmem:[#allocation5 + $0x1b8] sm:$0xff] }
 0x2fc   : > { %4631 = vmatpush2.bf16.msra.mxu0 %v16457_v3  ;;  %4684 = vmatpush2.bf16.msra.mxu1 %v16585_v20  ;;  %v972_v9 = vld [vmem:[#allocation5 + $0x670] sm:$0xff]  ;;  %v945_v6 = vld [vmem:[#allocation5 + $0x598] sm:$0xff] }
 0x2fd   : > { %4632 = vmatprep.subr.bf16.mxu0 %v16450_v22  ;;  %4685 = vmatprep.subr.bf16.mxu1 %v16578_v28  ;;  %v16554_v3 = vcombine.high %v968_v8, %v972_v9  ;;  %v832_v20 = vld [vmem:[#allocation5 + $0x210] sm:$0xff]  ;;  %v16553_v36 = vcombine.low %v968_v8, %v972_v9  ;;  %v949_v8 = vld [vmem:[#allocation5 + $0x5b8] sm:$0xff] }
 0x2fe   : > { %v836_v22 = vld [vmem:[#allocation5 + $0x230] sm:$0xff] }
 0x2ff   : > { %v960_v28 = vld [vmem:[#allocation5 + $0x610] sm:$0xff]  ;;  %v16418_v39 = vcombine.high %v832_v20, %v836_v22  ;;  %v16417_v42 = vcombine.low %v832_v20, %v836_v22 }
 0x300   : > { %4633 = vmatpush2.bf16.msra.mxu0 %v16449_v40  ;;  %4686 = vmatpush2.bf16.msra.mxu1 %v16577_v53  ;;  %v964_v43 = vld [vmem:[#allocation5 + $0x630] sm:$0xff]  ;;  %v825_v53 = vld [vmem:[#allocation5 + $0x1d8] sm:$0xff] }
 0x301   : > { %4634 = vmatprep.subr.bf16.mxu0 %v16442_v23  ;;  %4687 = vmatprep.subr.bf16.mxu1 %v16570_v24  ;;  %v16546_v40 = vcombine.high %v960_v28, %v964_v43  ;;  %v829_v23 = vld [vmem:[#allocation5 + $0x1f8] sm:$0xff]  ;;  %v16545_v33 = vcombine.low %v960_v28, %v964_v43  ;;  %v16532_v43 = vcombine.high %v945_v6, %v949_v8 }
 0x302   : > { %v953_v24 = vld [vmem:[#allocation5 + $0x5d8] sm:$0xff]  ;;  %v16412_v34 = vcombine.high %v825_v53, %v829_v23 }
 0x304   : > { %4635 = vmatpush2.bf16.msra.mxu0 %v16441_v56  ;;  %4688 = vmatpush2.bf16.msra.mxu1 %v16569_v58  ;;  %v16540_v56 = vcombine.high %v953_v24, %v957_v41  ;;  %v20646_v58 = vpop.f32.mrf.mxu0 }
 0x305   : > { %4636 = vmatprep.subr.bf16.mxu0 %v16434_v1  ;;  %4689 = vmatprep.subr.bf16.mxu1 %v16562_v10  ;;  %22862 = vst [vmem:[#allocation31_spill] sm:$0xff] %v20646_v58  ;;  %v20648_v1 = vpop.f32.mrf.mxu1  ;;  %v817_v10 = vld [vmem:[#allocation5 + $0x198] sm:$0xff] }
 0x306   : > { %22863 = vst [vmem:[#allocation32_spill] sm:$0xff] %v20648_v1  ;;  %v16404_v28 = vcombine.high %v817_v10, %v821_v59  ;;  %v933_v1 = vld [vmem:[#allocation5 + $0x538] sm:$0xff] }
 0x308   : > { %4637 = vmatpush2.bf16.msra.mxu0 %v16433_v12  ;;  %4690 = vmatpush2.bf16.msra.mxu1 %v16561_v18 }
 0x309   : > { %4638 = vmatprep.subr.bf16.mxu0 %v16426_v19  ;;  %4691 = vmatprep.subr.bf16.mxu1 %v16554_v3  ;;  %v16411_v19 = vcombine.low %v825_v53, %v829_v23  ;;  %v16539_v3 = vcombine.low %v953_v24, %v957_v41  ;;  %v16403_v41 = vcombine.low %v817_v10, %v821_v59 }
 0x30c   : > { %4639 = vmatpush2.bf16.msra.mxu0 %v16425_v31  ;;  %4692 = vmatpush2.bf16.msra.mxu1 %v16553_v36  ;;  %v809_v31 = vld [vmem:[#allocation5 + $0x158] sm:$0xff] }
 0x30d   : > { %4640 = vmatprep.subr.bf16.mxu0 %v16418_v39  ;;  %4693 = vmatprep.subr.bf16.mxu1 %v16546_v40  ;;  %v813_v39 = vld [vmem:[#allocation5 + $0x178] sm:$0xff] }
 0x30e   : > { %v937_v40 = vld [vmem:[#allocation5 + $0x558] sm:$0xff]  ;;  %v16395_v10 = vcombine.low %v809_v31, %v813_v39 }
 0x310   : > { %4641 = vmatpush2.bf16.msra.mxu0 %v16417_v42  ;;  %4694 = vmatpush2.bf16.msra.mxu1 %v16545_v33  ;;  %v3046_v9 = vpop.f32.mrf.mxu0  ;;  %v3099_v12 = vpop.f32.mrf.mxu1  ;;  %v941_v42 = vld [vmem:[#allocation5 + $0x578] sm:$0xff]  ;;  %v16531_v33 = vcombine.low %v945_v6, %v949_v8 }
 0x311   : > { %v20650_v18 = vadd.f32 %v3099_v12, %v3046_v9  ;;  %4716 = vmatprep.subr.bf16.mxu0 %v16412_v34  ;;  %4769 = vmatprep.subr.bf16.mxu1 %v16540_v56  ;;  %v16396_v9 = vcombine.high %v809_v31, %v813_v39  ;;  %v16524_v12 = vcombine.high %v937_v40, %v941_v42 }
 0x312   : > { %v3048_v20 = vpop.f32.mrf.mxu0  ;;  %v3101_v22 = vpop.f32.mrf.mxu1  ;;  %v16523_v59 = vcombine.low %v937_v40, %v941_v42  ;;  %v16515_v40 = vcombine.low %v929_v0, %v933_v1 }
 0x313   : > { %4643 = vmatmul.mubr.bf16.vlgmr.msra.gmra.mxu0 %v20488_v37  ;;  %4696 = vmatmul.mubr.bf16.vlgmr.msra.gmra.mxu1 %v20490_v38  ;;  %v20654_v36 = vadd.f32 %v3101_v22, %v3048_v20  ;;  %v801_v20 = vld [vmem:[#allocation5 + $0x118] sm:$0xff] }
 0x314   : > { %4652 = vmatprep.mubr.bf16.mxu0 %v20590_v15  ;;  %4705 = vmatprep.mubr.bf16.mxu1 %v20594_v16  ;;  %v3050_v53 = vpop.f32.mrf.mxu0  ;;  %v3103_v23 = vpop.f32.mrf.mxu1  ;;  %v805_v22 = vld [vmem:[#allocation5 + $0x138] sm:$0xff] }
 0x315   : > { %4717 = vmatpush1.bf16.msra.mxu0 %v16411_v19  ;;  %4770 = vmatpush1.bf16.msra.mxu1 %v16539_v3  ;;  %v20658_v24 = vadd.f32 %v3103_v23, %v3050_v53  ;;  %v16388_v3 = vcombine.high %v801_v20, %v805_v22  ;;  %v797_v23 = vld [vmem:[#allocation5 + $0xf8] sm:$0xff]  ;;  %v16387_v39 = vcombine.low %v801_v20, %v805_v22 }
 0x316   : > { %4718 = vmatprep.subr.bf16.mxu0 %v16404_v28  ;;  %4771 = vmatprep.subr.bf16.mxu1 %v16532_v43  ;;  %v20660_v34 = vpop.f32.mrf.mxu0  ;;  %v20662_v56 = vpop.f32.mrf.mxu1  ;;  %v16516_v28 = vcombine.high %v929_v0, %v933_v1  ;;  %v793_v43 = vld [vmem:[#allocation5 + $0xd8] sm:$0xff] }
 0x317   : > { %22864 = vst [vmem:[#allocation33_spill] sm:$0xff] %v20660_v34  ;;  %22865 = vst [vmem:[#allocation34_spill] sm:$0xff] %v20662_v56  ;;  %v16380_v42 = vcombine.high %v793_v43, %v797_v23  ;;  %v917_v56 = vld [vmem:[#allocation5 + $0x4b8] sm:$0xff] }
 0x318   : > { %v3056_v58 = vpop.f32.mrf.mxu0  ;;  %v3109_v50 = vpop.f32.mrf.mxu1  ;;  %v905_v20 = vld [vmem:[#allocation5 + $0x458] sm:$0xff] }
 0x319   : > { %4719 = vmatpush1.bf16.msra.mxu0 %v16403_v41  ;;  %4772 = vmatpush1.bf16.msra.mxu1 %v16531_v33  ;;  %v20664_v19 = vadd.f32 %v3109_v50, %v3056_v58  ;;  %v921_v41 = vld [vmem:[#allocation5 + $0x4d8] sm:$0xff] }
 0x31a   : > { %4720 = vmatprep.subr.bf16.mxu0 %v16396_v9  ;;  %4773 = vmatprep.subr.bf16.mxu1 %v16524_v12  ;;  %v3058_v6 = vpop.f32.mrf.mxu0  ;;  %v3111_v8 = vpop.f32.mrf.mxu1  ;;  %v925_v33 = vld [vmem:[#allocation5 + $0x4f8] sm:$0xff] }
 0x31b   : > { %4653 = vmatmul.mubr.bf16.gmra.mxu0 %v20500_v47  ;;  %4706 = vmatmul.mubr.bf16.gmra.mxu1 %v20502_v48  ;;  %v20668_v53 = vadd.f32 %v3111_v8, %v3058_v6  ;;  %v16508_v9 = vcombine.high %v921_v41, %v925_v33  ;;  %v785_v12 = vld [vmem:[#allocation5 + $0x98] sm:$0xff] }
 0x31c   : > { %4748 = vmatprep.mubr.bf16.mxu0 %v20566_v26  ;;  %4801 = vmatprep.mubr.bf16.mxu1 %v20570_v27  ;;  %v3060_v50 = vpop.f32.mrf.mxu0  ;;  %v3113_v58 = vpop.f32.mrf.mxu1  ;;  %v789_v6 = vld [vmem:[#allocation5 + $0xb8] sm:$0xff]  ;;  %v16379_v26 = vcombine.low %v793_v43, %v797_v23  ;;  %v16507_v27 = vcombine.low %v921_v41, %v925_v33 }
 0x31d   : > { %4721 = vmatpush1.bf16.msra.mxu0 %v16395_v10  ;;  %4774 = vmatpush1.bf16.msra.mxu1 %v16523_v59  ;;  %v20672_v31 = vadd.f32 %v3113_v58, %v3060_v50  ;;  %v913_v8 = vld [vmem:[#allocation5 + $0x498] sm:$0xff]  ;;  %v16372_v10 = vcombine.high %v785_v12, %v789_v6  ;;  %v16371_v1 = vcombine.low %v785_v12, %v789_v6 }
 0x31e   : > { %4722 = vmatprep.subr.bf16.mxu0 %v16388_v3  ;;  %4775 = vmatprep.subr.bf16.mxu1 %v16516_v28  ;;  %v16500_v59 = vcombine.high %v913_v8, %v917_v56  ;;  %v777_v50 = vld [vmem:[#allocation5 + $0x58] sm:$0xff]  ;;  %v16499_v22 = vcombine.low %v913_v8, %v917_v56 }
 0x31f   : > { %v781_v58 = vld [vmem:[#allocation5 + $0x78] sm:$0xff] }
 0x320   : > { %v909_v0 = vld [vmem:[#allocation5 + $0x478] sm:$0xff]  ;;  %v16364_v3 = vcombine.high %v777_v50, %v781_v58  ;;  %v16363_v41 = vcombine.low %v777_v50, %v781_v58 }
 0x321   : > { %4723 = vmatpush1.bf16.msra.mxu0 %v16387_v39  ;;  %4776 = vmatpush1.bf16.msra.mxu1 %v16515_v40  ;;  %v16492_v28 = vcombine.high %v905_v20, %v909_v0  ;;  %v769_v39 = vld [vmem:[#allocation5 + $0x18] sm:$0xff]  ;;  %v16491_v33 = vcombine.low %v905_v20, %v909_v0 }
 0x322   : > { %4724 = vmatprep.subr.bf16.mxu0 %v16380_v42  ;;  %4777 = vmatprep.subr.bf16.mxu1 %v16508_v9  ;;  %v773_v40 = vld [vmem:[#allocation5 + $0x38] sm:$0xff] }
 0x323   : > { %v897_v43 = vld [vmem:[#allocation5 + $0x418] sm:$0xff]  ;;  %v16356_v42 = vcombine.high %v769_v39, %v773_v40  ;;  %v16355_v6 = vcombine.low %v769_v39, %v773_v40 }
 0x324   : > { %v901_v23 = vld [vmem:[#allocation5 + $0x438] sm:$0xff] }
 0x325   : > { %4725 = vmatpush1.bf16.msra.mxu0 %v16379_v26  ;;  %4778 = vmatpush1.bf16.msra.mxu1 %v16507_v27  ;;  %v16484_v9 = vcombine.high %v897_v43, %v901_v23  ;;  %v889_v26 = vld [vmem:[#allocation5 + $0x3d8] sm:$0xff]  ;;  %v16483_v8 = vcombine.low %v897_v43, %v901_v23 }
 0x326   : > { %4726 = vmatprep.subr.bf16.mxu0 %v16372_v10  ;;  %4779 = vmatprep.subr.bf16.mxu1 %v16500_v59  ;;  %v893_v27 = vld [vmem:[#allocation5 + $0x3f8] sm:$0xff] }
 0x327   : > { %v1017_v12 = vld [vmem:[#allocation5 + $0x7d8] sm:$0xff]  ;;  %v16476_v10 = vcombine.high %v889_v26, %v893_v27  ;;  %v16475_v20 = vcombine.low %v889_v26, %v893_v27 }
 0x328   : > { %v1021_v56 = vld [vmem:[#allocation5 + $0x7f8] sm:$0xff] }
 0x329   : > { %4727 = vmatpush1.bf16.msra.mxu0 %v16371_v1  ;;  %4780 = vmatpush1.bf16.msra.mxu1 %v16499_v22  ;;  %v16604_v59 = vcombine.high %v1017_v12, %v1021_v56  ;;  %v881_v1 = vld [vmem:[#allocation5 + $0x398] sm:$0xff]  ;;  %v16603_v0 = vcombine.low %v1017_v12, %v1021_v56 }
 0x32a   : > { %4728 = vmatprep.subr.bf16.mxu0 %v16364_v3  ;;  %4781 = vmatprep.subr.bf16.mxu1 %v16492_v28  ;;  %v885_v22 = vld [vmem:[#allocation5 + $0x3b8] sm:$0xff] }
 0x32b   : > { %v1009_v50 = vld [vmem:[#allocation5 + $0x798] sm:$0xff]  ;;  %v16468_v3 = vcombine.high %v881_v1, %v885_v22  ;;  %v16467_v43 = vcombine.low %v881_v1, %v885_v22 }
 0x32c   : > { %v1013_v58 = vld [vmem:[#allocation5 + $0x7b8] sm:$0xff] }
 0x32d   : > { %4729 = vmatpush1.bf16.msra.mxu0 %v16363_v41  ;;  %4782 = vmatpush1.bf16.msra.mxu1 %v16491_v33  ;;  %v16596_v28 = vcombine.high %v1009_v50, %v1013_v58  ;;  %v873_v41 = vld [vmem:[#allocation5 + $0x358] sm:$0xff]  ;;  %v16595_v23 = vcombine.low %v1009_v50, %v1013_v58 }
 0x32e   : > { %4730 = vmatprep.subr.bf16.mxu0 %v16356_v42  ;;  %4783 = vmatprep.subr.bf16.mxu1 %v16484_v9  ;;  %v877_v33 = vld [vmem:[#allocation5 + $0x378] sm:$0xff] }
 0x32f   : > { %v1001_v39 = vld [vmem:[#allocation5 + $0x758] sm:$0xff]  ;;  %v16460_v42 = vcombine.high %v873_v41, %v877_v33  ;;  %v16459_v12 = vcombine.low %v873_v41, %v877_v33 }
 0x330   : > { %v1005_v40 = vld [vmem:[#allocation5 + $0x778] sm:$0xff] }
 0x331   : > { %4731 = vmatpush1.bf16.msra.mxu0 %v16355_v6  ;;  %4784 = vmatpush1.bf16.msra.mxu1 %v16483_v8  ;;  %v16588_v9 = vcombine.high %v1001_v39, %v1005_v40  ;;  %v865_v6 = vld [vmem:[#allocation5 + $0x318] sm:$0xff]  ;;  %v16587_v56 = vcombine.low %v1001_v39, %v1005_v40 }
 0x332   : > { %4732 = vmatprep.subr.bf16.mxu0 %v16476_v10  ;;  %4785 = vmatprep.subr.bf16.mxu1 %v16604_v59  ;;  %v869_v8 = vld [vmem:[#allocation5 + $0x338] sm:$0xff] }
 0x333   : > { %v993_v26 = vld [vmem:[#allocation5 + $0x718] sm:$0xff]  ;;  %v16452_v10 = vcombine.high %v865_v6, %v869_v8  ;;  %v16451_v50 = vcombine.low %v865_v6, %v869_v8 }
 0x334   : > { %v997_v27 = vld [vmem:[#allocation5 + $0x738] sm:$0xff] }
 0x335   : > { %4733 = vmatpush2.bf16.msra.mxu0 %v16475_v20  ;;  %4786 = vmatpush2.bf16.msra.mxu1 %v16603_v0  ;;  %v16580_v59 = vcombine.high %v993_v26, %v997_v27  ;;  %v857_v20 = vld [vmem:[#allocation5 + $0x2d8] sm:$0xff]  ;;  %v16579_v58 = vcombine.low %v993_v26, %v997_v27 }
 0x336   : > { %4734 = vmatprep.subr.bf16.mxu0 %v16468_v3  ;;  %4787 = vmatprep.subr.bf16.mxu1 %v16596_v28  ;;  %v861_v0 = vld [vmem:[#allocation5 + $0x2f8] sm:$0xff] }
 0x337   : > { %v985_v1 = vld [vmem:[#allocation5 + $0x6d8] sm:$0xff]  ;;  %v16444_v3 = vcombine.high %v857_v20, %v861_v0  ;;  %v16443_v39 = vcombine.low %v857_v20, %v861_v0 }
 0x338   : > { %v989_v22 = vld [vmem:[#allocation5 + $0x6f8] sm:$0xff] }
 0x339   : > { %4735 = vmatpush2.bf16.msra.mxu0 %v16467_v43  ;;  %4788 = vmatpush2.bf16.msra.mxu1 %v16595_v23  ;;  %v16572_v28 = vcombine.high %v985_v1, %v989_v22  ;;  %v849_v43 = vld [vmem:[#allocation5 + $0x298] sm:$0xff]  ;;  %v16571_v40 = vcombine.low %v985_v1, %v989_v22 }
 0x33a   : > { %4736 = vmatprep.subr.bf16.mxu0 %v16460_v42  ;;  %4789 = vmatprep.subr.bf16.mxu1 %v16588_v9  ;;  %v853_v23 = vld [vmem:[#allocation5 + $0x2b8] sm:$0xff] }
 0x33b   : > { %v977_v41 = vld [vmem:[#allocation5 + $0x698] sm:$0xff]  ;;  %v16436_v42 = vcombine.high %v849_v43, %v853_v23  ;;  %v16435_v26 = vcombine.low %v849_v43, %v853_v23 }
 0x33c   : > { %v981_v33 = vld [vmem:[#allocation5 + $0x6b8] sm:$0xff] }
 0x33d   : > { %4737 = vmatpush2.bf16.msra.mxu0 %v16459_v12  ;;  %4790 = vmatpush2.bf16.msra.mxu1 %v16587_v56  ;;  %v16564_v9 = vcombine.high %v977_v41, %v981_v33  ;;  %v841_v12 = vld [vmem:[#allocation5 + $0x258] sm:$0xff]  ;;  %v16563_v27 = vcombine.low %v977_v41, %v981_v33  ;;  %v20674_v41 = vpop.f32.mrf.mxu0  ;;  %v20676_v33 = vpop.f32.mrf.mxu1 }
 0x33e   : > { %4738 = vmatprep.subr.bf16.mxu0 %v16452_v10  ;;  %4791 = vmatprep.subr.bf16.mxu1 %v16580_v59  ;;  %v845_v56 = vld [vmem:[#allocation5 + $0x278] sm:$0xff]  ;;  %22866 = vst [vmem:[#allocation35_spill] sm:$0xff] %v20674_v41  ;;  %22867 = vst [vmem:[#allocation36_spill] sm:$0xff] %v20676_v33 }
 0x33f   : > { %v969_v6 = vld [vmem:[#allocation5 + $0x658] sm:$0xff]  ;;  %v16428_v10 = vcombine.high %v841_v12, %v845_v56  ;;  %v16427_v1 = vcombine.low %v841_v12, %v845_v56 }
 0x340   : > { %v973_v8 = vld [vmem:[#allocation5 + $0x678] sm:$0xff] }
 0x341   : > { %4739 = vmatpush2.bf16.msra.mxu0 %v16451_v50  ;;  %4792 = vmatpush2.bf16.msra.mxu1 %v16579_v58  ;;  %v16556_v59 = vcombine.high %v969_v6, %v973_v8  ;;  %v833_v50 = vld [vmem:[#allocation5 + $0x218] sm:$0xff]  ;;  %v16555_v22 = vcombine.low %v969_v6, %v973_v8 }
 0x342   : > { %4740 = vmatprep.subr.bf16.mxu0 %v16444_v3  ;;  %4793 = vmatprep.subr.bf16.mxu1 %v16572_v28  ;;  %v837_v58 = vld [vmem:[#allocation5 + $0x238] sm:$0xff] }
 0x343   : > { %v961_v20 = vld [vmem:[#allocation5 + $0x618] sm:$0xff]  ;;  %v16420_v3 = vcombine.high %v833_v50, %v837_v58  ;;  %v16419_v43 = vcombine.low %v833_v50, %v837_v58 }
 0x344   : > { %v965_v0 = vld [vmem:[#allocation5 + $0x638] sm:$0xff] }
 0x345   : > { %4741 = vmatpush2.bf16.msra.mxu0 %v16443_v39  ;;  %4794 = vmatpush2.bf16.msra.mxu1 %v16571_v40  ;;  %v16548_v28 = vcombine.high %v961_v20, %v965_v0  ;;  %v16547_v23 = vcombine.low %v961_v20, %v965_v0  ;;  %v19871_v12 = vld [vmem:[%s20452_s27 + $0x6c] ss:$16 sps:$4 sm:$0xff]  }
 0x346   : > { %4742 = vmatprep.subr.bf16.mxu0 %v16436_v42  ;;  %4795 = vmatprep.subr.bf16.mxu1 %v16564_v9  ;;  %v19870_v9 = vld [vmem:[%s20452_s27 + $0x64] ss:$16 sps:$4 sm:$0xff]  }
 0x349   : > { %4743 = vmatpush2.bf16.msra.mxu0 %v16435_v26  ;;  %4796 = vmatpush2.bf16.msra.mxu1 %v16563_v27 }
 0x34a   : > { %4744 = vmatprep.subr.bf16.mxu0 %v16428_v10  ;;  %4797 = vmatprep.subr.bf16.mxu1 %v16556_v59  ;;  %v19872_v10 = vld [vmem:[%s20452_s27 + $0x60] ss:$16 sps:$4 sm:$0xff]   ;;  %v19873_v59 = vld [vmem:[%s20452_s27 + $0x68] ss:$16 sps:$4 sm:$0xff]  }
 0x34d   : > { %4745 = vmatpush2.bf16.msra.mxu0 %v16427_v1  ;;  %4798 = vmatpush2.bf16.msra.mxu1 %v16555_v22  ;;  %v19876_v1 = vld [vmem:[%s20452_s27 + $0x40] ss:$16 sps:$4 sm:$0xff]   ;;  %v19877_v22 = vld [vmem:[%s20452_s27 + $0x48] ss:$16 sps:$4 sm:$0xff]  }
 0x34e   : > { %4746 = vmatprep.subr.bf16.mxu0 %v16420_v3  ;;  %4799 = vmatprep.subr.bf16.mxu1 %v16548_v28  ;;  %v19878_v3 = vld [vmem:[%s20452_s27 + $0x24] ss:$16 sps:$4 sm:$0xff]   ;;  %v19879_v28 = vld [vmem:[%s20452_s27 + $0x2c] ss:$16 sps:$4 sm:$0xff]  }
 0x351   : > { %4747 = vmatpush2.bf16.msra.mxu0 %v16419_v43  ;;  %4800 = vmatpush2.bf16.msra.mxu1 %v16547_v23  ;;  %v4432_v39 = vpop.f32.mrf.mxu0  ;;  %v4485_v40 = vpop.f32.mrf.mxu1 }
 0x352   : > { %v4433_v42 = vadd.f32 %v4432_v39, %v20550_v5  ;;  %4851 = vmatprep.subr.bf16.mxu0 %v19870_v9  ;;  %4904 = vmatprep.subr.bf16.mxu1 %v19871_v12  ;;  %v22868_v9 = vmov 0   ;;  %v19881_v12 = vld [vmem:[%s20452_s27 + $0x28] ss:$16 sps:$4 sm:$0xff]  }
 0x353   : > { %v4434_v56 = vpop.f32.mrf.mxu0  ;;  %v4487_v6 = vpop.f32.mrf.mxu1 }
 0x354   : > { %v20681_v8 = vadd.f32 %v4485_v40, %v4433_v42  ;;  %4749 = vmatmul.mubr.bf16.vlgmr.msra.gmra.mxu0 %v20488_v37  ;;  %4802 = vmatmul.mubr.bf16.vlgmr.msra.gmra.mxu1 %v20490_v38  ;;  %v4435_v26 = vadd.f32 %v4434_v56, %v20556_v14  ;;  %v19874_v38 = vld [vmem:[%s20452_s27 + $0x44] ss:$16 sps:$4 sm:$0xff]   ;;  %v19875_v14 = vld [vmem:[%s20452_s27 + $0x4c] ss:$16 sps:$4 sm:$0xff]  }
 0x355   : > { %4758 = vmatprep.mubr.bf16.mxu0 %v20590_v15  ;;  %4811 = vmatprep.mubr.bf16.mxu1 %v20594_v16  ;;  %v4436_v5 = vpop.f32.mrf.mxu0  ;;  %v4489_v27 = vpop.f32.mrf.mxu1 }
 0x356   : > { %4852 = vmatpush1.bf16.msra.mxu0 %v19872_v10  ;;  %4905 = vmatpush1.bf16.msra.mxu1 %v19873_v59  ;;  %v20690_v50 = vadd.f32 %v4487_v6, %v4435_v26  ;;  %v4437_v37 = vadd.f32 %v4436_v5, %v20558_v2  ;;  %v19882_v26 = vld [vmem:[%s20452_s27 + $0x4] ss:$16 sps:$4 sm:$0xff]   ;;  %v19885_v10 = vld [vmem:[%s20452_s27 + $0x8] ss:$16 sps:$4 sm:$0xff]  }
 0x357   : > { %4853 = vmatprep.subr.bf16.mxu0 %v19874_v38  ;;  %4906 = vmatprep.subr.bf16.mxu1 %v19875_v14  ;;  %v20695_v15 = vpop.f32.mrf.mxu0  ;;  %v20697_v16 = vpop.f32.mrf.mxu1  ;;  %v18425_v5 = vld [vmem:[#allocation2 + $0x20] sm:$0xff]   ;;  %v5014_v59 = vld [vmem:[#allocation5 + $0x11c0] sm:$0xff] }
 0x358   : > { %v20699_v58 = vadd.f32 %v4489_v27, %v4437_v37  ;;  %v19884_v27 = vld [vmem:[%s20452_s27] ss:$16 sps:$4 sm:$0xff]  }
 0x359   : > { %v4442_v20 = vpop.f32.mrf.mxu0  ;;  %v4495_v0 = vpop.f32.mrf.mxu1  ;;  %v5018_v37 = vld [vmem:[#allocation5 + $0x11e0] sm:$0xff] }
 0x35a   : > { %4854 = vmatpush1.bf16.msra.mxu0 %v19876_v1  ;;  %4907 = vmatpush1.bf16.msra.mxu1 %v19877_v22  ;;  %v4443_v2 = vadd.f32 %v4442_v20, %v20572_v45  ;;  %v19880_v45 = vld [vmem:[%s20452_s27 + $0x20] ss:$16 sps:$4 sm:$0xff]   ;;  %v16668_v14 = vcombine.high %v5014_v59, %v5018_v37 }
 0x35b   : > { %4855 = vmatprep.subr.bf16.mxu0 %v19878_v3  ;;  %4908 = vmatprep.subr.bf16.mxu1 %v19879_v28  ;;  %v4444_v43 = vpop.f32.mrf.mxu0  ;;  %v4497_v23 = vpop.f32.mrf.mxu1  ;;  %v5142_v38 = vld [vmem:[#allocation5 + $0x15c0] sm:$0xff] }
 0x35c   : > { %v20706_v39 = vadd.f32 %v4495_v0, %v4443_v2  ;;  %4759 = vmatmul.mubr.bf16.gmra.mxu0 %v20500_v47  ;;  %4812 = vmatmul.mubr.bf16.gmra.mxu1 %v20502_v48  ;;  %v4445_v40 = vadd.f32 %v4444_v43, %v20578_v51  ;;  %v19883_v48 = vld [vmem:[%s20452_s27 + $0xc] ss:$16 sps:$4 sm:$0xff]   ;;  %v5146_v20 = vld [vmem:[#allocation5 + $0x15e0] sm:$0xff] }
 0x35d   : > { %v4446_v42 = vpop.f32.mrf.mxu0  ;;  %4875 = vmatprep.mubr.bf16.mxu0 %v22868_v9  ;;  %4928 = vmatprep.mubr.bf16.mxu1 %v22868_v9  ;;  %v4499_v47 = vpop.f32.mrf.mxu1  ;;  %v5006_v0 = vld [vmem:[#allocation5 + $0x1180] sm:$0xff]  ;;  %v16795_v22 = vcombine.low %v5142_v38, %v5146_v20  ;;  %v16796_v2 = vcombine.high %v5142_v38, %v5146_v20 }
 0x35e   : > { %4856 = vmatpush1.bf16.msra.mxu0 %v19880_v45  ;;  %4909 = vmatpush1.bf16.msra.mxu1 %v19881_v12  ;;  %v20715_v56 = vadd.f32 %v4497_v23, %v4445_v40  ;;  %v4447_v6 = vadd.f32 %v4446_v42, %v20580_v57  ;;  %v16667_v57 = vcombine.low %v5014_v59, %v5018_v37  ;;  %v5010_v1 = vld [vmem:[#allocation5 + $0x11a0] sm:$0xff] }
 0x35f   : > { %4857 = vmatprep.subr.bf16.mxu0 %v19882_v26  ;;  %4910 = vmatprep.subr.bf16.mxu1 %v19883_v48  ;;  %v5134_v3 = vld [vmem:[#allocation5 + $0x1580] sm:$0xff]  ;;  %v16660_v43 = vcombine.high %v5006_v0, %v5010_v1  ;;  %v16659_v45 = vcombine.low %v5006_v0, %v5010_v1 }
 0x360   : > { %v20720_v51 = vadd.f32 %v4499_v47, %v4447_v6  ;;  %v5138_v28 = vld [vmem:[#allocation5 + $0x15a0] sm:$0xff]  ;;  %v18426_v47 = vld [vmem:[#allocation2 + $0x28] sm:$0xff]  }
 0x361   : > { %v16788_v23 = vcombine.high %v5134_v3, %v5138_v28  ;;  %v4998_v40 = vld [vmem:[#allocation5 + $0x1140] sm:$0xff]  ;;  %v16787_v26 = vcombine.low %v5134_v3, %v5138_v28 }
 0x362   : > { %4858 = vmatpush1.bf16.msra.mxu0 %v19884_v27  ;;  %4911 = vmatpush1.bf16.msra.mxu1 %v19885_v10  ;;  %v5002_v42 = vld [vmem:[#allocation5 + $0x1160] sm:$0xff] }
 0x363   : > { %6494 = vmatprep.subr.bf16.mxu0 %v16668_v14  ;;  %6547 = vmatprep.subr.bf16.mxu1 %v16796_v2  ;;  %v5126_v12 = vld [vmem:[#allocation5 + $0x1540] sm:$0xff]  ;;  %v16652_v48 = vcombine.high %v4998_v40, %v5002_v42  ;;  %v16651_v59 = vcombine.low %v4998_v40, %v5002_v42 }
 0x364   : > { %v5130_v6 = vld [vmem:[#allocation5 + $0x1560] sm:$0xff] }
 0x365   : > { %16607 = vmatmul.mubr.msk.bf16.vlgmr.msra.gmra.mxu0 %vm645_vm0, %v18425_v5  ;;  %16609 = vmatmul.mubr.msk.bf16.vlgmr.msra.gmra.mxu1 %vm645_vm0, %v18425_v5  ;;  %v4990_v5 = vld [vmem:[#allocation5 + $0x1100] sm:$0xff]  ;;  %v16780_v10 = vcombine.high %v5126_v12, %v5130_v6  ;;  %v16779_v14 = vcombine.low %v5126_v12, %v5130_v6 }
 0x366   : > { %4885 = vmatprep.mubr.bf16.mxu0 %v22868_v9  ;;  %4938 = vmatprep.mubr.bf16.mxu1 %v22868_v9  ;;  %v4994_v27 = vld [vmem:[#allocation5 + $0x1120] sm:$0xff] }
 0x367   : > { %6495 = vmatpush1.bf16.msra.mxu0 %v16667_v57  ;;  %6548 = vmatpush1.bf16.msra.mxu1 %v16795_v22  ;;  %v5118_v37 = vld [vmem:[#allocation5 + $0x1500] sm:$0xff]  ;;  %v16644_v57 = vcombine.high %v4990_v5, %v4994_v27  ;;  %v16643_v22 = vcombine.low %v4990_v5, %v4994_v27 }
 0x368   : > { %6496 = vmatprep.subr.bf16.mxu0 %v16660_v43  ;;  %6549 = vmatprep.subr.bf16.mxu1 %v16788_v23  ;;  %v5122_v38 = vld [vmem:[#allocation5 + $0x1520] sm:$0xff] }
 0x369   : > { %v4982_v20 = vld [vmem:[#allocation5 + $0x10c0] sm:$0xff]  ;;  %v16772_v1 = vcombine.high %v5118_v37, %v5122_v38  ;;  %v16771_v43 = vcombine.low %v5118_v37, %v5122_v38 }
 0x36a   : > { %v4986_v0 = vld [vmem:[#allocation5 + $0x10e0] sm:$0xff] }
 0x36b   : > { %6497 = vmatpush1.bf16.msra.mxu0 %v16659_v45  ;;  %6550 = vmatpush1.bf16.msra.mxu1 %v16787_v26  ;;  %v5110_v2 = vld [vmem:[#allocation5 + $0x14c0] sm:$0xff]  ;;  %v16636_v28 = vcombine.high %v4982_v20, %v4986_v0  ;;  %v16635_v45 = vcombine.low %v4982_v20, %v4986_v0 }
 0x36c   : > { %6498 = vmatprep.subr.bf16.mxu0 %v16652_v48  ;;  %6551 = vmatprep.subr.bf16.mxu1 %v16780_v10  ;;  %v5114_v3 = vld [vmem:[#allocation5 + $0x14e0] sm:$0xff] }
 0x36d   : > { %16608 = vmatmul.mubr.msk.bf16.gmra.mxu0 %vm645_vm0, %v18426_v47  ;;  %16610 = vmatmul.mubr.msk.bf16.gmra.mxu1 %vm645_vm0, %v18426_v47  ;;  %v4974_v23 = vld [vmem:[#allocation5 + $0x1080] sm:$0xff]  ;;  %v16764_v42 = vcombine.high %v5110_v2, %v5114_v3  ;;  %v16763_v26 = vcombine.low %v5110_v2, %v5114_v3 }
 0x36e   : > { %v4978_v40 = vld [vmem:[#allocation5 + $0x10a0] sm:$0xff] }
 0x36f   : > { %6499 = vmatpush1.bf16.msra.mxu0 %v16651_v59  ;;  %6552 = vmatpush1.bf16.msra.mxu1 %v16779_v14  ;;  %v5102_v47 = vld [vmem:[#allocation5 + $0x1480] sm:$0xff]  ;;  %v16628_v6 = vcombine.high %v4974_v23, %v4978_v40  ;;  %v16627_v10 = vcombine.low %v4974_v23, %v4978_v40 }
 0x370   : > { %6500 = vmatprep.subr.bf16.mxu0 %v16644_v57  ;;  %6553 = vmatprep.subr.bf16.mxu1 %v16772_v1  ;;  %v5106_v12 = vld [vmem:[#allocation5 + $0x14a0] sm:$0xff] }
 0x371   : > { %v4966_v48 = vld [vmem:[#allocation5 + $0x1040] sm:$0xff]  ;;  %v16756_v27 = vcombine.high %v5102_v47, %v5106_v12  ;;  %v16755_v57 = vcombine.low %v5102_v47, %v5106_v12 }
 0x372   : > { %v4970_v5 = vld [vmem:[#allocation5 + $0x1060] sm:$0xff] }
 0x373   : > { %6501 = vmatpush1.bf16.msra.mxu0 %v16643_v22  ;;  %6554 = vmatpush1.bf16.msra.mxu1 %v16771_v43  ;;  %v5094_v59 = vld [vmem:[#allocation5 + $0x1440] sm:$0xff]  ;;  %v16620_v38 = vcombine.high %v4966_v48, %v4970_v5  ;;  %v16619_v1 = vcombine.low %v4966_v48, %v4970_v5 }
 0x374   : > { %6502 = vmatprep.subr.bf16.mxu0 %v16636_v28  ;;  %6555 = vmatprep.subr.bf16.mxu1 %v16764_v42  ;;  %v5098_v37 = vld [vmem:[#allocation5 + $0x1460] sm:$0xff] }
 0x375   : > { %v4958_v14 = vld [vmem:[#allocation5 + $0x1000] sm:$0xff]  ;;  %v16748_v0 = vcombine.high %v5094_v59, %v5098_v37  ;;  %v16747_v28 = vcombine.low %v5094_v59, %v5098_v37 }
 0x376   : > { %v4962_v20 = vld [vmem:[#allocation5 + $0x1020] sm:$0xff] }
 0x377   : > { %6503 = vmatpush1.bf16.msra.mxu0 %v16635_v45  ;;  %6556 = vmatpush1.bf16.msra.mxu1 %v16763_v26  ;;  %v5086_v22 = vld [vmem:[#allocation5 + $0x1400] sm:$0xff]  ;;  %v16612_v3 = vcombine.high %v4958_v14, %v4962_v20  ;;  %v16611_v42 = vcombine.low %v4958_v14, %v4962_v20 }
 0x378   : > { %6504 = vmatprep.subr.bf16.mxu0 %v16628_v6  ;;  %6557 = vmatprep.subr.bf16.mxu1 %v16756_v27  ;;  %v5090_v2 = vld [vmem:[#allocation5 + $0x1420] sm:$0xff] }
 0x379   : > { %v5078_v43 = vld [vmem:[#allocation5 + $0x13c0] sm:$0xff]  ;;  %v16740_v40 = vcombine.high %v5086_v22, %v5090_v2  ;;  %v16739_v6 = vcombine.low %v5086_v22, %v5090_v2 }
 0x37a   : > { %v5082_v23 = vld [vmem:[#allocation5 + $0x13e0] sm:$0xff] }
 0x37b   : > { %6505 = vmatpush1.bf16.msra.mxu0 %v16627_v10  ;;  %6558 = vmatpush1.bf16.msra.mxu1 %v16755_v57  ;;  %v5206_v45 = vld [vmem:[#allocation5 + $0x17c0] sm:$0xff]  ;;  %v16732_v12 = vcombine.high %v5078_v43, %v5082_v23  ;;  %v16731_v27 = vcombine.low %v5078_v43, %v5082_v23 }
 0x37c   : > { %6506 = vmatprep.subr.bf16.mxu0 %v16620_v38  ;;  %6559 = vmatprep.subr.bf16.mxu1 %v16748_v0  ;;  %v5210_v47 = vld [vmem:[#allocation5 + $0x17e0] sm:$0xff]  ;;  %v20730_v0 = vpop.f32.mrf.mxu0 }
 0x37d   : > { %v5070_v26 = vld [vmem:[#allocation5 + $0x1380] sm:$0xff]  ;;  %v16860_v5 = vcombine.high %v5206_v45, %v5210_v47  ;;  %v16859_v38 = vcombine.low %v5206_v45, %v5210_v47 }
 0x37e   : > { %v5074_v48 = vld [vmem:[#allocation5 + $0x13a0] sm:$0xff] }
 0x37f   : > { %6507 = vmatpush1.bf16.msra.mxu0 %v16619_v1  ;;  %6560 = vmatpush1.bf16.msra.mxu1 %v16747_v28  ;;  %v5198_v10 = vld [vmem:[#allocation5 + $0x1780] sm:$0xff]  ;;  %v16724_v37 = vcombine.high %v5070_v26, %v5074_v48  ;;  %v16723_v14 = vcombine.low %v5070_v26, %v5074_v48  ;;  %v20732_v1 = vpop.f32.mrf.mxu1 }
 0x380   : > { %6508 = vmatprep.subr.bf16.mxu0 %v16612_v3  ;;  %6561 = vmatprep.subr.bf16.mxu1 %v16740_v40  ;;  %v5202_v59 = vld [vmem:[#allocation5 + $0x17a0] sm:$0xff] }
 0x381   : > { %v16852_v57 = vcombine.high %v5198_v10, %v5202_v59  ;;  %v16851_v20 = vcombine.low %v5198_v10, %v5202_v59  ;;  %v5062_v28 = vld [vmem:[#allocation5 + $0x1340] sm:$0xff] }
 0x382   : > { %v5066_v43 = vld [vmem:[#allocation5 + $0x1360] sm:$0xff] }
 0x383   : > { %6509 = vmatpush1.bf16.msra.mxu0 %v16611_v42  ;;  %6562 = vmatpush1.bf16.msra.mxu1 %v16739_v6  ;;  %v5190_v23 = vld [vmem:[#allocation5 + $0x1740] sm:$0xff]  ;;  %v16716_v45 = vcombine.high %v5062_v28, %v5066_v43  ;;  %v16715_v26 = vcombine.low %v5062_v28, %v5066_v43 }
 0x384   : > { %6510 = vmatprep.subr.bf16.mxu0 %v16732_v12  ;;  %6563 = vmatprep.subr.bf16.mxu1 %v16860_v5  ;;  %v5194_v47 = vld [vmem:[#allocation5 + $0x1760] sm:$0xff] }
 0x385   : > { %v16843_v48 = vcombine.low %v5190_v23, %v5194_v47  ;;  %v16844_v10 = vcombine.high %v5190_v23, %v5194_v47  ;;  %v5174_v47 = vld [vmem:[#allocation5 + $0x16c0] sm:$0xff] }
 0x387   : > { %6511 = vmatpush2.bf16.msra.mxu0 %v16731_v27  ;;  %6564 = vmatpush2.bf16.msra.mxu1 %v16859_v38  ;;  %v5058_v38 = vld [vmem:[#allocation5 + $0x1320] sm:$0xff] }
 0x388   : > { %6512 = vmatprep.subr.bf16.mxu0 %v16724_v37  ;;  %6565 = vmatprep.subr.bf16.mxu1 %v16852_v57  ;;  %v5054_v37 = vld [vmem:[#allocation5 + $0x1300] sm:$0xff] }
 0x389   : > { %v5182_v57 = vld [vmem:[#allocation5 + $0x1700] sm:$0xff] }
 0x38b   : > { %6513 = vmatpush2.bf16.msra.mxu0 %v16723_v14  ;;  %6566 = vmatpush2.bf16.msra.mxu1 %v16851_v20 }
 0x38c   : > { %6514 = vmatprep.subr.bf16.mxu0 %v16716_v45  ;;  %6567 = vmatprep.subr.bf16.mxu1 %v16844_v10  ;;  %v5050_v45 = vld [vmem:[#allocation5 + $0x12e0] sm:$0xff] }
 0x38d   : > { %v5178_v10 = vld [vmem:[#allocation5 + $0x16e0] sm:$0xff] }
 0x38f   : > { %6515 = vmatpush2.bf16.msra.mxu0 %v16715_v26  ;;  %6568 = vmatpush2.bf16.msra.mxu1 %v16843_v48 }
 0x392   : > { %v4538_v22 = vpop.f32.mrf.mxu0  ;;  %v4591_v2 = vpop.f32.mrf.mxu1 }
 0x393   : > { %v4539_v3 = vadd.f32 %v4538_v22, %v20586_v11  ;;  %v5186_v22 = vld [vmem:[#allocation5 + $0x1720] sm:$0xff] }
 0x394   : > { %v4540_v40 = vpop.f32.mrf.mxu0  ;;  %v4593_v42 = vpop.f32.mrf.mxu1  ;;  %v16835_v28 = vcombine.low %v5182_v57, %v5186_v22 }
 0x395   : > { %v20735_v12 = vadd.f32 %v4591_v2, %v4539_v3  ;;  %v4541_v6 = vadd.f32 %v4540_v40, %v20598_v30  ;;  %v16708_v30 = vcombine.high %v5054_v37, %v5058_v38  ;;  %v16707_v3 = vcombine.low %v5054_v37, %v5058_v38 }
 0x396   : > { %v4542_v5 = vpop.f32.mrf.mxu0  ;;  %v4595_v27 = vpop.f32.mrf.mxu1  ;;  %v16827_v37 = vcombine.low %v5174_v47, %v5178_v10 }
 0x397   : > { %v20738_v59 = vadd.f32 %v4593_v42, %v4541_v6  ;;  %v4543_v11 = vadd.f32 %v4542_v5, %v20602_v49  ;;  %6516 = vmatprep.subr.bf16.mxu0 %v16708_v30  ;;  %v16836_v49 = vcombine.high %v5182_v57, %v5186_v22  ;;  %v5046_v42 = vld [vmem:[#allocation5 + $0x12c0] sm:$0xff]  ;;  %v16828_v57 = vcombine.high %v5174_v47, %v5178_v10 }
 0x398   : > { %v20741_v14 = vpop.f32.mrf.mxu0  ;;  %v20743_v20 = vpop.f32.mrf.mxu1  ;;  %6517 = vmatpush2.bf16.msra.mxu0 %v16707_v3  ;;  %v16700_v5 = vcombine.high %v5046_v42, %v5050_v45  ;;  %v5038_v22 = vld [vmem:[#allocation5 + $0x1280] sm:$0xff] }
 0x399   : > { %v20745_v2 = vadd.f32 %v4595_v27, %v4543_v11  ;;  %6569 = vmatprep.subr.bf16.mxu1 %v16836_v49  ;;  %v16699_v11 = vcombine.low %v5046_v42, %v5050_v45  ;;  %v5042_v3 = vld [vmem:[#allocation5 + $0x12a0] sm:$0xff] }
 0x39a   : > { %v4548_v43 = vpop.f32.mrf.mxu0  ;;  %v4601_v23 = vpop.f32.mrf.mxu1  ;;  %6570 = vmatpush2.bf16.msra.mxu1 %v16835_v28  ;;  %6518 = vmatprep.subr.bf16.mxu0 %v16700_v5  ;;  %v5030_v45 = vld [vmem:[#allocation5 + $0x1240] sm:$0xff] }
 0x39b   : > { %v4549_v40 = vadd.f32 %v4548_v43, %v20608_v52  ;;  %v5166_v43 = vld [vmem:[#allocation5 + $0x1680] sm:$0xff]  ;;  %6571 = vmatprep.subr.bf16.mxu1 %v16828_v57 }
 0x39c   : > { %v4550_v6 = vpop.f32.mrf.mxu0  ;;  %v4603_v26 = vpop.f32.mrf.mxu1  ;;  %6519 = vmatpush2.bf16.msra.mxu0 %v16699_v11  ;;  %v5034_v47 = vld [vmem:[#allocation5 + $0x1260] sm:$0xff] }
 0x39d   : > { %v20748_v27 = vadd.f32 %v4601_v23, %v4549_v40  ;;  %v4551_v48 = vadd.f32 %v4550_v6, %v20612_v63  ;;  %v16692_v23 = vcombine.high %v5038_v22, %v5042_v3  ;;  %v5170_v40 = vld [vmem:[#allocation5 + $0x16a0] sm:$0xff]  ;;  %v16691_v63 = vcombine.low %v5038_v22, %v5042_v3 }
 0x39e   : > { %v4552_v38 = vpop.f32.mrf.mxu0  ;;  %v4605_v49 = vpop.f32.mrf.mxu1  ;;  %6572 = vmatpush2.bf16.msra.mxu1 %v16827_v37  ;;  %v16819_v28 = vcombine.low %v5166_v43, %v5170_v40  ;;  %v16820_v42 = vcombine.high %v5166_v43, %v5170_v40  ;;  %v5158_v6 = vld [vmem:[#allocation5 + $0x1640] sm:$0xff]  ;;  %v16683_v5 = vcombine.low %v5030_v45, %v5034_v47  ;;  %v20760_v40 = vld [vmem:[#allocation5 + $0x15c8] sm:$0xff] }
 0x39f   : > { %v20751_v52 = vadd.f32 %v4603_v26, %v4551_v48  ;;  %v4553_v30 = vadd.f32 %v4552_v38, %v20616_v7  ;;  %6520 = vmatprep.subr.bf16.mxu0 %v16692_v23  ;;  %v16684_v7 = vcombine.high %v5030_v45, %v5034_v47  ;;  %v5162_v26 = vld [vmem:[#allocation5 + $0x1660] sm:$0xff]  ;;  %v20758_v23 = vld [vmem:[#allocation5 + $0x11e8] sm:$0xff] }
 0x3a0   : > { %6521 = vmatpush2.bf16.msra.mxu0 %v16691_v63  ;;  %6573 = vmatprep.subr.bf16.mxu1 %v16820_v42  ;;  %v16811_v10 = vcombine.low %v5158_v6, %v5162_v26  ;;  %v16812_v48 = vcombine.high %v5158_v6, %v5162_v26  ;;  %v5022_v11 = vld [vmem:[#allocation5 + $0x1200] sm:$0xff]  ;;  %v20772_v6 = vpop.f32.mrf.mxu0 }
 0x3a1   : > { %v20754_v33 = vadd.f32 %v4605_v49, %v4553_v30  ;;  %6522 = vmatprep.subr.bf16.mxu0 %v16684_v7  ;;  %v5026_v37 = vld [vmem:[#allocation5 + $0x1220] sm:$0xff]  ;;  %v20756_v49 = vld [vmem:[#allocation5 + $0x11c8] sm:$0xff]  ;;  %v20774_v7 = vpop.f32.mrf.mxu1 }
 0x3a2   : > { %6574 = vmatpush2.bf16.msra.mxu1 %v16819_v28  ;;  %v5150_v38 = vld [vmem:[#allocation5 + $0x1600] sm:$0xff]  ;;  %v16676_v57 = vcombine.high %v5022_v11, %v5026_v37  ;;  %v16675_v22 = vcombine.low %v5022_v11, %v5026_v37  ;;  %v16670_v63 = vcombine.high %v20756_v49, %v20758_v23  ;;  %v20764_v28 = vld [vmem:[#allocation5 + $0x15e8] sm:$0xff] }
 0x3a3   : > { %6575 = vmatprep.subr.bf16.mxu1 %v16812_v48  ;;  %v5154_v30 = vld [vmem:[#allocation5 + $0x1620] sm:$0xff]  ;;  %v16798_v47 = vcombine.high %v20760_v40, %v20764_v28 }
 0x3a4   : > { %6523 = vmatpush2.bf16.msra.mxu0 %v16683_v5  ;;  %v16803_v3 = vcombine.low %v5150_v38, %v5154_v30  ;;  %v16804_v43 = vcombine.high %v5150_v38, %v5154_v30 }
 0x3a5   : > { %6524 = vmatprep.subr.bf16.mxu0 %v16676_v57 }
 0x3a6   : > { %6576 = vmatpush2.bf16.msra.mxu1 %v16811_v10 }
 0x3a7   : > { %6577 = vmatprep.subr.bf16.mxu1 %v16804_v43 }
 0x3a8   : > { %6525 = vmatpush2.bf16.msra.mxu0 %v16675_v22 }
 0x3a9   : > { %6600 = vmatprep.subr.bf16.mxu0 %v16670_v63 }
 0x3aa   : > { %6578 = vmatpush2.bf16.msra.mxu1 %v16803_v3 }
 0x3ab   : > { %6653 = vmatprep.subr.bf16.mxu1 %v16798_v47 }
 0x3d3   : > { %v4644_v26 = vpop.f32.mrf.mxu0  ;;  %v4697_v5 = vpop.f32.mrf.mxu1 }
 0x3d4   : > { %v4645_v10 = vadd.f32 %v4644_v26, %v20622_v60 }
 0x3d5   : > { %v4646_v48 = vpop.f32.mrf.mxu0  ;;  %v4699_v11 = vpop.f32.mrf.mxu1 }
 0x3d6   : > { %v20777_v37 = vadd.f32 %v4697_v5, %v4645_v10  ;;  %v4647_v38 = vadd.f32 %v4646_v48, %v20626_v17 }
 0x3d7   : > { %v4648_v57 = vpop.f32.mrf.mxu0  ;;  %v4701_v30 = vpop.f32.mrf.mxu1 }
 0x3d8   : > { %22869 = vst [vmem:[#allocation37_spill] sm:$0xff] %v20777_v37  ;;  %v20780_v22 = vadd.f32 %v4699_v11, %v4647_v38  ;;  %v4649_v3 = vadd.f32 %v4648_v57, %v20630_v25  ;;  %v5119_v37 = vld [vmem:[#allocation5 + $0x1508] sm:$0xff] }
 0x3d9   : > { %v20783_v43 = vpop.f32.mrf.mxu0  ;;  %v20785_v63 = vpop.f32.mrf.mxu1 }
 0x3da   : > { %22870 = vst [vmem:[#allocation38_spill] sm:$0xff] %v20780_v22  ;;  %22871 = vst [vmem:[#allocation39_spill] sm:$0xff] %v20783_v43  ;;  %v20787_v47 = vadd.f32 %v4701_v30, %v4649_v3  ;;  %v5003_v22 = vld [vmem:[#allocation5 + $0x1168] sm:$0xff] }
 0x3db   : > { %22872 = vst [vmem:[#allocation40_spill] sm:$0xff] %v20785_v63  ;;  %v4654_v45 = vpop.f32.mrf.mxu0  ;;  %v4707_v60 = vpop.f32.mrf.mxu1  ;;  %v4991_v63 = vld [vmem:[#allocation5 + $0x1108] sm:$0xff] }
 0x3dc   : > { %22873 = vst [vmem:[#allocation41_spill] sm:$0xff] %v20787_v47  ;;  %v4655_v26 = vadd.f32 %v4654_v45, %v20636_v46 }
 0x3dd   : > { %v4656_v5 = vpop.f32.mrf.mxu0  ;;  %v4709_v10 = vpop.f32.mrf.mxu1 }
 0x3de   : > { %v20790_v42 = vadd.f32 %v4707_v60, %v4655_v26  ;;  %v4657_v17 = vadd.f32 %v4656_v5, %v20640_v4 }
 0x3df   : > { %v4658_v48 = vpop.f32.mrf.mxu0  ;;  %v4711_v38 = vpop.f32.mrf.mxu1 }
 0x3e0   : > { %22874 = vst [vmem:[#allocation42_spill] sm:$0xff] %v20790_v42  ;;  %v20793_v11 = vadd.f32 %v4709_v10, %v4657_v17  ;;  %v4659_v25 = vadd.f32 %v4658_v48, %v20644_v13 }
 0x3e1   : > { %v20798_v30 = vpop.f32.mrf.mxu0  ;;  %v20800_v3 = vpop.f32.mrf.mxu1 }
 0x3e2   : > { %22875 = vst [vmem:[#allocation43_spill] sm:$0xff] %v20793_v11  ;;  %v20796_v57 = vadd.f32 %v4711_v38, %v4659_v25  ;;  %22877 = vst [vmem:[#allocation45_spill] sm:$0xff] %v20798_v30  ;;  %v5131_v11 = vld [vmem:[#allocation5 + $0x1568] sm:$0xff] }
 0x3e3   : > { %22878 = vst [vmem:[#allocation46_spill] sm:$0xff] %v20800_v3  ;;  %v5127_v3 = vld [vmem:[#allocation5 + $0x1548] sm:$0xff] }
 0x3e4   : > { %22876 = vst [vmem:[#allocation44_spill] sm:$0xff] %v20796_v57  ;;  %v16782_v30 = vcombine.high %v5127_v3, %v5131_v11 }
 0x414   : > { %v4750_v41 = vpop.f32.mrf.mxu0  ;;  %v4803_v46 = vpop.f32.mrf.mxu1 }
 0x415   : > { %v4751_v45 = vadd.f32 %v4750_v41, %v20650_v18 }
 0x416   : > { %v4752_v60 = vpop.f32.mrf.mxu0  ;;  %v4805_v26 = vpop.f32.mrf.mxu1 }
 0x417   : > { %v20803_v34 = vadd.f32 %v4803_v46, %v4751_v45  ;;  %v4753_v4 = vadd.f32 %v4752_v60, %v20654_v36 }
 0x418   : > { %v4754_v5 = vpop.f32.mrf.mxu0  ;;  %v4807_v10 = vpop.f32.mrf.mxu1 }
 0x419   : > { %22879 = vst [vmem:[#allocation47_spill] sm:$0xff] %v20803_v34  ;;  %v20806_v13 = vadd.f32 %v4805_v26, %v4753_v4  ;;  %v4755_v17 = vadd.f32 %v4754_v5, %v20658_v24 }
 0x41a   : > { %v20809_v48 = vpop.f32.mrf.mxu0  ;;  %v20811_v25 = vpop.f32.mrf.mxu1 }
 0x41b   : > { %22880 = vst [vmem:[#allocation48_spill] sm:$0xff] %v20806_v13  ;;  %22881 = vst [vmem:[#allocation49_spill] sm:$0xff] %v20809_v48  ;;  %v20813_v38 = vadd.f32 %v4807_v10, %v4755_v17  ;;  %v4999_v48 = vld [vmem:[#allocation5 + $0x1148] sm:$0xff] }
 0x41c   : > { %22882 = vst [vmem:[#allocation50_spill] sm:$0xff] %v20811_v25  ;;  %v4760_v57 = vpop.f32.mrf.mxu0  ;;  %v4813_v18 = vpop.f32.mrf.mxu1  ;;  %v16654_v42 = vcombine.high %v4999_v48, %v5003_v22 }
 0x41d   : > { %22883 = vst [vmem:[#allocation51_spill] sm:$0xff] %v20813_v38  ;;  %v4761_v41 = vadd.f32 %v4760_v57, %v20664_v19  ;;  %v5139_v38 = vld [vmem:[#allocation5 + $0x15a8] sm:$0xff] }
 0x41e   : > { %v4762_v46 = vpop.f32.mrf.mxu0  ;;  %v4815_v45 = vpop.f32.mrf.mxu1 }
 0x41f   : > { %v20816_v34 = vadd.f32 %v4813_v18, %v4761_v41  ;;  %v4763_v36 = vadd.f32 %v4762_v46, %v20668_v53  ;;  %v5011_v53 = vld [vmem:[#allocation5 + $0x11a8] sm:$0xff] }
 0x420   : > { %v4764_v60 = vpop.f32.mrf.mxu0  ;;  %v4817_v26 = vpop.f32.mrf.mxu1  ;;  %v5135_v46 = vld [vmem:[#allocation5 + $0x1588] sm:$0xff] }
 0x421   : > { %22884 = vst [vmem:[#allocation52_spill] sm:$0xff] %v20816_v34  ;;  %v20819_v4 = vadd.f32 %v4815_v45, %v4763_v36  ;;  %v4765_v24 = vadd.f32 %v4764_v60, %v20672_v31  ;;  %v5007_v34 = vld [vmem:[#allocation5 + $0x1188] sm:$0xff] }
 0x422   : > { %v20822_v5 = vpop.f32.mrf.mxu0  ;;  %v20824_v10 = vpop.f32.mrf.mxu1 }
 0x423   : > { %22885 = vst [vmem:[#allocation53_spill] sm:$0xff] %v20819_v4  ;;  %22886 = vst [vmem:[#allocation54_spill] sm:$0xff] %v20822_v5  ;;  %v20826_v17 = vadd.f32 %v4817_v26, %v4765_v24  ;;  %v16790_v5 = vcombine.high %v5135_v46, %v5139_v38 }
 0x424   : > { %22887 = vst [vmem:[#allocation55_spill] sm:$0xff] %v20824_v10  ;;  %v16662_v10 = vcombine.high %v5007_v34, %v5011_v53 }
 0x425   : > { %22888 = vst [vmem:[#allocation56_spill] sm:$0xff] %v20826_v17  ;;  %v4877_v13 = vpop.f32.mrf.mxu0  ;;  %v4930_v19 = vpop.f32.mrf.mxu1 }
 0x427   : > { %v4879_v57 = vpop.f32.mrf.mxu0  ;;  %v4932_v25 = vpop.f32.mrf.mxu1 }
 0x429   : > { %v4881_v18 = vpop.f32.mrf.mxu0  ;;  %v4934_v41 = vpop.f32.mrf.mxu1 }
 0x42a   : > { %v20832_v60 = vpack.c.bf16 %v4881_v18, %v4877_v13  ;;  %v20834_v26 = vpack.c.bf16 %v4934_v41, %v4930_v19  ;;  %v22889_v13 = vcombine.low %v20756_v49, %v20758_v23  ;;  %v16661_v19 = vcombine.low %v5007_v34, %v5011_v53  ;;  %v5115_v53 = vld [vmem:[#allocation5 + $0x14e8] sm:$0xff] }
 0x42b   : > { %v4883_v45 = vpop.f32.mrf.mxu0  ;;  %v4936_v36 = vpop.f32.mrf.mxu1  ;;  %v16789_v18 = vcombine.low %v5135_v46, %v5139_v38  ;;  %v16653_v23 = vcombine.low %v4999_v48, %v5003_v22  ;;  %v16781_v38 = vcombine.low %v5127_v3, %v5131_v11  ;;  %v4987_v22 = vld [vmem:[#allocation5 + $0x10e8] sm:$0xff] }
 0x42c   : > { %v20828_v4 = vpack.c.bf16 %v4883_v45, %v4879_v57  ;;  %v20830_v31 = vpack.c.bf16 %v4936_v36, %v4932_v25  ;;  %v22890_v25 = vcombine.low %v20760_v40, %v20764_v28  ;;  %v5123_v40 = vld [vmem:[#allocation5 + $0x1528] sm:$0xff] }
 0x42d   : > { %v4887_v24 = vpop.f32.mrf.mxu0  ;;  %v4940_v17 = vpop.f32.mrf.mxu1  ;;  %v5111_v48 = vld [vmem:[#allocation5 + $0x14c8] sm:$0xff]  ;;  %v16773_v11 = vcombine.low %v5119_v37, %v5123_v40 }
 0x42e   : > { %6526 = vmatprep.mubr.bf16.mxu0 %v20828_v4  ;;  %6579 = vmatprep.mubr.bf16.mxu1 %v20830_v31  ;;  %v4975_v3 = vld [vmem:[#allocation5 + $0x1088] sm:$0xff] }
 0x42f   : > { %v4889_v57 = vpop.f32.mrf.mxu0  ;;  %v4942_v45 = vpop.f32.mrf.mxu1  ;;  %6527 = vmatmul.mubr.bf16.vlgmr.msra.gmra.mxu0 %v20832_v60  ;;  %6580 = vmatmul.mubr.bf16.vlgmr.msra.gmra.mxu1 %v20834_v26  ;;  %v4979_v46 = vld [vmem:[#allocation5 + $0x10a8] sm:$0xff] }
 0x430   : > { %6601 = vmatpush1.bf16.msra.mxu0 %v22889_v13  ;;  %6654 = vmatpush1.bf16.msra.mxu1 %v22890_v25  ;;  %v4995_v13 = vld [vmem:[#allocation5 + $0x1128] sm:$0xff]  ;;  %v16765_v25 = vcombine.low %v5111_v48, %v5115_v53 }
 0x431   : > { %v4891_v41 = vpop.f32.mrf.mxu0  ;;  %v4944_v36 = vpop.f32.mrf.mxu1  ;;  %6602 = vmatprep.subr.bf16.mxu0 %v16662_v10  ;;  %6655 = vmatprep.subr.bf16.mxu1 %v16790_v5  ;;  %v4983_v5 = vld [vmem:[#allocation5 + $0x10c8] sm:$0xff]  ;;  %v16646_v10 = vcombine.high %v4991_v63, %v4995_v13 }
 0x432   : > { %v20846_v47 = vpack.c.bf16 %v4891_v41, %v4887_v24  ;;  %v20848_v43 = vpack.c.bf16 %v4944_v36, %v4940_v17  ;;  %v16774_v17 = vcombine.high %v5119_v37, %v5123_v40  ;;  %v5103_v24 = vld [vmem:[#allocation5 + $0x1488] sm:$0xff] }
 0x433   : > { %v4893_v44 = vpop.f32.mrf.mxu0  ;;  %v4946_v49 = vpop.f32.mrf.mxu1  ;;  %v5095_v41 = vld [vmem:[#allocation5 + $0x1448] sm:$0xff] }
 0x434   : > { %v20850_v28 = vpack.c.bf16 %v4893_v44, %v4889_v57  ;;  %v20852_v34 = vpack.c.bf16 %v4946_v49, %v4942_v45  ;;  %6603 = vmatpush1.bf16.msra.mxu0 %v16661_v19  ;;  %6656 = vmatpush1.bf16.msra.mxu1 %v16789_v18  ;;  %v16645_v44 = vcombine.low %v4991_v63, %v4995_v13  ;;  %v5107_v57 = vld [vmem:[#allocation5 + $0x14a8] sm:$0xff] }
 0x435   : > { %6604 = vmatprep.subr.bf16.mxu0 %v16654_v42  ;;  %6657 = vmatprep.subr.bf16.mxu1 %v16782_v30  ;;  %v16638_v42 = vcombine.high %v4983_v5, %v4987_v22  ;;  %v16766_v30 = vcombine.high %v5111_v48, %v5115_v53  ;;  %v16637_v45 = vcombine.low %v4983_v5, %v4987_v22  ;;  %v4967_v19 = vld [vmem:[#allocation5 + $0x1048] sm:$0xff] }
 0x436   : > { %6536 = vmatprep.mubr.bf16.mxu0 %v20850_v28  ;;  %6589 = vmatprep.mubr.bf16.mxu1 %v20852_v34  ;;  %v16630_v63 = vcombine.high %v4975_v3, %v4979_v46  ;;  %v16758_v37 = vcombine.high %v5103_v24, %v5107_v57  ;;  %v4971_v18 = vld [vmem:[#allocation5 + $0x1068] sm:$0xff]  ;;  %v16629_v49 = vcombine.low %v4975_v3, %v4979_v46 }
 0x437   : > { %6537 = vmatmul.mubr.bf16.gmra.mxu0 %v20846_v47  ;;  %6590 = vmatmul.mubr.bf16.gmra.mxu1 %v20848_v43  ;;  %v5099_v36 = vld [vmem:[#allocation5 + $0x1468] sm:$0xff]  ;;  %v16622_v13 = vcombine.high %v4967_v19, %v4971_v18  ;;  %v16621_v22 = vcombine.low %v4967_v19, %v4971_v18 }
 0x438   : > { %6605 = vmatpush1.bf16.msra.mxu0 %v16653_v23  ;;  %6658 = vmatpush1.bf16.msra.mxu1 %v16781_v38  ;;  %v16757_v23 = vcombine.low %v5103_v24, %v5107_v57  ;;  %v16750_v40 = vcombine.high %v5095_v41, %v5099_v36  ;;  %v4959_v38 = vld [vmem:[#allocation5 + $0x1008] sm:$0xff]  ;;  %v16749_v48 = vcombine.low %v5095_v41, %v5099_v36 }
 0x439   : > { %6632 = vmatprep.mubr.bf16.mxu0 %v20828_v4  ;;  %6685 = vmatprep.mubr.bf16.mxu1 %v20830_v31  ;;  %v5087_v5 = vld [vmem:[#allocation5 + $0x1408] sm:$0xff] }
 0x43a   : > { %6606 = vmatprep.subr.bf16.mxu0 %v16646_v10  ;;  %6659 = vmatprep.subr.bf16.mxu1 %v16774_v17  ;;  %v4963_v10 = vld [vmem:[#allocation5 + $0x1028] sm:$0xff] }
 0x43b   : > { %v5091_v17 = vld [vmem:[#allocation5 + $0x1428] sm:$0xff]  ;;  %v16614_v53 = vcombine.high %v4959_v38, %v4963_v10  ;;  %v16613_v46 = vcombine.low %v4959_v38, %v4963_v10 }
 0x43c   : > { %6607 = vmatpush1.bf16.msra.mxu0 %v16645_v44  ;;  %6660 = vmatpush1.bf16.msra.mxu1 %v16773_v11  ;;  %v16742_v44 = vcombine.high %v5087_v5, %v5091_v17  ;;  %v5079_v11 = vld [vmem:[#allocation5 + $0x13c8] sm:$0xff]  ;;  %v16741_v24 = vcombine.low %v5087_v5, %v5091_v17 }
 0x43d   : > { %6608 = vmatprep.subr.bf16.mxu0 %v16638_v42  ;;  %6661 = vmatprep.subr.bf16.mxu1 %v16766_v30  ;;  %v5083_v42 = vld [vmem:[#allocation5 + $0x13e8] sm:$0xff] }
 0x43e   : > { %v5207_v30 = vld [vmem:[#allocation5 + $0x17c8] sm:$0xff]  ;;  %v16734_v57 = vcombine.high %v5079_v11, %v5083_v42  ;;  %v16733_v18 = vcombine.low %v5079_v11, %v5083_v42 }
 0x43f   : > { %v5211_v3 = vld [vmem:[#allocation5 + $0x17e8] sm:$0xff] }
 0x440   : > { %6609 = vmatpush1.bf16.msra.mxu0 %v16637_v45  ;;  %6662 = vmatpush1.bf16.msra.mxu1 %v16765_v25  ;;  %v16862_v45 = vcombine.high %v5207_v30, %v5211_v3  ;;  %v5071_v25 = vld [vmem:[#allocation5 + $0x1388] sm:$0xff]  ;;  %v16861_v41 = vcombine.low %v5207_v30, %v5211_v3 }
 0x441   : > { %6610 = vmatprep.subr.bf16.mxu0 %v16630_v63  ;;  %6663 = vmatprep.subr.bf16.mxu1 %v16758_v37  ;;  %v5075_v63 = vld [vmem:[#allocation5 + $0x13a8] sm:$0xff] }
 0x442   : > { %v5199_v37 = vld [vmem:[#allocation5 + $0x1788] sm:$0xff]  ;;  %v16726_v36 = vcombine.high %v5071_v25, %v5075_v63  ;;  %v16725_v10 = vcombine.low %v5071_v25, %v5075_v63 }
 0x443   : > { %v5203_v19 = vld [vmem:[#allocation5 + $0x17a8] sm:$0xff] }
 0x444   : > { %6611 = vmatpush1.bf16.msra.mxu0 %v16629_v49  ;;  %6664 = vmatpush1.bf16.msra.mxu1 %v16757_v23  ;;  %v16854_v49 = vcombine.high %v5199_v37, %v5203_v19  ;;  %v5063_v23 = vld [vmem:[#allocation5 + $0x1348] sm:$0xff]  ;;  %v16853_v5 = vcombine.low %v5199_v37, %v5203_v19 }
 0x445   : > { %6612 = vmatprep.subr.bf16.mxu0 %v16622_v13  ;;  %6665 = vmatprep.subr.bf16.mxu1 %v16750_v40  ;;  %v5067_v13 = vld [vmem:[#allocation5 + $0x1368] sm:$0xff] }
 0x446   : > { %v5191_v40 = vld [vmem:[#allocation5 + $0x1748] sm:$0xff]  ;;  %v16718_v17 = vcombine.high %v5063_v23, %v5067_v13  ;;  %v16717_v42 = vcombine.low %v5063_v23, %v5067_v13 }
 0x447   : > { %v5195_v38 = vld [vmem:[#allocation5 + $0x1768] sm:$0xff] }
 0x448   : > { %6613 = vmatpush1.bf16.msra.mxu0 %v16621_v22  ;;  %6666 = vmatpush1.bf16.msra.mxu1 %v16749_v48  ;;  %v16846_v22 = vcombine.high %v5191_v40, %v5195_v38  ;;  %v5055_v48 = vld [vmem:[#allocation5 + $0x1308] sm:$0xff]  ;;  %v16845_v30 = vcombine.low %v5191_v40, %v5195_v38 }
 0x449   : > { %6614 = vmatprep.subr.bf16.mxu0 %v16614_v53  ;;  %6667 = vmatprep.subr.bf16.mxu1 %v16742_v44  ;;  %v5059_v53 = vld [vmem:[#allocation5 + $0x1328] sm:$0xff] }
 0x44a   : > { %v5183_v44 = vld [vmem:[#allocation5 + $0x1708] sm:$0xff]  ;;  %v16710_v3 = vcombine.high %v5055_v48, %v5059_v53  ;;  %v16709_v63 = vcombine.low %v5055_v48, %v5059_v53 }
 0x44b   : > { %v5187_v11 = vld [vmem:[#allocation5 + $0x1728] sm:$0xff] }
 0x44c   : > { %6615 = vmatpush1.bf16.msra.mxu0 %v16613_v46  ;;  %6668 = vmatpush1.bf16.msra.mxu1 %v16741_v24  ;;  %v16838_v46 = vcombine.high %v5183_v44, %v5187_v11  ;;  %v5047_v24 = vld [vmem:[#allocation5 + $0x12c8] sm:$0xff]  ;;  %v16837_v37 = vcombine.low %v5183_v44, %v5187_v11 }
 0x44d   : > { %6616 = vmatprep.subr.bf16.mxu0 %v16734_v57  ;;  %6669 = vmatprep.subr.bf16.mxu1 %v16862_v45  ;;  %v5051_v57 = vld [vmem:[#allocation5 + $0x12e8] sm:$0xff] }
 0x44e   : > { %v5175_v45 = vld [vmem:[#allocation5 + $0x16c8] sm:$0xff]  ;;  %v16702_v19 = vcombine.high %v5047_v24, %v5051_v57  ;;  %v16701_v13 = vcombine.low %v5047_v24, %v5051_v57 }
 0x44f   : > { %v5179_v25 = vld [vmem:[#allocation5 + $0x16e8] sm:$0xff] }
 0x450   : > { %6617 = vmatpush2.bf16.msra.mxu0 %v16733_v18  ;;  %6670 = vmatpush2.bf16.msra.mxu1 %v16861_v41  ;;  %v16830_v18 = vcombine.high %v5175_v45, %v5179_v25  ;;  %v5039_v41 = vld [vmem:[#allocation5 + $0x1288] sm:$0xff]  ;;  %v16829_v40 = vcombine.low %v5175_v45, %v5179_v25 }
 0x451   : > { %6618 = vmatprep.subr.bf16.mxu0 %v16726_v36  ;;  %6671 = vmatprep.subr.bf16.mxu1 %v16854_v49  ;;  %v5043_v36 = vld [vmem:[#allocation5 + $0x12a8] sm:$0xff] }
 0x452   : > { %v5167_v49 = vld [vmem:[#allocation5 + $0x1688] sm:$0xff]  ;;  %v16694_v38 = vcombine.high %v5039_v41, %v5043_v36  ;;  %v16693_v53 = vcombine.low %v5039_v41, %v5043_v36  ;;  %v5148_v41 = vld [vmem:[#allocation5 + $0x15f0] sm:$0xff] }
 0x453   : > { %v5171_v23 = vld [vmem:[#allocation5 + $0x16a8] sm:$0xff] }
 0x454   : > { %6619 = vmatpush2.bf16.msra.mxu0 %v16725_v10  ;;  %6672 = vmatpush2.bf16.msra.mxu1 %v16853_v5  ;;  %v16822_v10 = vcombine.high %v5167_v49, %v5171_v23  ;;  %v5031_v5 = vld [vmem:[#allocation5 + $0x1248] sm:$0xff]  ;;  %v16821_v44 = vcombine.low %v5167_v49, %v5171_v23 }
 0x455   : > { %6620 = vmatprep.subr.bf16.mxu0 %v16718_v17  ;;  %6673 = vmatprep.subr.bf16.mxu1 %v16846_v22  ;;  %v5035_v17 = vld [vmem:[#allocation5 + $0x1268] sm:$0xff] }
 0x456   : > { %v5159_v22 = vld [vmem:[#allocation5 + $0x1648] sm:$0xff]  ;;  %v16686_v11 = vcombine.high %v5031_v5, %v5035_v17  ;;  %v16685_v57 = vcombine.low %v5031_v5, %v5035_v17  ;;  %v5140_v5 = vld [vmem:[#allocation5 + $0x15b0] sm:$0xff] }
 0x457   : > { %v5163_v48 = vld [vmem:[#allocation5 + $0x1668] sm:$0xff] }
 0x458   : > { %6621 = vmatpush2.bf16.msra.mxu0 %v16717_v42  ;;  %6674 = vmatpush2.bf16.msra.mxu1 %v16845_v30  ;;  %v16814_v42 = vcombine.high %v5159_v22, %v5163_v48  ;;  %v5023_v30 = vld [vmem:[#allocation5 + $0x1208] sm:$0xff]  ;;  %v16813_v45 = vcombine.low %v5159_v22, %v5163_v48 }
 0x459   : > { %6622 = vmatprep.subr.bf16.mxu0 %v16710_v3  ;;  %6675 = vmatprep.subr.bf16.mxu1 %v16838_v46  ;;  %v5027_v3 = vld [vmem:[#allocation5 + $0x1228] sm:$0xff] }
 0x45a   : > { %v5151_v46 = vld [vmem:[#allocation5 + $0x1608] sm:$0xff]  ;;  %v16678_v25 = vcombine.high %v5023_v30, %v5027_v3  ;;  %v16677_v36 = vcombine.low %v5023_v30, %v5027_v3  ;;  %v5132_v30 = vld [vmem:[#allocation5 + $0x1570] sm:$0xff] }
 0x45b   : > { %v5155_v24 = vld [vmem:[#allocation5 + $0x1628] sm:$0xff] }
 0x45c   : > { %6623 = vmatpush2.bf16.msra.mxu0 %v16709_v63  ;;  %6676 = vmatpush2.bf16.msra.mxu1 %v16837_v37  ;;  %v16806_v63 = vcombine.high %v5151_v46, %v5155_v24  ;;  %v5016_v37 = vld [vmem:[#allocation5 + $0x11d0] sm:$0xff]  ;;  %v16805_v49 = vcombine.low %v5151_v46, %v5155_v24 }
 0x45d   : > { %6624 = vmatprep.subr.bf16.mxu0 %v16702_v19  ;;  %6677 = vmatprep.subr.bf16.mxu1 %v16830_v18  ;;  %v5020_v19 = vld [vmem:[#allocation5 + $0x11f0] sm:$0xff] }
 0x45e   : > { %v5144_v18 = vld [vmem:[#allocation5 + $0x15d0] sm:$0xff]  ;;  %v16672_v23 = vcombine.high %v5016_v37, %v5020_v19  ;;  %v16671_v17 = vcombine.low %v5016_v37, %v5020_v19 }
 0x45f   : > { %v16799_v22 = vcombine.low %v5144_v18, %v5148_v41  ;;  %v5124_v37 = vld [vmem:[#allocation5 + $0x1530] sm:$0xff] }
 0x460   : > { %6625 = vmatpush2.bf16.msra.mxu0 %v16701_v13  ;;  %6678 = vmatpush2.bf16.msra.mxu1 %v16829_v40  ;;  %v16800_v13 = vcombine.high %v5144_v18, %v5148_v41  ;;  %v5008_v40 = vld [vmem:[#allocation5 + $0x1190] sm:$0xff] }
 0x461   : > { %6626 = vmatprep.subr.bf16.mxu0 %v16694_v38  ;;  %6679 = vmatprep.subr.bf16.mxu1 %v16822_v10  ;;  %v5012_v38 = vld [vmem:[#allocation5 + $0x11b0] sm:$0xff] }
 0x462   : > { %v5136_v10 = vld [vmem:[#allocation5 + $0x1590] sm:$0xff]  ;;  %v16664_v48 = vcombine.high %v5008_v40, %v5012_v38  ;;  %v16663_v3 = vcombine.low %v5008_v40, %v5012_v38 }
 0x463   : > { %v16791_v46 = vcombine.low %v5136_v10, %v5140_v5  ;;  %v5116_v40 = vld [vmem:[#allocation5 + $0x14f0] sm:$0xff] }
 0x464   : > { %6627 = vmatpush2.bf16.msra.mxu0 %v16693_v53  ;;  %6680 = vmatpush2.bf16.msra.mxu1 %v16821_v44  ;;  %v16792_v53 = vcombine.high %v5136_v10, %v5140_v5  ;;  %v5000_v44 = vld [vmem:[#allocation5 + $0x1150] sm:$0xff] }
 0x465   : > { %6628 = vmatprep.subr.bf16.mxu0 %v16686_v11  ;;  %6681 = vmatprep.subr.bf16.mxu1 %v16814_v42  ;;  %v5004_v11 = vld [vmem:[#allocation5 + $0x1170] sm:$0xff] }
 0x466   : > { %v5128_v42 = vld [vmem:[#allocation5 + $0x1550] sm:$0xff]  ;;  %v16656_v24 = vcombine.high %v5000_v44, %v5004_v11  ;;  %v16655_v19 = vcombine.low %v5000_v44, %v5004_v11 }
 0x467   : > { %v16783_v18 = vcombine.low %v5128_v42, %v5132_v30  ;;  %v5108_v44 = vld [vmem:[#allocation5 + $0x14b0] sm:$0xff] }
 0x468   : > { %6629 = vmatpush2.bf16.msra.mxu0 %v16685_v57  ;;  %6682 = vmatpush2.bf16.msra.mxu1 %v16813_v45  ;;  %v16784_v57 = vcombine.high %v5128_v42, %v5132_v30  ;;  %v4992_v45 = vld [vmem:[#allocation5 + $0x1110] sm:$0xff] }
 0x469   : > { %6630 = vmatprep.subr.bf16.mxu0 %v16678_v25  ;;  %6683 = vmatprep.subr.bf16.mxu1 %v16806_v63  ;;  %v4996_v25 = vld [vmem:[#allocation5 + $0x1130] sm:$0xff] }
 0x46a   : > { %v5120_v63 = vld [vmem:[#allocation5 + $0x1510] sm:$0xff]  ;;  %v16648_v41 = vcombine.high %v4992_v45, %v4996_v25  ;;  %v16647_v38 = vcombine.low %v4992_v45, %v4996_v25 }
 0x46b   : > { %v16775_v10 = vcombine.low %v5120_v63, %v5124_v37  ;;  %v5100_v45 = vld [vmem:[#allocation5 + $0x1470] sm:$0xff] }
 0x46c   : > { %6631 = vmatpush2.bf16.msra.mxu0 %v16677_v36  ;;  %6684 = vmatpush2.bf16.msra.mxu1 %v16805_v49  ;;  %v16776_v36 = vcombine.high %v5120_v63, %v5124_v37  ;;  %v4984_v49 = vld [vmem:[#allocation5 + $0x10d0] sm:$0xff] }
 0x46d   : > { %6706 = vmatprep.subr.bf16.mxu0 %v16672_v23  ;;  %6759 = vmatprep.subr.bf16.mxu1 %v16800_v13  ;;  %v4988_v23 = vld [vmem:[#allocation5 + $0x10f0] sm:$0xff] }
 0x46e   : > { %v5112_v13 = vld [vmem:[#allocation5 + $0x14d0] sm:$0xff]  ;;  %v16640_v5 = vcombine.high %v4984_v49, %v4988_v23  ;;  %v16639_v11 = vcombine.low %v4984_v49, %v4988_v23 }
 0x46f   : > { %6633 = vmatmul.mubr.bf16.vlgmr.msra.gmra.mxu0 %v20832_v60  ;;  %6686 = vmatmul.mubr.bf16.vlgmr.msra.gmra.mxu1 %v20834_v26  ;;  %v16767_v42 = vcombine.low %v5112_v13, %v5116_v40  ;;  %v5092_v49 = vld [vmem:[#allocation5 + $0x1430] sm:$0xff] }
 0x470   : > { %6642 = vmatprep.mubr.bf16.mxu0 %v20850_v28  ;;  %6695 = vmatprep.mubr.bf16.mxu1 %v20852_v34 }
 0x471   : > { %6707 = vmatpush1.bf16.msra.mxu0 %v16671_v17  ;;  %6760 = vmatpush1.bf16.msra.mxu1 %v16799_v22  ;;  %v16768_v17 = vcombine.high %v5112_v13, %v5116_v40  ;;  %v4976_v22 = vld [vmem:[#allocation5 + $0x1090] sm:$0xff] }
 0x472   : > { %6708 = vmatprep.subr.bf16.mxu0 %v16664_v48  ;;  %6761 = vmatprep.subr.bf16.mxu1 %v16792_v53  ;;  %v4980_v48 = vld [vmem:[#allocation5 + $0x10b0] sm:$0xff] }
 0x473   : > { %v5104_v53 = vld [vmem:[#allocation5 + $0x1490] sm:$0xff]  ;;  %v16632_v30 = vcombine.high %v4976_v22, %v4980_v48  ;;  %v16631_v25 = vcombine.low %v4976_v22, %v4980_v48 }
 0x474   : > { %v16759_v63 = vcombine.low %v5104_v53, %v5108_v44  ;;  %v5212_v22 = vld [vmem:[#allocation5 + $0x17f0] sm:$0xff] }
 0x475   : > { %6709 = vmatpush1.bf16.msra.mxu0 %v16663_v3  ;;  %6762 = vmatpush1.bf16.msra.mxu1 %v16791_v46  ;;  %v16760_v3 = vcombine.high %v5104_v53, %v5108_v44  ;;  %v4968_v46 = vld [vmem:[#allocation5 + $0x1050] sm:$0xff] }
 0x476   : > { %6710 = vmatprep.subr.bf16.mxu0 %v16656_v24  ;;  %6763 = vmatprep.subr.bf16.mxu1 %v16784_v57  ;;  %v4972_v24 = vld [vmem:[#allocation5 + $0x1070] sm:$0xff] }
 0x477   : > { %6643 = vmatmul.mubr.bf16.gmra.mxu0 %v20846_v47  ;;  %6696 = vmatmul.mubr.bf16.gmra.mxu1 %v20848_v43  ;;  %v5096_v57 = vld [vmem:[#allocation5 + $0x1450] sm:$0xff]  ;;  %v16624_v37 = vcombine.high %v4968_v46, %v4972_v24  ;;  %v16623_v23 = vcombine.low %v4968_v46, %v4972_v24 }
 0x478   : > { %6738 = vmatprep.mubr.bf16.mxu0 %v20828_v4  ;;  %6791 = vmatprep.mubr.bf16.mxu1 %v20830_v31  ;;  %v16751_v13 = vcombine.low %v5096_v57, %v5100_v45  ;;  %v5204_v46 = vld [vmem:[#allocation5 + $0x17b0] sm:$0xff] }
 0x479   : > { %6711 = vmatpush1.bf16.msra.mxu0 %v16655_v19  ;;  %6764 = vmatpush1.bf16.msra.mxu1 %v16783_v18  ;;  %v16752_v19 = vcombine.high %v5096_v57, %v5100_v45  ;;  %v4960_v18 = vld [vmem:[#allocation5 + $0x1010] sm:$0xff] }
 0x47a   : > { %6712 = vmatprep.subr.bf16.mxu0 %v16648_v41  ;;  %6765 = vmatprep.subr.bf16.mxu1 %v16776_v36  ;;  %v4964_v41 = vld [vmem:[#allocation5 + $0x1030] sm:$0xff] }
 0x47b   : > { %v5088_v36 = vld [vmem:[#allocation5 + $0x1410] sm:$0xff]  ;;  %v16616_v40 = vcombine.high %v4960_v18, %v4964_v41  ;;  %v16615_v48 = vcombine.low %v4960_v18, %v4964_v41 }
 0x47c   : > { %v16743_v53 = vcombine.low %v5088_v36, %v5092_v49  ;;  %v5196_v18 = vld [vmem:[#allocation5 + $0x1770] sm:$0xff] }
 0x47d   : > { %6713 = vmatpush1.bf16.msra.mxu0 %v16647_v38  ;;  %6766 = vmatpush1.bf16.msra.mxu1 %v16775_v10  ;;  %v16744_v38 = vcombine.high %v5088_v36, %v5092_v49  ;;  %v5080_v10 = vld [vmem:[#allocation5 + $0x13d0] sm:$0xff] }
 0x47e   : > { %6714 = vmatprep.subr.bf16.mxu0 %v16640_v5  ;;  %6767 = vmatprep.subr.bf16.mxu1 %v16768_v17  ;;  %v5084_v5 = vld [vmem:[#allocation5 + $0x13f0] sm:$0xff] }
 0x47f   : > { %v5208_v17 = vld [vmem:[#allocation5 + $0x17d0] sm:$0xff]  ;;  %v16736_v44 = vcombine.high %v5080_v10, %v5084_v5  ;;  %v16735_v24 = vcombine.low %v5080_v10, %v5084_v5 }
 0x480   : > { %v16863_v57 = vcombine.low %v5208_v17, %v5212_v22  ;;  %v5188_v10 = vld [vmem:[#allocation5 + $0x1730] sm:$0xff] }
 0x481   : > { %6715 = vmatpush1.bf16.msra.mxu0 %v16639_v11  ;;  %6768 = vmatpush1.bf16.msra.mxu1 %v16767_v42  ;;  %v16864_v11 = vcombine.high %v5208_v17, %v5212_v22  ;;  %v5072_v42 = vld [vmem:[#allocation5 + $0x1390] sm:$0xff] }
 0x482   : > { %6716 = vmatprep.subr.bf16.mxu0 %v16632_v30  ;;  %6769 = vmatprep.subr.bf16.mxu1 %v16760_v3  ;;  %v5076_v30 = vld [vmem:[#allocation5 + $0x13b0] sm:$0xff] }
 0x483   : > { %v5200_v3 = vld [vmem:[#allocation5 + $0x1790] sm:$0xff]  ;;  %v16728_v45 = vcombine.high %v5072_v42, %v5076_v30  ;;  %v16727_v41 = vcombine.low %v5072_v42, %v5076_v30 }
 0x484   : > { %v16855_v36 = vcombine.low %v5200_v3, %v5204_v46  ;;  %v5180_v42 = vld [vmem:[#allocation5 + $0x16f0] sm:$0xff] }
 0x485   : > { %6717 = vmatpush1.bf16.msra.mxu0 %v16631_v25  ;;  %6770 = vmatpush1.bf16.msra.mxu1 %v16759_v63  ;;  %v16856_v25 = vcombine.high %v5200_v3, %v5204_v46  ;;  %v5064_v63 = vld [vmem:[#allocation5 + $0x1350] sm:$0xff] }
 0x486   : > { %6718 = vmatprep.subr.bf16.mxu0 %v16624_v37  ;;  %6771 = vmatprep.subr.bf16.mxu1 %v16752_v19  ;;  %v5068_v37 = vld [vmem:[#allocation5 + $0x1370] sm:$0xff] }
 0x487   : > { %v5192_v19 = vld [vmem:[#allocation5 + $0x1750] sm:$0xff]  ;;  %v16720_v49 = vcombine.high %v5064_v63, %v5068_v37  ;;  %v16719_v5 = vcombine.low %v5064_v63, %v5068_v37 }
 0x488   : > { %v16847_v17 = vcombine.low %v5192_v19, %v5196_v18  ;;  %v5172_v63 = vld [vmem:[#allocation5 + $0x16b0] sm:$0xff] }
 0x489   : > { %6719 = vmatpush1.bf16.msra.mxu0 %v16623_v23  ;;  %6772 = vmatpush1.bf16.msra.mxu1 %v16751_v13  ;;  %v16848_v23 = vcombine.high %v5192_v19, %v5196_v18  ;;  %v5056_v13 = vld [vmem:[#allocation5 + $0x1310] sm:$0xff] }
 0x48a   : > { %6720 = vmatprep.subr.bf16.mxu0 %v16616_v40  ;;  %6773 = vmatprep.subr.bf16.mxu1 %v16744_v38  ;;  %v5060_v40 = vld [vmem:[#allocation5 + $0x1330] sm:$0xff] }
 0x48b   : > { %v5184_v38 = vld [vmem:[#allocation5 + $0x1710] sm:$0xff]  ;;  %v16712_v22 = vcombine.high %v5056_v13, %v5060_v40  ;;  %v16711_v30 = vcombine.low %v5056_v13, %v5060_v40 }
 0x48c   : > { %v16839_v3 = vcombine.low %v5184_v38, %v5188_v10  ;;  %v5164_v13 = vld [vmem:[#allocation5 + $0x1670] sm:$0xff] }
 0x48d   : > { %6721 = vmatpush1.bf16.msra.mxu0 %v16615_v48  ;;  %6774 = vmatpush1.bf16.msra.mxu1 %v16743_v53  ;;  %v16840_v48 = vcombine.high %v5184_v38, %v5188_v10  ;;  %v5048_v53 = vld [vmem:[#allocation5 + $0x12d0] sm:$0xff] }
 0x48e   : > { %6722 = vmatprep.subr.bf16.mxu0 %v16736_v44  ;;  %6775 = vmatprep.subr.bf16.mxu1 %v16864_v11  ;;  %v5052_v44 = vld [vmem:[#allocation5 + $0x12f0] sm:$0xff] }
 0x48f   : > { %v5176_v11 = vld [vmem:[#allocation5 + $0x16d0] sm:$0xff]  ;;  %v16704_v46 = vcombine.high %v5048_v53, %v5052_v44  ;;  %v16703_v37 = vcombine.low %v5048_v53, %v5052_v44 }
 0x490   : > { %v16831_v19 = vcombine.low %v5176_v11, %v5180_v42  ;;  %v5156_v53 = vld [vmem:[#allocation5 + $0x1630] sm:$0xff] }
 0x491   : > { %6723 = vmatpush2.bf16.msra.mxu0 %v16735_v24  ;;  %6776 = vmatpush2.bf16.msra.mxu1 %v16863_v57  ;;  %v16832_v24 = vcombine.high %v5176_v11, %v5180_v42  ;;  %v5040_v57 = vld [vmem:[#allocation5 + $0x1290] sm:$0xff] }
 0x492   : > { %6724 = vmatprep.subr.bf16.mxu0 %v16728_v45  ;;  %6777 = vmatprep.subr.bf16.mxu1 %v16856_v25  ;;  %v5044_v45 = vld [vmem:[#allocation5 + $0x12b0] sm:$0xff] }
 0x493   : > { %v5168_v25 = vld [vmem:[#allocation5 + $0x1690] sm:$0xff]  ;;  %v16696_v18 = vcombine.high %v5040_v57, %v5044_v45  ;;  %v16695_v40 = vcombine.low %v5040_v57, %v5044_v45  ;;  %v5149_v57 = vld [vmem:[#allocation5 + $0x15f8] sm:$0xff] }
 0x494   : > { %v16823_v38 = vcombine.low %v5168_v25, %v5172_v63 }
 0x495   : > { %6725 = vmatpush2.bf16.msra.mxu0 %v16727_v41  ;;  %6778 = vmatpush2.bf16.msra.mxu1 %v16855_v36  ;;  %v16824_v41 = vcombine.high %v5168_v25, %v5172_v63  ;;  %v5032_v36 = vld [vmem:[#allocation5 + $0x1250] sm:$0xff] }
 0x496   : > { %6726 = vmatprep.subr.bf16.mxu0 %v16720_v49  ;;  %6779 = vmatprep.subr.bf16.mxu1 %v16848_v23  ;;  %v5036_v49 = vld [vmem:[#allocation5 + $0x1270] sm:$0xff] }
 0x497   : > { %v5160_v23 = vld [vmem:[#allocation5 + $0x1650] sm:$0xff]  ;;  %v16688_v10 = vcombine.high %v5032_v36, %v5036_v49  ;;  %v16687_v44 = vcombine.low %v5032_v36, %v5036_v49  ;;  %v5141_v36 = vld [vmem:[#allocation5 + $0x15b8] sm:$0xff] }
 0x498   : > { %v16815_v11 = vcombine.low %v5160_v23, %v5164_v13 }
 0x499   : > { %6727 = vmatpush2.bf16.msra.mxu0 %v16719_v5  ;;  %6780 = vmatpush2.bf16.msra.mxu1 %v16847_v17  ;;  %v16816_v5 = vcombine.high %v5160_v23, %v5164_v13  ;;  %v5024_v17 = vld [vmem:[#allocation5 + $0x1210] sm:$0xff] }
 0x49a   : > { %6728 = vmatprep.subr.bf16.mxu0 %v16712_v22  ;;  %6781 = vmatprep.subr.bf16.mxu1 %v16840_v48  ;;  %v5028_v22 = vld [vmem:[#allocation5 + $0x1230] sm:$0xff] }
 0x49b   : > { %v5152_v48 = vld [vmem:[#allocation5 + $0x1610] sm:$0xff]  ;;  %v16680_v42 = vcombine.high %v5024_v17, %v5028_v22  ;;  %v16679_v45 = vcombine.low %v5024_v17, %v5028_v22  ;;  %v5133_v17 = vld [vmem:[#allocation5 + $0x1578] sm:$0xff] }
 0x49c   : > { %v16807_v25 = vcombine.low %v5152_v48, %v5156_v53 }
 0x49d   : > { %6729 = vmatpush2.bf16.msra.mxu0 %v16711_v30  ;;  %6782 = vmatpush2.bf16.msra.mxu1 %v16839_v3  ;;  %v16808_v30 = vcombine.high %v5152_v48, %v5156_v53  ;;  %v5017_v3 = vld [vmem:[#allocation5 + $0x11d8] sm:$0xff] }
 0x49e   : > { %6730 = vmatprep.subr.bf16.mxu0 %v16704_v46  ;;  %6783 = vmatprep.subr.bf16.mxu1 %v16832_v24  ;;  %v5021_v46 = vld [vmem:[#allocation5 + $0x11f8] sm:$0xff] }
 0x49f   : > { %v5145_v24 = vld [vmem:[#allocation5 + $0x15d8] sm:$0xff]  ;;  %v16674_v63 = vcombine.high %v5017_v3, %v5021_v46  ;;  %v16673_v49 = vcombine.low %v5017_v3, %v5021_v46 }
 0x4a0   : > { %v16801_v23 = vcombine.low %v5145_v24, %v5149_v57  ;;  %v5125_v3 = vld [vmem:[#allocation5 + $0x1538] sm:$0xff] }
 0x4a1   : > { %6731 = vmatpush2.bf16.msra.mxu0 %v16703_v37  ;;  %6784 = vmatpush2.bf16.msra.mxu1 %v16831_v19  ;;  %v16802_v37 = vcombine.high %v5145_v24, %v5149_v57  ;;  %v5009_v19 = vld [vmem:[#allocation5 + $0x1198] sm:$0xff] }
 0x4a2   : > { %6732 = vmatprep.subr.bf16.mxu0 %v16696_v18  ;;  %6785 = vmatprep.subr.bf16.mxu1 %v16824_v41  ;;  %v5013_v18 = vld [vmem:[#allocation5 + $0x11b8] sm:$0xff] }
 0x4a3   : > { %v5137_v41 = vld [vmem:[#allocation5 + $0x1598] sm:$0xff]  ;;  %v16666_v13 = vcombine.high %v5009_v19, %v5013_v18  ;;  %v16665_v22 = vcombine.low %v5009_v19, %v5013_v18 }
 0x4a4   : > { %v16793_v48 = vcombine.low %v5137_v41, %v5141_v36  ;;  %v5117_v19 = vld [vmem:[#allocation5 + $0x14f8] sm:$0xff] }
 0x4a5   : > { %6733 = vmatpush2.bf16.msra.mxu0 %v16695_v40  ;;  %6786 = vmatpush2.bf16.msra.mxu1 %v16823_v38  ;;  %v16794_v40 = vcombine.high %v5137_v41, %v5141_v36  ;;  %v5001_v38 = vld [vmem:[#allocation5 + $0x1158] sm:$0xff] }
 0x4a6   : > { %6734 = vmatprep.subr.bf16.mxu0 %v16688_v10  ;;  %6787 = vmatprep.subr.bf16.mxu1 %v16816_v5  ;;  %v5005_v10 = vld [vmem:[#allocation5 + $0x1178] sm:$0xff] }
 0x4a7   : > { %v5129_v5 = vld [vmem:[#allocation5 + $0x1558] sm:$0xff]  ;;  %v16658_v53 = vcombine.high %v5001_v38, %v5005_v10  ;;  %v16657_v46 = vcombine.low %v5001_v38, %v5005_v10 }
 0x4a8   : > { %v16785_v24 = vcombine.low %v5129_v5, %v5133_v17  ;;  %v5109_v38 = vld [vmem:[#allocation5 + $0x14b8] sm:$0xff] }
 0x4a9   : > { %6735 = vmatpush2.bf16.msra.mxu0 %v16687_v44  ;;  %6788 = vmatpush2.bf16.msra.mxu1 %v16815_v11  ;;  %v16786_v44 = vcombine.high %v5129_v5, %v5133_v17  ;;  %v4993_v11 = vld [vmem:[#allocation5 + $0x1118] sm:$0xff] }
 0x4aa   : > { %6736 = vmatprep.subr.bf16.mxu0 %v16680_v42  ;;  %6789 = vmatprep.subr.bf16.mxu1 %v16808_v30  ;;  %v4997_v42 = vld [vmem:[#allocation5 + $0x1138] sm:$0xff] }
 0x4ab   : > { %v5121_v30 = vld [vmem:[#allocation5 + $0x1518] sm:$0xff]  ;;  %v16650_v57 = vcombine.high %v4993_v11, %v4997_v42  ;;  %v16649_v18 = vcombine.low %v4993_v11, %v4997_v42 }
 0x4ac   : > { %v16777_v41 = vcombine.low %v5121_v30, %v5125_v3  ;;  %v4969_v17 = vld [vmem:[#allocation5 + $0x1058] sm:$0xff] }
 0x4ad   : > { %6737 = vmatpush2.bf16.msra.mxu0 %v16679_v45  ;;  %6790 = vmatpush2.bf16.msra.mxu1 %v16807_v25  ;;  %v16778_v45 = vcombine.high %v5121_v30, %v5125_v3  ;;  %v4985_v25 = vld [vmem:[#allocation5 + $0x10d8] sm:$0xff] }
 0x4ae   : > { %6812 = vmatprep.subr.bf16.mxu0 %v16674_v63  ;;  %6865 = vmatprep.subr.bf16.mxu1 %v16802_v37  ;;  %v4989_v63 = vld [vmem:[#allocation5 + $0x10f8] sm:$0xff] }
 0x4af   : > { %v5113_v37 = vld [vmem:[#allocation5 + $0x14d8] sm:$0xff]  ;;  %v16642_v36 = vcombine.high %v4985_v25, %v4989_v63  ;;  %v16641_v10 = vcombine.low %v4985_v25, %v4989_v63 }
 0x4b0   : > { %6739 = vmatmul.mubr.bf16.vlgmr.msra.gmra.mxu0 %v20832_v60  ;;  %6792 = vmatmul.mubr.bf16.vlgmr.msra.gmra.mxu1 %v20834_v26  ;;  %v16769_v5 = vcombine.low %v5113_v37, %v5117_v19  ;;  %v4961_v3 = vld [vmem:[#allocation5 + $0x1018] sm:$0xff] }
 0x4b1   : > { %6748 = vmatprep.mubr.bf16.mxu0 %v20850_v28  ;;  %6801 = vmatprep.mubr.bf16.mxu1 %v20852_v34 }
 0x4b2   : > { %6813 = vmatpush1.bf16.msra.mxu0 %v16673_v49  ;;  %6866 = vmatpush1.bf16.msra.mxu1 %v16801_v23  ;;  %v16770_v49 = vcombine.high %v5113_v37, %v5117_v19  ;;  %v4977_v23 = vld [vmem:[#allocation5 + $0x1098] sm:$0xff] }
 0x4b3   : > { %6814 = vmatprep.subr.bf16.mxu0 %v16666_v13  ;;  %6867 = vmatprep.subr.bf16.mxu1 %v16794_v40  ;;  %v4981_v13 = vld [vmem:[#allocation5 + $0x10b8] sm:$0xff] }
 0x4b4   : > { %v5105_v40 = vld [vmem:[#allocation5 + $0x1498] sm:$0xff] }
 0x4b5   : > { %v16761_v11 = vcombine.low %v5105_v40, %v5109_v38  ;;  %v5081_v19 = vld [vmem:[#allocation5 + $0x13d8] sm:$0xff] }
 0x4b6   : > { %6815 = vmatpush1.bf16.msra.mxu0 %v16665_v22  ;;  %6868 = vmatpush1.bf16.msra.mxu1 %v16793_v48  ;;  %v4973_v22 = vld [vmem:[#allocation5 + $0x1078] sm:$0xff] }
 0x4b7   : > { %6816 = vmatprep.subr.bf16.mxu0 %v16658_v53  ;;  %6869 = vmatprep.subr.bf16.mxu1 %v16786_v44  ;;  %v5097_v48 = vld [vmem:[#allocation5 + $0x1458] sm:$0xff]  ;;  %v16633_v44 = vcombine.low %v4977_v23, %v4981_v13  ;;  %v16626_v42 = vcombine.high %v4969_v17, %v4973_v22 }
 0x4b8   : > { %6749 = vmatmul.mubr.bf16.gmra.mxu0 %v20846_v47  ;;  %6802 = vmatmul.mubr.bf16.gmra.mxu1 %v20848_v43  ;;  %v5101_v53 = vld [vmem:[#allocation5 + $0x1478] sm:$0xff] }
 0x4b9   : > { %6844 = vmatprep.mubr.bf16.mxu0 %v20828_v4  ;;  %6897 = vmatprep.mubr.bf16.mxu1 %v20830_v31  ;;  %v16634_v4 = vcombine.high %v4977_v23, %v4981_v13  ;;  %v16762_v31 = vcombine.high %v5105_v40, %v5109_v38  ;;  %v16754_v30 = vcombine.high %v5097_v48, %v5101_v53  ;;  %v5073_v38 = vld [vmem:[#allocation5 + $0x1398] sm:$0xff] }
 0x4ba   : > { %6817 = vmatpush1.bf16.msra.mxu0 %v16657_v46  ;;  %6870 = vmatpush1.bf16.msra.mxu1 %v16785_v24  ;;  %v4965_v46 = vld [vmem:[#allocation5 + $0x1038] sm:$0xff]  ;;  %v16753_v25 = vcombine.low %v5097_v48, %v5101_v53 }
 0x4bb   : > { %6818 = vmatprep.subr.bf16.mxu0 %v16650_v57  ;;  %6871 = vmatprep.subr.bf16.mxu1 %v16778_v45  ;;  %v5089_v24 = vld [vmem:[#allocation5 + $0x1418] sm:$0xff]  ;;  %v16625_v45 = vcombine.low %v4969_v17, %v4973_v22  ;;  %v16618_v63 = vcombine.high %v4961_v3, %v4965_v46 }
 0x4bc   : > { %v5093_v57 = vld [vmem:[#allocation5 + $0x1438] sm:$0xff] }
 0x4bd   : > { %v16746_v37 = vcombine.high %v5089_v24, %v5093_v57  ;;  %v16745_v23 = vcombine.low %v5089_v24, %v5093_v57  ;;  %v5065_v53 = vld [vmem:[#allocation5 + $0x1358] sm:$0xff] }
 0x4be   : > { %6819 = vmatpush1.bf16.msra.mxu0 %v16649_v18  ;;  %6872 = vmatpush1.bf16.msra.mxu1 %v16777_v41  ;;  %v5085_v18 = vld [vmem:[#allocation5 + $0x13f8] sm:$0xff] }
 0x4bf   : > { %6820 = vmatprep.subr.bf16.mxu0 %v16642_v36  ;;  %6873 = vmatprep.subr.bf16.mxu1 %v16770_v49  ;;  %v5209_v41 = vld [vmem:[#allocation5 + $0x17d8] sm:$0xff]  ;;  %v16617_v49 = vcombine.low %v4961_v3, %v4965_v46  ;;  %v16738_v13 = vcombine.high %v5081_v19, %v5085_v18 }
 0x4c0   : > { %v5213_v36 = vld [vmem:[#allocation5 + $0x17f8] sm:$0xff] }
 0x4c1   : > { %v16866_v40 = vcombine.high %v5209_v41, %v5213_v36  ;;  %v16865_v17 = vcombine.low %v5209_v41, %v5213_v36  ;;  %v5057_v57 = vld [vmem:[#allocation5 + $0x1318] sm:$0xff] }
 0x4c2   : > { %6821 = vmatpush1.bf16.msra.mxu0 %v16641_v10  ;;  %6874 = vmatpush1.bf16.msra.mxu1 %v16769_v5  ;;  %v5077_v10 = vld [vmem:[#allocation5 + $0x13b8] sm:$0xff] }
 0x4c3   : > { %6822 = vmatprep.subr.bf16.mxu0 %v16634_v4  ;;  %6875 = vmatprep.subr.bf16.mxu1 %v16762_v31  ;;  %v5201_v5 = vld [vmem:[#allocation5 + $0x1798] sm:$0xff]  ;;  %v16737_v31 = vcombine.low %v5081_v19, %v5085_v18  ;;  %v16730_v22 = vcombine.high %v5073_v38, %v5077_v10 }
 0x4c4   : > { %v5205_v4 = vld [vmem:[#allocation5 + $0x17b8] sm:$0xff] }
 0x4c5   : > { %v16858_v48 = vcombine.high %v5201_v5, %v5205_v4  ;;  %v16857_v3 = vcombine.low %v5201_v5, %v5205_v4  ;;  %v5049_v36 = vld [vmem:[#allocation5 + $0x12d8] sm:$0xff] }
 0x4c6   : > { %6823 = vmatpush1.bf16.msra.mxu0 %v16633_v44  ;;  %6876 = vmatpush1.bf16.msra.mxu1 %v16761_v11  ;;  %v5069_v44 = vld [vmem:[#allocation5 + $0x1378] sm:$0xff] }
 0x4c7   : > { %6824 = vmatprep.subr.bf16.mxu0 %v16626_v42  ;;  %6877 = vmatprep.subr.bf16.mxu1 %v16754_v30  ;;  %v5193_v11 = vld [vmem:[#allocation5 + $0x1758] sm:$0xff]  ;;  %v16729_v30 = vcombine.low %v5073_v38, %v5077_v10  ;;  %v16722_v46 = vcombine.high %v5065_v53, %v5069_v44 }
 0x4c8   : > { %v5197_v42 = vld [vmem:[#allocation5 + $0x1778] sm:$0xff] }
 0x4c9   : > { %v16850_v24 = vcombine.high %v5193_v11, %v5197_v42  ;;  %v16849_v19 = vcombine.low %v5193_v11, %v5197_v42  ;;  %v5041_v4 = vld [vmem:[#allocation5 + $0x1298] sm:$0xff] }
 0x4ca   : > { %6825 = vmatpush1.bf16.msra.mxu0 %v16625_v45  ;;  %6878 = vmatpush1.bf16.msra.mxu1 %v16753_v25  ;;  %v5061_v45 = vld [vmem:[#allocation5 + $0x1338] sm:$0xff] }
 0x4cb   : > { %6826 = vmatprep.subr.bf16.mxu0 %v16618_v63  ;;  %6879 = vmatprep.subr.bf16.mxu1 %v16746_v37  ;;  %v5185_v25 = vld [vmem:[#allocation5 + $0x1718] sm:$0xff]  ;;  %v16721_v37 = vcombine.low %v5065_v53, %v5069_v44  ;;  %v16714_v18 = vcombine.high %v5057_v57, %v5061_v45 }
 0x4cc   : > { %v5189_v63 = vld [vmem:[#allocation5 + $0x1738] sm:$0xff] }
 0x4cd   : > { %v16842_v41 = vcombine.high %v5185_v25, %v5189_v63  ;;  %v16841_v38 = vcombine.low %v5185_v25, %v5189_v63  ;;  %v5033_v42 = vld [vmem:[#allocation5 + $0x1258] sm:$0xff] }
 0x4ce   : > { %6827 = vmatpush1.bf16.msra.mxu0 %v16617_v49  ;;  %6880 = vmatpush1.bf16.msra.mxu1 %v16745_v23  ;;  %v5053_v49 = vld [vmem:[#allocation5 + $0x12f8] sm:$0xff] }
 0x4cf   : > { %6828 = vmatprep.subr.bf16.mxu0 %v16738_v13  ;;  %6881 = vmatprep.subr.bf16.mxu1 %v16866_v40  ;;  %v5177_v23 = vld [vmem:[#allocation5 + $0x16d8] sm:$0xff]  ;;  %v16713_v40 = vcombine.low %v5057_v57, %v5061_v45  ;;  %v16706_v10 = vcombine.high %v5049_v36, %v5053_v49 }
 0x4d0   : > { %v5181_v13 = vld [vmem:[#allocation5 + $0x16f8] sm:$0xff] }
 0x4d1   : > { %v16834_v5 = vcombine.high %v5177_v23, %v5181_v13  ;;  %v16833_v53 = vcombine.low %v5177_v23, %v5181_v13  ;;  %v5025_v63 = vld [vmem:[#allocation5 + $0x1218] sm:$0xff] }
 0x4d2   : > { %6829 = vmatpush2.bf16.msra.mxu0 %v16737_v31  ;;  %6882 = vmatpush2.bf16.msra.mxu1 %v16865_v17  ;;  %v5045_v31 = vld [vmem:[#allocation5 + $0x12b8] sm:$0xff] }
 0x4d3   : > { %6830 = vmatprep.subr.bf16.mxu0 %v16730_v22  ;;  %6883 = vmatprep.subr.bf16.mxu1 %v16858_v48  ;;  %v5169_v17 = vld [vmem:[#allocation5 + $0x1698] sm:$0xff]  ;;  %v16705_v48 = vcombine.low %v5049_v36, %v5053_v49  ;;  %v16698_v44 = vcombine.high %v5041_v4, %v5045_v31  ;;  %v6952_v49 = vlaneseq }
 0x4d4   : > { %v5173_v22 = vld [vmem:[#allocation5 + $0x16b8] sm:$0xff] }
 0x4d5   : > { %v16826_v11 = vcombine.high %v5169_v17, %v5173_v22  ;;  %v16825_v57 = vcombine.low %v5169_v17, %v5173_v22  ;;  %v20881_v17 = vld [vmem:[#allocation7] sm:$0xff] }
 0x4d6   : > { %6831 = vmatpush2.bf16.msra.mxu0 %v16729_v30  ;;  %6884 = vmatpush2.bf16.msra.mxu1 %v16857_v3  ;;  %v5037_v30 = vld [vmem:[#allocation5 + $0x1278] sm:$0xff] }
 0x4d7   : > { %6832 = vmatprep.subr.bf16.mxu0 %v16722_v46  ;;  %6885 = vmatprep.subr.bf16.mxu1 %v16850_v24  ;;  %v5161_v3 = vld [vmem:[#allocation5 + $0x1658] sm:$0xff]  ;;  %v16697_v24 = vcombine.low %v5041_v4, %v5045_v31  ;;  %v16690_v45 = vcombine.high %v5033_v42, %v5037_v30 }
 0x4d8   : > { %v5165_v46 = vld [vmem:[#allocation5 + $0x1678] sm:$0xff] }
 0x4d9   : > { %v16818_v25 = vcombine.high %v5161_v3, %v5165_v46  ;;  %v16817_v36 = vcombine.low %v5161_v3, %v5165_v46 }
 0x4da   : > { %6833 = vmatpush2.bf16.msra.mxu0 %v16721_v37  ;;  %6886 = vmatpush2.bf16.msra.mxu1 %v16849_v19  ;;  %v5029_v37 = vld [vmem:[#allocation5 + $0x1238] sm:$0xff] }
 0x4db   : > { %6834 = vmatprep.subr.bf16.mxu0 %v16714_v18  ;;  %6887 = vmatprep.subr.bf16.mxu1 %v16842_v41  ;;  %v5153_v19 = vld [vmem:[#allocation5 + $0x1618] sm:$0xff]  ;;  %v16689_v41 = vcombine.low %v5033_v42, %v5037_v30  ;;  %v16682_v23 = vcombine.high %v5025_v63, %v5029_v37  ;;  %v2788_v42 = vadd.f32 %v20562_v29, %v20560_v21 }
 0x4dc   : > { %v5157_v18 = vld [vmem:[#allocation5 + $0x1638] sm:$0xff] }
 0x4dd   : > { %v16810_v13 = vcombine.high %v5153_v19, %v5157_v18 }
 0x4de   : > { %6835 = vmatpush2.bf16.msra.mxu0 %v16713_v40  ;;  %6888 = vmatpush2.bf16.msra.mxu1 %v16841_v38  ;;  %v16681_v40 = vcombine.low %v5025_v63, %v5029_v37  ;;  %v16809_v38 = vcombine.low %v5153_v19, %v5157_v18 }
 0x4df   : > { %6836 = vmatprep.subr.bf16.mxu0 %v16706_v10  ;;  %6889 = vmatprep.subr.bf16.mxu1 %v16834_v5  ;;  %v20876_v10 = vshrl.u32 %v6952_v49, 7 }
 0x4e1   : > { %v20879_v5 = vsub.s32 0, %v20876_v10 }
 0x4e2   : > { %6837 = vmatpush2.bf16.msra.mxu0 %v16705_v48  ;;  %6890 = vmatpush2.bf16.msra.mxu1 %v16833_v53 }
 0x4e3   : > { %6838 = vmatprep.subr.bf16.mxu0 %v16698_v44  ;;  %6891 = vmatprep.subr.bf16.mxu1 %v16826_v11  ;;  %v6955_v11 = vrot.slane %v20881_v17, %v20879_v5 }
 0x4e6   : > { %6839 = vmatpush2.bf16.msra.mxu0 %v16697_v24  ;;  %6892 = vmatpush2.bf16.msra.mxu1 %v16825_v57 }
 0x4e7   : > { %6840 = vmatprep.subr.bf16.mxu0 %v16690_v45  ;;  %6893 = vmatprep.subr.bf16.mxu1 %v16818_v25  ;;  %v2798_v45 = vadd.f32 %v20584_v62, %v20582_v61 }
 0x4e9   : > { %v4449_v29 = vadd.f32 %v20730_v0, %v2798_v45 }
 0x4ea   : > { %6841 = vmatpush2.bf16.msra.mxu0 %v16689_v41  ;;  %6894 = vmatpush2.bf16.msra.mxu1 %v16817_v36 }
 0x4eb   : > { %6842 = vmatprep.subr.bf16.mxu0 %v16682_v23  ;;  %6895 = vmatprep.subr.bf16.mxu1 %v16810_v13 }
 0x4ee   : > { %6843 = vmatpush2.bf16.msra.mxu0 %v16681_v40  ;;  %6896 = vmatpush2.bf16.msra.mxu1 %v16809_v38 }
 0x4ef   : > { %v6528_v4 = vpop.f32.mrf.mxu0  ;;  %v6581_v31 = vpop.f32.mrf.mxu1 }
 0x4f0   : > { %v6582_v22 = vadd.f32 %v6581_v31, %v6528_v4 }
 0x4f1   : > { %6845 = vmatmul.mubr.bf16.vlgmr.msra.gmra.mxu0 %v20832_v60  ;;  %6898 = vmatmul.mubr.bf16.vlgmr.msra.gmra.mxu1 %v20834_v26  ;;  %v6530_v48 = vpop.f32.mrf.mxu0  ;;  %v6583_v53 = vpop.f32.mrf.mxu1  ;;  %v4439_v60 = vadd.f32 %v20695_v15, %v2788_v42  ;;  %v20899_v15 = vsub.s32 1, %v20876_v10 }
 0x4f2   : > { %v6918_v44 = vadd.f32 %v6582_v22, %v20681_v8  ;;  %6854 = vmatprep.mubr.bf16.mxu0 %v20850_v28  ;;  %6907 = vmatprep.mubr.bf16.mxu1 %v20852_v34  ;;  %v6584_v19 = vadd.f32 %v6583_v53, %v6530_v48 }
 0x4f3   : > { %v6532_v30 = vpop.f32.mrf.mxu0  ;;  %v6585_v3 = vpop.f32.mrf.mxu1  ;;  %v4492_v21 = vadd.f32 %v20697_v16, %v4439_v60  ;;  %v6959_v40 = vrot.slane %v20881_v17, %v20899_v15 }
 0x4f4   : > { %v6586_v46 = vadd.f32 %v6585_v3, %v6532_v30  ;;  %v6992_v57 = vadd.f32 %v6955_v11, %v6918_v44  ;;  %v6919_v4 = vadd.f32 %v6584_v19, %v20690_v50  ;;  %v2894_v19 = vadd.f32 %v20606_v35, %v20604_v32 }
 0x4f5   : > { %v6534_v26 = vpop.f32.mrf.mxu0  ;;  %v6587_v24 = vpop.f32.mrf.mxu1 }
 0x4f6   : > { %v6926_v8 = vadd.f32 %v6586_v46, %v20699_v58  ;;  %v6588_v34 = vadd.f32 %v6587_v24, %v6534_v26  ;;  %v7024_v61 = vmax.f32 %v6992_v57, 0.0  ;;  %v6993_v3 = vadd.f32 %v6959_v40, %v6919_v4 }
 0x4f7   : > { %v6538_v25 = vpop.f32.mrf.mxu0  ;;  %v6591_v28 = vpop.f32.mrf.mxu1 }
 0x4f8   : > { %v7000_v63 = vadd.f32 %v6955_v11, %v6926_v8  ;;  %v6592_v37 = vadd.f32 %v6591_v28, %v6538_v25  ;;  %v6927_v23 = vadd.f32 %v6588_v34, %v4492_v21  ;;  %v7025_v8 = vmax.f32 %v6993_v3, 0.0 }
 0x4f9   : > { %6855 = vmatmul.mubr.bf16.gmra.mxu0 %v20846_v47  ;;  %6908 = vmatmul.mubr.bf16.gmra.mxu1 %v20848_v43  ;;  %v6540_v58 = vpop.f32.mrf.mxu0  ;;  %v6593_v18 = vpop.f32.mrf.mxu1  ;;  %v4502_v43 = vadd.f32 %v20732_v1, %v4449_v29 }
 0x4fa   : > { %v7032_v62 = vmax.f32 %v7000_v63, 0.0  ;;  %v6934_v41 = vadd.f32 %v6592_v37, %v20706_v39  ;;  %v6594_v36 = vadd.f32 %v6593_v18, %v6540_v58  ;;  %7115 = vmatprep.mubr.bf16.mxu0 %v22868_v9  ;;  %7158 = vmatprep.mubr.bf16.mxu1 %v22868_v9  ;;  %v7001_v53 = vadd.f32 %v6959_v40, %v6927_v23 }
 0x4fb   : > { %v6542_v16 = vpop.f32.mrf.mxu0  ;;  %v6595_v0 = vpop.f32.mrf.mxu1 }
 0x4fc   : > { %v20906_v49 = vpack.c.bf16 %v7032_v62, %v7024_v61  ;;  %v6935_v47 = vadd.f32 %v6594_v36, %v20715_v56  ;;  %v6596_v13 = vadd.f32 %v6595_v0, %v6542_v16  ;;  %v7008_v31 = vadd.f32 %v6955_v11, %v6934_v41 }
 0x4fd   : > { %v6544_v38 = vpop.f32.mrf.mxu0  ;;  %v6597_v39 = vpop.f32.mrf.mxu1  ;;  %v7033_v57 = vmax.f32 %v7001_v53, 0.0  ;;  %v4545_v62 = vadd.f32 %v20741_v14, %v2894_v19  ;;  %v6966_v14 = vsub.s32 3, %v20876_v10 }
 0x4fe   : > { %v6942_v22 = vadd.f32 %v6596_v13, %v20720_v51  ;;  %v6598_v48 = vadd.f32 %v6597_v39, %v6544_v38  ;;  %v7009_v44 = vadd.f32 %v6959_v40, %v6935_v47  ;;  %v7040_v56 = vmax.f32 %v7008_v31, 0.0  ;;  %v20923_v51 = vld [vmem:[#allocation8] sm:$0xff]  }
 0x4ff   : > { %v20919_v50 = vpack.c.bf16 %v7033_v57, %v7025_v8  ;;  %v4598_v32 = vadd.f32 %v20743_v20, %v4545_v62 }
 0x500   : > { %v7016_v42 = vadd.f32 %v6955_v11, %v6942_v22  ;;  %v6943_v30 = vadd.f32 %v6598_v48, %v4502_v43  ;;  %v7041_v1 = vmax.f32 %v7009_v44, 0.0  ;;  %v6962_v11 = vsub.s32 2, %v20876_v10 }
 0x502   : > { %v7048_v46 = vmax.f32 %v7016_v42, 0.0  ;;  %v7017_v60 = vadd.f32 %v6959_v40, %v6943_v30  ;;  %v6963_v29 = vrot.slane %v20881_v17, %v6962_v11  ;;  %v6967_v30 = vrot.slane %v20881_v17, %v6966_v14 }
 0x504   : > { %v20914_v26 = vpack.c.bf16 %v7048_v46, %v7040_v56  ;;  %v7049_v24 = vmax.f32 %v7017_v60, 0.0 }
 0x506   : > { %v20916_v45 = vpack.c.bf16 %v7049_v24, %v7041_v1 }
 0x508   : > { %7095 = vmatprep.subr.bf16.mxu0 %v20916_v45 }
 0x509   : > { %7096 = vmatpush1.bf16.msra.mxu0 %v20914_v26 }
 0x50a   : > { %7097 = vmatprep.subr.bf16.mxu0 %v20919_v50 }
 0x50d   : > { %7098 = vmatpush1.bf16.msra.mxu0 %v20906_v49 }
 0x510   : > { %16868 = vmatmul.mubr.msk.bf16.vlgmr.msra.gmra.mxu0 %vm7079_vm1, %v20923_v51 }
 0x511   : > { %7201 = vmatprep.mubr.bf16.mxu0 %v22868_v9 }
 0x52f   : > { %v6634_v25 = vpop.f32.mrf.mxu0  ;;  %v6687_v28 = vpop.f32.mrf.mxu1 }
 0x530   : > { %v6688_v63 = vadd.f32 %v6687_v28, %v6634_v25 }
 0x531   : > { %v6636_v34 = vpop.f32.mrf.mxu0  ;;  %v6689_v37 = vpop.f32.mrf.mxu1 }
 0x532   : > { %v6920_v21 = vadd.f32 %v6688_v63, %v20735_v12  ;;  %v2904_v12 = vadd.f32 %v20620_v55, %v20618_v54  ;;  %v6690_v38 = vadd.f32 %v6689_v37, %v6636_v34 }
 0x533   : > { %v6638_v58 = vpop.f32.mrf.mxu0  ;;  %v6691_v18 = vpop.f32.mrf.mxu1 }
 0x534   : > { %v6692_v61 = vadd.f32 %v6691_v18, %v6638_v58  ;;  %v6994_v16 = vadd.f32 %v6963_v29, %v6920_v21  ;;  %v4555_v35 = vadd.f32 %v20772_v6, %v2904_v12  ;;  %v6921_v46 = vadd.f32 %v6690_v38, %v20738_v59 }
 0x535   : > { %v6640_v41 = vpop.f32.mrf.mxu0  ;;  %v6693_v36 = vpop.f32.mrf.mxu1  ;;  %v6970_v59 = vsub.s32 4, %v20876_v10 }
 0x536   : > { %v6928_v0 = vadd.f32 %v6692_v61, %v20745_v2  ;;  %v6694_v43 = vadd.f32 %v6693_v36, %v6640_v41  ;;  %v7026_v31 = vmax.f32 %v6994_v16, 0.0  ;;  %v4608_v6 = vadd.f32 %v20774_v7, %v4555_v35  ;;  %v22891_v16 = vld [vmem:[#allocation37_spill] sm:$0xff]  ;;  %v22894_v35 = vld [vmem:[#allocation39_spill] sm:$0xff] }
 0x537   : > { %v6644_v23 = vpop.f32.mrf.mxu0  ;;  %v6697_v47 = vpop.f32.mrf.mxu1  ;;  %v6971_v12 = vrot.slane %v20881_v17, %v6970_v59 }
 0x538   : > { %v7002_v13 = vadd.f32 %v6963_v29, %v6928_v0  ;;  %v6698_v40 = vadd.f32 %v6697_v47, %v6644_v23  ;;  %v6929_v44 = vadd.f32 %v6694_v43, %v4598_v32  ;;  %v22892_v23 = vld [vmem:[#allocation29_spill] sm:$0xff]  ;;  %v22893_v47 = vld [vmem:[#allocation30_spill] sm:$0xff] }
 0x539   : > { %v6646_v39 = vpop.f32.mrf.mxu0  ;;  %v6699_v4 = vpop.f32.mrf.mxu1 }
 0x53a   : > { %v7034_v22 = vmax.f32 %v7002_v13, 0.0  ;;  %v6936_v2 = vadd.f32 %v6698_v40, %v20748_v27  ;;  %v6700_v48 = vadd.f32 %v6699_v4, %v6646_v39  ;;  %v7003_v24 = vadd.f32 %v6967_v30, %v6929_v44 }
 0x53b   : > { %v6648_v54 = vpop.f32.mrf.mxu0  ;;  %v6701_v55 = vpop.f32.mrf.mxu1  ;;  %v3000_v13 = vadd.f32 %v22893_v47, %v22892_v23 }
 0x53c   : > { %v20944_v53 = vpack.c.bf16 %v7034_v22, %v7026_v31  ;;  %v6937_v42 = vadd.f32 %v6700_v48, %v20751_v52  ;;  %v6702_v20 = vadd.f32 %v6701_v55, %v6648_v54  ;;  %v7010_v27 = vadd.f32 %v6963_v29, %v6936_v2  ;;  %v22895_v22 = vld [vmem:[#allocation41_spill] sm:$0xff]  ;;  %v22896_v48 = vld [vmem:[#allocation31_spill] sm:$0xff]  ;;  %v22897_v54 = vld [vmem:[#allocation32_spill] sm:$0xff] }
 0x53d   : > { %v6650_v3 = vpop.f32.mrf.mxu0  ;;  %v6703_v56 = vpop.f32.mrf.mxu1  ;;  %v6995_v52 = vadd.f32 %v6967_v30, %v6921_v46  ;;  %v7035_v19 = vmax.f32 %v7003_v24, 0.0  ;;  %v4651_v38 = vadd.f32 %v22894_v35, %v3000_v13  ;;  %v3010_v55 = vadd.f32 %v22897_v54, %v22896_v48  ;;  %v22899_v46 = vld [vmem:[#allocation45_spill] sm:$0xff]  ;;  %v22904_v13 = vld [vmem:[#allocation44_spill] sm:$0xff] }
 0x53e   : > { %v6944_v60 = vadd.f32 %v6702_v20, %v20754_v33  ;;  %v6704_v1 = vadd.f32 %v6703_v56, %v6650_v3  ;;  %v7011_v57 = vadd.f32 %v6967_v30, %v6937_v42  ;;  %v7042_v28 = vmax.f32 %v7010_v27, 0.0  ;;  %v22898_v3 = vld [vmem:[#allocation40_spill] sm:$0xff] }
 0x53f   : > { %v7027_v58 = vmax.f32 %v6995_v52, 0.0  ;;  %v4704_v56 = vadd.f32 %v22898_v3, %v4651_v38  ;;  %v4661_v27 = vadd.f32 %v22899_v46, %v3010_v55  ;;  %v22900_v52 = vld [vmem:[#allocation42_spill] sm:$0xff] }
 0x540   : > { %v7018_v8 = vadd.f32 %v6963_v29, %v6944_v60  ;;  %v6945_v25 = vadd.f32 %v6704_v1, %v4608_v6  ;;  %v7043_v34 = vmax.f32 %v7011_v57, 0.0  ;;  %v6974_v1 = vsub.s32 5, %v20876_v10  ;;  %v18429_v3 = vld [vmem:[#allocation10 + $0x8e0] ss:$16 sps:$4 sm:$0xff]  }
 0x541   : > { %v20958_v33 = vpack.c.bf16 %v7035_v19, %v7027_v58  ;;  %v22901_v58 = vld [vmem:[#allocation43_spill] sm:$0xff]  ;;  %v18432_v46 = vld [vmem:[#allocation10 + $0x8c0] ss:$16 sps:$4 sm:$0xff]  }
 0x542   : > { %v7050_v63 = vmax.f32 %v7018_v8, 0.0  ;;  %v7019_v7 = vadd.f32 %v6967_v30, %v6945_v25 }
 0x544   : > { %v20953_v37 = vpack.c.bf16 %v7050_v63, %v7042_v28  ;;  %v7051_v21 = vmax.f32 %v7019_v7, 0.0 }
 0x546   : > { %v20955_v18 = vpack.c.bf16 %v7051_v21, %v7043_v34 }
 0x548   : > { %7138 = vmatprep.subr.bf16.mxu1 %v20955_v18 }
 0x549   : > { %7139 = vmatpush1.bf16.msra.mxu1 %v20953_v37 }
 0x54a   : > { %7140 = vmatprep.subr.bf16.mxu1 %v20958_v33 }
 0x54d   : > { %7141 = vmatpush1.bf16.msra.mxu1 %v20944_v53 }
 0x550   : > { %16869 = vmatmul.mubr.msk.bf16.vlgmr.msra.gmra.mxu1 %vm7079_vm1, %v20923_v51 }
 0x551   : > { %7244 = vmatprep.mubr.bf16.mxu1 %v22868_v9 }
 0x570   : > { %v6740_v29 = vpop.f32.mrf.mxu0  ;;  %v6793_v61 = vpop.f32.mrf.mxu1 }
 0x571   : > { %v6794_v62 = vadd.f32 %v6793_v61, %v6740_v29  ;;  %v22902_v61 = vld [vmem:[#allocation46_spill] sm:$0xff] }
 0x572   : > { %v6742_v41 = vpop.f32.mrf.mxu0  ;;  %v6795_v36 = vpop.f32.mrf.mxu1 }
 0x573   : > { %v6922_v0 = vadd.f32 %v6794_v62, %v22891_v16  ;;  %v6796_v60 = vadd.f32 %v6795_v36, %v6742_v41  ;;  %v4714_v62 = vadd.f32 %v22902_v61, %v4661_v27  ;;  %v6975_v41 = vrot.slane %v20881_v17, %v6974_v1  ;;  %v18437_v27 = vld [vmem:[#allocation10 + $0x8a4] ss:$16 sps:$4 sm:$0xff]  }
 0x574   : > { %v6744_v43 = vpop.f32.mrf.mxu0  ;;  %v6797_v40 = vpop.f32.mrf.mxu1  ;;  %v18440_v1 = vld [vmem:[#allocation10 + $0x884] ss:$16 sps:$4 sm:$0xff]  }
 0x575   : > { %v6798_v32 = vadd.f32 %v6797_v40, %v6744_v43  ;;  %v6996_v31 = vadd.f32 %v6971_v12, %v6922_v0  ;;  %v22903_v0 = vld [vmem:[#allocation38_spill] sm:$0xff] }
 0x576   : > { %v6746_v39 = vpop.f32.mrf.mxu0  ;;  %v6799_v4 = vpop.f32.mrf.mxu1  ;;  %v6923_v23 = vadd.f32 %v6796_v60, %v22903_v0  ;;  %v18435_v60 = vld [vmem:[#allocation10 + $0x8a0] ss:$16 sps:$4 sm:$0xff]  }
 0x577   : > { %v6930_v2 = vadd.f32 %v6798_v32, %v22895_v22  ;;  %v6800_v6 = vadd.f32 %v6799_v4, %v6746_v39  ;;  %v7028_v8 = vmax.f32 %v6996_v31, 0.0 }
 0x578   : > { %v6750_v44 = vpop.f32.mrf.mxu0  ;;  %v6803_v42 = vpop.f32.mrf.mxu1  ;;  %v6997_v4 = vadd.f32 %v6975_v41, %v6923_v23 }
 0x579   : > { %v7004_v20 = vadd.f32 %v6971_v12, %v6930_v2  ;;  %v6804_v30 = vadd.f32 %v6803_v42, %v6750_v44  ;;  %v6931_v19 = vadd.f32 %v6800_v6, %v4704_v56  ;;  %v18434_v56 = vld [vmem:[#allocation10 + $0x8c4] ss:$16 sps:$4 sm:$0xff]  }
 0x57a   : > { %v6752_v24 = vpop.f32.mrf.mxu0  ;;  %v6805_v57 = vpop.f32.mrf.mxu1 }
 0x57b   : > { %v7036_v25 = vmax.f32 %v7004_v20, 0.0  ;;  %v6938_v28 = vadd.f32 %v6804_v30, %v22900_v52  ;;  %v6806_v63 = vadd.f32 %v6805_v57, %v6752_v24  ;;  %v7005_v32 = vadd.f32 %v6975_v41, %v6931_v19  ;;  %v18431_v30 = vld [vmem:[#allocation10 + $0x8e4] ss:$16 sps:$4 sm:$0xff]   ;;  %v18438_v24 = vld [vmem:[#allocation10 + $0x880] ss:$16 sps:$4 sm:$0xff]  }
 0x57c   : > { %v6754_v7 = vpop.f32.mrf.mxu0  ;;  %v6807_v34 = vpop.f32.mrf.mxu1  ;;  %v7029_v20 = vmax.f32 %v6997_v4, 0.0  ;;  %v18443_v57 = vld [vmem:[#allocation10 + $0x864] ss:$16 sps:$4 sm:$0xff]   ;;  %v6978_v52 = vsub.s32 6, %v20876_v10 }
 0x57d   : > { %v20979_v21 = vpack.c.bf16 %v7036_v25, %v7028_v8  ;;  %v6939_v59 = vadd.f32 %v6806_v63, %v22901_v58  ;;  %v6808_v29 = vadd.f32 %v6807_v34, %v6754_v7  ;;  %v7012_v47 = vadd.f32 %v6971_v12, %v6938_v28  ;;  %v18441_v8 = vld [vmem:[#allocation10 + $0x860] ss:$16 sps:$4 sm:$0xff]   ;;  %v18446_v25 = vld [vmem:[#allocation10 + $0x844] ss:$16 sps:$4 sm:$0xff]  }
 0x57e   : > { %v6756_v36 = vpop.f32.mrf.mxu0  ;;  %v6809_v16 = vpop.f32.mrf.mxu1  ;;  %v7037_v44 = vmax.f32 %v7005_v32, 0.0  ;;  %v18444_v34 = vld [vmem:[#allocation10 + $0x840] ss:$16 sps:$4 sm:$0xff]   ;;  %v22909_v4 = vld [vmem:[#allocation51_spill] sm:$0xff] }
 0x57f   : > { %v6946_v43 = vadd.f32 %v6808_v29, %v22904_v13  ;;  %v6810_v40 = vadd.f32 %v6809_v16, %v6756_v36  ;;  %v7013_v35 = vadd.f32 %v6975_v41, %v6939_v59  ;;  %v7044_v31 = vmax.f32 %v7012_v47, 0.0  ;;  %v18449_v59 = vld [vmem:[#allocation10 + $0x824] ss:$16 sps:$4 sm:$0xff]   ;;  %v18447_v13 = vld [vmem:[#allocation10 + $0x820] ss:$16 sps:$4 sm:$0xff]  }
 0x580   : > { %v20991_v6 = vpack.c.bf16 %v7037_v44, %v7029_v20  ;;  %v22905_v29 = vld [vmem:[#allocation47_spill] sm:$0xff]  ;;  %v22907_v36 = vld [vmem:[#allocation34_spill] sm:$0xff] }
 0x581   : > { %v7020_v38 = vadd.f32 %v6971_v12, %v6946_v43  ;;  %v6947_v39 = vadd.f32 %v6810_v40, %v4714_v62  ;;  %v7045_v54 = vmax.f32 %v7013_v35, 0.0  ;;  %v21002_v12 = vld [vmem:[#allocation8 + $0x8] sm:$0xff]   ;;  %v6979_v62 = vrot.slane %v20881_v17, %v6978_v52 }
 0x582   : > { %v22908_v43 = vld [vmem:[#allocation49_spill] sm:$0xff] }
 0x583   : > { %v7052_v22 = vmax.f32 %v7020_v38, 0.0  ;;  %v7021_v2 = vadd.f32 %v6975_v41, %v6947_v39  ;;  %v22906_v41 = vld [vmem:[#allocation33_spill] sm:$0xff] }
 0x584   : > { %v3106_v16 = vadd.f32 %v22907_v36, %v22906_v41  ;;  %v18452_v38 = vld [vmem:[#allocation10 + $0x804] ss:$16 sps:$4 sm:$0xff]  }
 0x585   : > { %v20986_v48 = vpack.c.bf16 %v7052_v22, %v7044_v31  ;;  %v7053_v55 = vmax.f32 %v7021_v2, 0.0  ;;  %v22910_v22 = vld [vmem:[#allocation35_spill] sm:$0xff]  ;;  %v22911_v2 = vld [vmem:[#allocation36_spill] sm:$0xff] }
 0x586   : > { %v4757_v40 = vadd.f32 %v22908_v43, %v3106_v16  ;;  %v22915_v16 = vld [vmem:[#allocation53_spill] sm:$0xff] }
 0x587   : > { %v20988_v42 = vpack.c.bf16 %v7053_v55, %v7045_v54  ;;  %v3116_v54 = vadd.f32 %v22911_v2, %v22910_v22 }
 0x589   : > { %7181 = vmatprep.subr.bf16.mxu0 %v20988_v42 }
 0x58a   : > { %7182 = vmatpush1.bf16.msra.mxu0 %v20986_v48 }
 0x58b   : > { %7183 = vmatprep.subr.bf16.mxu0 %v20991_v6 }
 0x58e   : > { %7184 = vmatpush1.bf16.msra.mxu0 %v20979_v21 }
 0x58f   : > { %7542 = vmatprep.subr.bf16.mxu0 %v20916_v45 }
 0x591   : > { %16870 = vmatmul.mubr.msk.bf16.vlgmr.msra.gmra.mxu0 %vm7079_vm1, %v20923_v51 }
 0x592   : > { %7543 = vmatpush1.bf16.msra.mxu0 %v20914_v26  ;;  %7562 = vmatprep.mubr.bf16.mxu0 %v22868_v9 }
 0x593   : > { %7544 = vmatprep.subr.bf16.mxu0 %v20919_v50 }
 0x596   : > { %7545 = vmatpush1.bf16.msra.mxu0 %v20906_v49 }
 0x597   : > { %7628 = vmatprep.subr.bf16.mxu0 %v20988_v42 }
 0x599   : > { %16873 = vmatmul.mubr.msk.bf16.vlgmr.msra.gmra.mxu0 %vm7079_vm1, %v21002_v12 }
 0x59a   : > { %7629 = vmatpush1.bf16.msra.mxu0 %v20986_v48  ;;  %7648 = vmatprep.mubr.bf16.mxu0 %v22868_v9 }
 0x59b   : > { %7630 = vmatprep.subr.bf16.mxu0 %v20991_v6 }
 0x59e   : > { %7631 = vmatpush1.bf16.msra.mxu0 %v20979_v21 }
 0x59f   : > { %9247 = vmatprep.subr.bf16.mxu0 %v18431_v30 }
 0x5a1   : > { %16875 = vmatmul.mubr.msk.bf16.vlgmr.msra.gmra.mxu0 %vm7079_vm1, %v21002_v12 }
 0x5a2   : > { %9248 = vmatpush1.bf16.msra.mxu0 %v18429_v3 }
 0x5a3   : > { %9249 = vmatprep.subr.bf16.mxu0 %v18434_v56  ;;  %v18450_v56 = vld [vmem:[#allocation10 + $0x800] ss:$16 sps:$4 sm:$0xff]  }
 0x5a6   : > { %9250 = vmatpush1.bf16.msra.mxu0 %v18432_v46  ;;  %v22912_v46 = vld [vmem:[#allocation50_spill] sm:$0xff] }
 0x5a7   : > { %9251 = vmatprep.subr.bf16.mxu0 %v18437_v27  ;;  %v4810_v27 = vadd.f32 %v22912_v46, %v4757_v40  ;;  %v18458_v40 = vld [vmem:[#allocation10 + $0x9c4] ss:$16 sps:$4 sm:$0xff]  }
 0x5aa   : > { %9252 = vmatpush1.bf16.msra.mxu0 %v18435_v60  ;;  %v22913_v60 = vld [vmem:[#allocation54_spill] sm:$0xff] }
 0x5ab   : > { %9253 = vmatprep.subr.bf16.mxu0 %v18440_v1  ;;  %v4767_v1 = vadd.f32 %v22913_v60, %v3116_v54 }
 0x5ae   : > { %9254 = vmatpush1.bf16.msra.mxu0 %v18438_v24  ;;  %v6982_v24 = vsub.s32 7, %v20876_v10 }
 0x5af   : > { %9255 = vmatprep.subr.bf16.mxu0 %v18443_v57 }
 0x5b1   : > { %v6846_v28 = vpop.f32.mrf.mxu0  ;;  %v6899_v63 = vpop.f32.mrf.mxu1 }
 0x5b2   : > { %v6900_v7 = vadd.f32 %v6899_v63, %v6846_v28  ;;  %9256 = vmatpush1.bf16.msra.mxu0 %v18441_v8 }
 0x5b3   : > { %v6848_v19 = vpop.f32.mrf.mxu0  ;;  %v6901_v58 = vpop.f32.mrf.mxu1  ;;  %9257 = vmatprep.subr.bf16.mxu0 %v18446_v25  ;;  %v18455_v25 = vld [vmem:[#allocation10 + $0x9e4] ss:$16 sps:$4 sm:$0xff]  }
 0x5b4   : > { %v6924_v61 = vadd.f32 %v6900_v7, %v22905_v29  ;;  %v6902_v28 = vadd.f32 %v6901_v58, %v6848_v19  ;;  %v22917_v58 = vld [vmem:[#allocation48_spill] sm:$0xff] }
 0x5b5   : > { %v6850_v0 = vpop.f32.mrf.mxu0  ;;  %v6903_v23 = vpop.f32.mrf.mxu1 }
 0x5b6   : > { %v6904_v47 = vadd.f32 %v6903_v23, %v6850_v0  ;;  %9258 = vmatpush1.bf16.msra.mxu0 %v18444_v34  ;;  %v6998_v39 = vadd.f32 %v6979_v62, %v6924_v61  ;;  %v22914_v34 = vld [vmem:[#allocation52_spill] sm:$0xff] }
 0x5b7   : > { %v6852_v32 = vpop.f32.mrf.mxu0  ;;  %v6905_v35 = vpop.f32.mrf.mxu1  ;;  %9259 = vmatprep.subr.bf16.mxu0 %v18449_v59  ;;  %v18453_v23 = vld [vmem:[#allocation10 + $0x9e0] ss:$16 sps:$4 sm:$0xff]  }
 0x5b8   : > { %v6932_v31 = vadd.f32 %v6904_v47, %v22909_v4  ;;  %v6906_v30 = vadd.f32 %v6905_v35, %v6852_v32  ;;  %v7030_v52 = vmax.f32 %v6998_v39, 0.0  ;;  %v22916_v32 = vld [vmem:[#allocation55_spill] sm:$0xff]  ;;  %v6925_v35 = vadd.f32 %v6902_v28, %v22917_v58  ;;  %v18462_v28 = vld [vmem:[#allocation10 + $0x980] ss:$16 sps:$4 sm:$0xff]  }
 0x5b9   : > { %v6856_v55 = vpop.f32.mrf.mxu0  ;;  %v6909_v44 = vpop.f32.mrf.mxu1  ;;  %v4820_v19 = vadd.f32 %v22916_v32, %v4767_v1  ;;  %v18485_v32 = vld [vmem:[#allocation10 + $0xac4] ss:$16 sps:$4 sm:$0xff]  }
 0x5ba   : > { %v7006_v20 = vadd.f32 %v6979_v62, %v6932_v31  ;;  %v6910_v3 = vadd.f32 %v6909_v44, %v6856_v55  ;;  %9260 = vmatpush1.bf16.msra.mxu0 %v18447_v13  ;;  %v6933_v36 = vadd.f32 %v6906_v30, %v4810_v27  ;;  %v22918_v31 = vld [vmem:[#allocation56_spill] sm:$0xff] }
 0x5bb   : > { %v6858_v57 = vpop.f32.mrf.mxu0  ;;  %v6911_v8 = vpop.f32.mrf.mxu1  ;;  %9261 = vmatprep.subr.bf16.mxu0 %v18452_v38  ;;  %v6983_v38 = vrot.slane %v20881_v17, %v6982_v24  ;;  %v18456_v44 = vld [vmem:[#allocation10 + $0x9c0] ss:$16 sps:$4 sm:$0xff]   ;;  %v18461_v30 = vld [vmem:[#allocation10 + $0x9a4] ss:$16 sps:$4 sm:$0xff]  }
 0x5bc   : > { %v7038_v63 = vmax.f32 %v7006_v20, 0.0  ;;  %v6912_v7 = vadd.f32 %v6911_v8, %v6858_v57  ;;  %v6940_v59 = vadd.f32 %v6910_v3, %v22914_v34  ;;  %v18459_v17 = vld [vmem:[#allocation10 + $0x9a0] ss:$16 sps:$4 sm:$0xff]   ;;  %v18464_v8 = vld [vmem:[#allocation10 + $0x984] ss:$16 sps:$4 sm:$0xff]  }
 0x5bd   : > { %v6860_v29 = vpop.f32.mrf.mxu0  ;;  %v6913_v61 = vpop.f32.mrf.mxu1  ;;  %v7007_v2 = vadd.f32 %v6983_v38, %v6933_v36  ;;  %v6999_v3 = vadd.f32 %v6983_v38, %v6925_v35  ;;  %v18467_v34 = vld [vmem:[#allocation10 + $0x964] ss:$16 sps:$4 sm:$0xff]   ;;  %v18468_v36 = vld [vmem:[#allocation10 + $0x940] ss:$16 sps:$4 sm:$0xff]  }
 0x5be   : > { %v21027_v41 = vpack.c.bf16 %v7038_v63, %v7030_v52  ;;  %v6941_v0 = vadd.f32 %v6912_v7, %v22915_v16  ;;  %9262 = vmatpush1.bf16.msra.mxu0 %v18450_v56  ;;  %v6914_v47 = vadd.f32 %v6913_v61, %v6860_v29  ;;  %v7014_v4 = vadd.f32 %v6979_v62, %v6940_v59  ;;  %v18465_v7 = vld [vmem:[#allocation10 + $0x960] ss:$16 sps:$4 sm:$0xff]   ;;  %v18470_v16 = vld [vmem:[#allocation10 + $0x944] ss:$16 sps:$4 sm:$0xff]  }
 0x5bf   : > { %v6862_v13 = vpop.f32.mrf.mxu0  ;;  %v6915_v43 = vpop.f32.mrf.mxu1  ;;  %9263 = vmatprep.subr.bf16.mxu0 %v18455_v25  ;;  %v7039_v60 = vmax.f32 %v7007_v2, 0.0  ;;  %v7031_v25 = vmax.f32 %v6999_v3, 0.0  ;;  %v18491_v58 = vld [vmem:[#allocation10 + $0xaa4] ss:$16 sps:$4 sm:$0xff]   ;;  %v18489_v35 = vld [vmem:[#allocation10 + $0xaa0] ss:$16 sps:$4 sm:$0xff]  }
 0x5c0   : > { %v6916_v39 = vadd.f32 %v6915_v43, %v6862_v13  ;;  %v6948_v22 = vadd.f32 %v6914_v47, %v22918_v31  ;;  %v7015_v54 = vadd.f32 %v6983_v38, %v6941_v0  ;;  %v7046_v46 = vmax.f32 %v7014_v4, 0.0  ;;  %v18473_v0 = vld [vmem:[#allocation10 + $0x924] ss:$16 sps:$4 sm:$0xff]   ;;  %v18477_v13 = vld [vmem:[#allocation10 + $0xae0] ss:$16 sps:$4 sm:$0xff]  }
 0x5c1   : > { %v18476_v47 = vld [vmem:[#allocation10 + $0x904] ss:$16 sps:$4 sm:$0xff]  }
 0x5c2   : > { %v6949_v55 = vadd.f32 %v6916_v39, %v4820_v19  ;;  %9264 = vmatpush2.bf16.msra.mxu0 %v18453_v23  ;;  %v7022_v20 = vadd.f32 %v6979_v62, %v6948_v22  ;;  %v7047_v1 = vmax.f32 %v7015_v54, 0.0  ;;  %v21039_v62 = vpack.c.bf16 %v7039_v60, %v7031_v25  ;;  %v18474_v23 = vld [vmem:[#allocation10 + $0x900] ss:$16 sps:$4 sm:$0xff]   ;;  %v18479_v43 = vld [vmem:[#allocation10 + $0xae4] ss:$16 sps:$4 sm:$0xff]  }
 0x5c3   : > { %9265 = vmatprep.subr.bf16.mxu0 %v18458_v40  ;;  %v18482_v40 = vld [vmem:[#allocation10 + $0xce4] ss:$16 sps:$4 sm:$0xff]   ;;  %v18483_v19 = vld [vmem:[#allocation10 + $0xac0] ss:$16 sps:$4 sm:$0xff]  }
 0x5c4   : > { %v7023_v56 = vadd.f32 %v6983_v38, %v6949_v55  ;;  %v7054_v27 = vmax.f32 %v7022_v20, 0.0  ;;  %v18497_v38 = vld [vmem:[#allocation10 + $0xa84] ss:$16 sps:$4 sm:$0xff]   ;;  %v18495_v39 = vld [vmem:[#allocation10 + $0xa80] ss:$16 sps:$4 sm:$0xff]  }
 0x5c5   : > { %v18503_v4 = vld [vmem:[#allocation10 + $0xa64] ss:$16 sps:$4 sm:$0xff]   ;;  %v18507_v22 = vld [vmem:[#allocation10 + $0xa40] ss:$16 sps:$4 sm:$0xff]  }
 0x5c6   : > { %v7055_v57 = vmax.f32 %v7023_v56, 0.0  ;;  %9266 = vmatpush2.bf16.msra.mxu0 %v18456_v44  ;;  %v21034_v24 = vpack.c.bf16 %v7054_v27, %v7046_v46  ;;  %v18509_v31 = vld [vmem:[#allocation10 + $0xa44] ss:$16 sps:$4 sm:$0xff]   ;;  %v18513_v54 = vld [vmem:[#allocation10 + $0xa20] ss:$16 sps:$4 sm:$0xff]  }
 0x5c7   : > { %9267 = vmatprep.subr.bf16.mxu0 %v18461_v30  ;;  %v18515_v2 = vld [vmem:[#allocation10 + $0xa24] ss:$16 sps:$4 sm:$0xff]   ;;  %v18519_v44 = vld [vmem:[#allocation10 + $0xa00] ss:$16 sps:$4 sm:$0xff]  }
 0x5c8   : > { %v21036_v52 = vpack.c.bf16 %v7055_v57, %v7047_v1  ;;  %v18521_v55 = vld [vmem:[#allocation10 + $0xa04] ss:$16 sps:$4 sm:$0xff]   ;;  %v18525_v30 = vld [vmem:[#allocation10 + $0xbe0] ss:$16 sps:$4 sm:$0xff]  }
 0x5c9   : > { %v18527_v20 = vld [vmem:[#allocation10 + $0xbe4] ss:$16 sps:$4 sm:$0xff]   ;;  %v18531_v56 = vld [vmem:[#allocation10 + $0xbc0] ss:$16 sps:$4 sm:$0xff]  }
 0x5ca   : > { %7224 = vmatprep.subr.bf16.mxu1 %v21036_v52  ;;  %9268 = vmatpush2.bf16.msra.mxu0 %v18459_v17  ;;  %v18533_v3 = vld [vmem:[#allocation10 + $0xbc4] ss:$16 sps:$4 sm:$0xff]   ;;  %v18537_v27 = vld [vmem:[#allocation10 + $0xba0] ss:$16 sps:$4 sm:$0xff]  }
 0x5cb   : > { %7225 = vmatpush1.bf16.msra.mxu1 %v21034_v24  ;;  %9269 = vmatprep.subr.bf16.mxu0 %v18464_v8  ;;  %v18539_v46 = vld [vmem:[#allocation10 + $0xba4] ss:$16 sps:$4 sm:$0xff]   ;;  %v18543_v1 = vld [vmem:[#allocation10 + $0xb80] ss:$16 sps:$4 sm:$0xff]  }
 0x5cc   : > { %7226 = vmatprep.subr.bf16.mxu1 %v21039_v62  ;;  %v18545_v60 = vld [vmem:[#allocation10 + $0xb84] ss:$16 sps:$4 sm:$0xff]   ;;  %v18549_v8 = vld [vmem:[#allocation10 + $0xb60] ss:$16 sps:$4 sm:$0xff]  }
 0x5cd   : > { %v18551_v25 = vld [vmem:[#allocation10 + $0xb64] ss:$16 sps:$4 sm:$0xff]  }
 0x5ce   : > { %9270 = vmatpush2.bf16.msra.mxu0 %v18462_v28 }
 0x5cf   : > { %7227 = vmatpush1.bf16.msra.mxu1 %v21027_v41  ;;  %9271 = vmatprep.subr.bf16.mxu0 %v18467_v34  ;;  %v18555_v34 = vld [vmem:[#allocation10 + $0xb40] ss:$16 sps:$4 sm:$0xff]  }
 0x5d0   : > { %7585 = vmatprep.subr.bf16.mxu1 %v20955_v18  ;;  %v7117_v63 = vpop.f32.mrf.mxu0 }
 0x5d2   : > { %16871 = vmatmul.mubr.msk.bf16.vlgmr.msra.gmra.mxu1 %vm7079_vm1, %v20923_v51  ;;  %v21047_v59 = vpop.f32.mrf.mxu0  ;;  %9272 = vmatpush2.bf16.msra.mxu0 %v18465_v7  ;;  %v18471_v51 = vld [vmem:[#allocation10 + $0x920] ss:$16 sps:$4 sm:$0xff]   ;;  %v18557_v7 = vld [vmem:[#allocation10 + $0xb44] ss:$16 sps:$4 sm:$0xff]  }
 0x5d3   : > { %7586 = vmatpush1.bf16.msra.mxu1 %v20953_v37  ;;  %7605 = vmatprep.mubr.bf16.mxu1 %v22868_v9 }
 0x5d4   : > { %7587 = vmatprep.subr.bf16.mxu1 %v20958_v33  ;;  %v7121_v29 = vpop.f32.mrf.mxu0  ;;  %9273 = vmatprep.subr.bf16.mxu0 %v18470_v16  ;;  %v18569_v16 = vld [vmem:[#allocation10 + $0xb04] ss:$16 sps:$4 sm:$0xff]  }
 0x5d5   : > { %v21052_v61 = vpack.c.bf16 %v7121_v29, %v7117_v63  ;;  %v18561_v29 = vld [vmem:[#allocation10 + $0xb20] ss:$16 sps:$4 sm:$0xff]  }
 0x5d6   : > { %9274 = vmatpush2.bf16.msra.mxu0 %v18468_v36  ;;  %v18563_v36 = vld [vmem:[#allocation10 + $0xb24] ss:$16 sps:$4 sm:$0xff]  }
 0x5d7   : > { %7588 = vmatpush1.bf16.msra.mxu1 %v20944_v53  ;;  %9275 = vmatprep.subr.bf16.mxu0 %v18473_v0  ;;  %v18575_v0 = vld [vmem:[#allocation10 + $0xee4] ss:$16 sps:$4 sm:$0xff]  }
 0x5d8   : > { %7671 = vmatprep.subr.bf16.mxu1 %v21036_v52 }
 0x5da   : > { %16874 = vmatmul.mubr.msk.bf16.vlgmr.msra.gmra.mxu1 %vm7079_vm1, %v21002_v12  ;;  %9276 = vmatpush2.bf16.msra.mxu0 %v18471_v51  ;;  %v18567_v51 = vld [vmem:[#allocation10 + $0xb00] ss:$16 sps:$4 sm:$0xff]  }
 0x5db   : > { %7672 = vmatpush1.bf16.msra.mxu1 %v21034_v24  ;;  %7691 = vmatprep.mubr.bf16.mxu1 %v22868_v9 }
 0x5dc   : > { %7673 = vmatprep.subr.bf16.mxu1 %v21039_v62  ;;  %9277 = vmatprep.subr.bf16.mxu0 %v18476_v47 }
 0x5de   : > { %9278 = vmatpush2.bf16.msra.mxu0 %v18474_v23  ;;  %v21068_v23 = vpop.f32.mrf.mxu0 }
 0x5df   : > { %7674 = vmatpush1.bf16.msra.mxu1 %v21027_v41  ;;  %9333 = vmatprep.subr.bf16.mxu0 %v18482_v40 }
 0x5e0   : > { %9290 = vmatprep.subr.bf16.mxu1 %v18479_v43 }
 0x5e2   : > { %16876 = vmatmul.mubr.msk.bf16.vlgmr.msra.gmra.mxu1 %vm7079_vm1, %v21002_v12  ;;  %v18501_v12 = vld [vmem:[#allocation10 + $0xa60] ss:$16 sps:$4 sm:$0xff]  }
 0x5e3   : > { %9291 = vmatpush1.bf16.msra.mxu1 %v18477_v13 }
 0x5e4   : > { %9292 = vmatprep.subr.bf16.mxu1 %v18485_v32 }
 0x5e7   : > { %9293 = vmatpush1.bf16.msra.mxu1 %v18483_v19 }
 0x5e8   : > { %9294 = vmatprep.subr.bf16.mxu1 %v18491_v58 }
 0x5eb   : > { %9295 = vmatpush1.bf16.msra.mxu1 %v18489_v35 }
 0x5ec   : > { %9296 = vmatprep.subr.bf16.mxu1 %v18497_v38 }
 0x5ef   : > { %9297 = vmatpush1.bf16.msra.mxu1 %v18495_v39 }
 0x5f0   : > { %9298 = vmatprep.subr.bf16.mxu1 %v18503_v4 }
 0x5f3   : > { %9299 = vmatpush1.bf16.msra.mxu1 %v18501_v12 }
 0x5f4   : > { %9300 = vmatprep.subr.bf16.mxu1 %v18509_v31  ;;  %v18480_v31 = vld [vmem:[#allocation10 + $0xce0] ss:$16 sps:$4 sm:$0xff]  }
 0x5f7   : > { %9301 = vmatpush1.bf16.msra.mxu1 %v18507_v22  ;;  %v18488_v22 = vld [vmem:[#allocation10 + $0xcc4] ss:$16 sps:$4 sm:$0xff]  }
 0x5f8   : > { %9302 = vmatprep.subr.bf16.mxu1 %v18515_v2 }
 0x5fb   : > { %9303 = vmatpush1.bf16.msra.mxu1 %v18513_v54 }
 0x5fc   : > { %9304 = vmatprep.subr.bf16.mxu1 %v18521_v55  ;;  %v18486_v55 = vld [vmem:[#allocation10 + $0xcc0] ss:$16 sps:$4 sm:$0xff]  }
 0x5ff   : > { %9305 = vmatpush1.bf16.msra.mxu1 %v18519_v44  ;;  %v18494_v44 = vld [vmem:[#allocation10 + $0xca4] ss:$16 sps:$4 sm:$0xff]  }
 0x600   : > { %9306 = vmatprep.subr.bf16.mxu1 %v18527_v20 }
 0x603   : > { %9307 = vmatpush2.bf16.msra.mxu1 %v18525_v30 }
 0x604   : > { %9308 = vmatprep.subr.bf16.mxu1 %v18533_v3  ;;  %v18492_v3 = vld [vmem:[#allocation10 + $0xca0] ss:$16 sps:$4 sm:$0xff]  }
 0x607   : > { %9309 = vmatpush2.bf16.msra.mxu1 %v18531_v56 }
 0x608   : > { %9310 = vmatprep.subr.bf16.mxu1 %v18539_v46  ;;  %v18500_v46 = vld [vmem:[#allocation10 + $0xc84] ss:$16 sps:$4 sm:$0xff]  }
 0x60b   : > { %9311 = vmatpush2.bf16.msra.mxu1 %v18537_v27  ;;  %v18498_v27 = vld [vmem:[#allocation10 + $0xc80] ss:$16 sps:$4 sm:$0xff]  }
 0x60c   : > { %9312 = vmatprep.subr.bf16.mxu1 %v18545_v60  ;;  %v18506_v60 = vld [vmem:[#allocation10 + $0xc64] ss:$16 sps:$4 sm:$0xff]  }
 0x60f   : > { %9313 = vmatpush2.bf16.msra.mxu1 %v18543_v1  ;;  %v18504_v1 = vld [vmem:[#allocation10 + $0xc60] ss:$16 sps:$4 sm:$0xff]  }
 0x610   : > { %v7160_v57 = vpop.f32.mrf.mxu1  ;;  %9314 = vmatprep.subr.bf16.mxu1 %v18551_v25  ;;  %v18518_v25 = vld [vmem:[#allocation10 + $0xc24] ss:$16 sps:$4 sm:$0xff]  }
 0x612   : > { %v21064_v17 = vpop.f32.mrf.mxu1 }
 0x613   : > { %9315 = vmatpush2.bf16.msra.mxu1 %v18549_v8  ;;  %v18510_v8 = vld [vmem:[#allocation10 + $0xc40] ss:$16 sps:$4 sm:$0xff]  }
 0x614   : > { %v7164_v28 = vpop.f32.mrf.mxu1  ;;  %9316 = vmatprep.subr.bf16.mxu1 %v18557_v7  ;;  %v18524_v7 = vld [vmem:[#allocation10 + $0xc04] ss:$16 sps:$4 sm:$0xff]  }
 0x615   : > { %v21066_v63 = vpack.c.bf16 %v7164_v28, %v7160_v57  ;;  %v18512_v57 = vld [vmem:[#allocation10 + $0xc44] ss:$16 sps:$4 sm:$0xff]   ;;  %v18516_v28 = vld [vmem:[#allocation10 + $0xc20] ss:$16 sps:$4 sm:$0xff]  }
 0x617   : > { %9317 = vmatpush2.bf16.msra.mxu1 %v18555_v34  ;;  %v18522_v34 = vld [vmem:[#allocation10 + $0xc00] ss:$16 sps:$4 sm:$0xff]  }
 0x618   : > { %9318 = vmatprep.subr.bf16.mxu1 %v18563_v36  ;;  %v18528_v36 = vld [vmem:[#allocation10 + $0xde0] ss:$16 sps:$4 sm:$0xff]  }
 0x61b   : > { %9319 = vmatpush2.bf16.msra.mxu1 %v18561_v29  ;;  %v18530_v29 = vld [vmem:[#allocation10 + $0xde4] ss:$16 sps:$4 sm:$0xff]  }
 0x61c   : > { %9320 = vmatprep.subr.bf16.mxu1 %v18569_v16  ;;  %v18536_v16 = vld [vmem:[#allocation10 + $0xdc4] ss:$16 sps:$4 sm:$0xff]  }
 0x61f   : > { %9321 = vmatpush2.bf16.msra.mxu1 %v18567_v51  ;;  %v18534_v51 = vld [vmem:[#allocation10 + $0xdc0] ss:$16 sps:$4 sm:$0xff]  }
 0x620   : > { %9376 = vmatprep.subr.bf16.mxu1 %v18575_v0  ;;  %v18542_v0 = vld [vmem:[#allocation10 + $0xda4] ss:$16 sps:$4 sm:$0xff]  }
 0x651   : > { %v7203_v47 = vpop.f32.mrf.mxu0 }
 0x653   : > { %v7205_v13 = vpop.f32.mrf.mxu0 }
 0x655   : > { %v7207_v43 = vpop.f32.mrf.mxu0 }
 0x656   : > { %v21070_v40 = vpack.c.bf16 %v7207_v43, %v7203_v47  ;;  %v18540_v47 = vld [vmem:[#allocation10 + $0xda0] ss:$16 sps:$4 sm:$0xff]  }
 0x657   : > { %v7209_v32 = vpop.f32.mrf.mxu0  ;;  %v18546_v43 = vld [vmem:[#allocation10 + $0xd80] ss:$16 sps:$4 sm:$0xff]  }
 0x658   : > { %v21072_v19 = vpack.c.bf16 %v7209_v32, %v7205_v13  ;;  %v18548_v13 = vld [vmem:[#allocation10 + $0xd84] ss:$16 sps:$4 sm:$0xff]  }
 0x659   : > { %v7564_v58 = vpop.f32.mrf.mxu0  ;;  %v18554_v32 = vld [vmem:[#allocation10 + $0xd64] ss:$16 sps:$4 sm:$0xff]  }
 0x65b   : > { %v7566_v35 = vpop.f32.mrf.mxu0 }
 0x65d   : > { %v7568_v38 = vpop.f32.mrf.mxu0 }
 0x65e   : > { %v21074_v39 = vpack.c.bf16 %v7568_v38, %v7564_v58  ;;  %v21087_v58 = vpop.f32.mrf.mxu1  ;;  %v18560_v38 = vld [vmem:[#allocation10 + $0xd44] ss:$16 sps:$4 sm:$0xff]  }
 0x65f   : > { %v7570_v4 = vpop.f32.mrf.mxu0 }
 0x660   : > { %v21076_v12 = vpack.c.bf16 %v7570_v4, %v7566_v35  ;;  %v18552_v35 = vld [vmem:[#allocation10 + $0xd60] ss:$16 sps:$4 sm:$0xff]  }
 0x661   : > { %v21078_v2 = vpop.f32.mrf.mxu0 }
 0x662   : > { %9279 = vmatprep.mubr.bf16.mxu0 %v21076_v12 }
 0x663   : > { %9280 = vmatmul.mubr.bf16.vlgmr.msra.gmra.mxu0 %v21074_v39  ;;  %v7652_v54 = vpop.f32.mrf.mxu0 }
 0x664   : > { %9334 = vmatpush1.bf16.msra.mxu0 %v18480_v31 }
 0x665   : > { %9335 = vmatprep.subr.bf16.mxu0 %v18488_v22  ;;  %v21082_v20 = vpop.f32.mrf.mxu0  ;;  %v18558_v22 = vld [vmem:[#allocation10 + $0xd40] ss:$16 sps:$4 sm:$0xff]  }
 0x667   : > { %v7656_v30 = vpop.f32.mrf.mxu0 }
 0x668   : > { %9336 = vmatpush1.bf16.msra.mxu0 %v18486_v55  ;;  %v21084_v56 = vpack.c.bf16 %v7656_v30, %v7652_v54  ;;  %v18566_v54 = vld [vmem:[#allocation10 + $0xd24] ss:$16 sps:$4 sm:$0xff]  }
 0x669   : > { %9337 = vmatprep.subr.bf16.mxu0 %v18494_v44 }
 0x66a   : > { %9365 = vmatprep.mubr.bf16.mxu0 %v21084_v56 }
 0x66c   : > { %9338 = vmatpush1.bf16.msra.mxu0 %v18492_v3  ;;  %v18564_v3 = vld [vmem:[#allocation10 + $0xd20] ss:$16 sps:$4 sm:$0xff]  }
 0x66d   : > { %9339 = vmatprep.subr.bf16.mxu0 %v18500_v46 }
 0x670   : > { %9340 = vmatpush1.bf16.msra.mxu0 %v18498_v27  ;;  %v18572_v27 = vld [vmem:[#allocation10 + $0xd04] ss:$16 sps:$4 sm:$0xff]  }
 0x671   : > { %9341 = vmatprep.subr.bf16.mxu0 %v18506_v60 }
 0x674   : > { %9342 = vmatpush1.bf16.msra.mxu0 %v18504_v1 }
 0x675   : > { %9343 = vmatprep.subr.bf16.mxu0 %v18512_v57  ;;  %v18570_v57 = vld [vmem:[#allocation10 + $0xd00] ss:$16 sps:$4 sm:$0xff]  }
 0x678   : > { %9344 = vmatpush1.bf16.msra.mxu0 %v18510_v8  ;;  %v18578_v8 = vld [vmem:[#allocation10 + $0x8ec] ss:$16 sps:$4 sm:$0xff]  }
 0x679   : > { %9345 = vmatprep.subr.bf16.mxu0 %v18518_v25 }
 0x67c   : > { %9346 = vmatpush1.bf16.msra.mxu0 %v18516_v28  ;;  %v21095_v28 = vpack.c.bf16 %v21082_v20, %v21078_v2  ;;  %v18582_v2 = vld [vmem:[#allocation10 + $0x8c8] ss:$16 sps:$4 sm:$0xff]  }
 0x67d   : > { %9347 = vmatprep.subr.bf16.mxu0 %v18524_v7 }
 0x680   : > { %9348 = vmatpush1.bf16.msra.mxu0 %v18522_v34  ;;  %v18576_v34 = vld [vmem:[#allocation10 + $0x8e8] ss:$16 sps:$4 sm:$0xff]  }
 0x681   : > { %9349 = vmatprep.subr.bf16.mxu0 %v18530_v29 }
 0x684   : > { %9350 = vmatpush2.bf16.msra.mxu0 %v18528_v36  ;;  %v18573_v36 = vld [vmem:[#allocation10 + $0xee0] ss:$16 sps:$4 sm:$0xff]  }
 0x685   : > { %9351 = vmatprep.subr.bf16.mxu0 %v18536_v16 }
 0x688   : > { %9352 = vmatpush2.bf16.msra.mxu0 %v18534_v51  ;;  %v18581_v51 = vld [vmem:[#allocation10 + $0xec4] ss:$16 sps:$4 sm:$0xff]  }
 0x689   : > { %9353 = vmatprep.subr.bf16.mxu0 %v18542_v0  ;;  %v18584_v0 = vld [vmem:[#allocation10 + $0x8cc] ss:$16 sps:$4 sm:$0xff]  }
 0x68c   : > { %9354 = vmatpush2.bf16.msra.mxu0 %v18540_v47 }
 0x68d   : > { %9355 = vmatprep.subr.bf16.mxu0 %v18548_v13  ;;  %v18579_v13 = vld [vmem:[#allocation10 + $0xec0] ss:$16 sps:$4 sm:$0xff]  }
 0x690   : > { %9356 = vmatpush2.bf16.msra.mxu0 %v18546_v43  ;;  %v18590_v43 = vld [vmem:[#allocation10 + $0x8ac] ss:$16 sps:$4 sm:$0xff]  }
 0x691   : > { %9357 = vmatprep.subr.bf16.mxu0 %v18554_v32  ;;  %v18587_v32 = vld [vmem:[#allocation10 + $0xea4] ss:$16 sps:$4 sm:$0xff]  }
 0x692   : > { %v7246_v4 = vpop.f32.mrf.mxu1 }
 0x694   : > { %v7248_v31 = vpop.f32.mrf.mxu1  ;;  %9358 = vmatpush2.bf16.msra.mxu0 %v18552_v35 }
 0x695   : > { %9359 = vmatprep.subr.bf16.mxu0 %v18560_v38  ;;  %v18588_v38 = vld [vmem:[#allocation10 + $0x8a8] ss:$16 sps:$4 sm:$0xff]  }
 0x696   : > { %v7250_v55 = vpop.f32.mrf.mxu1 }
 0x697   : > { %v21089_v44 = vpack.c.bf16 %v7250_v55, %v7246_v4  ;;  %v18593_v55 = vld [vmem:[#allocation10 + $0xe84] ss:$16 sps:$4 sm:$0xff]  }
 0x698   : > { %v7252_v30 = vpop.f32.mrf.mxu1  ;;  %9360 = vmatpush2.bf16.msra.mxu0 %v18558_v22  ;;  %v18596_v22 = vld [vmem:[#allocation10 + $0x88c] ss:$16 sps:$4 sm:$0xff]  }
 0x699   : > { %v21091_v46 = vpack.c.bf16 %v7252_v30, %v7248_v31  ;;  %9361 = vmatprep.subr.bf16.mxu0 %v18566_v54  ;;  %v18585_v31 = vld [vmem:[#allocation10 + $0xea0] ss:$16 sps:$4 sm:$0xff]  }
 0x69a   : > { %v7607_v60 = vpop.f32.mrf.mxu1  ;;  %v18591_v30 = vld [vmem:[#allocation10 + $0xe80] ss:$16 sps:$4 sm:$0xff]  }
 0x69c   : > { %v7609_v1 = vpop.f32.mrf.mxu1  ;;  %9362 = vmatpush2.bf16.msra.mxu0 %v18564_v3  ;;  %v18602_v3 = vld [vmem:[#allocation10 + $0x86c] ss:$16 sps:$4 sm:$0xff]  }
 0x69d   : > { %9363 = vmatprep.subr.bf16.mxu0 %v18572_v27  ;;  %v18599_v27 = vld [vmem:[#allocation10 + $0xe64] ss:$16 sps:$4 sm:$0xff]  }
 0x69e   : > { %v7611_v25 = vpop.f32.mrf.mxu1 }
 0x69f   : > { %v21099_v16 = vpack.c.bf16 %v7611_v25, %v7607_v60  ;;  %v18600_v60 = vld [vmem:[#allocation10 + $0x868] ss:$16 sps:$4 sm:$0xff]  }
 0x6a0   : > { %v7613_v7 = vpop.f32.mrf.mxu1  ;;  %9364 = vmatpush2.bf16.msra.mxu0 %v18570_v57  ;;  %v18608_v57 = vld [vmem:[#allocation10 + $0x84c] ss:$16 sps:$4 sm:$0xff]   ;;  %v18606_v25 = vld [vmem:[#allocation10 + $0x848] ss:$16 sps:$4 sm:$0xff]  }
 0x6a1   : > { %v21097_v29 = vpack.c.bf16 %v7613_v7, %v7609_v1  ;;  %9419 = vmatprep.subr.bf16.mxu0 %v18578_v8  ;;  %v18597_v1 = vld [vmem:[#allocation10 + $0xe60] ss:$16 sps:$4 sm:$0xff]   ;;  %v18605_v8 = vld [vmem:[#allocation10 + $0xe44] ss:$16 sps:$4 sm:$0xff]  }
 0x6a2   : > { %v21101_v47 = vpop.f32.mrf.mxu1  ;;  %v18603_v7 = vld [vmem:[#allocation10 + $0xe40] ss:$16 sps:$4 sm:$0xff]  }
 0x6a3   : > { %9322 = vmatprep.mubr.bf16.mxu1 %v21097_v29  ;;  %9366 = vmatmul.mubr.bf16.vlgmr.msra.gmra.mxu0 %v21095_v28 }
 0x6a4   : > { %9323 = vmatmul.mubr.bf16.vlgmr.msra.gmra.mxu1 %v21099_v16  ;;  %9420 = vmatpush1.bf16.msra.mxu0 %v18576_v34  ;;  %v7695_v20 = vpop.f32.mrf.mxu1  ;;  %v18614_v34 = vld [vmem:[#allocation10 + $0x82c] ss:$16 sps:$4 sm:$0xff]  }
 0x6a5   : > { %9377 = vmatpush1.bf16.msra.mxu1 %v18573_v36  ;;  %9451 = vmatprep.mubr.bf16.mxu0 %v21076_v12  ;;  %v18594_v12 = vld [vmem:[#allocation10 + $0x888] ss:$16 sps:$4 sm:$0xff]   ;;  %v18611_v36 = vld [vmem:[#allocation10 + $0xe24] ss:$16 sps:$4 sm:$0xff]  }
 0x6a6   : > { %9378 = vmatprep.subr.bf16.mxu1 %v18581_v51  ;;  %9421 = vmatprep.subr.bf16.mxu0 %v18584_v0  ;;  %v21107_v35 = vpop.f32.mrf.mxu1  ;;  %v18612_v51 = vld [vmem:[#allocation10 + $0x828] ss:$16 sps:$4 sm:$0xff]   ;;  %v18609_v0 = vld [vmem:[#allocation10 + $0xe20] ss:$16 sps:$4 sm:$0xff]  }
 0x6a8   : > { %9422 = vmatpush1.bf16.msra.mxu0 %v18582_v2  ;;  %v7699_v4 = vpop.f32.mrf.mxu1  ;;  %v18620_v2 = vld [vmem:[#allocation10 + $0x80c] ss:$16 sps:$4 sm:$0xff]  }
 0x6a9   : > { %9379 = vmatpush1.bf16.msra.mxu1 %v18579_v13  ;;  %9423 = vmatprep.subr.bf16.mxu0 %v18590_v43  ;;  %v21109_v54 = vpack.c.bf16 %v7699_v4, %v7695_v20  ;;  %v18617_v20 = vld [vmem:[#allocation10 + $0xe04] ss:$16 sps:$4 sm:$0xff]   ;;  %v18618_v13 = vld [vmem:[#allocation10 + $0x808] ss:$16 sps:$4 sm:$0xff]   ;;  %v18615_v43 = vld [vmem:[#allocation10 + $0xe00] ss:$16 sps:$4 sm:$0xff]  }
 0x6aa   : > { %9380 = vmatprep.subr.bf16.mxu1 %v18587_v32  ;;  %v18626_v32 = vld [vmem:[#allocation10 + $0x9ec] ss:$16 sps:$4 sm:$0xff]   ;;  %v18624_v4 = vld [vmem:[#allocation10 + $0x9e8] ss:$16 sps:$4 sm:$0xff]  }
 0x6ab   : > { %9408 = vmatprep.mubr.bf16.mxu1 %v21109_v54 }
 0x6ac   : > { %9424 = vmatpush1.bf16.msra.mxu0 %v18588_v38  ;;  %v18623_v38 = vld [vmem:[#allocation10 + $0xfe4] ss:$16 sps:$4 sm:$0xff]  }
 0x6ad   : > { %9381 = vmatpush1.bf16.msra.mxu1 %v18585_v31  ;;  %9425 = vmatprep.subr.bf16.mxu0 %v18596_v22  ;;  %v18621_v31 = vld [vmem:[#allocation10 + $0xfe0] ss:$16 sps:$4 sm:$0xff]   ;;  %v18632_v22 = vld [vmem:[#allocation10 + $0x9cc] ss:$16 sps:$4 sm:$0xff]  }
 0x6ae   : > { %9382 = vmatprep.subr.bf16.mxu1 %v18593_v55  ;;  %v18629_v55 = vld [vmem:[#allocation10 + $0xfc4] ss:$16 sps:$4 sm:$0xff]  }
 0x6b0   : > { %9426 = vmatpush1.bf16.msra.mxu0 %v18594_v12  ;;  %v18630_v12 = vld [vmem:[#allocation10 + $0x9c8] ss:$16 sps:$4 sm:$0xff]  }
 0x6b1   : > { %9383 = vmatpush1.bf16.msra.mxu1 %v18591_v30  ;;  %9427 = vmatprep.subr.bf16.mxu0 %v18602_v3  ;;  %v18627_v30 = vld [vmem:[#allocation10 + $0xfc0] ss:$16 sps:$4 sm:$0xff]   ;;  %v18638_v3 = vld [vmem:[#allocation10 + $0x9ac] ss:$16 sps:$4 sm:$0xff]  }
 0x6b2   : > { %9384 = vmatprep.subr.bf16.mxu1 %v18599_v27  ;;  %v18635_v27 = vld [vmem:[#allocation10 + $0xfa4] ss:$16 sps:$4 sm:$0xff]  }
 0x6b4   : > { %9428 = vmatpush1.bf16.msra.mxu0 %v18600_v60  ;;  %v18636_v60 = vld [vmem:[#allocation10 + $0x9a8] ss:$16 sps:$4 sm:$0xff]  }
 0x6b5   : > { %9385 = vmatpush1.bf16.msra.mxu1 %v18597_v1  ;;  %9429 = vmatprep.subr.bf16.mxu0 %v18608_v57  ;;  %v18633_v1 = vld [vmem:[#allocation10 + $0xfa0] ss:$16 sps:$4 sm:$0xff]   ;;  %v18644_v57 = vld [vmem:[#allocation10 + $0x98c] ss:$16 sps:$4 sm:$0xff]  }
 0x6b6   : > { %9386 = vmatprep.subr.bf16.mxu1 %v18605_v8  ;;  %v18641_v8 = vld [vmem:[#allocation10 + $0xf84] ss:$16 sps:$4 sm:$0xff]  }
 0x6b8   : > { %9430 = vmatpush1.bf16.msra.mxu0 %v18606_v25  ;;  %v18642_v25 = vld [vmem:[#allocation10 + $0x988] ss:$16 sps:$4 sm:$0xff]  }
 0x6b9   : > { %9387 = vmatpush1.bf16.msra.mxu1 %v18603_v7  ;;  %9431 = vmatprep.subr.bf16.mxu0 %v18614_v34  ;;  %v18639_v7 = vld [vmem:[#allocation10 + $0xf80] ss:$16 sps:$4 sm:$0xff]   ;;  %v18650_v34 = vld [vmem:[#allocation10 + $0x96c] ss:$16 sps:$4 sm:$0xff]  }
 0x6ba   : > { %9388 = vmatprep.subr.bf16.mxu1 %v18611_v36  ;;  %v18647_v36 = vld [vmem:[#allocation10 + $0xf64] ss:$16 sps:$4 sm:$0xff]  }
 0x6bc   : > { %9432 = vmatpush1.bf16.msra.mxu0 %v18612_v51  ;;  %v18648_v51 = vld [vmem:[#allocation10 + $0x968] ss:$16 sps:$4 sm:$0xff]  }
 0x6bd   : > { %9389 = vmatpush1.bf16.msra.mxu1 %v18609_v0  ;;  %9433 = vmatprep.subr.bf16.mxu0 %v18620_v2  ;;  %v18645_v0 = vld [vmem:[#allocation10 + $0xf60] ss:$16 sps:$4 sm:$0xff]   ;;  %v18656_v2 = vld [vmem:[#allocation10 + $0x94c] ss:$16 sps:$4 sm:$0xff]  }
 0x6be   : > { %9390 = vmatprep.subr.bf16.mxu1 %v18617_v20  ;;  %v18653_v20 = vld [vmem:[#allocation10 + $0xf44] ss:$16 sps:$4 sm:$0xff]  }
 0x6c0   : > { %9434 = vmatpush1.bf16.msra.mxu0 %v18618_v13  ;;  %v18654_v13 = vld [vmem:[#allocation10 + $0x948] ss:$16 sps:$4 sm:$0xff]  }
 0x6c1   : > { %9391 = vmatpush1.bf16.msra.mxu1 %v18615_v43  ;;  %9435 = vmatprep.subr.bf16.mxu0 %v18626_v32  ;;  %v18651_v43 = vld [vmem:[#allocation10 + $0xf40] ss:$16 sps:$4 sm:$0xff]   ;;  %v18662_v32 = vld [vmem:[#allocation10 + $0x92c] ss:$16 sps:$4 sm:$0xff]  }
 0x6c2   : > { %9392 = vmatprep.subr.bf16.mxu1 %v18623_v38  ;;  %v18659_v38 = vld [vmem:[#allocation10 + $0xf24] ss:$16 sps:$4 sm:$0xff]  }
 0x6c4   : > { %9436 = vmatpush2.bf16.msra.mxu0 %v18624_v4  ;;  %v18660_v4 = vld [vmem:[#allocation10 + $0x928] ss:$16 sps:$4 sm:$0xff]  }
 0x6c5   : > { %9393 = vmatpush2.bf16.msra.mxu1 %v18621_v31  ;;  %9437 = vmatprep.subr.bf16.mxu0 %v18632_v22  ;;  %v18657_v31 = vld [vmem:[#allocation10 + $0xf20] ss:$16 sps:$4 sm:$0xff]   ;;  %v18668_v22 = vld [vmem:[#allocation10 + $0x90c] ss:$16 sps:$4 sm:$0xff]  }
 0x6c6   : > { %9394 = vmatprep.subr.bf16.mxu1 %v18629_v55  ;;  %v18665_v55 = vld [vmem:[#allocation10 + $0xf04] ss:$16 sps:$4 sm:$0xff]  }
 0x6c8   : > { %9438 = vmatpush2.bf16.msra.mxu0 %v18630_v12  ;;  %v18666_v12 = vld [vmem:[#allocation10 + $0x908] ss:$16 sps:$4 sm:$0xff]  }
 0x6c9   : > { %9395 = vmatpush2.bf16.msra.mxu1 %v18627_v30  ;;  %9439 = vmatprep.subr.bf16.mxu0 %v18638_v3  ;;  %v18663_v30 = vld [vmem:[#allocation10 + $0xf00] ss:$16 sps:$4 sm:$0xff]   ;;  %v18674_v3 = vld [vmem:[#allocation10 + $0xcec] ss:$16 sps:$4 sm:$0xff]  }
 0x6ca   : > { %9396 = vmatprep.subr.bf16.mxu1 %v18635_v27  ;;  %v18671_v27 = vld [vmem:[#allocation10 + $0xaec] ss:$16 sps:$4 sm:$0xff]  }
 0x6cc   : > { %9440 = vmatpush2.bf16.msra.mxu0 %v18636_v60  ;;  %v18672_v60 = vld [vmem:[#allocation10 + $0xce8] ss:$16 sps:$4 sm:$0xff]  }
 0x6cd   : > { %9397 = vmatpush2.bf16.msra.mxu1 %v18633_v1  ;;  %9441 = vmatprep.subr.bf16.mxu0 %v18644_v57  ;;  %v18669_v1 = vld [vmem:[#allocation10 + $0xae8] ss:$16 sps:$4 sm:$0xff]   ;;  %v21114_v57 = vpack.c.bf16 %v21107_v35, %v21101_v47 }
 0x6ce   : > { %9398 = vmatprep.subr.bf16.mxu1 %v18641_v8  ;;  %v18677_v8 = vld [vmem:[#allocation10 + $0xacc] ss:$16 sps:$4 sm:$0xff]   ;;  %v18684_v47 = vld [vmem:[#allocation10 + $0xca8] ss:$16 sps:$4 sm:$0xff]  }
 0x6cf   : > { %v18681_v35 = vld [vmem:[#allocation10 + $0xaa8] ss:$16 sps:$4 sm:$0xff]  }
 0x6d0   : > { %9442 = vmatpush2.bf16.msra.mxu0 %v18642_v25  ;;  %v18680_v25 = vld [vmem:[#allocation10 + $0xccc] ss:$16 sps:$4 sm:$0xff]  }
 0x6d1   : > { %9399 = vmatpush2.bf16.msra.mxu1 %v18639_v7  ;;  %9443 = vmatprep.subr.bf16.mxu0 %v18650_v34  ;;  %v18678_v7 = vld [vmem:[#allocation10 + $0xcc8] ss:$16 sps:$4 sm:$0xff]  }
 0x6d2   : > { %9400 = vmatprep.subr.bf16.mxu1 %v18647_v36  ;;  %v18675_v34 = vld [vmem:[#allocation10 + $0xac8] ss:$16 sps:$4 sm:$0xff]   ;;  %v18686_v36 = vld [vmem:[#allocation10 + $0xcac] ss:$16 sps:$4 sm:$0xff]  }
 0x6d4   : > { %9444 = vmatpush2.bf16.msra.mxu0 %v18648_v51  ;;  %v18683_v51 = vld [vmem:[#allocation10 + $0xaac] ss:$16 sps:$4 sm:$0xff]  }
 0x6d5   : > { %9401 = vmatpush2.bf16.msra.mxu1 %v18645_v0  ;;  %9445 = vmatprep.subr.bf16.mxu0 %v18656_v2  ;;  %v18689_v0 = vld [vmem:[#allocation10 + $0xa8c] ss:$16 sps:$4 sm:$0xff]   ;;  %v18690_v2 = vld [vmem:[#allocation10 + $0xc88] ss:$16 sps:$4 sm:$0xff]  }
 0x6d6   : > { %9402 = vmatprep.subr.bf16.mxu1 %v18653_v20  ;;  %v18687_v20 = vld [vmem:[#allocation10 + $0xa88] ss:$16 sps:$4 sm:$0xff]  }
 0x6d8   : > { %9446 = vmatpush2.bf16.msra.mxu0 %v18654_v13  ;;  %v18695_v13 = vld [vmem:[#allocation10 + $0xa6c] ss:$16 sps:$4 sm:$0xff]  }
 0x6d9   : > { %9403 = vmatpush2.bf16.msra.mxu1 %v18651_v43  ;;  %9447 = vmatprep.subr.bf16.mxu0 %v18662_v32  ;;  %v18693_v43 = vld [vmem:[#allocation10 + $0xa68] ss:$16 sps:$4 sm:$0xff]   ;;  %v18704_v32 = vld [vmem:[#allocation10 + $0xc4c] ss:$16 sps:$4 sm:$0xff]  }
 0x6da   : > { %9404 = vmatprep.subr.bf16.mxu1 %v18659_v38  ;;  %v18701_v38 = vld [vmem:[#allocation10 + $0xa4c] ss:$16 sps:$4 sm:$0xff]  }
 0x6dc   : > { %9448 = vmatpush2.bf16.msra.mxu0 %v18660_v4  ;;  %v18702_v4 = vld [vmem:[#allocation10 + $0xc48] ss:$16 sps:$4 sm:$0xff]  }
 0x6dd   : > { %9405 = vmatpush2.bf16.msra.mxu1 %v18657_v31  ;;  %9449 = vmatprep.subr.bf16.mxu0 %v18668_v22  ;;  %v18699_v31 = vld [vmem:[#allocation10 + $0xa48] ss:$16 sps:$4 sm:$0xff]   ;;  %v18710_v22 = vld [vmem:[#allocation10 + $0xc2c] ss:$16 sps:$4 sm:$0xff]  }
 0x6de   : > { %9406 = vmatprep.subr.bf16.mxu1 %v18665_v55  ;;  %v18707_v55 = vld [vmem:[#allocation10 + $0xa2c] ss:$16 sps:$4 sm:$0xff]  }
 0x6e0   : > { %9450 = vmatpush2.bf16.msra.mxu0 %v18666_v12  ;;  %v18708_v12 = vld [vmem:[#allocation10 + $0xc28] ss:$16 sps:$4 sm:$0xff]  }
 0x6e1   : > { %9407 = vmatpush2.bf16.msra.mxu1 %v18663_v30  ;;  %9505 = vmatprep.subr.bf16.mxu0 %v18674_v3  ;;  %v18705_v30 = vld [vmem:[#allocation10 + $0xa28] ss:$16 sps:$4 sm:$0xff]   ;;  %v18716_v3 = vld [vmem:[#allocation10 + $0xc0c] ss:$16 sps:$4 sm:$0xff]  }
 0x6e2   : > { %9462 = vmatprep.subr.bf16.mxu1 %v18671_v27  ;;  %v18713_v27 = vld [vmem:[#allocation10 + $0xa0c] ss:$16 sps:$4 sm:$0xff]  }
 0x6e3   : > { %9452 = vmatmul.mubr.bf16.vlgmr.msra.gmra.mxu0 %v21074_v39  ;;  %v18692_v39 = vld [vmem:[#allocation10 + $0xc8c] ss:$16 sps:$4 sm:$0xff]  }
 0x6e4   : > { %9409 = vmatmul.mubr.bf16.vlgmr.msra.gmra.mxu1 %v21114_v57  ;;  %9506 = vmatpush1.bf16.msra.mxu0 %v18672_v60  ;;  %v18714_v60 = vld [vmem:[#allocation10 + $0xc08] ss:$16 sps:$4 sm:$0xff]  }
 0x6e5   : > { %9463 = vmatpush1.bf16.msra.mxu1 %v18669_v1  ;;  %9494 = vmatprep.mubr.bf16.mxu1 %v21097_v29  ;;  %v18698_v29 = vld [vmem:[#allocation10 + $0xc6c] ss:$16 sps:$4 sm:$0xff]   ;;  %v18711_v1 = vld [vmem:[#allocation10 + $0xa08] ss:$16 sps:$4 sm:$0xff]  }
 0x6e6   : > { %9537 = vmatprep.mubr.bf16.mxu0 %v21084_v56  ;;  %9464 = vmatprep.subr.bf16.mxu1 %v18677_v8  ;;  %v18696_v56 = vld [vmem:[#allocation10 + $0xc68] ss:$16 sps:$4 sm:$0xff]   ;;  %v18722_v8 = vld [vmem:[#allocation10 + $0xdec] ss:$16 sps:$4 sm:$0xff]  }
 0x6e7   : > { %9507 = vmatprep.subr.bf16.mxu0 %v18680_v25  ;;  %v18719_v25 = vld [vmem:[#allocation10 + $0xbec] ss:$16 sps:$4 sm:$0xff]  }
 0x6e8   : > { %9508 = vmatpush1.bf16.msra.mxu0 %v18678_v7  ;;  %v18720_v7 = vld [vmem:[#allocation10 + $0xde8] ss:$16 sps:$4 sm:$0xff]  }
 0x6e9   : > { %9465 = vmatpush1.bf16.msra.mxu1 %v18675_v34  ;;  %9509 = vmatprep.subr.bf16.mxu0 %v18686_v36  ;;  %v18717_v34 = vld [vmem:[#allocation10 + $0xbe8] ss:$16 sps:$4 sm:$0xff]   ;;  %v18728_v36 = vld [vmem:[#allocation10 + $0xdcc] ss:$16 sps:$4 sm:$0xff]  }
 0x6ea   : > { %9466 = vmatprep.subr.bf16.mxu1 %v18683_v51  ;;  %v18725_v51 = vld [vmem:[#allocation10 + $0xbcc] ss:$16 sps:$4 sm:$0xff]  }
 0x6ec   : > { %9510 = vmatpush1.bf16.msra.mxu0 %v18684_v47  ;;  %v18726_v47 = vld [vmem:[#allocation10 + $0xdc8] ss:$16 sps:$4 sm:$0xff]  }
 0x6ed   : > { %9467 = vmatpush1.bf16.msra.mxu1 %v18681_v35  ;;  %9511 = vmatprep.subr.bf16.mxu0 %v18692_v39  ;;  %v18723_v35 = vld [vmem:[#allocation10 + $0xbc8] ss:$16 sps:$4 sm:$0xff]   ;;  %v18734_v39 = vld [vmem:[#allocation10 + $0xdac] ss:$16 sps:$4 sm:$0xff]  }
 0x6ee   : > { %9468 = vmatprep.subr.bf16.mxu1 %v18689_v0  ;;  %v18731_v0 = vld [vmem:[#allocation10 + $0xbac] ss:$16 sps:$4 sm:$0xff]  }
 0x6f0   : > { %9512 = vmatpush1.bf16.msra.mxu0 %v18690_v2  ;;  %v18732_v2 = vld [vmem:[#allocation10 + $0xda8] ss:$16 sps:$4 sm:$0xff]  }
 0x6f1   : > { %9469 = vmatpush1.bf16.msra.mxu1 %v18687_v20  ;;  %9513 = vmatprep.subr.bf16.mxu0 %v18698_v29  ;;  %v18729_v20 = vld [vmem:[#allocation10 + $0xba8] ss:$16 sps:$4 sm:$0xff]   ;;  %v18740_v29 = vld [vmem:[#allocation10 + $0xd8c] ss:$16 sps:$4 sm:$0xff]  }
 0x6f2   : > { %9470 = vmatprep.subr.bf16.mxu1 %v18695_v13  ;;  %v18737_v13 = vld [vmem:[#allocation10 + $0xb8c] ss:$16 sps:$4 sm:$0xff]  }
 0x6f4   : > { %9514 = vmatpush1.bf16.msra.mxu0 %v18696_v56  ;;  %v18738_v56 = vld [vmem:[#allocation10 + $0xd88] ss:$16 sps:$4 sm:$0xff]  }
 0x6f5   : > { %9471 = vmatpush1.bf16.msra.mxu1 %v18693_v43  ;;  %9515 = vmatprep.subr.bf16.mxu0 %v18704_v32  ;;  %v18735_v43 = vld [vmem:[#allocation10 + $0xb88] ss:$16 sps:$4 sm:$0xff]   ;;  %v18746_v32 = vld [vmem:[#allocation10 + $0xd6c] ss:$16 sps:$4 sm:$0xff]  }
 0x6f6   : > { %9472 = vmatprep.subr.bf16.mxu1 %v18701_v38  ;;  %v18743_v38 = vld [vmem:[#allocation10 + $0xb6c] ss:$16 sps:$4 sm:$0xff]  }
 0x6f8   : > { %9516 = vmatpush1.bf16.msra.mxu0 %v18702_v4  ;;  %v18744_v4 = vld [vmem:[#allocation10 + $0xd68] ss:$16 sps:$4 sm:$0xff]  }
 0x6f9   : > { %9473 = vmatpush1.bf16.msra.mxu1 %v18699_v31  ;;  %9517 = vmatprep.subr.bf16.mxu0 %v18710_v22  ;;  %v18741_v31 = vld [vmem:[#allocation10 + $0xb68] ss:$16 sps:$4 sm:$0xff]   ;;  %v18752_v22 = vld [vmem:[#allocation10 + $0xd4c] ss:$16 sps:$4 sm:$0xff]  }
 0x6fa   : > { %9474 = vmatprep.subr.bf16.mxu1 %v18707_v55  ;;  %v18749_v55 = vld [vmem:[#allocation10 + $0xb4c] ss:$16 sps:$4 sm:$0xff]  }
 0x6fc   : > { %9518 = vmatpush1.bf16.msra.mxu0 %v18708_v12  ;;  %v18750_v12 = vld [vmem:[#allocation10 + $0xd48] ss:$16 sps:$4 sm:$0xff]  }
 0x6fd   : > { %9475 = vmatpush1.bf16.msra.mxu1 %v18705_v30  ;;  %9519 = vmatprep.subr.bf16.mxu0 %v18716_v3  ;;  %v18747_v30 = vld [vmem:[#allocation10 + $0xb48] ss:$16 sps:$4 sm:$0xff]   ;;  %v18758_v3 = vld [vmem:[#allocation10 + $0xd2c] ss:$16 sps:$4 sm:$0xff]  }
 0x6fe   : > { %9476 = vmatprep.subr.bf16.mxu1 %v18713_v27  ;;  %v18755_v27 = vld [vmem:[#allocation10 + $0xb2c] ss:$16 sps:$4 sm:$0xff]  }
 0x700   : > { %9520 = vmatpush1.bf16.msra.mxu0 %v18714_v60  ;;  %v18756_v60 = vld [vmem:[#allocation10 + $0xd28] ss:$16 sps:$4 sm:$0xff]  }
 0x701   : > { %9477 = vmatpush1.bf16.msra.mxu1 %v18711_v1  ;;  %9521 = vmatprep.subr.bf16.mxu0 %v18722_v8  ;;  %v18753_v1 = vld [vmem:[#allocation10 + $0xb28] ss:$16 sps:$4 sm:$0xff]   ;;  %v18764_v8 = vld [vmem:[#allocation10 + $0xd0c] ss:$16 sps:$4 sm:$0xff]  }
 0x702   : > { %9478 = vmatprep.subr.bf16.mxu1 %v18719_v25  ;;  %v18761_v25 = vld [vmem:[#allocation10 + $0xb0c] ss:$16 sps:$4 sm:$0xff]  }
 0x704   : > { %9522 = vmatpush2.bf16.msra.mxu0 %v18720_v7  ;;  %v18762_v7 = vld [vmem:[#allocation10 + $0xd08] ss:$16 sps:$4 sm:$0xff]  }
 0x705   : > { %9479 = vmatpush2.bf16.msra.mxu1 %v18717_v34  ;;  %9523 = vmatprep.subr.bf16.mxu0 %v18728_v36  ;;  %v18759_v34 = vld [vmem:[#allocation10 + $0xb08] ss:$16 sps:$4 sm:$0xff]   ;;  %v18770_v36 = vld [vmem:[#allocation10 + $0xe4] ss:$16 sps:$4 sm:$0xff]  }
 0x706   : > { %9480 = vmatprep.subr.bf16.mxu1 %v18725_v51  ;;  %v18767_v51 = vld [vmem:[#allocation10 + $0xeec] ss:$16 sps:$4 sm:$0xff]  }
 0x708   : > { %9524 = vmatpush2.bf16.msra.mxu0 %v18726_v47  ;;  %v18768_v47 = vld [vmem:[#allocation10 + $0xe0] ss:$16 sps:$4 sm:$0xff]  }
 0x709   : > { %9481 = vmatpush2.bf16.msra.mxu1 %v18723_v35  ;;  %9525 = vmatprep.subr.bf16.mxu0 %v18734_v39  ;;  %v18765_v35 = vld [vmem:[#allocation10 + $0xee8] ss:$16 sps:$4 sm:$0xff]   ;;  %v18773_v39 = vld [vmem:[#allocation10 + $0xecc] ss:$16 sps:$4 sm:$0xff]  }
 0x70a   : > { %9482 = vmatprep.subr.bf16.mxu1 %v18731_v0  ;;  %v18776_v0 = vld [vmem:[#allocation10 + $0xc4] ss:$16 sps:$4 sm:$0xff]  }
 0x70c   : > { %9526 = vmatpush2.bf16.msra.mxu0 %v18732_v2  ;;  %v21123_v2 = vpack.c.bf16 %v21068_v23, %v21047_v59  ;;  %v18788_v59 = vld [vmem:[#allocation10 + $0x84] ss:$16 sps:$4 sm:$0xff]   ;;  %v18785_v23 = vld [vmem:[#allocation10 + $0xe8c] ss:$16 sps:$4 sm:$0xff]  }
 0x70d   : > { %9483 = vmatpush2.bf16.msra.mxu1 %v18729_v20  ;;  %9527 = vmatprep.subr.bf16.mxu0 %v18740_v29  ;;  %v18774_v20 = vld [vmem:[#allocation10 + $0xc0] ss:$16 sps:$4 sm:$0xff]   ;;  %v18771_v29 = vld [vmem:[#allocation10 + $0xec8] ss:$16 sps:$4 sm:$0xff]  }
 0x70e   : > { %9484 = vmatprep.subr.bf16.mxu1 %v18737_v13  ;;  %v18782_v13 = vld [vmem:[#allocation10 + $0xa4] ss:$16 sps:$4 sm:$0xff]  }
 0x710   : > { %9528 = vmatpush2.bf16.msra.mxu0 %v18738_v56  ;;  %v18779_v56 = vld [vmem:[#allocation10 + $0xeac] ss:$16 sps:$4 sm:$0xff]  }
 0x711   : > { %9485 = vmatpush2.bf16.msra.mxu1 %v18735_v43  ;;  %9529 = vmatprep.subr.bf16.mxu0 %v18746_v32  ;;  %v18777_v43 = vld [vmem:[#allocation10 + $0xea8] ss:$16 sps:$4 sm:$0xff]  }
 0x712   : > { %9486 = vmatprep.subr.bf16.mxu1 %v18743_v38  ;;  %v18783_v32 = vld [vmem:[#allocation10 + $0xe88] ss:$16 sps:$4 sm:$0xff]   ;;  %v18791_v38 = vld [vmem:[#allocation10 + $0xe6c] ss:$16 sps:$4 sm:$0xff]  }
 0x714   : > { %9530 = vmatpush2.bf16.msra.mxu0 %v18744_v4  ;;  %v18792_v4 = vld [vmem:[#allocation10 + $0x60] ss:$16 sps:$4 sm:$0xff]  }
 0x715   : > { %9487 = vmatpush2.bf16.msra.mxu1 %v18741_v31  ;;  %9531 = vmatprep.subr.bf16.mxu0 %v18752_v22  ;;  %v18789_v31 = vld [vmem:[#allocation10 + $0xe68] ss:$16 sps:$4 sm:$0xff]   ;;  %v18800_v22 = vld [vmem:[#allocation10 + $0x44] ss:$16 sps:$4 sm:$0xff]  }
 0x716   : > { %9488 = vmatprep.subr.bf16.mxu1 %v18749_v55  ;;  %v18797_v55 = vld [vmem:[#allocation10 + $0xe4c] ss:$16 sps:$4 sm:$0xff]  }
 0x718   : > { %9532 = vmatpush2.bf16.msra.mxu0 %v18750_v12  ;;  %v18798_v12 = vld [vmem:[#allocation10 + $0x40] ss:$16 sps:$4 sm:$0xff]  }
 0x719   : > { %9489 = vmatpush2.bf16.msra.mxu1 %v18747_v30  ;;  %9533 = vmatprep.subr.bf16.mxu0 %v18758_v3  ;;  %v18795_v30 = vld [vmem:[#allocation10 + $0xe48] ss:$16 sps:$4 sm:$0xff]   ;;  %v18806_v3 = vld [vmem:[#allocation10 + $0x24] ss:$16 sps:$4 sm:$0xff]  }
 0x71a   : > { %9490 = vmatprep.subr.bf16.mxu1 %v18755_v27  ;;  %v18803_v27 = vld [vmem:[#allocation10 + $0xe2c] ss:$16 sps:$4 sm:$0xff]  }
 0x71c   : > { %9534 = vmatpush2.bf16.msra.mxu0 %v18756_v60  ;;  %v18804_v60 = vld [vmem:[#allocation10 + $0x20] ss:$16 sps:$4 sm:$0xff]  }
 0x71d   : > { %9491 = vmatpush2.bf16.msra.mxu1 %v18753_v1  ;;  %9535 = vmatprep.subr.bf16.mxu0 %v18764_v8  ;;  %v18801_v1 = vld [vmem:[#allocation10 + $0xe28] ss:$16 sps:$4 sm:$0xff]   ;;  %v18812_v8 = vld [vmem:[#allocation10 + $0x4] ss:$16 sps:$4 sm:$0xff]  }
 0x71e   : > { %9492 = vmatprep.subr.bf16.mxu1 %v18761_v25  ;;  %v18809_v25 = vld [vmem:[#allocation10 + $0xe0c] ss:$16 sps:$4 sm:$0xff]  }
 0x720   : > { %9536 = vmatpush2.bf16.msra.mxu0 %v18762_v7  ;;  %v18810_v7 = vld [vmem:[#allocation10] ss:$16 sps:$4 sm:$0xff]  }
 0x721   : > { %9493 = vmatpush2.bf16.msra.mxu1 %v18759_v34  ;;  %10871 = vmatprep.subr.bf16.mxu0 %v18770_v36  ;;  %v18807_v34 = vld [vmem:[#allocation10 + $0xe08] ss:$16 sps:$4 sm:$0xff]   ;;  %v18818_v36 = vld [vmem:[#allocation10 + $0x1e4] ss:$16 sps:$4 sm:$0xff]  }
 0x722   : > { %9548 = vmatprep.subr.bf16.mxu1 %v18767_v51  ;;  %v18815_v51 = vld [vmem:[#allocation10 + $0xfec] ss:$16 sps:$4 sm:$0xff]  }
 0x723   : > { %9538 = vmatmul.mubr.bf16.vlgmr.msra.gmra.mxu0 %v21095_v28  ;;  %v18780_v28 = vld [vmem:[#allocation10 + $0xa0] ss:$16 sps:$4 sm:$0xff]  }
 0x724   : > { %9495 = vmatmul.mubr.bf16.vlgmr.msra.gmra.mxu1 %v21099_v16  ;;  %10872 = vmatpush1.bf16.msra.mxu0 %v18768_v47  ;;  %v18786_v16 = vld [vmem:[#allocation10 + $0x80] ss:$16 sps:$4 sm:$0xff]  }
 0x725   : > { %9549 = vmatpush1.bf16.msra.mxu1 %v18765_v35  ;;  %9580 = vmatprep.mubr.bf16.mxu1 %v21109_v54  ;;  %v18794_v54 = vld [vmem:[#allocation10 + $0x64] ss:$16 sps:$4 sm:$0xff]   ;;  %v18816_v47 = vld [vmem:[#allocation10 + $0x1e0] ss:$16 sps:$4 sm:$0xff]   ;;  %v18813_v35 = vld [vmem:[#allocation10 + $0xfe8] ss:$16 sps:$4 sm:$0xff]  }
 0x726   : > { %10903 = vmatprep.mubr.bf16.mxu0 %v21123_v2  ;;  %9550 = vmatprep.subr.bf16.mxu1 %v18773_v39  ;;  %v18824_v39 = vld [vmem:[#allocation10 + $0x1c4] ss:$16 sps:$4 sm:$0xff]  }
 0x727   : > { %10873 = vmatprep.subr.bf16.mxu0 %v18776_v0  ;;  %v18821_v0 = vld [vmem:[#allocation10 + $0xfcc] ss:$16 sps:$4 sm:$0xff]  }
 0x728   : > { %10874 = vmatpush1.bf16.msra.mxu0 %v18774_v20  ;;  %v18822_v20 = vld [vmem:[#allocation10 + $0x1c0] ss:$16 sps:$4 sm:$0xff]  }
 0x729   : > { %9551 = vmatpush1.bf16.msra.mxu1 %v18771_v29  ;;  %10875 = vmatprep.subr.bf16.mxu0 %v18782_v13  ;;  %v18819_v29 = vld [vmem:[#allocation10 + $0xfc8] ss:$16 sps:$4 sm:$0xff]   ;;  %v18830_v13 = vld [vmem:[#allocation10 + $0x1a4] ss:$16 sps:$4 sm:$0xff]  }
 0x72a   : > { %9552 = vmatprep.subr.bf16.mxu1 %v18779_v56  ;;  %v18827_v56 = vld [vmem:[#allocation10 + $0xfac] ss:$16 sps:$4 sm:$0xff]  }
 0x72c   : > { %10876 = vmatpush1.bf16.msra.mxu0 %v18780_v28  ;;  %v18828_v28 = vld [vmem:[#allocation10 + $0x1a0] ss:$16 sps:$4 sm:$0xff]  }
 0x72d   : > { %9553 = vmatpush1.bf16.msra.mxu1 %v18777_v43  ;;  %10877 = vmatprep.subr.bf16.mxu0 %v18788_v59  ;;  %v18825_v43 = vld [vmem:[#allocation10 + $0xfa8] ss:$16 sps:$4 sm:$0xff]   ;;  %v18836_v59 = vld [vmem:[#allocation10 + $0x184] ss:$16 sps:$4 sm:$0xff]  }
 0x72e   : > { %9554 = vmatprep.subr.bf16.mxu1 %v18785_v23  ;;  %v18833_v23 = vld [vmem:[#allocation10 + $0xf8c] ss:$16 sps:$4 sm:$0xff]  }
 0x730   : > { %10878 = vmatpush1.bf16.msra.mxu0 %v18786_v16  ;;  %v18834_v16 = vld [vmem:[#allocation10 + $0x180] ss:$16 sps:$4 sm:$0xff]  }
 0x731   : > { %9555 = vmatpush1.bf16.msra.mxu1 %v18783_v32  ;;  %10879 = vmatprep.subr.bf16.mxu0 %v18794_v54  ;;  %v18831_v32 = vld [vmem:[#allocation10 + $0xf88] ss:$16 sps:$4 sm:$0xff]   ;;  %v18842_v54 = vld [vmem:[#allocation10 + $0x164] ss:$16 sps:$4 sm:$0xff]  }
 0x732   : > { %9556 = vmatprep.subr.bf16.mxu1 %v18791_v38  ;;  %v18839_v38 = vld [vmem:[#allocation10 + $0xf6c] ss:$16 sps:$4 sm:$0xff]  }
 0x734   : > { %10880 = vmatpush1.bf16.msra.mxu0 %v18792_v4  ;;  %v18840_v4 = vld [vmem:[#allocation10 + $0x160] ss:$16 sps:$4 sm:$0xff]  }
 0x735   : > { %9557 = vmatpush1.bf16.msra.mxu1 %v18789_v31  ;;  %10881 = vmatprep.subr.bf16.mxu0 %v18800_v22  ;;  %v18837_v31 = vld [vmem:[#allocation10 + $0xf68] ss:$16 sps:$4 sm:$0xff]   ;;  %v18848_v22 = vld [vmem:[#allocation10 + $0x144] ss:$16 sps:$4 sm:$0xff]  }
 0x736   : > { %9558 = vmatprep.subr.bf16.mxu1 %v18797_v55  ;;  %v18845_v55 = vld [vmem:[#allocation10 + $0xf4c] ss:$16 sps:$4 sm:$0xff]  }
 0x738   : > { %10882 = vmatpush1.bf16.msra.mxu0 %v18798_v12  ;;  %v18846_v12 = vld [vmem:[#allocation10 + $0x140] ss:$16 sps:$4 sm:$0xff]  }
 0x739   : > { %9559 = vmatpush1.bf16.msra.mxu1 %v18795_v30  ;;  %10883 = vmatprep.subr.bf16.mxu0 %v18806_v3  ;;  %v9281_v30 = vpop.f32.mrf.mxu0  ;;  %v18843_v3 = vld [vmem:[#allocation10 + $0xf48] ss:$16 sps:$4 sm:$0xff]  }
 0x73a   : > { %9560 = vmatprep.subr.bf16.mxu1 %v18803_v27  ;;  %v18854_v27 = vld [vmem:[#allocation10 + $0x124] ss:$16 sps:$4 sm:$0xff]  }
 0x73c   : > { %10884 = vmatpush1.bf16.msra.mxu0 %v18804_v60  ;;  %v18851_v60 = vld [vmem:[#allocation10 + $0xf2c] ss:$16 sps:$4 sm:$0xff]  }
 0x73d   : > { %9561 = vmatpush1.bf16.msra.mxu1 %v18801_v1  ;;  %10885 = vmatprep.subr.bf16.mxu0 %v18812_v8  ;;  %v18852_v1 = vld [vmem:[#allocation10 + $0x120] ss:$16 sps:$4 sm:$0xff]   ;;  %v9283_v8 = vpop.f32.mrf.mxu0 }
 0x73e   : > { %9562 = vmatprep.subr.bf16.mxu1 %v18809_v25  ;;  %v18849_v25 = vld [vmem:[#allocation10 + $0xf28] ss:$16 sps:$4 sm:$0xff]  }
 0x740   : > { %10886 = vmatpush1.bf16.msra.mxu0 %v18810_v7  ;;  %v18860_v7 = vld [vmem:[#allocation10 + $0x104] ss:$16 sps:$4 sm:$0xff]  }
 0x741   : > { %9563 = vmatpush1.bf16.msra.mxu1 %v18807_v34  ;;  %10887 = vmatprep.subr.bf16.mxu0 %v18818_v36  ;;  %v18857_v34 = vld [vmem:[#allocation10 + $0xf0c] ss:$16 sps:$4 sm:$0xff]   ;;  %v18858_v36 = vld [vmem:[#allocation10 + $0x100] ss:$16 sps:$4 sm:$0xff]  }
 0x742   : > { %9564 = vmatprep.subr.bf16.mxu1 %v18815_v51  ;;  %v9285_v51 = vpop.f32.mrf.mxu0 }
 0x744   : > { %10888 = vmatpush2.bf16.msra.mxu0 %v18816_v47  ;;  %v18855_v47 = vld [vmem:[#allocation10 + $0xf08] ss:$16 sps:$4 sm:$0xff]  }
 0x745   : > { %9565 = vmatpush2.bf16.msra.mxu1 %v18813_v35  ;;  %10889 = vmatprep.subr.bf16.mxu0 %v18824_v39  ;;  %v18866_v35 = vld [vmem:[#allocation10 + $0x4e4] ss:$16 sps:$4 sm:$0xff]  }
 0x746   : > { %9566 = vmatprep.subr.bf16.mxu1 %v18821_v0  ;;  %v18863_v39 = vld [vmem:[#allocation10 + $0x2e4] ss:$16 sps:$4 sm:$0xff]   ;;  %v18864_v0 = vld [vmem:[#allocation10 + $0x4e0] ss:$16 sps:$4 sm:$0xff]  }
 0x748   : > { %10890 = vmatpush2.bf16.msra.mxu0 %v18822_v20  ;;  %v9287_v20 = vpop.f32.mrf.mxu0 }
 0x749   : > { %9567 = vmatpush2.bf16.msra.mxu1 %v18819_v29  ;;  %10891 = vmatprep.subr.bf16.mxu0 %v18830_v13  ;;  %v18861_v29 = vld [vmem:[#allocation10 + $0x2e0] ss:$16 sps:$4 sm:$0xff]   ;;  %v18869_v13 = vld [vmem:[#allocation10 + $0x2c4] ss:$16 sps:$4 sm:$0xff]  }
 0x74a   : > { %9568 = vmatprep.subr.bf16.mxu1 %v18827_v56  ;;  %v21130_v56 = vpack.c.bf16 %v21087_v58, %v21064_v17  ;;  %v18875_v58 = vld [vmem:[#allocation10 + $0x2a4] ss:$16 sps:$4 sm:$0xff]  }
 0x74c   : > { %10892 = vmatpush2.bf16.msra.mxu0 %v18828_v28 }
 0x74d   : > { %9569 = vmatpush2.bf16.msra.mxu1 %v18825_v43  ;;  %10893 = vmatprep.subr.bf16.mxu0 %v18836_v59  ;;  %v18872_v43 = vld [vmem:[#allocation10 + $0x4c4] ss:$16 sps:$4 sm:$0xff]  }
 0x74e   : > { %9570 = vmatprep.subr.bf16.mxu1 %v18833_v23  ;;  %v18870_v23 = vld [vmem:[#allocation10 + $0x4c0] ss:$16 sps:$4 sm:$0xff]  }
 0x750   : > { %10894 = vmatpush2.bf16.msra.mxu0 %v18834_v16 }
 0x751   : > { %9571 = vmatpush2.bf16.msra.mxu1 %v18831_v32  ;;  %10895 = vmatprep.subr.bf16.mxu0 %v18842_v54  ;;  %v18867_v32 = vld [vmem:[#allocation10 + $0x2c0] ss:$16 sps:$4 sm:$0xff]  }
 0x752   : > { %9572 = vmatprep.subr.bf16.mxu1 %v18839_v38  ;;  %v18878_v38 = vld [vmem:[#allocation10 + $0x4a4] ss:$16 sps:$4 sm:$0xff]  }
 0x754   : > { %10896 = vmatpush2.bf16.msra.mxu0 %v18840_v4 }
 0x755   : > { %9573 = vmatpush2.bf16.msra.mxu1 %v18837_v31  ;;  %10897 = vmatprep.subr.bf16.mxu0 %v18848_v22 }
 0x756   : > { %9574 = vmatprep.subr.bf16.mxu1 %v18845_v55  ;;  %v18876_v55 = vld [vmem:[#allocation10 + $0x4a0] ss:$16 sps:$4 sm:$0xff]  }
 0x758   : > { %10898 = vmatpush2.bf16.msra.mxu0 %v18846_v12 }
 0x759   : > { %9575 = vmatpush2.bf16.msra.mxu1 %v18843_v3  ;;  %10899 = vmatprep.subr.bf16.mxu0 %v18854_v27  ;;  %v18873_v3 = vld [vmem:[#allocation10 + $0x2a0] ss:$16 sps:$4 sm:$0xff]   ;;  %v18884_v27 = vld [vmem:[#allocation10 + $0x484] ss:$16 sps:$4 sm:$0xff]  }
 0x75a   : > { %9576 = vmatprep.subr.bf16.mxu1 %v18851_v60 }
 0x75c   : > { %10900 = vmatpush2.bf16.msra.mxu0 %v18852_v1 }
 0x75d   : > { %9577 = vmatpush2.bf16.msra.mxu1 %v18849_v25  ;;  %10901 = vmatprep.subr.bf16.mxu0 %v18860_v7  ;;  %v18881_v25 = vld [vmem:[#allocation10 + $0x284] ss:$16 sps:$4 sm:$0xff]  }
 0x75e   : > { %9578 = vmatprep.subr.bf16.mxu1 %v18857_v34  ;;  %v18882_v34 = vld [vmem:[#allocation10 + $0x480] ss:$16 sps:$4 sm:$0xff]  }
 0x760   : > { %10902 = vmatpush2.bf16.msra.mxu0 %v18858_v36 }
 0x761   : > { %9579 = vmatpush2.bf16.msra.mxu1 %v18855_v47  ;;  %10957 = vmatprep.subr.bf16.mxu0 %v18866_v35  ;;  %v18879_v47 = vld [vmem:[#allocation10 + $0x280] ss:$16 sps:$4 sm:$0xff]   ;;  %v18887_v35 = vld [vmem:[#allocation10 + $0x264] ss:$16 sps:$4 sm:$0xff]  }
 0x762   : > { %10914 = vmatprep.subr.bf16.mxu1 %v18863_v39  ;;  %v18888_v39 = vld [vmem:[#allocation10 + $0x460] ss:$16 sps:$4 sm:$0xff]  }
 0x763   : > { %10904 = vmatmul.mubr.bf16.vlgmr.msra.gmra.mxu0 %v21052_v61  ;;  %v9367_v28 = vpop.f32.mrf.mxu0 }
 0x764   : > { %9581 = vmatmul.mubr.bf16.vlgmr.msra.gmra.mxu1 %v21114_v57  ;;  %v9324_v59 = vpop.f32.mrf.mxu1  ;;  %10958 = vmatpush1.bf16.msra.mxu0 %v18864_v0  ;;  %v18885_v0 = vld [vmem:[#allocation10 + $0x260] ss:$16 sps:$4 sm:$0xff]  }
 0x765   : > { %v9325_v16 = vadd.f32 %v9324_v59, %v9281_v30  ;;  %10915 = vmatpush1.bf16.msra.mxu1 %v18861_v29  ;;  %10946 = vmatprep.mubr.bf16.mxu1 %v21130_v56  ;;  %v9369_v54 = vpop.f32.mrf.mxu0  ;;  %v18896_v29 = vld [vmem:[#allocation10 + $0x444] ss:$16 sps:$4 sm:$0xff]  }
 0x766   : > { %10989 = vmatprep.mubr.bf16.mxu0 %v21072_v19  ;;  %v9326_v17 = vpop.f32.mrf.mxu1  ;;  %10916 = vmatprep.subr.bf16.mxu1 %v18869_v13  ;;  %v18894_v13 = vld [vmem:[#allocation10 + $0x440] ss:$16 sps:$4 sm:$0xff]   ;;  %v18899_v59 = vld [vmem:[#allocation10 + $0x224] ss:$16 sps:$4 sm:$0xff]  }
 0x767   : > { %v9327_v4 = vadd.f32 %v9326_v17, %v9283_v8  ;;  %v21136_v31 = vadd.f32 %v9367_v28, %v9325_v16  ;;  %10959 = vmatprep.subr.bf16.mxu0 %v18872_v43  ;;  %v9371_v57 = vpop.f32.mrf.mxu0  ;;  %v18891_v28 = vld [vmem:[#allocation10 + $0x240] ss:$16 sps:$4 sm:$0xff]   ;;  %v18902_v43 = vld [vmem:[#allocation10 + $0x424] ss:$16 sps:$4 sm:$0xff]  }
 0x768   : > { %v9328_v22 = vpop.f32.mrf.mxu1  ;;  %10960 = vmatpush1.bf16.msra.mxu0 %v18870_v23  ;;  %v18900_v23 = vld [vmem:[#allocation10 + $0x420] ss:$16 sps:$4 sm:$0xff]  }
 0x769   : > { %v9329_v12 = vadd.f32 %v9328_v22, %v9285_v51  ;;  %v21138_v30 = vadd.f32 %v9369_v54, %v9327_v4  ;;  %10917 = vmatpush1.bf16.msra.mxu1 %v18867_v32  ;;  %10961 = vmatprep.subr.bf16.mxu0 %v18878_v38  ;;  %v9373_v1 = vpop.f32.mrf.mxu0  ;;  %v18890_v51 = vld [vmem:[#allocation10 + $0x464] ss:$16 sps:$4 sm:$0xff]   ;;  %v18897_v16 = vld [vmem:[#allocation10 + $0x220] ss:$16 sps:$4 sm:$0xff]  }
 0x76a   : > { %v9330_v60 = vpop.f32.mrf.mxu1  ;;  %10918 = vmatprep.subr.bf16.mxu1 %v18875_v58  ;;  %v18908_v32 = vld [vmem:[#allocation10 + $0x404] ss:$16 sps:$4 sm:$0xff]   ;;  %v18906_v38 = vld [vmem:[#allocation10 + $0x400] ss:$16 sps:$4 sm:$0xff]  }
 0x76b   : > { %v9331_v7 = vadd.f32 %v9330_v60, %v9287_v20  ;;  %v21140_v8 = vadd.f32 %v9371_v57, %v9329_v12  ;;  %v18893_v20 = vld [vmem:[#allocation10 + $0x244] ss:$16 sps:$4 sm:$0xff]   ;;  %v18903_v17 = vld [vmem:[#allocation10 + $0x200] ss:$16 sps:$4 sm:$0xff]  }
 0x76c   : > { %10962 = vmatpush1.bf16.msra.mxu0 %v18876_v55  ;;  %v18905_v54 = vld [vmem:[#allocation10 + $0x204] ss:$16 sps:$4 sm:$0xff]   ;;  %v18912_v57 = vld [vmem:[#allocation10 + $0x5e0] ss:$16 sps:$4 sm:$0xff]  }
 0x76d   : > { %v21142_v36 = vadd.f32 %v9373_v1, %v9331_v7  ;;  %10919 = vmatpush1.bf16.msra.mxu1 %v18873_v3  ;;  %10963 = vmatprep.subr.bf16.mxu0 %v18884_v27  ;;  %v18914_v58 = vld [vmem:[#allocation10 + $0x5e4] ss:$16 sps:$4 sm:$0xff]   ;;  %v18909_v22 = vld [vmem:[#allocation10 + $0x3e0] ss:$16 sps:$4 sm:$0xff]  }
 0x76e   : > { %10920 = vmatprep.subr.bf16.mxu1 %v18881_v25  ;;  %v18911_v4 = vld [vmem:[#allocation10 + $0x3e4] ss:$16 sps:$4 sm:$0xff]   ;;  %v18918_v3 = vld [vmem:[#allocation10 + $0x5c0] ss:$16 sps:$4 sm:$0xff]  }
 0x76f   : > { %v18920_v55 = vld [vmem:[#allocation10 + $0x5c4] ss:$16 sps:$4 sm:$0xff]   ;;  %v18915_v27 = vld [vmem:[#allocation10 + $0x3c0] ss:$16 sps:$4 sm:$0xff]  }
 0x770   : > { %10964 = vmatpush1.bf16.msra.mxu0 %v18882_v34  ;;  %v18917_v12 = vld [vmem:[#allocation10 + $0x3c4] ss:$16 sps:$4 sm:$0xff]   ;;  %v18924_v25 = vld [vmem:[#allocation10 + $0x5a0] ss:$16 sps:$4 sm:$0xff]  }
 0x771   : > { %10921 = vmatpush1.bf16.msra.mxu1 %v18879_v47  ;;  %10965 = vmatprep.subr.bf16.mxu0 %v18890_v51  ;;  %v18926_v60 = vld [vmem:[#allocation10 + $0x5a4] ss:$16 sps:$4 sm:$0xff]   ;;  %v18921_v7 = vld [vmem:[#allocation10 + $0x3a0] ss:$16 sps:$4 sm:$0xff]  }
 0x772   : > { %10922 = vmatprep.subr.bf16.mxu1 %v18887_v35  ;;  %v18923_v1 = vld [vmem:[#allocation10 + $0x3a4] ss:$16 sps:$4 sm:$0xff]   ;;  %v18930_v51 = vld [vmem:[#allocation10 + $0x580] ss:$16 sps:$4 sm:$0xff]  }
 0x773   : > { %v18932_v34 = vld [vmem:[#allocation10 + $0x584] ss:$16 sps:$4 sm:$0xff]   ;;  %v18927_v35 = vld [vmem:[#allocation10 + $0x380] ss:$16 sps:$4 sm:$0xff]  }
 0x774   : > { %10966 = vmatpush1.bf16.msra.mxu0 %v18888_v39  ;;  %v18929_v47 = vld [vmem:[#allocation10 + $0x384] ss:$16 sps:$4 sm:$0xff]  }
 0x775   : > { %10923 = vmatpush1.bf16.msra.mxu1 %v18885_v0  ;;  %10967 = vmatprep.subr.bf16.mxu0 %v18896_v29  ;;  %v18938_v39 = vld [vmem:[#allocation10 + $0x564] ss:$16 sps:$4 sm:$0xff]   ;;  %v18936_v29 = vld [vmem:[#allocation10 + $0x560] ss:$16 sps:$4 sm:$0xff]  }
 0x776   : > { %10924 = vmatprep.subr.bf16.mxu1 %v18893_v20  ;;  %v18935_v0 = vld [vmem:[#allocation10 + $0x364] ss:$16 sps:$4 sm:$0xff]   ;;  %v18933_v20 = vld [vmem:[#allocation10 + $0x360] ss:$16 sps:$4 sm:$0xff]  }
 0x778   : > { %10968 = vmatpush1.bf16.msra.mxu0 %v18894_v13  ;;  %v18944_v13 = vld [vmem:[#allocation10 + $0x544] ss:$16 sps:$4 sm:$0xff]  }
 0x779   : > { %10925 = vmatpush1.bf16.msra.mxu1 %v18891_v28  ;;  %10969 = vmatprep.subr.bf16.mxu0 %v18902_v43  ;;  %v18941_v28 = vld [vmem:[#allocation10 + $0x344] ss:$16 sps:$4 sm:$0xff]   ;;  %v18942_v43 = vld [vmem:[#allocation10 + $0x540] ss:$16 sps:$4 sm:$0xff]  }
 0x77a   : > { %10926 = vmatprep.subr.bf16.mxu1 %v18899_v59  ;;  %v18939_v59 = vld [vmem:[#allocation10 + $0x340] ss:$16 sps:$4 sm:$0xff]  }
 0x77c   : > { %10970 = vmatpush1.bf16.msra.mxu0 %v18900_v23  ;;  %v18950_v23 = vld [vmem:[#allocation10 + $0x524] ss:$16 sps:$4 sm:$0xff]  }
 0x77d   : > { %10927 = vmatpush1.bf16.msra.mxu1 %v18897_v16  ;;  %10971 = vmatprep.subr.bf16.mxu0 %v18908_v32  ;;  %v18947_v16 = vld [vmem:[#allocation10 + $0x324] ss:$16 sps:$4 sm:$0xff]   ;;  %v18948_v32 = vld [vmem:[#allocation10 + $0x520] ss:$16 sps:$4 sm:$0xff]  }
 0x77e   : > { %10928 = vmatprep.subr.bf16.mxu1 %v18905_v54  ;;  %v18945_v54 = vld [vmem:[#allocation10 + $0x320] ss:$16 sps:$4 sm:$0xff]  }
 0x780   : > { %10972 = vmatpush1.bf16.msra.mxu0 %v18906_v38  ;;  %v18956_v38 = vld [vmem:[#allocation10 + $0x504] ss:$16 sps:$4 sm:$0xff]  }
 0x781   : > { %10929 = vmatpush1.bf16.msra.mxu1 %v18903_v17  ;;  %10973 = vmatprep.subr.bf16.mxu0 %v18914_v58  ;;  %v18953_v17 = vld [vmem:[#allocation10 + $0x304] ss:$16 sps:$4 sm:$0xff]   ;;  %v18954_v58 = vld [vmem:[#allocation10 + $0x500] ss:$16 sps:$4 sm:$0xff]  }
 0x782   : > { %10930 = vmatprep.subr.bf16.mxu1 %v18911_v4  ;;  %v18951_v4 = vld [vmem:[#allocation10 + $0x300] ss:$16 sps:$4 sm:$0xff]  }
 0x784   : > { %10974 = vmatpush2.bf16.msra.mxu0 %v18912_v57  ;;  %v18962_v57 = vld [vmem:[#allocation10 + $0xec] ss:$16 sps:$4 sm:$0xff]  }
 0x785   : > { %10931 = vmatpush2.bf16.msra.mxu1 %v18909_v22  ;;  %10975 = vmatprep.subr.bf16.mxu0 %v18920_v55  ;;  %v18959_v22 = vld [vmem:[#allocation10 + $0x6e4] ss:$16 sps:$4 sm:$0xff]   ;;  %v18960_v55 = vld [vmem:[#allocation10 + $0xe8] ss:$16 sps:$4 sm:$0xff]  }
 0x786   : > { %10932 = vmatprep.subr.bf16.mxu1 %v18917_v12  ;;  %v18957_v12 = vld [vmem:[#allocation10 + $0x6e0] ss:$16 sps:$4 sm:$0xff]  }
 0x788   : > { %10976 = vmatpush2.bf16.msra.mxu0 %v18918_v3  ;;  %v18965_v3 = vld [vmem:[#allocation10 + $0x6c4] ss:$16 sps:$4 sm:$0xff]  }
 0x789   : > { %10933 = vmatpush2.bf16.msra.mxu1 %v18915_v27  ;;  %10977 = vmatprep.subr.bf16.mxu0 %v18926_v60  ;;  %v18968_v27 = vld [vmem:[#allocation10 + $0xcc] ss:$16 sps:$4 sm:$0xff]  }
 0x78a   : > { %10934 = vmatprep.subr.bf16.mxu1 %v18923_v1  ;;  %v18966_v1 = vld [vmem:[#allocation10 + $0xc8] ss:$16 sps:$4 sm:$0xff]  }
 0x78c   : > { %10978 = vmatpush2.bf16.msra.mxu0 %v18924_v25 }
 0x78d   : > { %10935 = vmatpush2.bf16.msra.mxu1 %v18921_v7  ;;  %10979 = vmatprep.subr.bf16.mxu0 %v18932_v34  ;;  %v18963_v7 = vld [vmem:[#allocation10 + $0x6c0] ss:$16 sps:$4 sm:$0xff]   ;;  %v18974_v34 = vld [vmem:[#allocation10 + $0xac] ss:$16 sps:$4 sm:$0xff]  }
 0x78e   : > { %10936 = vmatprep.subr.bf16.mxu1 %v18929_v47 }
 0x790   : > { %10980 = vmatpush2.bf16.msra.mxu0 %v18930_v51  ;;  %v18971_v51 = vld [vmem:[#allocation10 + $0x6a4] ss:$16 sps:$4 sm:$0xff]  }
 0x791   : > { %10937 = vmatpush2.bf16.msra.mxu1 %v18927_v35  ;;  %10981 = vmatprep.subr.bf16.mxu0 %v18938_v39 }
 0x792   : > { %10938 = vmatprep.subr.bf16.mxu1 %v18935_v0  ;;  %v18972_v0 = vld [vmem:[#allocation10 + $0xa8] ss:$16 sps:$4 sm:$0xff]  }
 0x794   : > { %10982 = vmatpush2.bf16.msra.mxu0 %v18936_v29  ;;  %v18969_v29 = vld [vmem:[#allocation10 + $0x6a0] ss:$16 sps:$4 sm:$0xff]  }
 0x795   : > { %10939 = vmatpush2.bf16.msra.mxu1 %v18933_v20  ;;  %10983 = vmatprep.subr.bf16.mxu0 %v18944_v13  ;;  %v18980_v20 = vld [vmem:[#allocation10 + $0x8c] ss:$16 sps:$4 sm:$0xff]  }
 0x796   : > { %10940 = vmatprep.subr.bf16.mxu1 %v18941_v28 }
 0x798   : > { %10984 = vmatpush2.bf16.msra.mxu0 %v18942_v43  ;;  %v18975_v43 = vld [vmem:[#allocation10 + $0x680] ss:$16 sps:$4 sm:$0xff]  }
 0x799   : > { %10941 = vmatpush2.bf16.msra.mxu1 %v18939_v59  ;;  %10985 = vmatprep.subr.bf16.mxu0 %v18950_v23  ;;  %v18986_v59 = vld [vmem:[#allocation10 + $0x6c] ss:$16 sps:$4 sm:$0xff]   ;;  %v18983_v23 = vld [vmem:[#allocation10 + $0x664] ss:$16 sps:$4 sm:$0xff]  }
 0x79a   : > { %10942 = vmatprep.subr.bf16.mxu1 %v18947_v16  ;;  %v18981_v16 = vld [vmem:[#allocation10 + $0x660] ss:$16 sps:$4 sm:$0xff]  }
 0x79c   : > { %10986 = vmatpush2.bf16.msra.mxu0 %v18948_v32  ;;  %v18992_v32 = vld [vmem:[#allocation10 + $0x4c] ss:$16 sps:$4 sm:$0xff]  }
 0x79d   : > { %10943 = vmatpush2.bf16.msra.mxu1 %v18945_v54  ;;  %10987 = vmatprep.subr.bf16.mxu0 %v18956_v38  ;;  %v18989_v54 = vld [vmem:[#allocation10 + $0x644] ss:$16 sps:$4 sm:$0xff]   ;;  %v18990_v38 = vld [vmem:[#allocation10 + $0x48] ss:$16 sps:$4 sm:$0xff]  }
 0x79e   : > { %10944 = vmatprep.subr.bf16.mxu1 %v18953_v17  ;;  %v18998_v17 = vld [vmem:[#allocation10 + $0x2c] ss:$16 sps:$4 sm:$0xff]  }
 0x7a0   : > { %10988 = vmatpush2.bf16.msra.mxu0 %v18954_v58  ;;  %v18995_v58 = vld [vmem:[#allocation10 + $0x624] ss:$16 sps:$4 sm:$0xff]  }
 0x7a1   : > { %10945 = vmatpush2.bf16.msra.mxu1 %v18951_v4  ;;  %11043 = vmatprep.subr.bf16.mxu0 %v18962_v57  ;;  %v18996_v4 = vld [vmem:[#allocation10 + $0x28] ss:$16 sps:$4 sm:$0xff]   ;;  %v18993_v57 = vld [vmem:[#allocation10 + $0x620] ss:$16 sps:$4 sm:$0xff]  }
 0x7a2   : > { %11000 = vmatprep.subr.bf16.mxu1 %v18959_v22  ;;  %v19004_v22 = vld [vmem:[#allocation10 + $0xc] ss:$16 sps:$4 sm:$0xff]  }
 0x7a3   : > { %10990 = vmatmul.mubr.bf16.vlgmr.msra.gmra.mxu0 %v21070_v40 }
 0x7a4   : > { %v9410_v60 = vpop.f32.mrf.mxu1  ;;  %10947 = vmatmul.mubr.bf16.vlgmr.msra.gmra.mxu1 %v21066_v63  ;;  %11044 = vmatpush1.bf16.msra.mxu0 %v18960_v55  ;;  %v19001_v55 = vld [vmem:[#allocation10 + $0x604] ss:$16 sps:$4 sm:$0xff]  }
 0x7a5   : > { %v21147_v25 = vadd.f32 %v9410_v60, %v21136_v31  ;;  %11001 = vmatpush1.bf16.msra.mxu1 %v18957_v12  ;;  %11032 = vmatprep.mubr.bf16.mxu1 %v21091_v46  ;;  %v19002_v12 = vld [vmem:[#allocation10 + $0x8] ss:$16 sps:$4 sm:$0xff]   ;;  %v19007_v60 = vld [vmem:[#allocation10 + $0x7e4] ss:$16 sps:$4 sm:$0xff]  }
 0x7a6   : > { %11075 = vmatprep.mubr.bf16.mxu0 %v21123_v2  ;;  %v9412_v47 = vpop.f32.mrf.mxu1  ;;  %11002 = vmatprep.subr.bf16.mxu1 %v18965_v3  ;;  %v18977_v2 = vld [vmem:[#allocation10 + $0x684] ss:$16 sps:$4 sm:$0xff]   ;;  %v18999_v3 = vld [vmem:[#allocation10 + $0x600] ss:$16 sps:$4 sm:$0xff]  }
 0x7a7   : > { %v21152_v35 = vadd.f32 %v9412_v47, %v21138_v30  ;;  %11045 = vmatprep.subr.bf16.mxu0 %v18968_v27  ;;  %v18978_v30 = vld [vmem:[#allocation10 + $0x88] ss:$16 sps:$4 sm:$0xff]   ;;  %v19010_v27 = vld [vmem:[#allocation10 + $0x1ec] ss:$16 sps:$4 sm:$0xff]   ;;  %v19013_v47 = vld [vmem:[#allocation10 + $0x7c4] ss:$16 sps:$4 sm:$0xff]  }
 0x7a8   : > { %v9414_v39 = vpop.f32.mrf.mxu1  ;;  %11046 = vmatpush1.bf16.msra.mxu0 %v18966_v1  ;;  %v19008_v1 = vld [vmem:[#allocation10 + $0x1e8] ss:$16 sps:$4 sm:$0xff]  }
 0x7a9   : > { %v21155_v31 = vadd.f32 %v9414_v39, %v21140_v8  ;;  %11003 = vmatpush1.bf16.msra.mxu1 %v18963_v7  ;;  %11047 = vmatprep.subr.bf16.mxu0 %v18974_v34  ;;  %v18984_v8 = vld [vmem:[#allocation10 + $0x68] ss:$16 sps:$4 sm:$0xff]   ;;  %v19005_v7 = vld [vmem:[#allocation10 + $0x7e0] ss:$16 sps:$4 sm:$0xff]   ;;  %v19016_v34 = vld [vmem:[#allocation10 + $0x1cc] ss:$16 sps:$4 sm:$0xff]  }
 0x7aa   : > { %v9416_v13 = vpop.f32.mrf.mxu1  ;;  %11004 = vmatprep.subr.bf16.mxu1 %v18971_v51  ;;  %v19014_v51 = vld [vmem:[#allocation10 + $0x1c8] ss:$16 sps:$4 sm:$0xff]   ;;  %v19011_v39 = vld [vmem:[#allocation10 + $0x7c0] ss:$16 sps:$4 sm:$0xff]  }
 0x7ab   : > { %v21158_v28 = vadd.f32 %v9416_v13, %v21142_v36  ;;  %v18987_v36 = vld [vmem:[#allocation10 + $0x640] ss:$16 sps:$4 sm:$0xff]  }
 0x7ac   : > { %11048 = vmatpush1.bf16.msra.mxu0 %v18972_v0  ;;  %v19022_v0 = vld [vmem:[#allocation10 + $0x1ac] ss:$16 sps:$4 sm:$0xff]   ;;  %v19017_v13 = vld [vmem:[#allocation10 + $0x7a0] ss:$16 sps:$4 sm:$0xff]  }
 0x7ad   : > { %11005 = vmatpush1.bf16.msra.mxu1 %v18969_v29  ;;  %11049 = vmatprep.subr.bf16.mxu0 %v18980_v20  ;;  %v19019_v29 = vld [vmem:[#allocation10 + $0x7a4] ss:$16 sps:$4 sm:$0xff]   ;;  %v19020_v20 = vld [vmem:[#allocation10 + $0x1a8] ss:$16 sps:$4 sm:$0xff]  }
 0x7ae   : > { %11006 = vmatprep.subr.bf16.mxu1 %v18977_v2  ;;  %v19028_v2 = vld [vmem:[#allocation10 + $0x18c] ss:$16 sps:$4 sm:$0xff]  }
 0x7b0   : > { %11050 = vmatpush1.bf16.msra.mxu0 %v18978_v30  ;;  %v19025_v30 = vld [vmem:[#allocation10 + $0x784] ss:$16 sps:$4 sm:$0xff]  }
 0x7b1   : > { %11007 = vmatpush1.bf16.msra.mxu1 %v18975_v43  ;;  %11051 = vmatprep.subr.bf16.mxu0 %v18986_v59  ;;  %v19026_v43 = vld [vmem:[#allocation10 + $0x188] ss:$16 sps:$4 sm:$0xff]   ;;  %v19023_v59 = vld [vmem:[#allocation10 + $0x780] ss:$16 sps:$4 sm:$0xff]  }
 0x7b2   : > { %11008 = vmatprep.subr.bf16.mxu1 %v18983_v23  ;;  %v19034_v23 = vld [vmem:[#allocation10 + $0x16c] ss:$16 sps:$4 sm:$0xff]  }
 0x7b4   : > { %11052 = vmatpush1.bf16.msra.mxu0 %v18984_v8  ;;  %v19031_v8 = vld [vmem:[#allocation10 + $0x764] ss:$16 sps:$4 sm:$0xff]  }
 0x7b5   : > { %11009 = vmatpush1.bf16.msra.mxu1 %v18981_v16  ;;  %11053 = vmatprep.subr.bf16.mxu0 %v18992_v32  ;;  %v19032_v16 = vld [vmem:[#allocation10 + $0x168] ss:$16 sps:$4 sm:$0xff]   ;;  %v19029_v32 = vld [vmem:[#allocation10 + $0x760] ss:$16 sps:$4 sm:$0xff]  }
 0x7b6   : > { %11010 = vmatprep.subr.bf16.mxu1 %v18989_v54  ;;  %v19040_v54 = vld [vmem:[#allocation10 + $0x14c] ss:$16 sps:$4 sm:$0xff]  }
 0x7b8   : > { %11054 = vmatpush1.bf16.msra.mxu0 %v18990_v38  ;;  %v19037_v38 = vld [vmem:[#allocation10 + $0x744] ss:$16 sps:$4 sm:$0xff]  }
 0x7b9   : > { %11011 = vmatpush1.bf16.msra.mxu1 %v18987_v36  ;;  %11055 = vmatprep.subr.bf16.mxu0 %v18998_v17  ;;  %v19038_v36 = vld [vmem:[#allocation10 + $0x148] ss:$16 sps:$4 sm:$0xff]   ;;  %v9453_v17 = vpop.f32.mrf.mxu0 }
 0x7ba   : > { %11012 = vmatprep.subr.bf16.mxu1 %v18995_v58  ;;  %v19035_v58 = vld [vmem:[#allocation10 + $0x740] ss:$16 sps:$4 sm:$0xff]  }
 0x7bc   : > { %11056 = vmatpush1.bf16.msra.mxu0 %v18996_v4  ;;  %v19046_v4 = vld [vmem:[#allocation10 + $0x12c] ss:$16 sps:$4 sm:$0xff]  }
 0x7bd   : > { %11013 = vmatpush1.bf16.msra.mxu1 %v18993_v57  ;;  %11057 = vmatprep.subr.bf16.mxu0 %v19004_v22  ;;  %v19043_v57 = vld [vmem:[#allocation10 + $0x724] ss:$16 sps:$4 sm:$0xff]   ;;  %v19044_v22 = vld [vmem:[#allocation10 + $0x128] ss:$16 sps:$4 sm:$0xff]  }
 0x7be   : > { %11014 = vmatprep.subr.bf16.mxu1 %v19001_v55  ;;  %v9455_v55 = vpop.f32.mrf.mxu0 }
 0x7c0   : > { %11058 = vmatpush1.bf16.msra.mxu0 %v19002_v12  ;;  %v19041_v12 = vld [vmem:[#allocation10 + $0x720] ss:$16 sps:$4 sm:$0xff]  }
 0x7c1   : > { %11015 = vmatpush1.bf16.msra.mxu1 %v18999_v3  ;;  %11059 = vmatprep.subr.bf16.mxu0 %v19010_v27  ;;  %v19052_v3 = vld [vmem:[#allocation10 + $0x10c] ss:$16 sps:$4 sm:$0xff]   ;;  %v19049_v27 = vld [vmem:[#allocation10 + $0x704] ss:$16 sps:$4 sm:$0xff]  }
 0x7c2   : > { %11016 = vmatprep.subr.bf16.mxu1 %v19007_v60  ;;  %v19050_v60 = vld [vmem:[#allocation10 + $0x108] ss:$16 sps:$4 sm:$0xff]  }
 0x7c4   : > { %11060 = vmatpush2.bf16.msra.mxu0 %v19008_v1  ;;  %v9457_v1 = vpop.f32.mrf.mxu0 }
 0x7c5   : > { %11017 = vmatpush2.bf16.msra.mxu1 %v19005_v7  ;;  %11061 = vmatprep.subr.bf16.mxu0 %v19016_v34  ;;  %v19047_v7 = vld [vmem:[#allocation10 + $0x700] ss:$16 sps:$4 sm:$0xff]   ;;  %v19058_v34 = vld [vmem:[#allocation10 + $0x4ec] ss:$16 sps:$4 sm:$0xff]  }
 0x7c6   : > { %11018 = vmatprep.subr.bf16.mxu1 %v19013_v47  ;;  %v19055_v47 = vld [vmem:[#allocation10 + $0x2ec] ss:$16 sps:$4 sm:$0xff]  }
 0x7c8   : > { %11062 = vmatpush2.bf16.msra.mxu0 %v19014_v51  ;;  %v19056_v51 = vld [vmem:[#allocation10 + $0x4e8] ss:$16 sps:$4 sm:$0xff]  }
 0x7c9   : > { %11019 = vmatpush2.bf16.msra.mxu1 %v19011_v39  ;;  %11063 = vmatprep.subr.bf16.mxu0 %v19022_v0  ;;  %v9459_v39 = vpop.f32.mrf.mxu0  ;;  %v19053_v0 = vld [vmem:[#allocation10 + $0x2e8] ss:$16 sps:$4 sm:$0xff]  }
 0x7ca   : > { %11020 = vmatprep.subr.bf16.mxu1 %v19019_v29  ;;  %v19061_v29 = vld [vmem:[#allocation10 + $0x2cc] ss:$16 sps:$4 sm:$0xff]  }
 0x7cc   : > { %11064 = vmatpush2.bf16.msra.mxu0 %v19020_v20 }
 0x7cd   : > { %11021 = vmatpush2.bf16.msra.mxu1 %v19017_v13  ;;  %11065 = vmatprep.subr.bf16.mxu0 %v19028_v2  ;;  %v19064_v13 = vld [vmem:[#allocation10 + $0x4cc] ss:$16 sps:$4 sm:$0xff]  }
 0x7ce   : > { %11022 = vmatprep.subr.bf16.mxu1 %v19025_v30  ;;  %v19062_v30 = vld [vmem:[#allocation10 + $0x4c8] ss:$16 sps:$4 sm:$0xff]  }
 0x7d0   : > { %11066 = vmatpush2.bf16.msra.mxu0 %v19026_v43 }
 0x7d1   : > { %11023 = vmatpush2.bf16.msra.mxu1 %v19023_v59  ;;  %11067 = vmatprep.subr.bf16.mxu0 %v19034_v23  ;;  %v19059_v23 = vld [vmem:[#allocation10 + $0x2c8] ss:$16 sps:$4 sm:$0xff]  }
 0x7d2   : > { %11024 = vmatprep.subr.bf16.mxu1 %v19031_v8  ;;  %v19070_v8 = vld [vmem:[#allocation10 + $0x4ac] ss:$16 sps:$4 sm:$0xff]  }
 0x7d4   : > { %11068 = vmatpush2.bf16.msra.mxu0 %v19032_v16 }
 0x7d5   : > { %11025 = vmatpush2.bf16.msra.mxu1 %v19029_v32  ;;  %11069 = vmatprep.subr.bf16.mxu0 %v19040_v54  ;;  %v19067_v32 = vld [vmem:[#allocation10 + $0x2ac] ss:$16 sps:$4 sm:$0xff]  }
 0x7d6   : > { %11026 = vmatprep.subr.bf16.mxu1 %v19037_v38 }
 0x7d8   : > { %11070 = vmatpush2.bf16.msra.mxu0 %v19038_v36 }
 0x7d9   : > { %11027 = vmatpush2.bf16.msra.mxu1 %v19035_v58  ;;  %11071 = vmatprep.subr.bf16.mxu0 %v19046_v4  ;;  %v19068_v58 = vld [vmem:[#allocation10 + $0x4a8] ss:$16 sps:$4 sm:$0xff]  }
 0x7da   : > { %11028 = vmatprep.subr.bf16.mxu1 %v19043_v57  ;;  %v19076_v57 = vld [vmem:[#allocation10 + $0x48c] ss:$16 sps:$4 sm:$0xff]  }
 0x7dc   : > { %11072 = vmatpush2.bf16.msra.mxu0 %v19044_v22 }
 0x7dd   : > { %11029 = vmatpush2.bf16.msra.mxu1 %v19041_v12  ;;  %11073 = vmatprep.subr.bf16.mxu0 %v19052_v3 }
 0x7de   : > { %11030 = vmatprep.subr.bf16.mxu1 %v19049_v27 }
 0x7e0   : > { %11074 = vmatpush2.bf16.msra.mxu0 %v19050_v60 }
 0x7e1   : > { %11031 = vmatpush2.bf16.msra.mxu1 %v19047_v7  ;;  %11129 = vmatprep.subr.bf16.mxu0 %v19058_v34  ;;  %v19071_v7 = vld [vmem:[#allocation10 + $0x288] ss:$16 sps:$4 sm:$0xff]   ;;  %v19082_v34 = vld [vmem:[#allocation10 + $0x46c] ss:$16 sps:$4 sm:$0xff]  }
 0x7e2   : > { %11086 = vmatprep.subr.bf16.mxu1 %v19055_v47  ;;  %v19080_v47 = vld [vmem:[#allocation10 + $0x468] ss:$16 sps:$4 sm:$0xff]  }
 0x7e3   : > { %v9539_v20 = vpop.f32.mrf.mxu0  ;;  %11076 = vmatmul.mubr.bf16.vlgmr.msra.gmra.mxu0 %v21052_v61 }
 0x7e4   : > { %v9496_v2 = vpop.f32.mrf.mxu1  ;;  %11033 = vmatmul.mubr.bf16.vlgmr.msra.gmra.mxu1 %v21089_v44  ;;  %11130 = vmatpush1.bf16.msra.mxu0 %v19056_v51  ;;  %v19077_v51 = vld [vmem:[#allocation10 + $0x268] ss:$16 sps:$4 sm:$0xff]  }
 0x7e5   : > { %v9497_v43 = vadd.f32 %v9496_v2, %v9453_v17  ;;  %11087 = vmatpush1.bf16.msra.mxu1 %v19053_v0  ;;  %11118 = vmatprep.mubr.bf16.mxu1 %v21130_v56  ;;  %v9541_v59 = vpop.f32.mrf.mxu0  ;;  %v19065_v56 = vld [vmem:[#allocation10 + $0x2a8] ss:$16 sps:$4 sm:$0xff]   ;;  %v19088_v0 = vld [vmem:[#allocation10 + $0x44c] ss:$16 sps:$4 sm:$0xff]  }
 0x7e6   : > { %11161 = vmatprep.mubr.bf16.mxu0 %v21072_v19  ;;  %v9498_v16 = vpop.f32.mrf.mxu1  ;;  %11088 = vmatprep.subr.bf16.mxu1 %v19061_v29  ;;  %v19073_v19 = vld [vmem:[#allocation10 + $0x28c] ss:$16 sps:$4 sm:$0xff]  }
 0x7e7   : > { %v21164_v54 = vadd.f32 %v9539_v20, %v9497_v43  ;;  %v9499_v61 = vadd.f32 %v9498_v16, %v9455_v55  ;;  %11131 = vmatprep.subr.bf16.mxu0 %v19064_v13  ;;  %v9543_v36 = vpop.f32.mrf.mxu0  ;;  %v19074_v55 = vld [vmem:[#allocation10 + $0x488] ss:$16 sps:$4 sm:$0xff]   ;;  %v19085_v29 = vld [vmem:[#allocation10 + $0x24c] ss:$16 sps:$4 sm:$0xff]  }
 0x7e8   : > { %v9500_v38 = vpop.f32.mrf.mxu1  ;;  %11132 = vmatpush1.bf16.msra.mxu0 %v19062_v30  ;;  %v19083_v20 = vld [vmem:[#allocation10 + $0x248] ss:$16 sps:$4 sm:$0xff]   ;;  %v19094_v13 = vld [vmem:[#allocation10 + $0x42c] ss:$16 sps:$4 sm:$0xff]  }
 0x7e9   : > { %v21166_v17 = vadd.f32 %v9541_v59, %v9499_v61  ;;  %v9501_v4 = vadd.f32 %v9500_v38, %v9457_v1  ;;  %11089 = vmatpush1.bf16.msra.mxu1 %v19059_v23  ;;  %11133 = vmatprep.subr.bf16.mxu0 %v19070_v8  ;;  %v9545_v27 = vpop.f32.mrf.mxu0  ;;  %v19079_v1 = vld [vmem:[#allocation10 + $0x26c] ss:$16 sps:$4 sm:$0xff]   ;;  %v19092_v30 = vld [vmem:[#allocation10 + $0x428] ss:$16 sps:$4 sm:$0xff]  }
 0x7ea   : > { %v9502_v22 = vpop.f32.mrf.mxu1  ;;  %11090 = vmatprep.subr.bf16.mxu1 %v19067_v32  ;;  %v19091_v2 = vld [vmem:[#allocation10 + $0x22c] ss:$16 sps:$4 sm:$0xff]   ;;  %v19089_v43 = vld [vmem:[#allocation10 + $0x228] ss:$16 sps:$4 sm:$0xff]  }
 0x7eb   : > { %v21168_v12 = vadd.f32 %v9543_v36, %v9501_v4  ;;  %v9503_v3 = vadd.f32 %v9502_v22, %v9459_v39  ;;  %v19086_v39 = vld [vmem:[#allocation10 + $0x448] ss:$16 sps:$4 sm:$0xff]   ;;  %v19100_v59 = vld [vmem:[#allocation10 + $0x40c] ss:$16 sps:$4 sm:$0xff]  }
 0x7ec   : > { %11134 = vmatpush1.bf16.msra.mxu0 %v19068_v58  ;;  %v19097_v23 = vld [vmem:[#allocation10 + $0x20c] ss:$16 sps:$4 sm:$0xff]   ;;  %v19098_v8 = vld [vmem:[#allocation10 + $0x408] ss:$16 sps:$4 sm:$0xff]  }
 0x7ed   : > { %v21170_v60 = vadd.f32 %v9545_v27, %v9503_v3  ;;  %11091 = vmatpush1.bf16.msra.mxu1 %v19065_v56  ;;  %11135 = vmatprep.subr.bf16.mxu0 %v19076_v57  ;;  %v19095_v16 = vld [vmem:[#allocation10 + $0x208] ss:$16 sps:$4 sm:$0xff]   ;;  %v19106_v32 = vld [vmem:[#allocation10 + $0x5ec] ss:$16 sps:$4 sm:$0xff]  }
 0x7ee   : > { %11092 = vmatprep.subr.bf16.mxu1 %v19073_v19  ;;  %v19103_v61 = vld [vmem:[#allocation10 + $0x3ec] ss:$16 sps:$4 sm:$0xff]   ;;  %v19104_v38 = vld [vmem:[#allocation10 + $0x5e8] ss:$16 sps:$4 sm:$0xff]  }
 0x7ef   : > { %v19101_v36 = vld [vmem:[#allocation10 + $0x3e8] ss:$16 sps:$4 sm:$0xff]   ;;  %v19112_v58 = vld [vmem:[#allocation10 + $0x5cc] ss:$16 sps:$4 sm:$0xff]  }
 0x7f0   : > { %11136 = vmatpush1.bf16.msra.mxu0 %v19074_v55  ;;  %v19109_v4 = vld [vmem:[#allocation10 + $0x3cc] ss:$16 sps:$4 sm:$0xff]   ;;  %v19110_v56 = vld [vmem:[#allocation10 + $0x5c8] ss:$16 sps:$4 sm:$0xff]  }
 0x7f1   : > { %11093 = vmatpush1.bf16.msra.mxu1 %v19071_v7  ;;  %11137 = vmatprep.subr.bf16.mxu0 %v19082_v34  ;;  %v19107_v57 = vld [vmem:[#allocation10 + $0x3c8] ss:$16 sps:$4 sm:$0xff]   ;;  %v19118_v22 = vld [vmem:[#allocation10 + $0x5ac] ss:$16 sps:$4 sm:$0xff]  }
 0x7f2   : > { %11094 = vmatprep.subr.bf16.mxu1 %v19079_v1  ;;  %v19115_v19 = vld [vmem:[#allocation10 + $0x3ac] ss:$16 sps:$4 sm:$0xff]   ;;  %v19116_v3 = vld [vmem:[#allocation10 + $0x5a8] ss:$16 sps:$4 sm:$0xff]  }
 0x7f3   : > { %v19113_v27 = vld [vmem:[#allocation10 + $0x3a8] ss:$16 sps:$4 sm:$0xff]   ;;  %v19124_v55 = vld [vmem:[#allocation10 + $0x58c] ss:$16 sps:$4 sm:$0xff]  }
 0x7f4   : > { %11138 = vmatpush1.bf16.msra.mxu0 %v19080_v47  ;;  %v19121_v7 = vld [vmem:[#allocation10 + $0x38c] ss:$16 sps:$4 sm:$0xff]   ;;  %v19122_v34 = vld [vmem:[#allocation10 + $0x588] ss:$16 sps:$4 sm:$0xff]  }
 0x7f5   : > { %11095 = vmatpush1.bf16.msra.mxu1 %v19077_v51  ;;  %11139 = vmatprep.subr.bf16.mxu0 %v19088_v0  ;;  %v19119_v1 = vld [vmem:[#allocation10 + $0x388] ss:$16 sps:$4 sm:$0xff]   ;;  %v19130_v47 = vld [vmem:[#allocation10 + $0x56c] ss:$16 sps:$4 sm:$0xff]  }
 0x7f6   : > { %11096 = vmatprep.subr.bf16.mxu1 %v19085_v29  ;;  %v19127_v51 = vld [vmem:[#allocation10 + $0x36c] ss:$16 sps:$4 sm:$0xff]   ;;  %v19128_v0 = vld [vmem:[#allocation10 + $0x568] ss:$16 sps:$4 sm:$0xff]  }
 0x7f7   : > { %v19125_v29 = vld [vmem:[#allocation10 + $0x368] ss:$16 sps:$4 sm:$0xff]  }
 0x7f8   : > { %11140 = vmatpush1.bf16.msra.mxu0 %v19086_v39  ;;  %v19136_v39 = vld [vmem:[#allocation10 + $0x54c] ss:$16 sps:$4 sm:$0xff]  }
 0x7f9   : > { %11097 = vmatpush1.bf16.msra.mxu1 %v19083_v20  ;;  %11141 = vmatprep.subr.bf16.mxu0 %v19094_v13  ;;  %v19133_v20 = vld [vmem:[#allocation10 + $0x34c] ss:$16 sps:$4 sm:$0xff]   ;;  %v19134_v13 = vld [vmem:[#allocation10 + $0x548] ss:$16 sps:$4 sm:$0xff]  }
 0x7fa   : > { %11098 = vmatprep.subr.bf16.mxu1 %v19091_v2  ;;  %v19131_v2 = vld [vmem:[#allocation10 + $0x348] ss:$16 sps:$4 sm:$0xff]  }
 0x7fc   : > { %11142 = vmatpush1.bf16.msra.mxu0 %v19092_v30  ;;  %v19142_v30 = vld [vmem:[#allocation10 + $0x52c] ss:$16 sps:$4 sm:$0xff]  }
 0x7fd   : > { %11099 = vmatpush1.bf16.msra.mxu1 %v19089_v43  ;;  %11143 = vmatprep.subr.bf16.mxu0 %v19100_v59  ;;  %v19139_v43 = vld [vmem:[#allocation10 + $0x32c] ss:$16 sps:$4 sm:$0xff]   ;;  %v19140_v59 = vld [vmem:[#allocation10 + $0x528] ss:$16 sps:$4 sm:$0xff]  }
 0x7fe   : > { %11100 = vmatprep.subr.bf16.mxu1 %v19097_v23  ;;  %v19137_v23 = vld [vmem:[#allocation10 + $0x328] ss:$16 sps:$4 sm:$0xff]  }
 0x800   : > { %11144 = vmatpush1.bf16.msra.mxu0 %v19098_v8  ;;  %v19148_v8 = vld [vmem:[#allocation10 + $0x50c] ss:$16 sps:$4 sm:$0xff]  }
 0x801   : > { %11101 = vmatpush1.bf16.msra.mxu1 %v19095_v16  ;;  %11145 = vmatprep.subr.bf16.mxu0 %v19106_v32  ;;  %v19145_v16 = vld [vmem:[#allocation10 + $0x30c] ss:$16 sps:$4 sm:$0xff]   ;;  %v19146_v32 = vld [vmem:[#allocation10 + $0x508] ss:$16 sps:$4 sm:$0xff]  }
 0x802   : > { %11102 = vmatprep.subr.bf16.mxu1 %v19103_v61  ;;  %v19143_v61 = vld [vmem:[#allocation10 + $0x308] ss:$16 sps:$4 sm:$0xff]  }
 0x804   : > { %11146 = vmatpush2.bf16.msra.mxu0 %v19104_v38  ;;  %v19151_v38 = vld [vmem:[#allocation10 + $0x6ec] ss:$16 sps:$4 sm:$0xff]  }
 0x805   : > { %11103 = vmatpush2.bf16.msra.mxu1 %v19101_v36  ;;  %11147 = vmatprep.subr.bf16.mxu0 %v19112_v58  ;;  %v19149_v36 = vld [vmem:[#allocation10 + $0x6e8] ss:$16 sps:$4 sm:$0xff]   ;;  %v19154_v58 = vld [vmem:[#allocation10 + $0x6cc] ss:$16 sps:$4 sm:$0xff]  }
 0x806   : > { %11104 = vmatprep.subr.bf16.mxu1 %v19109_v4 }
 0x808   : > { %11148 = vmatpush2.bf16.msra.mxu0 %v19110_v56 }
 0x809   : > { %11105 = vmatpush2.bf16.msra.mxu1 %v19107_v57  ;;  %11149 = vmatprep.subr.bf16.mxu0 %v19118_v22 }
 0x80a   : > { %11106 = vmatprep.subr.bf16.mxu1 %v19115_v19  ;;  %v19152_v19 = vld [vmem:[#allocation10 + $0x6c8] ss:$16 sps:$4 sm:$0xff]  }
 0x80c   : > { %11150 = vmatpush2.bf16.msra.mxu0 %v19116_v3 }
 0x80d   : > { %11107 = vmatpush2.bf16.msra.mxu1 %v19113_v27  ;;  %11151 = vmatprep.subr.bf16.mxu0 %v19124_v55 }
 0x80e   : > { %11108 = vmatprep.subr.bf16.mxu1 %v19121_v7 }
 0x810   : > { %11152 = vmatpush2.bf16.msra.mxu0 %v19122_v34  ;;  %v19161_v34 = vld [vmem:[#allocation10 + $0x68c] ss:$16 sps:$4 sm:$0xff]  }
 0x811   : > { %11109 = vmatpush2.bf16.msra.mxu1 %v19119_v1  ;;  %11153 = vmatprep.subr.bf16.mxu0 %v19130_v47  ;;  %v19167_v47 = vld [vmem:[#allocation10 + $0x64c] ss:$16 sps:$4 sm:$0xff]  }
 0x812   : > { %11110 = vmatprep.subr.bf16.mxu1 %v19127_v51  ;;  %v19206_v51 = vld [vmem:[#allocation10 + $0x10a4] ss:$16 sps:$4 sm:$0xff]  }
 0x814   : > { %11154 = vmatpush2.bf16.msra.mxu0 %v19128_v0  ;;  %v19170_v0 = vld [vmem:[#allocation10 + $0x62c] ss:$16 sps:$4 sm:$0xff]  }
 0x815   : > { %11111 = vmatpush2.bf16.msra.mxu1 %v19125_v29  ;;  %11155 = vmatprep.subr.bf16.mxu0 %v19136_v39  ;;  %v19168_v29 = vld [vmem:[#allocation10 + $0x628] ss:$16 sps:$4 sm:$0xff]   ;;  %v19209_v39 = vld [vmem:[#allocation10 + $0x1084] ss:$16 sps:$4 sm:$0xff]  }
 0x816   : > { %11112 = vmatprep.subr.bf16.mxu1 %v19133_v20  ;;  %v19173_v20 = vld [vmem:[#allocation10 + $0x60c] ss:$16 sps:$4 sm:$0xff]  }
 0x818   : > { %11156 = vmatpush2.bf16.msra.mxu0 %v19134_v13  ;;  %v19207_v13 = vld [vmem:[#allocation10 + $0x1080] ss:$16 sps:$4 sm:$0xff]  }
 0x819   : > { %11113 = vmatpush2.bf16.msra.mxu1 %v19131_v2  ;;  %11157 = vmatprep.subr.bf16.mxu0 %v19142_v30  ;;  %v19171_v2 = vld [vmem:[#allocation10 + $0x608] ss:$16 sps:$4 sm:$0xff]   ;;  %v19212_v30 = vld [vmem:[#allocation10 + $0x1064] ss:$16 sps:$4 sm:$0xff]  }
 0x81a   : > { %11114 = vmatprep.subr.bf16.mxu1 %v19139_v43  ;;  %v19176_v43 = vld [vmem:[#allocation10 + $0x7ec] ss:$16 sps:$4 sm:$0xff]  }
 0x81c   : > { %11158 = vmatpush2.bf16.msra.mxu0 %v19140_v59  ;;  %v19210_v59 = vld [vmem:[#allocation10 + $0x1060] ss:$16 sps:$4 sm:$0xff]  }
 0x81d   : > { %11115 = vmatpush2.bf16.msra.mxu1 %v19137_v23  ;;  %11159 = vmatprep.subr.bf16.mxu0 %v19148_v8  ;;  %v19174_v23 = vld [vmem:[#allocation10 + $0x7e8] ss:$16 sps:$4 sm:$0xff]   ;;  %v19215_v8 = vld [vmem:[#allocation10 + $0x1044] ss:$16 sps:$4 sm:$0xff]  }
 0x81e   : > { %11116 = vmatprep.subr.bf16.mxu1 %v19145_v16  ;;  %v19179_v16 = vld [vmem:[#allocation10 + $0x7cc] ss:$16 sps:$4 sm:$0xff]  }
 0x820   : > { %11160 = vmatpush2.bf16.msra.mxu0 %v19146_v32  ;;  %v19213_v32 = vld [vmem:[#allocation10 + $0x1040] ss:$16 sps:$4 sm:$0xff]  }
 0x821   : > { %11117 = vmatpush2.bf16.msra.mxu1 %v19143_v61  ;;  %11238 = vmatprep.subr.bf16.mxu0 %v20916_v45  ;;  %v19177_v61 = vld [vmem:[#allocation10 + $0x7c8] ss:$16 sps:$4 sm:$0xff]  }
 0x822   : > { %11172 = vmatprep.subr.bf16.mxu1 %v19151_v38  ;;  %v19218_v38 = vld [vmem:[#allocation10 + $0x1024] ss:$16 sps:$4 sm:$0xff]  }
 0x823   : > { %v10905_v4 = vpop.f32.mrf.mxu0  ;;  %11162 = vmatmul.mubr.bf16.vlgmr.msra.gmra.mxu0 %v21070_v40  ;;  %v19157_v40 = vld [vmem:[#allocation10 + $0x6ac] ss:$16 sps:$4 sm:$0xff]  }
 0x824   : > { %v9582_v56 = vpop.f32.mrf.mxu1  ;;  %v21175_v57 = vadd.f32 %v10905_v4, %v21147_v25  ;;  %11119 = vmatmul.mubr.bf16.vlgmr.msra.gmra.mxu1 %v21066_v63  ;;  %11239 = vmatpush1.bf16.msra.mxu0 %v20914_v26  ;;  %v21191_v25 = vld [vmem:[#allocation8 + $0x10] sm:$0xff]  }
 0x825   : > { %v21180_v22 = vadd.f32 %v9582_v56, %v21164_v54  ;;  %11173 = vmatpush1.bf16.msra.mxu1 %v19149_v36  ;;  %11204 = vmatprep.mubr.bf16.mxu1 %v21091_v46  ;;  %v10907_v45 = vpop.f32.mrf.mxu0  ;;  %v19182_v36 = vld [vmem:[#allocation10 + $0x7ac] ss:$16 sps:$4 sm:$0xff]   ;;  %v19180_v4 = vld [vmem:[#allocation10 + $0x7a8] ss:$16 sps:$4 sm:$0xff]   ;;  %v19221_v56 = vld [vmem:[#allocation10 + $0x1004] ss:$16 sps:$4 sm:$0xff]  }
 0x826   : > { %v9584_v3 = vpop.f32.mrf.mxu1  ;;  %v21184_v27 = vadd.f32 %v10907_v45, %v21152_v35  ;;  %11240 = vmatprep.subr.bf16.mxu0 %v20919_v50  ;;  %11174 = vmatprep.subr.bf16.mxu1 %v19154_v58  ;;  %v19216_v58 = vld [vmem:[#allocation10 + $0x1020] ss:$16 sps:$4 sm:$0xff]   ;;  %v19185_v45 = vld [vmem:[#allocation10 + $0x78c] ss:$16 sps:$4 sm:$0xff]  }
 0x827   : > { %v21188_v63 = vadd.f32 %v9584_v3, %v21166_v17  ;;  %v10909_v26 = vpop.f32.mrf.mxu0  ;;  %11258 = vmatprep.mubr.bf16.mxu0 %v22868_v9  ;;  %v19155_v17 = vld [vmem:[#allocation10 + $0x6a8] ss:$16 sps:$4 sm:$0xff]  }
 0x828   : > { %v9586_v54 = vpop.f32.mrf.mxu1  ;;  %v21194_v46 = vadd.f32 %v10909_v26, %v21155_v31  ;;  %11241 = vmatpush1.bf16.msra.mxu0 %v20906_v49  ;;  %v19159_v49 = vld [vmem:[#allocation10 + $0x688] ss:$16 sps:$4 sm:$0xff]   ;;  %v19164_v31 = vld [vmem:[#allocation10 + $0x66c] ss:$16 sps:$4 sm:$0xff]  }
 0x829   : > { %v21198_v35 = vadd.f32 %v9586_v54, %v21168_v12  ;;  %11175 = vmatpush1.bf16.msra.mxu1 %v19152_v19  ;;  %v10911_v50 = vpop.f32.mrf.mxu0  ;;  %11324 = vmatprep.subr.bf16.mxu0 %v20988_v42  ;;  %v19200_v42 = vld [vmem:[#allocation10 + $0x10e4] ss:$16 sps:$4 sm:$0xff]   ;;  %v19162_v12 = vld [vmem:[#allocation10 + $0x668] ss:$16 sps:$4 sm:$0xff]   ;;  %v19219_v19 = vld [vmem:[#allocation10 + $0x1000] ss:$16 sps:$4 sm:$0xff]  }
 0x82a   : > { %v9588_v55 = vpop.f32.mrf.mxu1  ;;  %v21202_v7 = vadd.f32 %v10911_v50, %v21158_v28  ;;  %11176 = vmatprep.subr.bf16.mxu1 %v19157_v40  ;;  %v19198_v28 = vld [vmem:[#allocation10 + $0x10e0] ss:$16 sps:$4 sm:$0xff]   ;;  %v19183_v3 = vld [vmem:[#allocation10 + $0x788] ss:$16 sps:$4 sm:$0xff]   ;;  %v19224_v40 = vld [vmem:[#allocation10 + $0x11e4] ss:$16 sps:$4 sm:$0xff]  }
 0x82b   : > { %v21205_v1 = vadd.f32 %v9588_v55, %v21170_v60  ;;  %17390 = vmatmul.mubr.msk.bf16.vlgmr.msra.gmra.mxu0 %vm7079_vm1, %v21191_v25  ;;  %v19203_v60 = vld [vmem:[#allocation10 + $0x10c4] ss:$16 sps:$4 sm:$0xff]   ;;  %v19188_v26 = vld [vmem:[#allocation10 + $0x76c] ss:$16 sps:$4 sm:$0xff]   ;;  %v19222_v54 = vld [vmem:[#allocation10 + $0x11e0] ss:$16 sps:$4 sm:$0xff]  }
 0x82c   : > { %11325 = vmatpush1.bf16.msra.mxu0 %v20986_v48  ;;  %11344 = vmatprep.mubr.bf16.mxu0 %v22868_v9  ;;  %v19201_v48 = vld [vmem:[#allocation10 + $0x10c0] ss:$16 sps:$4 sm:$0xff]   ;;  %v19186_v50 = vld [vmem:[#allocation10 + $0x768] ss:$16 sps:$4 sm:$0xff]   ;;  %v19191_v55 = vld [vmem:[#allocation10 + $0x74c] ss:$16 sps:$4 sm:$0xff]  }
 0x82d   : > { %11177 = vmatpush1.bf16.msra.mxu1 %v19155_v17  ;;  %11326 = vmatprep.subr.bf16.mxu0 %v20991_v6  ;;  %v19165_v6 = vld [vmem:[#allocation10 + $0x648] ss:$16 sps:$4 sm:$0xff]   ;;  %v19227_v17 = vld [vmem:[#allocation10 + $0x11c4] ss:$16 sps:$4 sm:$0xff]  }
 0x82e   : > { %11178 = vmatprep.subr.bf16.mxu1 %v19161_v34  ;;  %v19225_v34 = vld [vmem:[#allocation10 + $0x11c0] ss:$16 sps:$4 sm:$0xff]  }
 0x830   : > { %11327 = vmatpush1.bf16.msra.mxu0 %v20979_v21  ;;  %v19204_v21 = vld [vmem:[#allocation10 + $0x10a0] ss:$16 sps:$4 sm:$0xff]  }
 0x831   : > { %11179 = vmatpush1.bf16.msra.mxu1 %v19159_v49  ;;  %12943 = vmatprep.subr.bf16.mxu0 %v19200_v42  ;;  %v19189_v49 = vld [vmem:[#allocation10 + $0x748] ss:$16 sps:$4 sm:$0xff]   ;;  %v19230_v42 = vld [vmem:[#allocation10 + $0x11a4] ss:$16 sps:$4 sm:$0xff]  }
 0x832   : > { %11180 = vmatprep.subr.bf16.mxu1 %v19164_v31  ;;  %v19194_v31 = vld [vmem:[#allocation10 + $0x72c] ss:$16 sps:$4 sm:$0xff]  }
 0x833   : > { %17392 = vmatmul.mubr.msk.bf16.vlgmr.msra.gmra.mxu0 %vm7079_vm1, %v21191_v25 }
 0x834   : > { %12944 = vmatpush1.bf16.msra.mxu0 %v19198_v28  ;;  %v19228_v28 = vld [vmem:[#allocation10 + $0x11a0] ss:$16 sps:$4 sm:$0xff]  }
 0x835   : > { %11181 = vmatpush1.bf16.msra.mxu1 %v19162_v12  ;;  %12945 = vmatprep.subr.bf16.mxu0 %v19203_v60  ;;  %v19192_v12 = vld [vmem:[#allocation10 + $0x728] ss:$16 sps:$4 sm:$0xff]   ;;  %v19233_v60 = vld [vmem:[#allocation10 + $0x1184] ss:$16 sps:$4 sm:$0xff]  }
 0x836   : > { %11182 = vmatprep.subr.bf16.mxu1 %v19167_v47  ;;  %v19197_v47 = vld [vmem:[#allocation10 + $0x70c] ss:$16 sps:$4 sm:$0xff]  }
 0x838   : > { %12946 = vmatpush1.bf16.msra.mxu0 %v19201_v48  ;;  %v19231_v48 = vld [vmem:[#allocation10 + $0x1180] ss:$16 sps:$4 sm:$0xff]  }
 0x839   : > { %11183 = vmatpush1.bf16.msra.mxu1 %v19165_v6  ;;  %12947 = vmatprep.subr.bf16.mxu0 %v19206_v51  ;;  %v19195_v6 = vld [vmem:[#allocation10 + $0x708] ss:$16 sps:$4 sm:$0xff]  }
 0x83a   : > { %11184 = vmatprep.subr.bf16.mxu1 %v19170_v0 }
 0x83c   : > { %12948 = vmatpush1.bf16.msra.mxu0 %v19204_v21  ;;  %v19236_v21 = vld [vmem:[#allocation10 + $0x1164] ss:$16 sps:$4 sm:$0xff]  }
 0x83d   : > { %11185 = vmatpush1.bf16.msra.mxu1 %v19168_v29  ;;  %12949 = vmatprep.subr.bf16.mxu0 %v19209_v39 }
 0x83e   : > { %11186 = vmatprep.subr.bf16.mxu1 %v19173_v20  ;;  %v19234_v20 = vld [vmem:[#allocation10 + $0x1160] ss:$16 sps:$4 sm:$0xff]  }
 0x840   : > { %12950 = vmatpush1.bf16.msra.mxu0 %v19207_v13 }
 0x841   : > { %11187 = vmatpush1.bf16.msra.mxu1 %v19171_v2  ;;  %12951 = vmatprep.subr.bf16.mxu0 %v19212_v30 }
 0x842   : > { %11188 = vmatprep.subr.bf16.mxu1 %v19176_v43  ;;  %v19239_v43 = vld [vmem:[#allocation10 + $0x1144] ss:$16 sps:$4 sm:$0xff]  }
 0x844   : > { %12952 = vmatpush1.bf16.msra.mxu0 %v19210_v59 }
 0x845   : > { %11189 = vmatpush2.bf16.msra.mxu1 %v19174_v23  ;;  %12953 = vmatprep.subr.bf16.mxu0 %v19215_v8 }
 0x846   : > { %11190 = vmatprep.subr.bf16.mxu1 %v19179_v16  ;;  %v19242_v16 = vld [vmem:[#allocation10 + $0x1124] ss:$16 sps:$4 sm:$0xff]  }
 0x848   : > { %12954 = vmatpush1.bf16.msra.mxu0 %v19213_v32 }
 0x849   : > { %11191 = vmatpush2.bf16.msra.mxu1 %v19177_v61  ;;  %12955 = vmatprep.subr.bf16.mxu0 %v19218_v38  ;;  %v19248_v61 = vld [vmem:[#allocation10 + $0x12e4] ss:$16 sps:$4 sm:$0xff]  }
 0x84a   : > { %11192 = vmatprep.subr.bf16.mxu1 %v19182_v36  ;;  %v19251_v38 = vld [vmem:[#allocation10 + $0x14e4] ss:$16 sps:$4 sm:$0xff]   ;;  %v19252_v36 = vld [vmem:[#allocation10 + $0x12c0] ss:$16 sps:$4 sm:$0xff]  }
 0x84c   : > { %12956 = vmatpush1.bf16.msra.mxu0 %v19216_v58  ;;  %v19258_v58 = vld [vmem:[#allocation10 + $0x12a0] ss:$16 sps:$4 sm:$0xff]  }
 0x84d   : > { %11193 = vmatpush2.bf16.msra.mxu1 %v19180_v4  ;;  %12957 = vmatprep.subr.bf16.mxu0 %v19221_v56  ;;  %v19266_v4 = vld [vmem:[#allocation10 + $0x1284] ss:$16 sps:$4 sm:$0xff]  }
 0x84e   : > { %11194 = vmatprep.subr.bf16.mxu1 %v19185_v45  ;;  %v19272_v56 = vld [vmem:[#allocation10 + $0x1264] ss:$16 sps:$4 sm:$0xff]  }
 0x84f   : > { %v19278_v45 = vld [vmem:[#allocation10 + $0x1244] ss:$16 sps:$4 sm:$0xff]  }
 0x850   : > { %12958 = vmatpush1.bf16.msra.mxu0 %v19219_v19  ;;  %v19276_v19 = vld [vmem:[#allocation10 + $0x1240] ss:$16 sps:$4 sm:$0xff]  }
 0x851   : > { %11195 = vmatpush2.bf16.msra.mxu1 %v19183_v3  ;;  %12959 = vmatprep.subr.bf16.mxu0 %v19224_v40  ;;  %v19284_v3 = vld [vmem:[#allocation10 + $0x1224] ss:$16 sps:$4 sm:$0xff]   ;;  %v19282_v40 = vld [vmem:[#allocation10 + $0x1220] ss:$16 sps:$4 sm:$0xff]  }
 0x852   : > { %11196 = vmatprep.subr.bf16.mxu1 %v19188_v26  ;;  %v19290_v26 = vld [vmem:[#allocation10 + $0x1204] ss:$16 sps:$4 sm:$0xff]  }
 0x854   : > { %12960 = vmatpush2.bf16.msra.mxu0 %v19222_v54  ;;  %v19288_v54 = vld [vmem:[#allocation10 + $0x1200] ss:$16 sps:$4 sm:$0xff]  }
 0x855   : > { %11197 = vmatpush2.bf16.msra.mxu1 %v19186_v50  ;;  %12961 = vmatprep.subr.bf16.mxu0 %v19227_v17  ;;  %v19296_v50 = vld [vmem:[#allocation10 + $0x13e4] ss:$16 sps:$4 sm:$0xff]   ;;  %v19294_v17 = vld [vmem:[#allocation10 + $0x13e0] ss:$16 sps:$4 sm:$0xff]  }
 0x856   : > { %11198 = vmatprep.subr.bf16.mxu1 %v19191_v55  ;;  %v19302_v55 = vld [vmem:[#allocation10 + $0x13c4] ss:$16 sps:$4 sm:$0xff]  }
 0x858   : > { %12962 = vmatpush2.bf16.msra.mxu0 %v19225_v34  ;;  %v19300_v34 = vld [vmem:[#allocation10 + $0x13c0] ss:$16 sps:$4 sm:$0xff]  }
 0x859   : > { %11199 = vmatpush2.bf16.msra.mxu1 %v19189_v49  ;;  %12963 = vmatprep.subr.bf16.mxu0 %v19230_v42  ;;  %v19308_v49 = vld [vmem:[#allocation10 + $0x13a4] ss:$16 sps:$4 sm:$0xff]   ;;  %v19306_v42 = vld [vmem:[#allocation10 + $0x13a0] ss:$16 sps:$4 sm:$0xff]  }
 0x85a   : > { %11200 = vmatprep.subr.bf16.mxu1 %v19194_v31  ;;  %v19314_v31 = vld [vmem:[#allocation10 + $0x1384] ss:$16 sps:$4 sm:$0xff]  }
 0x85c   : > { %12964 = vmatpush2.bf16.msra.mxu0 %v19228_v28  ;;  %v19312_v28 = vld [vmem:[#allocation10 + $0x1380] ss:$16 sps:$4 sm:$0xff]  }
 0x85d   : > { %11201 = vmatpush2.bf16.msra.mxu1 %v19192_v12  ;;  %12965 = vmatprep.subr.bf16.mxu0 %v19233_v60 }
 0x85e   : > { %11202 = vmatprep.subr.bf16.mxu1 %v19197_v47 }
 0x860   : > { %12966 = vmatpush2.bf16.msra.mxu0 %v19231_v48  ;;  %v19320_v48 = vld [vmem:[#allocation10 + $0x1364] ss:$16 sps:$4 sm:$0xff]  }
 0x861   : > { %11203 = vmatpush2.bf16.msra.mxu1 %v19195_v6  ;;  %12967 = vmatprep.subr.bf16.mxu0 %v19236_v21 }
 0x862   : > { %11281 = vmatprep.subr.bf16.mxu1 %v20955_v18 }
 0x863   : > { %v10991_v51 = vpop.f32.mrf.mxu0 }
 0x864   : > { %v10948_v0 = vpop.f32.mrf.mxu1  ;;  %11205 = vmatmul.mubr.bf16.vlgmr.msra.gmra.mxu1 %v21089_v44  ;;  %12968 = vmatpush2.bf16.msra.mxu0 %v19234_v20 }
 0x865   : > { %v10949_v29 = vadd.f32 %v10948_v0, %v21175_v57  ;;  %11282 = vmatpush1.bf16.msra.mxu1 %v20953_v37  ;;  %v10993_v39 = vpop.f32.mrf.mxu0  ;;  %11301 = vmatprep.mubr.bf16.mxu1 %v22868_v9  ;;  %v19237_v57 = vld [vmem:[#allocation10 + $0x1140] ss:$16 sps:$4 sm:$0xff]  }
 0x866   : > { %v10950_v13 = vpop.f32.mrf.mxu1  ;;  %11283 = vmatprep.subr.bf16.mxu1 %v20958_v33  ;;  %12969 = vmatprep.subr.bf16.mxu0 %v19239_v43  ;;  %v19318_v0 = vld [vmem:[#allocation10 + $0x1360] ss:$16 sps:$4 sm:$0xff]  }
 0x867   : > { %v21221_v2 = vadd.f32 %v10991_v51, %v10949_v29  ;;  %v10951_v18 = vadd.f32 %v10950_v13, %v21184_v27  ;;  %v10995_v44 = vpop.f32.mrf.mxu0 }
 0x868   : > { %v10952_v30 = vpop.f32.mrf.mxu1  ;;  %12970 = vmatpush2.bf16.msra.mxu0 %v19237_v57  ;;  %v19332_v57 = vld [vmem:[#allocation10 + $0x1324] ss:$16 sps:$4 sm:$0xff]  }
 0x869   : > { %v21224_v59 = vadd.f32 %v10993_v39, %v10951_v18  ;;  %v10953_v37 = vadd.f32 %v10952_v30, %v21194_v46  ;;  %11284 = vmatpush1.bf16.msra.mxu1 %v20944_v53  ;;  %v10997_v27 = vpop.f32.mrf.mxu0  ;;  %v19240_v53 = vld [vmem:[#allocation10 + $0x1120] ss:$16 sps:$4 sm:$0xff]   ;;  %12971 = vmatprep.subr.bf16.mxu0 %v19242_v16  ;;  %v19245_v46 = vld [vmem:[#allocation10 + $0x1104] ss:$16 sps:$4 sm:$0xff]  }
 0x86a   : > { %v10954_v23 = vpop.f32.mrf.mxu1  ;;  %11367 = vmatprep.subr.bf16.mxu1 %v21036_v52  ;;  %v19243_v52 = vld [vmem:[#allocation10 + $0x1100] ss:$16 sps:$4 sm:$0xff]   ;;  %v19326_v30 = vld [vmem:[#allocation10 + $0x1344] ss:$16 sps:$4 sm:$0xff]  }
 0x86b   : > { %v21229_v33 = vadd.f32 %v10995_v44, %v10953_v37  ;;  %v10955_v8 = vadd.f32 %v10954_v23, %v21202_v7  ;;  %v19246_v7 = vld [vmem:[#allocation10 + $0x12e0] ss:$16 sps:$4 sm:$0xff]   ;;  %v19338_v23 = vld [vmem:[#allocation10 + $0x1304] ss:$16 sps:$4 sm:$0xff]  }
 0x86c   : > { %17391 = vmatmul.mubr.msk.bf16.vlgmr.msra.gmra.mxu1 %vm7079_vm1, %v21191_v25  ;;  %12972 = vmatpush2.bf16.msra.mxu0 %v19240_v53  ;;  %v19324_v44 = vld [vmem:[#allocation10 + $0x1340] ss:$16 sps:$4 sm:$0xff]  }
 0x86d   : > { %v21234_v32 = vadd.f32 %v10997_v27, %v10955_v8  ;;  %11368 = vmatpush1.bf16.msra.mxu1 %v21034_v24  ;;  %11387 = vmatprep.mubr.bf16.mxu1 %v22868_v9  ;;  %v19254_v24 = vld [vmem:[#allocation10 + $0x12c4] ss:$16 sps:$4 sm:$0xff]  }
 0x86e   : > { %11369 = vmatprep.subr.bf16.mxu1 %v21039_v62  ;;  %12973 = vmatprep.subr.bf16.mxu0 %v19245_v46  ;;  %v19260_v62 = vld [vmem:[#allocation10 + $0x12a4] ss:$16 sps:$4 sm:$0xff]  }
 0x870   : > { %12974 = vmatpush2.bf16.msra.mxu0 %v19243_v52 }
 0x871   : > { %11370 = vmatpush1.bf16.msra.mxu1 %v21027_v41  ;;  %13029 = vmatprep.subr.bf16.mxu0 %v19251_v38  ;;  %v19264_v41 = vld [vmem:[#allocation10 + $0x1280] ss:$16 sps:$4 sm:$0xff]  }
 0x872   : > { %12986 = vmatprep.subr.bf16.mxu1 %v19248_v61 }
 0x874   : > { %17393 = vmatmul.mubr.msk.bf16.vlgmr.msra.gmra.mxu1 %vm7079_vm1, %v21191_v25  ;;  %v19270_v25 = vld [vmem:[#allocation10 + $0x1260] ss:$16 sps:$4 sm:$0xff]  }
 0x875   : > { %12987 = vmatpush1.bf16.msra.mxu1 %v19246_v7 }
 0x876   : > { %12988 = vmatprep.subr.bf16.mxu1 %v19254_v24 }
 0x879   : > { %12989 = vmatpush1.bf16.msra.mxu1 %v19252_v36 }
 0x87a   : > { %12990 = vmatprep.subr.bf16.mxu1 %v19260_v62 }
 0x87d   : > { %12991 = vmatpush1.bf16.msra.mxu1 %v19258_v58 }
 0x87e   : > { %12992 = vmatprep.subr.bf16.mxu1 %v19266_v4 }
 0x881   : > { %12993 = vmatpush1.bf16.msra.mxu1 %v19264_v41 }
 0x882   : > { %12994 = vmatprep.subr.bf16.mxu1 %v19272_v56 }
 0x885   : > { %12995 = vmatpush1.bf16.msra.mxu1 %v19270_v25 }
 0x886   : > { %12996 = vmatprep.subr.bf16.mxu1 %v19278_v45 }
 0x889   : > { %12997 = vmatpush1.bf16.msra.mxu1 %v19276_v19 }
 0x88a   : > { %12998 = vmatprep.subr.bf16.mxu1 %v19284_v3 }
 0x88d   : > { %12999 = vmatpush1.bf16.msra.mxu1 %v19282_v40  ;;  %v19249_v40 = vld [vmem:[#allocation10 + $0x14e0] ss:$16 sps:$4 sm:$0xff]  }
 0x88e   : > { %13000 = vmatprep.subr.bf16.mxu1 %v19290_v26  ;;  %v19257_v26 = vld [vmem:[#allocation10 + $0x14c4] ss:$16 sps:$4 sm:$0xff]  }
 0x891   : > { %13001 = vmatpush1.bf16.msra.mxu1 %v19288_v54 }
 0x892   : > { %13002 = vmatprep.subr.bf16.mxu1 %v19296_v50 }
 0x895   : > { %13003 = vmatpush2.bf16.msra.mxu1 %v19294_v17  ;;  %v19255_v17 = vld [vmem:[#allocation10 + $0x14c0] ss:$16 sps:$4 sm:$0xff]  }
 0x896   : > { %13004 = vmatprep.subr.bf16.mxu1 %v19302_v55  ;;  %v19263_v55 = vld [vmem:[#allocation10 + $0x14a4] ss:$16 sps:$4 sm:$0xff]  }
 0x899   : > { %13005 = vmatpush2.bf16.msra.mxu1 %v19300_v34 }
 0x89a   : > { %13006 = vmatprep.subr.bf16.mxu1 %v19308_v49 }
 0x89d   : > { %13007 = vmatpush2.bf16.msra.mxu1 %v19306_v42  ;;  %v19261_v42 = vld [vmem:[#allocation10 + $0x14a0] ss:$16 sps:$4 sm:$0xff]  }
 0x89e   : > { %13008 = vmatprep.subr.bf16.mxu1 %v19314_v31 }
 0x8a1   : > { %13009 = vmatpush2.bf16.msra.mxu1 %v19312_v28  ;;  %v19269_v28 = vld [vmem:[#allocation10 + $0x1484] ss:$16 sps:$4 sm:$0xff]  }
 0x8a2   : > { %13010 = vmatprep.subr.bf16.mxu1 %v19320_v48  ;;  %v19281_v48 = vld [vmem:[#allocation10 + $0x1444] ss:$16 sps:$4 sm:$0xff]  }
 0x8a3   : > { %v11077_v12 = vpop.f32.mrf.mxu0 }
 0x8a4   : > { %v11034_v60 = vpop.f32.mrf.mxu1  ;;  %v11078_v47 = vadd.f32 %v11077_v12, %v21180_v22  ;;  %v19267_v12 = vld [vmem:[#allocation10 + $0x1480] ss:$16 sps:$4 sm:$0xff]  }
 0x8a5   : > { %v21244_v6 = vadd.f32 %v11034_v60, %v21221_v2  ;;  %v11079_v51 = vpop.f32.mrf.mxu0  ;;  %13011 = vmatpush2.bf16.msra.mxu1 %v19318_v0  ;;  %v19275_v60 = vld [vmem:[#allocation10 + $0x1464] ss:$16 sps:$4 sm:$0xff]  }
 0x8a6   : > { %v11036_v21 = vpop.f32.mrf.mxu1  ;;  %v11080_v29 = vadd.f32 %v11079_v51, %v21188_v63  ;;  %13012 = vmatprep.subr.bf16.mxu1 %v19326_v30  ;;  %v19279_v51 = vld [vmem:[#allocation10 + $0x1440] ss:$16 sps:$4 sm:$0xff]   ;;  %v19287_v0 = vld [vmem:[#allocation10 + $0x1424] ss:$16 sps:$4 sm:$0xff]  }
 0x8a7   : > { %v21248_v39 = vadd.f32 %v11036_v21, %v21224_v59  ;;  %v11081_v20 = vpop.f32.mrf.mxu0  ;;  %v19330_v59 = vld [vmem:[#allocation10 + $0x1320] ss:$16 sps:$4 sm:$0xff]   ;;  %v19305_v30 = vld [vmem:[#allocation10 + $0x15c4] ss:$16 sps:$4 sm:$0xff]  }
 0x8a8   : > { %v11038_v13 = vpop.f32.mrf.mxu1  ;;  %v11082_v18 = vadd.f32 %v11081_v20, %v21198_v35  ;;  %v19336_v35 = vld [vmem:[#allocation10 + $0x1300] ss:$16 sps:$4 sm:$0xff]  }
 0x8a9   : > { %v21252_v22 = vadd.f32 %v11038_v13, %v21229_v33  ;;  %v11083_v2 = vpop.f32.mrf.mxu0  ;;  %13013 = vmatpush2.bf16.msra.mxu1 %v19324_v44  ;;  %v19344_v33 = vld [vmem:[#allocation10 + $0x16e4] ss:$16 sps:$4 sm:$0xff]   ;;  %v19285_v21 = vld [vmem:[#allocation10 + $0x1420] ss:$16 sps:$4 sm:$0xff]  }
 0x8aa   : > { %v11040_v43 = vpop.f32.mrf.mxu1  ;;  %v11084_v37 = vadd.f32 %v11083_v2, %v21205_v1  ;;  %13014 = vmatprep.subr.bf16.mxu1 %v19332_v57  ;;  %v19291_v20 = vld [vmem:[#allocation10 + $0x1400] ss:$16 sps:$4 sm:$0xff]   ;;  %v19299_v13 = vld [vmem:[#allocation10 + $0x15e4] ss:$16 sps:$4 sm:$0xff]  }
 0x8ab   : > { %v21256_v63 = vadd.f32 %v11040_v43, %v21234_v32  ;;  %v19303_v2 = vld [vmem:[#allocation10 + $0x15c0] ss:$16 sps:$4 sm:$0xff]   ;;  %v19311_v44 = vld [vmem:[#allocation10 + $0x15a4] ss:$16 sps:$4 sm:$0xff]  }
 0x8ac   : > { %v19309_v43 = vld [vmem:[#allocation10 + $0x15a0] ss:$16 sps:$4 sm:$0xff]   ;;  %v19323_v57 = vld [vmem:[#allocation10 + $0x1564] ss:$16 sps:$4 sm:$0xff]  }
 0x8ad   : > { %13015 = vmatpush2.bf16.msra.mxu1 %v19330_v59  ;;  %v19315_v59 = vld [vmem:[#allocation10 + $0x1580] ss:$16 sps:$4 sm:$0xff]  }
 0x8ae   : > { %13016 = vmatprep.subr.bf16.mxu1 %v19338_v23  ;;  %v19321_v23 = vld [vmem:[#allocation10 + $0x1560] ss:$16 sps:$4 sm:$0xff]  }
 0x8b1   : > { %13017 = vmatpush2.bf16.msra.mxu1 %v19336_v35  ;;  %v19329_v35 = vld [vmem:[#allocation10 + $0x1544] ss:$16 sps:$4 sm:$0xff]  }
 0x8b2   : > { %13072 = vmatprep.subr.bf16.mxu1 %v19344_v33 }
 0x8e3   : > { %v11163_v8 = vpop.f32.mrf.mxu0 }
 0x8e4   : > { %v11120_v27 = vpop.f32.mrf.mxu1 }
 0x8e5   : > { %v11121_v16 = vadd.f32 %v11120_v27, %v11078_v47  ;;  %v11165_v53 = vpop.f32.mrf.mxu0  ;;  %v19273_v47 = vld [vmem:[#allocation10 + $0x1460] ss:$16 sps:$4 sm:$0xff]  }
 0x8e6   : > { %v11122_v1 = vpop.f32.mrf.mxu1 }
 0x8e7   : > { %v21258_v52 = vadd.f32 %v11163_v8, %v11121_v16  ;;  %v11123_v32 = vadd.f32 %v11122_v1, %v11080_v29  ;;  %v11167_v46 = vpop.f32.mrf.mxu0  ;;  %v19293_v29 = vld [vmem:[#allocation10 + $0x1404] ss:$16 sps:$4 sm:$0xff]   ;;  %v19327_v16 = vld [vmem:[#allocation10 + $0x1540] ss:$16 sps:$4 sm:$0xff]  }
 0x8e8   : > { %v11124_v7 = vpop.f32.mrf.mxu1  ;;  %v19335_v1 = vld [vmem:[#allocation10 + $0x1524] ss:$16 sps:$4 sm:$0xff]  }
 0x8e9   : > { %v21260_v61 = vadd.f32 %v11165_v53, %v11123_v32  ;;  %v11125_v38 = vadd.f32 %v11124_v7, %v11082_v18  ;;  %v11169_v24 = vpop.f32.mrf.mxu0  ;;  %v19297_v18 = vld [vmem:[#allocation10 + $0x15e0] ss:$16 sps:$4 sm:$0xff]  }
 0x8ea   : > { %v11126_v36 = vpop.f32.mrf.mxu1 }
 0x8eb   : > { %v21262_v62 = vadd.f32 %v11167_v46, %v11125_v38  ;;  %v11127_v58 = vadd.f32 %v11126_v36, %v11084_v37  ;;  %v11260_v4 = vpop.f32.mrf.mxu0  ;;  %v19317_v37 = vld [vmem:[#allocation10 + $0x1584] ss:$16 sps:$4 sm:$0xff]   ;;  %v19333_v38 = vld [vmem:[#allocation10 + $0x1520] ss:$16 sps:$4 sm:$0xff]  }
 0x8ed   : > { %v21264_v41 = vadd.f32 %v11169_v24, %v11127_v58  ;;  %v11262_v56 = vpop.f32.mrf.mxu0 }
 0x8ef   : > { %v11264_v25 = vpop.f32.mrf.mxu0 }
 0x8f0   : > { %v21266_v45 = vpack.c.bf16 %v11264_v25, %v11260_v4  ;;  %v19339_v4 = vld [vmem:[#allocation10 + $0x1500] ss:$16 sps:$4 sm:$0xff]  }
 0x8f1   : > { %v11266_v19 = vpop.f32.mrf.mxu0 }
 0x8f2   : > { %v21268_v3 = vpack.c.bf16 %v11266_v19, %v11262_v56  ;;  %v19345_v19 = vld [vmem:[#allocation10 + $0x10e8] ss:$16 sps:$4 sm:$0xff]  }
 0x8f3   : > { %v21270_v54 = vpop.f32.mrf.mxu0 }
 0x8f4   : > { %12975 = vmatprep.mubr.bf16.mxu0 %v21268_v3 }
 0x8f5   : > { %12976 = vmatmul.mubr.bf16.vlgmr.msra.gmra.mxu0 %v21266_v45  ;;  %v11348_v50 = vpop.f32.mrf.mxu0 }
 0x8f6   : > { %13030 = vmatpush1.bf16.msra.mxu0 %v19249_v40 }
 0x8f7   : > { %13031 = vmatprep.subr.bf16.mxu0 %v19257_v26  ;;  %v21274_v34 = vpop.f32.mrf.mxu0 }
 0x8f8   : > { %v21293_v25 = vpack.c.bf16 %v21274_v34, %v21270_v54  ;;  %v19351_v54 = vld [vmem:[#allocation10 + $0x10c8] ss:$16 sps:$4 sm:$0xff]  }
 0x8f9   : > { %v11352_v49 = vpop.f32.mrf.mxu0 }
 0x8fa   : > { %13032 = vmatpush1.bf16.msra.mxu0 %v19255_v17  ;;  %v21276_v31 = vpack.c.bf16 %v11352_v49, %v11348_v50  ;;  %v19350_v50 = vld [vmem:[#allocation10 + $0x16c4] ss:$16 sps:$4 sm:$0xff]   ;;  %v19353_v17 = vld [vmem:[#allocation10 + $0x10cc] ss:$16 sps:$4 sm:$0xff]   ;;  %v19348_v49 = vld [vmem:[#allocation10 + $0x16c0] ss:$16 sps:$4 sm:$0xff]  }
 0x8fb   : > { %13033 = vmatprep.subr.bf16.mxu0 %v19263_v55 }
 0x8fc   : > { %13061 = vmatprep.mubr.bf16.mxu0 %v21276_v31 }
 0x8fe   : > { %13034 = vmatpush1.bf16.msra.mxu0 %v19261_v42  ;;  %v19359_v42 = vld [vmem:[#allocation10 + $0x10ac] ss:$16 sps:$4 sm:$0xff]  }
 0x8ff   : > { %13035 = vmatprep.subr.bf16.mxu0 %v19269_v28  ;;  %v19356_v28 = vld [vmem:[#allocation10 + $0x16a4] ss:$16 sps:$4 sm:$0xff]  }
 0x902   : > { %13036 = vmatpush1.bf16.msra.mxu0 %v19267_v12 }
 0x903   : > { %13037 = vmatprep.subr.bf16.mxu0 %v19275_v60  ;;  %v19357_v60 = vld [vmem:[#allocation10 + $0x10a8] ss:$16 sps:$4 sm:$0xff]  }
 0x906   : > { %13038 = vmatpush1.bf16.msra.mxu0 %v19273_v47 }
 0x907   : > { %13039 = vmatprep.subr.bf16.mxu0 %v19281_v48  ;;  %v19354_v48 = vld [vmem:[#allocation10 + $0x16a0] ss:$16 sps:$4 sm:$0xff]  }
 0x90a   : > { %13040 = vmatpush1.bf16.msra.mxu0 %v19279_v51  ;;  %v19365_v51 = vld [vmem:[#allocation10 + $0x108c] ss:$16 sps:$4 sm:$0xff]  }
 0x90b   : > { %13041 = vmatprep.subr.bf16.mxu0 %v19287_v0 }
 0x90e   : > { %13042 = vmatpush1.bf16.msra.mxu0 %v19285_v21  ;;  %v19362_v21 = vld [vmem:[#allocation10 + $0x1684] ss:$16 sps:$4 sm:$0xff]  }
 0x90f   : > { %13043 = vmatprep.subr.bf16.mxu0 %v19293_v29  ;;  %v19360_v29 = vld [vmem:[#allocation10 + $0x1680] ss:$16 sps:$4 sm:$0xff]  }
 0x912   : > { %13044 = vmatpush1.bf16.msra.mxu0 %v19291_v20  ;;  %v19371_v20 = vld [vmem:[#allocation10 + $0x106c] ss:$16 sps:$4 sm:$0xff]  }
 0x913   : > { %13045 = vmatprep.subr.bf16.mxu0 %v19299_v13  ;;  %v19368_v13 = vld [vmem:[#allocation10 + $0x1664] ss:$16 sps:$4 sm:$0xff]  }
 0x916   : > { %13046 = vmatpush2.bf16.msra.mxu0 %v19297_v18  ;;  %v19369_v18 = vld [vmem:[#allocation10 + $0x1068] ss:$16 sps:$4 sm:$0xff]  }
 0x917   : > { %13047 = vmatprep.subr.bf16.mxu0 %v19305_v30  ;;  %v19366_v30 = vld [vmem:[#allocation10 + $0x1660] ss:$16 sps:$4 sm:$0xff]  }
 0x91a   : > { %13048 = vmatpush2.bf16.msra.mxu0 %v19303_v2  ;;  %v19377_v2 = vld [vmem:[#allocation10 + $0x104c] ss:$16 sps:$4 sm:$0xff]  }
 0x91b   : > { %13049 = vmatprep.subr.bf16.mxu0 %v19311_v44  ;;  %v19374_v44 = vld [vmem:[#allocation10 + $0x1644] ss:$16 sps:$4 sm:$0xff]  }
 0x91e   : > { %13050 = vmatpush2.bf16.msra.mxu0 %v19309_v43  ;;  %v19375_v43 = vld [vmem:[#allocation10 + $0x1048] ss:$16 sps:$4 sm:$0xff]  }
 0x91f   : > { %13051 = vmatprep.subr.bf16.mxu0 %v19317_v37  ;;  %v19372_v37 = vld [vmem:[#allocation10 + $0x1640] ss:$16 sps:$4 sm:$0xff]  }
 0x922   : > { %13052 = vmatpush2.bf16.msra.mxu0 %v19315_v59  ;;  %v19383_v59 = vld [vmem:[#allocation10 + $0x102c] ss:$16 sps:$4 sm:$0xff]  }
 0x923   : > { %13053 = vmatprep.subr.bf16.mxu0 %v19323_v57  ;;  %v19380_v57 = vld [vmem:[#allocation10 + $0x1624] ss:$16 sps:$4 sm:$0xff]  }
 0x924   : > { %v11206_v33 = vpop.f32.mrf.mxu1 }
 0x925   : > { %v21280_v8 = vadd.f32 %v11206_v33, %v21258_v52  ;;  %v19341_v52 = vld [vmem:[#allocation10 + $0x1504] ss:$16 sps:$4 sm:$0xff]   ;;  %v19389_v33 = vld [vmem:[#allocation10 + $0x100c] ss:$16 sps:$4 sm:$0xff]  }
 0x926   : > { %v11208_v27 = vpop.f32.mrf.mxu1  ;;  %13054 = vmatpush2.bf16.msra.mxu0 %v19321_v23  ;;  %v19381_v23 = vld [vmem:[#allocation10 + $0x1028] ss:$16 sps:$4 sm:$0xff]  }
 0x927   : > { %v21283_v53 = vadd.f32 %v11208_v27, %v21260_v61  ;;  %13055 = vmatprep.subr.bf16.mxu0 %v19329_v35  ;;  %v19347_v61 = vld [vmem:[#allocation10 + $0x10ec] ss:$16 sps:$4 sm:$0xff]   ;;  %v19378_v35 = vld [vmem:[#allocation10 + $0x1620] ss:$16 sps:$4 sm:$0xff]   ;;  %v19386_v27 = vld [vmem:[#allocation10 + $0x1604] ss:$16 sps:$4 sm:$0xff]  }
 0x928   : > { %v11210_v32 = vpop.f32.mrf.mxu1 }
 0x929   : > { %v21286_v46 = vadd.f32 %v11210_v32, %v21262_v62  ;;  %v19395_v32 = vld [vmem:[#allocation10 + $0x11ec] ss:$16 sps:$4 sm:$0xff]  }
 0x92a   : > { %v11212_v7 = vpop.f32.mrf.mxu1  ;;  %13056 = vmatpush2.bf16.msra.mxu0 %v19327_v16  ;;  %v19387_v16 = vld [vmem:[#allocation10 + $0x1008] ss:$16 sps:$4 sm:$0xff]  }
 0x92b   : > { %v21289_v24 = vadd.f32 %v11212_v7, %v21264_v41  ;;  %13057 = vmatprep.subr.bf16.mxu0 %v19335_v1  ;;  %v19342_v41 = vld [vmem:[#allocation10 + $0x16e0] ss:$16 sps:$4 sm:$0xff]   ;;  %v19392_v7 = vld [vmem:[#allocation10 + $0x17e4] ss:$16 sps:$4 sm:$0xff]  }
 0x92c   : > { %v11303_v36 = vpop.f32.mrf.mxu1  ;;  %v19384_v1 = vld [vmem:[#allocation10 + $0x1600] ss:$16 sps:$4 sm:$0xff]  }
 0x92e   : > { %v11305_v58 = vpop.f32.mrf.mxu1  ;;  %13058 = vmatpush2.bf16.msra.mxu0 %v19333_v38  ;;  %v19393_v38 = vld [vmem:[#allocation10 + $0x11e8] ss:$16 sps:$4 sm:$0xff]  }
 0x92f   : > { %13059 = vmatprep.subr.bf16.mxu0 %v19341_v52  ;;  %v19390_v52 = vld [vmem:[#allocation10 + $0x17e0] ss:$16 sps:$4 sm:$0xff]  }
 0x930   : > { %v11307_v56 = vpop.f32.mrf.mxu1 }
 0x931   : > { %v21297_v26 = vpack.c.bf16 %v11307_v56, %v11303_v36  ;;  %v19401_v36 = vld [vmem:[#allocation10 + $0x11cc] ss:$16 sps:$4 sm:$0xff]  }
 0x932   : > { %v11309_v62 = vpop.f32.mrf.mxu1  ;;  %13060 = vmatpush2.bf16.msra.mxu0 %v19339_v4  ;;  %v19399_v4 = vld [vmem:[#allocation10 + $0x11c8] ss:$16 sps:$4 sm:$0xff]   ;;  %v19407_v56 = vld [vmem:[#allocation10 + $0x11ac] ss:$16 sps:$4 sm:$0xff]  }
 0x933   : > { %v21295_v40 = vpack.c.bf16 %v11309_v62, %v11305_v58  ;;  %13115 = vmatprep.subr.bf16.mxu0 %v19347_v61  ;;  %v19398_v58 = vld [vmem:[#allocation10 + $0x17c4] ss:$16 sps:$4 sm:$0xff]   ;;  %v19396_v61 = vld [vmem:[#allocation10 + $0x17c0] ss:$16 sps:$4 sm:$0xff]  }
 0x934   : > { %v21299_v55 = vpop.f32.mrf.mxu1  ;;  %v19404_v62 = vld [vmem:[#allocation10 + $0x17a4] ss:$16 sps:$4 sm:$0xff]  }
 0x935   : > { %13018 = vmatprep.mubr.bf16.mxu1 %v21295_v40  ;;  %13062 = vmatmul.mubr.bf16.vlgmr.msra.gmra.mxu0 %v21293_v25 }
 0x936   : > { %13019 = vmatmul.mubr.bf16.vlgmr.msra.gmra.mxu1 %v21297_v26  ;;  %13116 = vmatpush1.bf16.msra.mxu0 %v19345_v19  ;;  %v11391_v34 = vpop.f32.mrf.mxu1  ;;  %v19405_v19 = vld [vmem:[#allocation10 + $0x11a8] ss:$16 sps:$4 sm:$0xff]  }
 0x937   : > { %13073 = vmatpush1.bf16.msra.mxu1 %v19342_v41  ;;  %13147 = vmatprep.mubr.bf16.mxu0 %v21268_v3  ;;  %v19363_v3 = vld [vmem:[#allocation10 + $0x1088] ss:$16 sps:$4 sm:$0xff]   ;;  %v19402_v41 = vld [vmem:[#allocation10 + $0x17a0] ss:$16 sps:$4 sm:$0xff]  }
 0x938   : > { %13074 = vmatprep.subr.bf16.mxu1 %v19350_v50  ;;  %13117 = vmatprep.subr.bf16.mxu0 %v19353_v17  ;;  %v21305_v12 = vpop.f32.mrf.mxu1  ;;  %v19413_v50 = vld [vmem:[#allocation10 + $0x118c] ss:$16 sps:$4 sm:$0xff]   ;;  %v19410_v17 = vld [vmem:[#allocation10 + $0x1784] ss:$16 sps:$4 sm:$0xff]  }
 0x93a   : > { %13118 = vmatpush1.bf16.msra.mxu0 %v19351_v54  ;;  %v11395_v47 = vpop.f32.mrf.mxu1  ;;  %v19411_v54 = vld [vmem:[#allocation10 + $0x1188] ss:$16 sps:$4 sm:$0xff]  }
 0x93b   : > { %13075 = vmatpush1.bf16.msra.mxu1 %v19348_v49  ;;  %13119 = vmatprep.subr.bf16.mxu0 %v19359_v42  ;;  %v21307_v0 = vpack.c.bf16 %v11395_v47, %v11391_v34  ;;  %v19408_v34 = vld [vmem:[#allocation10 + $0x1780] ss:$16 sps:$4 sm:$0xff]   ;;  %v19419_v49 = vld [vmem:[#allocation10 + $0x116c] ss:$16 sps:$4 sm:$0xff]   ;;  %v19416_v42 = vld [vmem:[#allocation10 + $0x1764] ss:$16 sps:$4 sm:$0xff]  }
 0x93c   : > { %13076 = vmatprep.subr.bf16.mxu1 %v19356_v28  ;;  %v19417_v28 = vld [vmem:[#allocation10 + $0x1168] ss:$16 sps:$4 sm:$0xff]   ;;  %v19425_v47 = vld [vmem:[#allocation10 + $0x114c] ss:$16 sps:$4 sm:$0xff]  }
 0x93d   : > { %13104 = vmatprep.mubr.bf16.mxu1 %v21307_v0 }
 0x93e   : > { %13120 = vmatpush1.bf16.msra.mxu0 %v19357_v60  ;;  %v19414_v60 = vld [vmem:[#allocation10 + $0x1760] ss:$16 sps:$4 sm:$0xff]  }
 0x93f   : > { %13077 = vmatpush1.bf16.msra.mxu1 %v19354_v48  ;;  %13121 = vmatprep.subr.bf16.mxu0 %v19365_v51  ;;  %v19422_v48 = vld [vmem:[#allocation10 + $0x1744] ss:$16 sps:$4 sm:$0xff]   ;;  %v19423_v51 = vld [vmem:[#allocation10 + $0x1148] ss:$16 sps:$4 sm:$0xff]  }
 0x940   : > { %13078 = vmatprep.subr.bf16.mxu1 %v19362_v21  ;;  %v19420_v21 = vld [vmem:[#allocation10 + $0x1740] ss:$16 sps:$4 sm:$0xff]  }
 0x942   : > { %13122 = vmatpush1.bf16.msra.mxu0 %v19363_v3  ;;  %v19431_v3 = vld [vmem:[#allocation10 + $0x112c] ss:$16 sps:$4 sm:$0xff]  }
 0x943   : > { %13079 = vmatpush1.bf16.msra.mxu1 %v19360_v29  ;;  %13123 = vmatprep.subr.bf16.mxu0 %v19371_v20  ;;  %v19428_v29 = vld [vmem:[#allocation10 + $0x1724] ss:$16 sps:$4 sm:$0xff]   ;;  %v19429_v20 = vld [vmem:[#allocation10 + $0x1128] ss:$16 sps:$4 sm:$0xff]  }
 0x944   : > { %13080 = vmatprep.subr.bf16.mxu1 %v19368_v13  ;;  %v19426_v13 = vld [vmem:[#allocation10 + $0x1720] ss:$16 sps:$4 sm:$0xff]  }
 0x946   : > { %13124 = vmatpush1.bf16.msra.mxu0 %v19369_v18  ;;  %v19437_v18 = vld [vmem:[#allocation10 + $0x110c] ss:$16 sps:$4 sm:$0xff]  }
 0x947   : > { %13081 = vmatpush1.bf16.msra.mxu1 %v19366_v30  ;;  %13125 = vmatprep.subr.bf16.mxu0 %v19377_v2  ;;  %v19434_v30 = vld [vmem:[#allocation10 + $0x1704] ss:$16 sps:$4 sm:$0xff]   ;;  %v19435_v2 = vld [vmem:[#allocation10 + $0x1108] ss:$16 sps:$4 sm:$0xff]  }
 0x948   : > { %13082 = vmatprep.subr.bf16.mxu1 %v19374_v44  ;;  %v19432_v44 = vld [vmem:[#allocation10 + $0x1700] ss:$16 sps:$4 sm:$0xff]  }
 0x94a   : > { %13126 = vmatpush1.bf16.msra.mxu0 %v19375_v43  ;;  %v19443_v43 = vld [vmem:[#allocation10 + $0x14ec] ss:$16 sps:$4 sm:$0xff]  }
 0x94b   : > { %13083 = vmatpush1.bf16.msra.mxu1 %v19372_v37  ;;  %13127 = vmatprep.subr.bf16.mxu0 %v19383_v59  ;;  %v19440_v37 = vld [vmem:[#allocation10 + $0x12ec] ss:$16 sps:$4 sm:$0xff]   ;;  %v19441_v59 = vld [vmem:[#allocation10 + $0x14e8] ss:$16 sps:$4 sm:$0xff]  }
 0x94c   : > { %13084 = vmatprep.subr.bf16.mxu1 %v19380_v57  ;;  %v19438_v57 = vld [vmem:[#allocation10 + $0x12e8] ss:$16 sps:$4 sm:$0xff]  }
 0x94e   : > { %13128 = vmatpush1.bf16.msra.mxu0 %v19381_v23  ;;  %v21312_v23 = vpack.c.bf16 %v21305_v12, %v21299_v55  ;;  %v19453_v55 = vld [vmem:[#allocation10 + $0x14a8] ss:$16 sps:$4 sm:$0xff]  }
 0x94f   : > { %13085 = vmatpush1.bf16.msra.mxu1 %v19378_v35  ;;  %13129 = vmatprep.subr.bf16.mxu0 %v19389_v33  ;;  %v19446_v35 = vld [vmem:[#allocation10 + $0x12cc] ss:$16 sps:$4 sm:$0xff]   ;;  %v19450_v12 = vld [vmem:[#allocation10 + $0x12a8] ss:$16 sps:$4 sm:$0xff]  }
 0x950   : > { %13086 = vmatprep.subr.bf16.mxu1 %v19386_v27  ;;  %v19449_v33 = vld [vmem:[#allocation10 + $0x14cc] ss:$16 sps:$4 sm:$0xff]   ;;  %v19447_v27 = vld [vmem:[#allocation10 + $0x14c8] ss:$16 sps:$4 sm:$0xff]  }
 0x952   : > { %13130 = vmatpush1.bf16.msra.mxu0 %v19387_v16  ;;  %v19444_v16 = vld [vmem:[#allocation10 + $0x12c8] ss:$16 sps:$4 sm:$0xff]  }
 0x953   : > { %13087 = vmatpush1.bf16.msra.mxu1 %v19384_v1  ;;  %13131 = vmatprep.subr.bf16.mxu0 %v19395_v32  ;;  %v19455_v1 = vld [vmem:[#allocation10 + $0x14ac] ss:$16 sps:$4 sm:$0xff]  }
 0x954   : > { %13088 = vmatprep.subr.bf16.mxu1 %v19392_v7  ;;  %v19452_v32 = vld [vmem:[#allocation10 + $0x12ac] ss:$16 sps:$4 sm:$0xff]  }
 0x955   : > { %v19458_v7 = vld [vmem:[#allocation10 + $0x128c] ss:$16 sps:$4 sm:$0xff]  }
 0x956   : > { %13132 = vmatpush2.bf16.msra.mxu0 %v19393_v38  ;;  %v19459_v38 = vld [vmem:[#allocation10 + $0x1488] ss:$16 sps:$4 sm:$0xff]  }
 0x957   : > { %13089 = vmatpush2.bf16.msra.mxu1 %v19390_v52  ;;  %13133 = vmatprep.subr.bf16.mxu0 %v19401_v36  ;;  %v19456_v52 = vld [vmem:[#allocation10 + $0x1288] ss:$16 sps:$4 sm:$0xff]   ;;  %v19464_v36 = vld [vmem:[#allocation10 + $0x126c] ss:$16 sps:$4 sm:$0xff]  }
 0x958   : > { %13090 = vmatprep.subr.bf16.mxu1 %v19398_v58  ;;  %v19462_v58 = vld [vmem:[#allocation10 + $0x1268] ss:$16 sps:$4 sm:$0xff]  }
 0x95a   : > { %13134 = vmatpush2.bf16.msra.mxu0 %v19399_v4  ;;  %v19473_v4 = vld [vmem:[#allocation10 + $0x144c] ss:$16 sps:$4 sm:$0xff]  }
 0x95b   : > { %13091 = vmatpush2.bf16.msra.mxu1 %v19396_v61  ;;  %13135 = vmatprep.subr.bf16.mxu0 %v19407_v56  ;;  %v19470_v61 = vld [vmem:[#allocation10 + $0x124c] ss:$16 sps:$4 sm:$0xff]   ;;  %v19471_v56 = vld [vmem:[#allocation10 + $0x1448] ss:$16 sps:$4 sm:$0xff]  }
 0x95c   : > { %13092 = vmatprep.subr.bf16.mxu1 %v19404_v62  ;;  %v19468_v62 = vld [vmem:[#allocation10 + $0x1248] ss:$16 sps:$4 sm:$0xff]  }
 0x95e   : > { %13136 = vmatpush2.bf16.msra.mxu0 %v19405_v19  ;;  %v19479_v19 = vld [vmem:[#allocation10 + $0x142c] ss:$16 sps:$4 sm:$0xff]  }
 0x95f   : > { %13093 = vmatpush2.bf16.msra.mxu1 %v19402_v41  ;;  %13137 = vmatprep.subr.bf16.mxu0 %v19413_v50  ;;  %v19476_v41 = vld [vmem:[#allocation10 + $0x122c] ss:$16 sps:$4 sm:$0xff]   ;;  %v19477_v50 = vld [vmem:[#allocation10 + $0x1428] ss:$16 sps:$4 sm:$0xff]  }
 0x960   : > { %13094 = vmatprep.subr.bf16.mxu1 %v19410_v17  ;;  %v19474_v17 = vld [vmem:[#allocation10 + $0x1228] ss:$16 sps:$4 sm:$0xff]  }
 0x962   : > { %13138 = vmatpush2.bf16.msra.mxu0 %v19411_v54  ;;  %v19485_v54 = vld [vmem:[#allocation10 + $0x140c] ss:$16 sps:$4 sm:$0xff]  }
 0x963   : > { %13095 = vmatpush2.bf16.msra.mxu1 %v19408_v34  ;;  %13139 = vmatprep.subr.bf16.mxu0 %v19419_v49  ;;  %v19482_v34 = vld [vmem:[#allocation10 + $0x120c] ss:$16 sps:$4 sm:$0xff]   ;;  %v19483_v49 = vld [vmem:[#allocation10 + $0x1408] ss:$16 sps:$4 sm:$0xff]  }
 0x964   : > { %13096 = vmatprep.subr.bf16.mxu1 %v19416_v42  ;;  %v19480_v42 = vld [vmem:[#allocation10 + $0x1208] ss:$16 sps:$4 sm:$0xff]  }
 0x966   : > { %13140 = vmatpush2.bf16.msra.mxu0 %v19417_v28  ;;  %v19491_v28 = vld [vmem:[#allocation10 + $0x15ec] ss:$16 sps:$4 sm:$0xff]  }
 0x967   : > { %13097 = vmatpush2.bf16.msra.mxu1 %v19414_v60  ;;  %13141 = vmatprep.subr.bf16.mxu0 %v19425_v47  ;;  %v19488_v60 = vld [vmem:[#allocation10 + $0x13ec] ss:$16 sps:$4 sm:$0xff]   ;;  %v19489_v47 = vld [vmem:[#allocation10 + $0x15e8] ss:$16 sps:$4 sm:$0xff]  }
 0x968   : > { %13098 = vmatprep.subr.bf16.mxu1 %v19422_v48  ;;  %v19486_v48 = vld [vmem:[#allocation10 + $0x13e8] ss:$16 sps:$4 sm:$0xff]  }
 0x96a   : > { %13142 = vmatpush2.bf16.msra.mxu0 %v19423_v51  ;;  %v19497_v51 = vld [vmem:[#allocation10 + $0x15cc] ss:$16 sps:$4 sm:$0xff]  }
 0x96b   : > { %13099 = vmatpush2.bf16.msra.mxu1 %v19420_v21  ;;  %13143 = vmatprep.subr.bf16.mxu0 %v19431_v3  ;;  %v19494_v21 = vld [vmem:[#allocation10 + $0x13cc] ss:$16 sps:$4 sm:$0xff]   ;;  %v19495_v3 = vld [vmem:[#allocation10 + $0x15c8] ss:$16 sps:$4 sm:$0xff]  }
 0x96c   : > { %13100 = vmatprep.subr.bf16.mxu1 %v19428_v29  ;;  %v19492_v29 = vld [vmem:[#allocation10 + $0x13c8] ss:$16 sps:$4 sm:$0xff]  }
 0x96e   : > { %13144 = vmatpush2.bf16.msra.mxu0 %v19429_v20  ;;  %v19503_v20 = vld [vmem:[#allocation10 + $0x15ac] ss:$16 sps:$4 sm:$0xff]  }
 0x96f   : > { %13101 = vmatpush2.bf16.msra.mxu1 %v19426_v13  ;;  %13145 = vmatprep.subr.bf16.mxu0 %v19437_v18  ;;  %v19500_v13 = vld [vmem:[#allocation10 + $0x13ac] ss:$16 sps:$4 sm:$0xff]   ;;  %v19501_v18 = vld [vmem:[#allocation10 + $0x15a8] ss:$16 sps:$4 sm:$0xff]  }
 0x970   : > { %13102 = vmatprep.subr.bf16.mxu1 %v19434_v30  ;;  %v19498_v30 = vld [vmem:[#allocation10 + $0x13a8] ss:$16 sps:$4 sm:$0xff]  }
 0x972   : > { %13146 = vmatpush2.bf16.msra.mxu0 %v19435_v2  ;;  %v19509_v2 = vld [vmem:[#allocation10 + $0x158c] ss:$16 sps:$4 sm:$0xff]  }
 0x973   : > { %13103 = vmatpush2.bf16.msra.mxu1 %v19432_v44  ;;  %13201 = vmatprep.subr.bf16.mxu0 %v19443_v43  ;;  %v19506_v44 = vld [vmem:[#allocation10 + $0x138c] ss:$16 sps:$4 sm:$0xff]   ;;  %v19507_v43 = vld [vmem:[#allocation10 + $0x1588] ss:$16 sps:$4 sm:$0xff]  }
 0x974   : > { %13158 = vmatprep.subr.bf16.mxu1 %v19440_v37  ;;  %v19504_v37 = vld [vmem:[#allocation10 + $0x1388] ss:$16 sps:$4 sm:$0xff]  }
 0x975   : > { %13148 = vmatmul.mubr.bf16.vlgmr.msra.gmra.mxu0 %v21266_v45  ;;  %v19461_v45 = vld [vmem:[#allocation10 + $0x148c] ss:$16 sps:$4 sm:$0xff]  }
 0x976   : > { %13105 = vmatmul.mubr.bf16.vlgmr.msra.gmra.mxu1 %v21312_v23  ;;  %13202 = vmatpush1.bf16.msra.mxu0 %v19441_v59  ;;  %v19515_v59 = vld [vmem:[#allocation10 + $0x156c] ss:$16 sps:$4 sm:$0xff]  }
 0x977   : > { %13159 = vmatpush1.bf16.msra.mxu1 %v19438_v57  ;;  %13190 = vmatprep.mubr.bf16.mxu1 %v21295_v40  ;;  %v19467_v40 = vld [vmem:[#allocation10 + $0x146c] ss:$16 sps:$4 sm:$0xff]  }
 0x978   : > { %13233 = vmatprep.mubr.bf16.mxu0 %v21276_v31  ;;  %13160 = vmatprep.subr.bf16.mxu1 %v19446_v35  ;;  %v19465_v31 = vld [vmem:[#allocation10 + $0x1468] ss:$16 sps:$4 sm:$0xff]   ;;  %v19512_v57 = vld [vmem:[#allocation10 + $0x136c] ss:$16 sps:$4 sm:$0xff]  }
 0x979   : > { %13203 = vmatprep.subr.bf16.mxu0 %v19449_v33  ;;  %v19513_v35 = vld [vmem:[#allocation10 + $0x1568] ss:$16 sps:$4 sm:$0xff]  }
 0x97a   : > { %13204 = vmatpush1.bf16.msra.mxu0 %v19447_v27  ;;  %v19510_v33 = vld [vmem:[#allocation10 + $0x1368] ss:$16 sps:$4 sm:$0xff]   ;;  %v19521_v27 = vld [vmem:[#allocation10 + $0x154c] ss:$16 sps:$4 sm:$0xff]  }
 0x97b   : > { %13161 = vmatpush1.bf16.msra.mxu1 %v19444_v16  ;;  %13205 = vmatprep.subr.bf16.mxu0 %v19455_v1  ;;  %v19518_v16 = vld [vmem:[#allocation10 + $0x134c] ss:$16 sps:$4 sm:$0xff]   ;;  %v19519_v1 = vld [vmem:[#allocation10 + $0x1548] ss:$16 sps:$4 sm:$0xff]  }
 0x97c   : > { %13162 = vmatprep.subr.bf16.mxu1 %v19452_v32  ;;  %v19516_v32 = vld [vmem:[#allocation10 + $0x1348] ss:$16 sps:$4 sm:$0xff]  }
 0x97e   : > { %13206 = vmatpush1.bf16.msra.mxu0 %v19453_v55  ;;  %v19527_v55 = vld [vmem:[#allocation10 + $0x152c] ss:$16 sps:$4 sm:$0xff]  }
 0x97f   : > { %13163 = vmatpush1.bf16.msra.mxu1 %v19450_v12  ;;  %13207 = vmatprep.subr.bf16.mxu0 %v19461_v45  ;;  %v19524_v12 = vld [vmem:[#allocation10 + $0x132c] ss:$16 sps:$4 sm:$0xff]   ;;  %v19525_v45 = vld [vmem:[#allocation10 + $0x1528] ss:$16 sps:$4 sm:$0xff]  }
 0x980   : > { %13164 = vmatprep.subr.bf16.mxu1 %v19458_v7  ;;  %v19522_v7 = vld [vmem:[#allocation10 + $0x1328] ss:$16 sps:$4 sm:$0xff]  }
 0x982   : > { %13208 = vmatpush1.bf16.msra.mxu0 %v19459_v38  ;;  %v19533_v38 = vld [vmem:[#allocation10 + $0x150c] ss:$16 sps:$4 sm:$0xff]  }
 0x983   : > { %13165 = vmatpush1.bf16.msra.mxu1 %v19456_v52  ;;  %13209 = vmatprep.subr.bf16.mxu0 %v19467_v40  ;;  %v19530_v52 = vld [vmem:[#allocation10 + $0x130c] ss:$16 sps:$4 sm:$0xff]   ;;  %v19531_v40 = vld [vmem:[#allocation10 + $0x1508] ss:$16 sps:$4 sm:$0xff]  }
 0x984   : > { %13166 = vmatprep.subr.bf16.mxu1 %v19464_v36  ;;  %v19528_v36 = vld [vmem:[#allocation10 + $0x1308] ss:$16 sps:$4 sm:$0xff]  }
 0x986   : > { %13210 = vmatpush1.bf16.msra.mxu0 %v19465_v31  ;;  %v19536_v31 = vld [vmem:[#allocation10 + $0x16ec] ss:$16 sps:$4 sm:$0xff]  }
 0x987   : > { %13167 = vmatpush1.bf16.msra.mxu1 %v19462_v58  ;;  %13211 = vmatprep.subr.bf16.mxu0 %v19473_v4  ;;  %v19534_v58 = vld [vmem:[#allocation10 + $0x16e8] ss:$16 sps:$4 sm:$0xff]   ;;  %v19539_v4 = vld [vmem:[#allocation10 + $0x16cc] ss:$16 sps:$4 sm:$0xff]  }
 0x988   : > { %13168 = vmatprep.subr.bf16.mxu1 %v19470_v61  ;;  %v19537_v61 = vld [vmem:[#allocation10 + $0x16c8] ss:$16 sps:$4 sm:$0xff]  }
 0x98a   : > { %13212 = vmatpush1.bf16.msra.mxu0 %v19471_v56  ;;  %v19542_v56 = vld [vmem:[#allocation10 + $0x16ac] ss:$16 sps:$4 sm:$0xff]  }
 0x98b   : > { %13169 = vmatpush1.bf16.msra.mxu1 %v19468_v62  ;;  %13213 = vmatprep.subr.bf16.mxu0 %v19479_v19  ;;  %v19540_v62 = vld [vmem:[#allocation10 + $0x16a8] ss:$16 sps:$4 sm:$0xff]   ;;  %v19545_v19 = vld [vmem:[#allocation10 + $0x168c] ss:$16 sps:$4 sm:$0xff]  }
 0x98c   : > { %13170 = vmatprep.subr.bf16.mxu1 %v19476_v41  ;;  %v19543_v41 = vld [vmem:[#allocation10 + $0x1688] ss:$16 sps:$4 sm:$0xff]  }
 0x98e   : > { %13214 = vmatpush1.bf16.msra.mxu0 %v19477_v50  ;;  %v19548_v50 = vld [vmem:[#allocation10 + $0x166c] ss:$16 sps:$4 sm:$0xff]  }
 0x98f   : > { %13171 = vmatpush1.bf16.msra.mxu1 %v19474_v17  ;;  %13215 = vmatprep.subr.bf16.mxu0 %v19485_v54  ;;  %v19549_v17 = vld [vmem:[#allocation10 + $0x1648] ss:$16 sps:$4 sm:$0xff]   ;;  %v19554_v54 = vld [vmem:[#allocation10 + $0x162c] ss:$16 sps:$4 sm:$0xff]  }
 0x990   : > { %13172 = vmatprep.subr.bf16.mxu1 %v19482_v34  ;;  %v19557_v34 = vld [vmem:[#allocation10 + $0x160c] ss:$16 sps:$4 sm:$0xff]  }
 0x992   : > { %13216 = vmatpush1.bf16.msra.mxu0 %v19483_v49  ;;  %v19555_v49 = vld [vmem:[#allocation10 + $0x1608] ss:$16 sps:$4 sm:$0xff]  }
 0x993   : > { %13173 = vmatpush1.bf16.msra.mxu1 %v19480_v42  ;;  %13217 = vmatprep.subr.bf16.mxu0 %v19491_v28  ;;  %v19560_v42 = vld [vmem:[#allocation10 + $0x17ec] ss:$16 sps:$4 sm:$0xff]   ;;  %v19558_v28 = vld [vmem:[#allocation10 + $0x17e8] ss:$16 sps:$4 sm:$0xff]  }
 0x994   : > { %13174 = vmatprep.subr.bf16.mxu1 %v19488_v60  ;;  %v19563_v60 = vld [vmem:[#allocation10 + $0x17cc] ss:$16 sps:$4 sm:$0xff]  }
 0x996   : > { %13218 = vmatpush2.bf16.msra.mxu0 %v19489_v47  ;;  %v19561_v47 = vld [vmem:[#allocation10 + $0x17c8] ss:$16 sps:$4 sm:$0xff]  }
 0x997   : > { %13175 = vmatpush2.bf16.msra.mxu1 %v19486_v48  ;;  %13219 = vmatprep.subr.bf16.mxu0 %v19497_v51  ;;  %v19566_v48 = vld [vmem:[#allocation10 + $0x17ac] ss:$16 sps:$4 sm:$0xff]   ;;  %v19564_v51 = vld [vmem:[#allocation10 + $0x17a8] ss:$16 sps:$4 sm:$0xff]  }
 0x998   : > { %13176 = vmatprep.subr.bf16.mxu1 %v19494_v21  ;;  %v19569_v21 = vld [vmem:[#allocation10 + $0x178c] ss:$16 sps:$4 sm:$0xff]  }
 0x99a   : > { %13220 = vmatpush2.bf16.msra.mxu0 %v19495_v3  ;;  %v19567_v3 = vld [vmem:[#allocation10 + $0x1788] ss:$16 sps:$4 sm:$0xff]  }
 0x99b   : > { %13177 = vmatpush2.bf16.msra.mxu1 %v19492_v29  ;;  %13221 = vmatprep.subr.bf16.mxu0 %v19503_v20  ;;  %v19572_v29 = vld [vmem:[#allocation10 + $0x176c] ss:$16 sps:$4 sm:$0xff]   ;;  %v19570_v20 = vld [vmem:[#allocation10 + $0x1768] ss:$16 sps:$4 sm:$0xff]  }
 0x99c   : > { %13178 = vmatprep.subr.bf16.mxu1 %v19500_v13  ;;  %v19575_v13 = vld [vmem:[#allocation10 + $0x174c] ss:$16 sps:$4 sm:$0xff]  }
 0x99e   : > { %13222 = vmatpush2.bf16.msra.mxu0 %v19501_v18  ;;  %v19573_v18 = vld [vmem:[#allocation10 + $0x1748] ss:$16 sps:$4 sm:$0xff]  }
 0x99f   : > { %13179 = vmatpush2.bf16.msra.mxu1 %v19498_v30  ;;  %13223 = vmatprep.subr.bf16.mxu0 %v19509_v2  ;;  %v19578_v30 = vld [vmem:[#allocation10 + $0x172c] ss:$16 sps:$4 sm:$0xff]   ;;  %v19576_v2 = vld [vmem:[#allocation10 + $0x1728] ss:$16 sps:$4 sm:$0xff]  }
 0x9a0   : > { %13180 = vmatprep.subr.bf16.mxu1 %v19506_v44  ;;  %v19581_v44 = vld [vmem:[#allocation10 + $0x170c] ss:$16 sps:$4 sm:$0xff]  }
 0x9a2   : > { %13224 = vmatpush2.bf16.msra.mxu0 %v19507_v43  ;;  %v19579_v43 = vld [vmem:[#allocation10 + $0x1708] ss:$16 sps:$4 sm:$0xff]  }
 0x9a3   : > { %13181 = vmatpush2.bf16.msra.mxu1 %v19504_v37  ;;  %13225 = vmatprep.subr.bf16.mxu0 %v19515_v59 }
 0x9a4   : > { %13182 = vmatprep.subr.bf16.mxu1 %v19512_v57 }
 0x9a6   : > { %13226 = vmatpush2.bf16.msra.mxu0 %v19513_v35 }
 0x9a7   : > { %13183 = vmatpush2.bf16.msra.mxu1 %v19510_v33  ;;  %13227 = vmatprep.subr.bf16.mxu0 %v19521_v27 }
 0x9a8   : > { %13184 = vmatprep.subr.bf16.mxu1 %v19518_v16 }
 0x9aa   : > { %13228 = vmatpush2.bf16.msra.mxu0 %v19519_v1 }
 0x9ab   : > { %13185 = vmatpush2.bf16.msra.mxu1 %v19516_v32  ;;  %13229 = vmatprep.subr.bf16.mxu0 %v19527_v55 }
 0x9ac   : > { %13186 = vmatprep.subr.bf16.mxu1 %v19524_v12 }
 0x9ae   : > { %13230 = vmatpush2.bf16.msra.mxu0 %v19525_v45 }
 0x9af   : > { %13187 = vmatpush2.bf16.msra.mxu1 %v19522_v7  ;;  %13231 = vmatprep.subr.bf16.mxu0 %v19533_v38 }
 0x9b0   : > { %13188 = vmatprep.subr.bf16.mxu1 %v19530_v52 }
 0x9b2   : > { %13232 = vmatpush2.bf16.msra.mxu0 %v19531_v40 }
 0x9b3   : > { %13189 = vmatpush2.bf16.msra.mxu1 %v19528_v36  ;;  %v21324_v36 = vld [vmem:[#allocation11] sm:$0xf] }
 0x9b4   : > { %13244 = vmatprep.subr.bf16.mxu1 %v19536_v31 }
 0x9b5   : > { %13234 = vmatmul.mubr.bf16.vlgmr.msra.gmra.mxu0 %v21293_v25  ;;  %v19546_v25 = vld [vmem:[#allocation10 + $0x1668] ss:$16 sps:$4 sm:$0xff]   ;;  %v12977_v37 = vpop.f32.mrf.mxu0 }
 0x9b6   : > { %13191 = vmatmul.mubr.bf16.vlgmr.msra.gmra.mxu1 %v21297_v26  ;;  %13374 = vmatprep.mubr.bf16.mxu0 %v22868_v9  ;;  %v19551_v26 = vld [vmem:[#allocation10 + $0x164c] ss:$16 sps:$4 sm:$0xff]  }
 0x9b7   : > { %13245 = vmatpush1.bf16.msra.mxu1 %v19534_v58  ;;  %13276 = vmatprep.mubr.bf16.mxu1 %v21307_v0  ;;  %v19552_v0 = vld [vmem:[#allocation10 + $0x1628] ss:$16 sps:$4 sm:$0xff]   ;;  %v12979_v59 = vpop.f32.mrf.mxu0 }
 0x9b8   : > { %13246 = vmatprep.subr.bf16.mxu1 %v19539_v4 }
 0x9b9   : > { %v12981_v57 = vpop.f32.mrf.mxu0 }
 0x9bb   : > { %13247 = vmatpush1.bf16.msra.mxu1 %v19537_v61  ;;  %v12983_v33 = vpop.f32.mrf.mxu0 }
 0x9bc   : > { %13248 = vmatprep.subr.bf16.mxu1 %v19542_v56 }
 0x9bf   : > { %13249 = vmatpush1.bf16.msra.mxu1 %v19540_v62 }
 0x9c0   : > { %13250 = vmatprep.subr.bf16.mxu1 %v19545_v19  ;;  %v13300_v19 = vrot.slane %v21324_v36, %v20879_v5 }
 0x9c3   : > { %13251 = vmatpush1.bf16.msra.mxu1 %v19543_v41 }
 0x9c4   : > { %13252 = vmatprep.subr.bf16.mxu1 %v19548_v50 }
 0x9c7   : > { %13253 = vmatpush1.bf16.msra.mxu1 %v19546_v25 }
 0x9c8   : > { %13254 = vmatprep.subr.bf16.mxu1 %v19551_v26 }
 0x9cb   : > { %13255 = vmatpush1.bf16.msra.mxu1 %v19549_v17  ;;  %v13304_v17 = vrot.slane %v21324_v36, %v20899_v15 }
 0x9cc   : > { %13256 = vmatprep.subr.bf16.mxu1 %v19554_v54 }
 0x9cf   : > { %13257 = vmatpush1.bf16.msra.mxu1 %v19552_v0 }
 0x9d0   : > { %13258 = vmatprep.subr.bf16.mxu1 %v19557_v34 }
 0x9d3   : > { %13259 = vmatpush1.bf16.msra.mxu1 %v19555_v49 }
 0x9d4   : > { %13260 = vmatprep.subr.bf16.mxu1 %v19560_v42 }
 0x9d7   : > { %13261 = vmatpush2.bf16.msra.mxu1 %v19558_v28 }
 0x9d8   : > { %13262 = vmatprep.subr.bf16.mxu1 %v19563_v60 }
 0x9db   : > { %13263 = vmatpush2.bf16.msra.mxu1 %v19561_v47 }
 0x9dc   : > { %13264 = vmatprep.subr.bf16.mxu1 %v19566_v48 }
 0x9df   : > { %13265 = vmatpush2.bf16.msra.mxu1 %v19564_v51 }
 0x9e0   : > { %13266 = vmatprep.subr.bf16.mxu1 %v19569_v21 }
 0x9e3   : > { %13267 = vmatpush2.bf16.msra.mxu1 %v19567_v3 }
 0x9e4   : > { %13268 = vmatprep.subr.bf16.mxu1 %v19572_v29 }
 0x9e7   : > { %13269 = vmatpush2.bf16.msra.mxu1 %v19570_v20  ;;  %v21340_v20 = vld [vmem:[#allocation13] sm:$0xf] }
 0x9e8   : > { %13270 = vmatprep.subr.bf16.mxu1 %v19575_v13  ;;  %v19584_v13 = vld [vmem:[%s22820_s8 + $0x274] ss:$8 sps:$4 sm:$0xff]  }
 0x9eb   : > { %13271 = vmatpush2.bf16.msra.mxu1 %v19573_v18  ;;  %v19587_v18 = vld [vmem:[%s22820_s8 + $0x264] ss:$8 sps:$4 sm:$0xff]  }
 0x9ec   : > { %13272 = vmatprep.subr.bf16.mxu1 %v19578_v30  ;;  %v19585_v30 = vld [vmem:[%s22820_s8 + $0x260] ss:$8 sps:$4 sm:$0xff]  }
 0x9ef   : > { %13273 = vmatpush2.bf16.msra.mxu1 %v19576_v2  ;;  %v19590_v2 = vld [vmem:[%s22820_s8 + $0x254] ss:$8 sps:$4 sm:$0xff]  }
 0x9f0   : > { %13274 = vmatprep.subr.bf16.mxu1 %v19581_v44  ;;  %v19588_v44 = vld [vmem:[%s22820_s8 + $0x250] ss:$8 sps:$4 sm:$0xff]  }
 0x9f3   : > { %13275 = vmatpush2.bf16.msra.mxu1 %v19579_v43  ;;  %v19593_v43 = vld [vmem:[%s22820_s8 + $0x244] ss:$8 sps:$4 sm:$0xff]  }
 0x9f5   : > { %v13063_v16 = vpop.f32.mrf.mxu0 }
 0x9f6   : > { %13277 = vmatmul.mubr.bf16.vlgmr.msra.gmra.mxu1 %v21312_v23  ;;  %v13020_v35 = vpop.f32.mrf.mxu1 }
 0x9f7   : > { %13415 = vmatprep.mubr.bf16.mxu1 %v22868_v9  ;;  %v13065_v32 = vpop.f32.mrf.mxu0  ;;  %v13021_v55 = vadd.f32 %v13020_v35, %v12977_v37  ;;  %v19591_v37 = vld [vmem:[%s22820_s8 + $0x240] ss:$8 sps:$4 sm:$0xff]   ;;  %v19599_v35 = vld [vmem:[%s22820_s8 + $0x224] ss:$8 sps:$4 sm:$0xff]  }
 0x9f8   : > { %v13022_v27 = vpop.f32.mrf.mxu1 }
 0x9f9   : > { %v13023_v12 = vadd.f32 %v13022_v27, %v12979_v59  ;;  %v13067_v7 = vpop.f32.mrf.mxu0  ;;  %v13064_v38 = vadd.f32 %v13063_v16, %v13021_v55  ;;  %v19596_v59 = vld [vmem:[%s22820_s8 + $0x234] ss:$8 sps:$4 sm:$0xff]   ;;  %v19600_v16 = vld [vmem:[%s22820_s8 + $0x210] ss:$8 sps:$4 sm:$0xff]  }
 0x9fa   : > { %v13024_v1 = vpop.f32.mrf.mxu1  ;;  %v19602_v27 = vld [vmem:[%s22820_s8 + $0x214] ss:$8 sps:$4 sm:$0xff]  }
 0x9fb   : > { %v13025_v52 = vadd.f32 %v13024_v1, %v12981_v57  ;;  %v13066_v23 = vadd.f32 %v13065_v32, %v13023_v12  ;;  %v13069_v4 = vpop.f32.mrf.mxu0  ;;  %v19594_v57 = vld [vmem:[%s22820_s8 + $0x230] ss:$8 sps:$4 sm:$0xff]   ;;  %v19605_v1 = vld [vmem:[%s22820_s8 + $0x204] ss:$8 sps:$4 sm:$0xff]   ;;  %v19603_v32 = vld [vmem:[%s22820_s8 + $0x200] ss:$8 sps:$4 sm:$0xff]  }
 0x9fc   : > { %v13026_v45 = vpop.f32.mrf.mxu1  ;;  %v19608_v55 = vld [vmem:[%s22820_s8 + $0x2f4] ss:$8 sps:$4 sm:$0xff]   ;;  %v19606_v12 = vld [vmem:[%s22820_s8 + $0x2f0] ss:$8 sps:$4 sm:$0xff]  }
 0x9fd   : > { %v13027_v31 = vadd.f32 %v13026_v45, %v12983_v33  ;;  %v13068_v56 = vadd.f32 %v13067_v7, %v13025_v52  ;;  %v19597_v33 = vld [vmem:[%s22820_s8 + $0x220] ss:$8 sps:$4 sm:$0xff]   ;;  %v19611_v45 = vld [vmem:[%s22820_s8 + $0x2e4] ss:$8 sps:$4 sm:$0xff]   ;;  %v19612_v52 = vld [vmem:[%s22820_s8 + $0x2d0] ss:$8 sps:$4 sm:$0xff]  }
 0x9fe   : > { %v19609_v7 = vld [vmem:[%s22820_s8 + $0x2e0] ss:$8 sps:$4 sm:$0xff]  }
 0x9ff   : > { %v13070_v25 = vadd.f32 %v13069_v4, %v13027_v31  ;;  %v19620_v31 = vld [vmem:[%s22820_s8 + $0x2b4] ss:$8 sps:$4 sm:$0xff]   ;;  %v19623_v4 = vld [vmem:[%s22820_s8 + $0x2a4] ss:$8 sps:$4 sm:$0xff]  }
 0xa36   : > { %v13106_v40 = vpop.f32.mrf.mxu1 }
 0xa37   : > { %v13107_v58 = vadd.f32 %v13106_v40, %v13064_v38  ;;  %v19614_v38 = vld [vmem:[%s22820_s8 + $0x2d4] ss:$8 sps:$4 sm:$0xff]   ;;  %v19617_v40 = vld [vmem:[%s22820_s8 + $0x2c4] ss:$8 sps:$4 sm:$0xff]  }
 0xa38   : > { %v13108_v61 = vpop.f32.mrf.mxu1 }
 0xa39   : > { %v13287_v62 = vadd.f32 %v13107_v58, %v21244_v6  ;;  %v13109_v41 = vadd.f32 %v13108_v61, %v13066_v23  ;;  %v19615_v23 = vld [vmem:[%s22820_s8 + $0x2c0] ss:$8 sps:$4 sm:$0xff]   ;;  %v19618_v58 = vld [vmem:[%s22820_s8 + $0x2b0] ss:$8 sps:$4 sm:$0xff]  }
 0xa3a   : > { %v13110_v50 = vpop.f32.mrf.mxu1  ;;  %v19621_v61 = vld [vmem:[%s22820_s8 + $0x2a0] ss:$8 sps:$4 sm:$0xff]  }
 0xa3b   : > { %v13288_v26 = vadd.f32 %v13109_v41, %v21248_v39  ;;  %v13111_v54 = vadd.f32 %v13110_v50, %v13068_v56  ;;  %v13317_v34 = vadd.f32 %v13300_v19, %v13287_v62  ;;  %v19624_v56 = vld [vmem:[%s22820_s8 + $0x290] ss:$8 sps:$4 sm:$0xff]   ;;  %v19626_v62 = vld [vmem:[%s22820_s8 + $0x294] ss:$8 sps:$4 sm:$0xff]   ;;  %v19627_v41 = vld [vmem:[%s22820_s8 + $0x280] ss:$8 sps:$4 sm:$0xff]  }
 0xa3c   : > { %v13112_v0 = vpop.f32.mrf.mxu1  ;;  %v19632_v50 = vld [vmem:[%s22820_s8 + $0x74] ss:$8 sps:$4 sm:$0xff]  }
 0xa3d   : > { %v13291_v49 = vadd.f32 %v13111_v54, %v21252_v22  ;;  %v13113_v42 = vadd.f32 %v13112_v0, %v13070_v25  ;;  %v13318_v28 = vadd.f32 %v13304_v17, %v13288_v26  ;;  %v13325_v47 = vmax.f32 %v13317_v34, 0.0  ;;  %v21347_v22 = vld [vmem:[#allocation13 + $0x4] sm:$0xf]  ;;  %v13149_v25 = vpop.f32.mrf.mxu0 }
 0xa3f   : > { %v13321_v60 = vadd.f32 %v13300_v19, %v13291_v49  ;;  %v13292_v6 = vadd.f32 %v13113_v42, %v21256_v63  ;;  %v13326_v21 = vmax.f32 %v13318_v28, 0.0  ;;  %v19582_v63 = vld [vmem:[%s22820_s8 + $0x270] ss:$8 sps:$4 sm:$0xff]   ;;  %v19629_v19 = vld [vmem:[%s22820_s8 + $0x284] ss:$8 sps:$4 sm:$0xff]   ;;  %v13151_v26 = vpop.f32.mrf.mxu0 }
 0xa41   : > { %v13329_v48 = vmax.f32 %v13321_v60, 0.0  ;;  %v13322_v51 = vadd.f32 %v13304_v17, %v13292_v6  ;;  %v13153_v17 = vpop.f32.mrf.mxu0 }
 0xa43   : > { %v21334_v3 = vpack.c.bf16 %v13329_v48, %v13325_v47  ;;  %v13330_v39 = vmax.f32 %v13322_v51, 0.0  ;;  %v13155_v0 = vpop.f32.mrf.mxu0 }
 0xa45   : > { %v21336_v29 = vpack.c.bf16 %v13330_v39, %v13326_v21 }
 0xa47   : > { %13356 = vmatprep.subr.bf16.mxu0 %v21336_v29 }
 0xa48   : > { %13357 = vmatpush1.bf16.msra.mxu0 %v21334_v3 }
 0xa49   : > { %13511 = vmatprep.subr.bf16.mxu0 %v21336_v29 }
 0xa4b   : > { %17650 = vmatmul.mubr.msk.bf16.vlgmr.msra.gmra.mxu0 %vm13338_vm2, %v21340_v20 }
 0xa4c   : > { %13512 = vmatpush1.bf16.msra.mxu0 %v21334_v3  ;;  %13529 = vmatprep.mubr.bf16.mxu0 %v22868_v9 }
 0xa4d   : > { %13968 = vmatprep.subr.bf16.mxu0 %v19584_v13 }
 0xa53   : > { %17652 = vmatmul.mubr.msk.bf16.vlgmr.msra.gmra.mxu0 %vm13338_vm2, %v21347_v22 }
 0xa54   : > { %13969 = vmatpush1.bf16.msra.mxu0 %v19582_v63 }
 0xa55   : > { %13970 = vmatprep.subr.bf16.mxu0 %v19587_v18 }
 0xa58   : > { %13971 = vmatpush1.bf16.msra.mxu0 %v19585_v30 }
 0xa59   : > { %13972 = vmatprep.subr.bf16.mxu0 %v19590_v2 }
 0xa5c   : > { %13973 = vmatpush1.bf16.msra.mxu0 %v19588_v44 }
 0xa5d   : > { %13974 = vmatprep.subr.bf16.mxu0 %v19593_v43  ;;  %v13308_v43 = vrot.slane %v21324_v36, %v6962_v11 }
 0xa60   : > { %13975 = vmatpush1.bf16.msra.mxu0 %v19591_v37 }
 0xa61   : > { %13976 = vmatprep.subr.bf16.mxu0 %v19596_v59 }
 0xa64   : > { %13977 = vmatpush1.bf16.msra.mxu0 %v19594_v57 }
 0xa65   : > { %13978 = vmatprep.subr.bf16.mxu0 %v19599_v35 }
 0xa68   : > { %13979 = vmatpush1.bf16.msra.mxu0 %v19597_v33 }
 0xa69   : > { %13980 = vmatprep.subr.bf16.mxu0 %v19602_v27  ;;  %v13312_v27 = vrot.slane %v21324_v36, %v6966_v14  ;;  %v19678_v14 = vld [vmem:[%s22820_s8 + $0x370] ss:$8 sps:$4 sm:$0xff]   ;;  %v19683_v36 = vld [vmem:[%s22820_s8 + $0x364] ss:$8 sps:$4 sm:$0xff]  }
 0xa6c   : > { %13981 = vmatpush1.bf16.msra.mxu0 %v19600_v16 }
 0xa6d   : > { %13982 = vmatprep.subr.bf16.mxu0 %v19605_v1 }
 0xa70   : > { %13983 = vmatpush1.bf16.msra.mxu0 %v19603_v32 }
 0xa71   : > { %13984 = vmatprep.subr.bf16.mxu0 %v19608_v55 }
 0xa74   : > { %13985 = vmatpush2.bf16.msra.mxu0 %v19606_v12 }
 0xa75   : > { %13986 = vmatprep.subr.bf16.mxu0 %v19611_v45  ;;  %v13235_v49 = vpop.f32.mrf.mxu0 }
 0xa76   : > { %v13192_v54 = vpop.f32.mrf.mxu1 }
 0xa77   : > { %v13193_v28 = vadd.f32 %v13192_v54, %v13149_v25  ;;  %v13237_v60 = vpop.f32.mrf.mxu0  ;;  %v19699_v25 = vld [vmem:[%s22820_s8 + $0x300] ss:$8 sps:$4 sm:$0xff]   ;;  %v19707_v54 = vld [vmem:[%s22820_s8 + $0x3e4] ss:$8 sps:$4 sm:$0xff]  }
 0xa78   : > { %13987 = vmatpush2.bf16.msra.mxu0 %v19609_v7  ;;  %v13194_v34 = vpop.f32.mrf.mxu1 }
 0xa79   : > { %13988 = vmatprep.subr.bf16.mxu0 %v19614_v38  ;;  %v13195_v6 = vadd.f32 %v13194_v34, %v13151_v26  ;;  %v13236_v48 = vadd.f32 %v13235_v49, %v13193_v28  ;;  %v13239_v21 = vpop.f32.mrf.mxu0  ;;  %v19704_v26 = vld [vmem:[%s22820_s8 + $0x3f4] ss:$8 sps:$4 sm:$0xff]   ;;  %v19708_v49 = vld [vmem:[%s22820_s8 + $0x3d0] ss:$8 sps:$4 sm:$0xff]   ;;  %v19711_v28 = vld [vmem:[%s22820_s8 + $0x3c0] ss:$8 sps:$4 sm:$0xff]  }
 0xa7a   : > { %v13196_v42 = vpop.f32.mrf.mxu1  ;;  %v19710_v34 = vld [vmem:[%s22820_s8 + $0x3d4] ss:$8 sps:$4 sm:$0xff]  }
 0xa7b   : > { %v13197_v51 = vadd.f32 %v13196_v42, %v13153_v17  ;;  %v13238_v63 = vadd.f32 %v13237_v60, %v13195_v6  ;;  %v13241_v59 = vpop.f32.mrf.mxu0  ;;  %v19702_v17 = vld [vmem:[%s22820_s8 + $0x3f0] ss:$8 sps:$4 sm:$0xff]   ;;  %v19713_v42 = vld [vmem:[%s22820_s8 + $0x3c4] ss:$8 sps:$4 sm:$0xff]   ;;  %v19716_v60 = vld [vmem:[%s22820_s8 + $0x3b4] ss:$8 sps:$4 sm:$0xff]  }
 0xa7c   : > { %13989 = vmatpush2.bf16.msra.mxu0 %v19612_v52  ;;  %v13198_v47 = vpop.f32.mrf.mxu1  ;;  %v19714_v6 = vld [vmem:[%s22820_s8 + $0x3b0] ss:$8 sps:$4 sm:$0xff]  }
 0xa7d   : > { %13990 = vmatprep.subr.bf16.mxu0 %v19617_v40  ;;  %v13199_v13 = vadd.f32 %v13198_v47, %v13155_v0  ;;  %v13240_v2 = vadd.f32 %v13239_v21, %v13197_v51  ;;  %v19705_v0 = vld [vmem:[%s22820_s8 + $0x3e0] ss:$8 sps:$4 sm:$0xff]  }
 0xa7e   : > { %v19717_v51 = vld [vmem:[%s22820_s8 + $0x3a0] ss:$8 sps:$4 sm:$0xff]  }
 0xa7f   : > { %v13242_v35 = vadd.f32 %v13241_v59, %v13199_v13  ;;  %v19722_v13 = vld [vmem:[%s22820_s8 + $0x394] ss:$8 sps:$4 sm:$0xff]  }
 0xa80   : > { %13991 = vmatpush2.bf16.msra.mxu0 %v19615_v23 }
 0xa81   : > { %13992 = vmatprep.subr.bf16.mxu0 %v19620_v31  ;;  %v19689_v31 = vld [vmem:[%s22820_s8 + $0x344] ss:$8 sps:$4 sm:$0xff]  }
 0xa84   : > { %13993 = vmatpush2.bf16.msra.mxu0 %v19618_v58  ;;  %v19687_v58 = vld [vmem:[%s22820_s8 + $0x340] ss:$8 sps:$4 sm:$0xff]  }
 0xa85   : > { %13994 = vmatprep.subr.bf16.mxu0 %v19623_v4  ;;  %v19692_v4 = vld [vmem:[%s22820_s8 + $0x334] ss:$8 sps:$4 sm:$0xff]  }
 0xa88   : > { %13995 = vmatpush2.bf16.msra.mxu0 %v19621_v61  ;;  %v19690_v61 = vld [vmem:[%s22820_s8 + $0x330] ss:$8 sps:$4 sm:$0xff]  }
 0xa89   : > { %13996 = vmatprep.subr.bf16.mxu0 %v19626_v62  ;;  %v19693_v62 = vld [vmem:[%s22820_s8 + $0x320] ss:$8 sps:$4 sm:$0xff]  }
 0xa8c   : > { %13997 = vmatpush2.bf16.msra.mxu0 %v19624_v56  ;;  %v19695_v56 = vld [vmem:[%s22820_s8 + $0x324] ss:$8 sps:$4 sm:$0xff]  }
 0xa8d   : > { %13998 = vmatprep.subr.bf16.mxu0 %v19629_v19  ;;  %v19698_v19 = vld [vmem:[%s22820_s8 + $0x314] ss:$8 sps:$4 sm:$0xff]  }
 0xa90   : > { %13999 = vmatpush2.bf16.msra.mxu0 %v19627_v41  ;;  %v19696_v41 = vld [vmem:[%s22820_s8 + $0x310] ss:$8 sps:$4 sm:$0xff]  }
 0xa91   : > { %14370 = vmatprep.subr.bf16.mxu0 %v19632_v50  ;;  %v19701_v50 = vld [vmem:[%s22820_s8 + $0x304] ss:$8 sps:$4 sm:$0xff]  }
 0xab6   : > { %v13278_v39 = vpop.f32.mrf.mxu1 }
 0xab7   : > { %v13279_v18 = vadd.f32 %v13278_v39, %v13236_v48  ;;  %v19719_v48 = vld [vmem:[%s22820_s8 + $0x3a4] ss:$8 sps:$4 sm:$0xff]  }
 0xab8   : > { %v13280_v30 = vpop.f32.mrf.mxu1 }
 0xab9   : > { %v13289_v44 = vadd.f32 %v13279_v18, %v21280_v8  ;;  %v13281_v37 = vadd.f32 %v13280_v30, %v13238_v63  ;;  %v19720_v63 = vld [vmem:[%s22820_s8 + $0x390] ss:$8 sps:$4 sm:$0xff]  }
 0xaba   : > { %v13282_v57 = vpop.f32.mrf.mxu1 }
 0xabb   : > { %v13290_v33 = vadd.f32 %v13281_v37, %v21283_v53  ;;  %v13283_v16 = vadd.f32 %v13282_v57, %v13240_v2  ;;  %v13319_v32 = vadd.f32 %v13308_v43, %v13289_v44  ;;  %v19725_v2 = vld [vmem:[%s22820_s8 + $0x384] ss:$8 sps:$4 sm:$0xff]   ;;  %v19723_v44 = vld [vmem:[%s22820_s8 + $0x380] ss:$8 sps:$4 sm:$0xff]  }
 0xabc   : > { %v13284_v1 = vpop.f32.mrf.mxu1 }
 0xabd   : > { %v13293_v55 = vadd.f32 %v13283_v16, %v21286_v46  ;;  %v13285_v8 = vadd.f32 %v13284_v1, %v13242_v35  ;;  %v13320_v12 = vadd.f32 %v13312_v27, %v13290_v33  ;;  %v13327_v7 = vmax.f32 %v13319_v32, 0.0  ;;  %v19680_v46 = vld [vmem:[%s22820_s8 + $0x374] ss:$8 sps:$4 sm:$0xff]   ;;  %v19630_v35 = vld [vmem:[%s22820_s8 + $0x70] ss:$8 sps:$4 sm:$0xff]  }
 0xabe   : > { %v19635_v33 = vld [vmem:[%s22820_s8 + $0x64] ss:$8 sps:$4 sm:$0xff]   ;;  %v19728_v16 = vld [vmem:[%s22820_s8 + $0x174] ss:$8 sps:$4 sm:$0xff]   ;;  %v19633_v32 = vld [vmem:[%s22820_s8 + $0x60] ss:$8 sps:$4 sm:$0xff]  }
 0xabf   : > { %v13323_v45 = vadd.f32 %v13308_v43, %v13293_v55  ;;  %v13294_v11 = vadd.f32 %v13285_v8, %v21289_v24  ;;  %v13328_v40 = vmax.f32 %v13320_v12, 0.0  ;;  %v19681_v24 = vld [vmem:[%s22820_s8 + $0x360] ss:$8 sps:$4 sm:$0xff]   ;;  %v19638_v55 = vld [vmem:[%s22820_s8 + $0x54] ss:$8 sps:$4 sm:$0xff]  }
 0xac0   : > { %v19636_v8 = vld [vmem:[%s22820_s8 + $0x50] ss:$8 sps:$4 sm:$0xff]   ;;  %v19641_v12 = vld [vmem:[%s22820_s8 + $0x44] ss:$8 sps:$4 sm:$0xff]  }
 0xac1   : > { %v13331_v38 = vmax.f32 %v13323_v45, 0.0  ;;  %v13324_v52 = vadd.f32 %v13312_v27, %v13294_v11  ;;  %v19639_v45 = vld [vmem:[%s22820_s8 + $0x40] ss:$8 sps:$4 sm:$0xff]   ;;  %v19644_v11 = vld [vmem:[%s22820_s8 + $0x34] ss:$8 sps:$4 sm:$0xff]  }
 0xac3   : > { %v21460_v23 = vpack.c.bf16 %v13331_v38, %v13327_v7  ;;  %v13332_v53 = vmax.f32 %v13324_v52, 0.0  ;;  %v19642_v7 = vld [vmem:[%s22820_s8 + $0x30] ss:$8 sps:$4 sm:$0xff]   ;;  %v19647_v38 = vld [vmem:[%s22820_s8 + $0x24] ss:$8 sps:$4 sm:$0xff]  }
 0xac4   : > { %v19645_v52 = vld [vmem:[%s22820_s8 + $0x20] ss:$8 sps:$4 sm:$0xff]  }
 0xac5   : > { %v21462_v10 = vpack.c.bf16 %v13332_v53, %v13328_v40  ;;  %v19650_v40 = vld [vmem:[%s22820_s8 + $0x14] ss:$8 sps:$4 sm:$0xff]   ;;  %v19648_v53 = vld [vmem:[%s22820_s8 + $0x10] ss:$8 sps:$4 sm:$0xff]  }
 0xac7   : > { %13397 = vmatprep.subr.bf16.mxu1 %v21462_v10 }
 0xac8   : > { %13398 = vmatpush1.bf16.msra.mxu1 %v21460_v23 }
 0xac9   : > { %13552 = vmatprep.subr.bf16.mxu1 %v21462_v10 }
 0xacb   : > { %17651 = vmatmul.mubr.msk.bf16.vlgmr.msra.gmra.mxu1 %vm13338_vm2, %v21340_v20  ;;  %v19686_v20 = vld [vmem:[%s22820_s8 + $0x354] ss:$8 sps:$4 sm:$0xff]  }
 0xacc   : > { %13553 = vmatpush1.bf16.msra.mxu1 %v21460_v23  ;;  %13570 = vmatprep.mubr.bf16.mxu1 %v22868_v9 }
 0xacd   : > { %14009 = vmatprep.subr.bf16.mxu1 %v19680_v46  ;;  %v19651_v46 = vld [vmem:[%s22820_s8] ss:$8 sps:$4 sm:$0xff]  }
 0xad3   : > { %17653 = vmatmul.mubr.msk.bf16.vlgmr.msra.gmra.mxu1 %vm13338_vm2, %v21347_v22  ;;  %v19684_v22 = vld [vmem:[%s22820_s8 + $0x350] ss:$8 sps:$4 sm:$0xff]  }
 0xad4   : > { %14010 = vmatpush1.bf16.msra.mxu1 %v19678_v14  ;;  %v19653_v14 = vld [vmem:[%s22820_s8 + $0x4] ss:$8 sps:$4 sm:$0xff]  }
 0xad5   : > { %14011 = vmatprep.subr.bf16.mxu1 %v19683_v36  ;;  %v19654_v36 = vld [vmem:[%s22820_s8 + $0xf0] ss:$8 sps:$4 sm:$0xff]  }
 0xad8   : > { %14012 = vmatpush1.bf16.msra.mxu1 %v19681_v24  ;;  %v19656_v24 = vld [vmem:[%s22820_s8 + $0xf4] ss:$8 sps:$4 sm:$0xff]  }
 0xad9   : > { %14013 = vmatprep.subr.bf16.mxu1 %v19686_v20  ;;  %v19659_v20 = vld [vmem:[%s22820_s8 + $0xe4] ss:$8 sps:$4 sm:$0xff]  }
 0xadc   : > { %14014 = vmatpush1.bf16.msra.mxu1 %v19684_v22  ;;  %v19657_v22 = vld [vmem:[%s22820_s8 + $0xe0] ss:$8 sps:$4 sm:$0xff]  }
 0xadd   : > { %14015 = vmatprep.subr.bf16.mxu1 %v19689_v31  ;;  %v19662_v31 = vld [vmem:[%s22820_s8 + $0xd4] ss:$8 sps:$4 sm:$0xff]  }
 0xae0   : > { %14016 = vmatpush1.bf16.msra.mxu1 %v19687_v58  ;;  %v19660_v58 = vld [vmem:[%s22820_s8 + $0xd0] ss:$8 sps:$4 sm:$0xff]  }
 0xae1   : > { %14017 = vmatprep.subr.bf16.mxu1 %v19692_v4  ;;  %v19665_v4 = vld [vmem:[%s22820_s8 + $0xc4] ss:$8 sps:$4 sm:$0xff]  }
 0xae4   : > { %14018 = vmatpush1.bf16.msra.mxu1 %v19690_v61  ;;  %v19663_v61 = vld [vmem:[%s22820_s8 + $0xc0] ss:$8 sps:$4 sm:$0xff]  }
 0xae5   : > { %14019 = vmatprep.subr.bf16.mxu1 %v19695_v56  ;;  %v19668_v56 = vld [vmem:[%s22820_s8 + $0xb4] ss:$8 sps:$4 sm:$0xff]  }
 0xae8   : > { %14020 = vmatpush1.bf16.msra.mxu1 %v19693_v62  ;;  %v19666_v62 = vld [vmem:[%s22820_s8 + $0xb0] ss:$8 sps:$4 sm:$0xff]  }
 0xae9   : > { %14021 = vmatprep.subr.bf16.mxu1 %v19698_v19  ;;  %v19671_v19 = vld [vmem:[%s22820_s8 + $0xa4] ss:$8 sps:$4 sm:$0xff]  }
 0xaec   : > { %14022 = vmatpush1.bf16.msra.mxu1 %v19696_v41  ;;  %v19669_v41 = vld [vmem:[%s22820_s8 + $0xa0] ss:$8 sps:$4 sm:$0xff]  }
 0xaed   : > { %14023 = vmatprep.subr.bf16.mxu1 %v19701_v50  ;;  %v19674_v50 = vld [vmem:[%s22820_s8 + $0x94] ss:$8 sps:$4 sm:$0xff]  }
 0xaf0   : > { %14024 = vmatpush1.bf16.msra.mxu1 %v19699_v25  ;;  %v19672_v25 = vld [vmem:[%s22820_s8 + $0x90] ss:$8 sps:$4 sm:$0xff]  }
 0xaf1   : > { %14025 = vmatprep.subr.bf16.mxu1 %v19704_v26  ;;  %v19677_v26 = vld [vmem:[%s22820_s8 + $0x84] ss:$8 sps:$4 sm:$0xff]  }
 0xaf4   : > { %14026 = vmatpush2.bf16.msra.mxu1 %v19702_v17  ;;  %v19675_v17 = vld [vmem:[%s22820_s8 + $0x80] ss:$8 sps:$4 sm:$0xff]  }
 0xaf5   : > { %14027 = vmatprep.subr.bf16.mxu1 %v19707_v54 }
 0xaf8   : > { %14028 = vmatpush2.bf16.msra.mxu1 %v19705_v0  ;;  %v21672_v0 = vld [vmem:[#allocation13 + $0x8] sm:$0xf] }
 0xaf9   : > { %14029 = vmatprep.subr.bf16.mxu1 %v19710_v34 }
 0xafc   : > { %14030 = vmatpush2.bf16.msra.mxu1 %v19708_v49 }
 0xafd   : > { %14031 = vmatprep.subr.bf16.mxu1 %v19713_v42 }
 0xb00   : > { %14032 = vmatpush2.bf16.msra.mxu1 %v19711_v28 }
 0xb01   : > { %14033 = vmatprep.subr.bf16.mxu1 %v19716_v60 }
 0xb04   : > { %14034 = vmatpush2.bf16.msra.mxu1 %v19714_v6 }
 0xb05   : > { %14035 = vmatprep.subr.bf16.mxu1 %v19719_v48 }
 0xb08   : > { %14036 = vmatpush2.bf16.msra.mxu1 %v19717_v51  ;;  %v19731_v51 = vld [vmem:[%s22820_s8 + $0x164] ss:$8 sps:$4 sm:$0xff]  }
 0xb09   : > { %14037 = vmatprep.subr.bf16.mxu1 %v19722_v13  ;;  %v19734_v13 = vld [vmem:[%s22820_s8 + $0x154] ss:$8 sps:$4 sm:$0xff]  }
 0xb0b   : > { %v21551_v47 = vpop.f32.mrf.mxu0 }
 0xb0c   : > { %14038 = vmatpush2.bf16.msra.mxu1 %v19720_v63  ;;  %v13424_v54 = vpack.c.bf16 %v21551_v47, %v21551_v47  ;;  %v19729_v63 = vld [vmem:[%s22820_s8 + $0x160] ss:$8 sps:$4 sm:$0xff]  }
 0xb0d   : > { %v13378_v21 = vpop.f32.mrf.mxu0  ;;  %14039 = vmatprep.subr.bf16.mxu1 %v19725_v2  ;;  %v19735_v2 = vld [vmem:[%s22820_s8 + $0x140] ss:$8 sps:$4 sm:$0xff]  }
 0xb0e   : > { %v13425_v59 = vpack.c.bf16 %v13378_v21, %v13378_v21 }
 0xb0f   : > { %v13380_v39 = vpop.f32.mrf.mxu0 }
 0xb10   : > { %14040 = vmatpush2.bf16.msra.mxu1 %v19723_v44  ;;  %v19740_v44 = vld [vmem:[%s22820_s8 + $0x134] ss:$8 sps:$4 sm:$0xff]  }
 0xb11   : > { %v13381_v18 = vpop.f32.mrf.mxu0  ;;  %14411 = vmatprep.subr.bf16.mxu1 %v19728_v16  ;;  %v19752_v16 = vld [vmem:[%s22820_s8 + $0x1f4] ss:$8 sps:$4 sm:$0xff]  }
 0xb12   : > { %v19732_v18 = vld [vmem:[%s22820_s8 + $0x150] ss:$8 sps:$4 sm:$0xff]  }
 0xb13   : > { %v13531_v30 = vpop.f32.mrf.mxu0 }
 0xb14   : > { %v13579_v43 = vpack.c.bf16 %v13531_v30, %v13531_v30  ;;  %v19737_v30 = vld [vmem:[%s22820_s8 + $0x144] ss:$8 sps:$4 sm:$0xff]  }
 0xb15   : > { %v13533_v37 = vpop.f32.mrf.mxu0 }
 0xb16   : > { %v13580_v57 = vpack.c.bf16 %v13533_v37, %v13533_v37  ;;  %v19743_v37 = vld [vmem:[%s22820_s8 + $0x124] ss:$8 sps:$4 sm:$0xff]  }
 0xb17   : > { %v13535_v27 = vpop.f32.mrf.mxu0 }
 0xb18   : > { %14000 = vmatprep.mubr.bf16.mxu0 %v13580_v57  ;;  %v19746_v57 = vld [vmem:[%s22820_s8 + $0x114] ss:$8 sps:$4 sm:$0xff]   ;;  %v19747_v27 = vld [vmem:[%s22820_s8 + $0x100] ss:$8 sps:$4 sm:$0xff]  }
 0xb19   : > { %14001 = vmatmul.mubr.bf16.vlgmr.msra.gmra.mxu0 %v13579_v43  ;;  %v13536_v1 = vpop.f32.mrf.mxu0  ;;  %v19738_v43 = vld [vmem:[%s22820_s8 + $0x130] ss:$8 sps:$4 sm:$0xff]  }
 0xb1a   : > { %14371 = vmatpush1.bf16.msra.mxu0 %v19630_v35  ;;  %14402 = vmatprep.mubr.bf16.mxu0 %v13425_v59  ;;  %v19741_v59 = vld [vmem:[%s22820_s8 + $0x120] ss:$8 sps:$4 sm:$0xff]   ;;  %v19744_v35 = vld [vmem:[%s22820_s8 + $0x110] ss:$8 sps:$4 sm:$0xff]  }
 0xb1b   : > { %14372 = vmatprep.subr.bf16.mxu0 %v19635_v33  ;;  %v19749_v33 = vld [vmem:[%s22820_s8 + $0x104] ss:$8 sps:$4 sm:$0xff]   ;;  %v19750_v1 = vld [vmem:[%s22820_s8 + $0x1f0] ss:$8 sps:$4 sm:$0xff]  }
 0xb1e   : > { %14373 = vmatpush1.bf16.msra.mxu0 %v19633_v32  ;;  %v19755_v32 = vld [vmem:[%s22820_s8 + $0x1e4] ss:$8 sps:$4 sm:$0xff]  }
 0xb1f   : > { %14374 = vmatprep.subr.bf16.mxu0 %v19638_v55  ;;  %v19753_v55 = vld [vmem:[%s22820_s8 + $0x1e0] ss:$8 sps:$4 sm:$0xff]  }
 0xb22   : > { %14375 = vmatpush1.bf16.msra.mxu0 %v19636_v8  ;;  %v19758_v8 = vld [vmem:[%s22820_s8 + $0x1d4] ss:$8 sps:$4 sm:$0xff]  }
 0xb23   : > { %14376 = vmatprep.subr.bf16.mxu0 %v19641_v12  ;;  %v19756_v12 = vld [vmem:[%s22820_s8 + $0x1d0] ss:$8 sps:$4 sm:$0xff]  }
 0xb26   : > { %14377 = vmatpush1.bf16.msra.mxu0 %v19639_v45  ;;  %v19761_v45 = vld [vmem:[%s22820_s8 + $0x1c4] ss:$8 sps:$4 sm:$0xff]  }
 0xb27   : > { %14378 = vmatprep.subr.bf16.mxu0 %v19644_v11  ;;  %v19759_v11 = vld [vmem:[%s22820_s8 + $0x1c0] ss:$8 sps:$4 sm:$0xff]  }
 0xb2a   : > { %14379 = vmatpush1.bf16.msra.mxu0 %v19642_v7  ;;  %v19764_v7 = vld [vmem:[%s22820_s8 + $0x1b4] ss:$8 sps:$4 sm:$0xff]  }
 0xb2b   : > { %14380 = vmatprep.subr.bf16.mxu0 %v19647_v38  ;;  %v19762_v38 = vld [vmem:[%s22820_s8 + $0x1b0] ss:$8 sps:$4 sm:$0xff]  }
 0xb2e   : > { %14381 = vmatpush1.bf16.msra.mxu0 %v19645_v52  ;;  %v19767_v52 = vld [vmem:[%s22820_s8 + $0x1a4] ss:$8 sps:$4 sm:$0xff]  }
 0xb2f   : > { %14382 = vmatprep.subr.bf16.mxu0 %v19650_v40  ;;  %v19765_v40 = vld [vmem:[%s22820_s8 + $0x1a0] ss:$8 sps:$4 sm:$0xff]  }
 0xb32   : > { %14383 = vmatpush1.bf16.msra.mxu0 %v19648_v53  ;;  %v19770_v53 = vld [vmem:[%s22820_s8 + $0x194] ss:$8 sps:$4 sm:$0xff]  }
 0xb33   : > { %14384 = vmatprep.subr.bf16.mxu0 %v19653_v14  ;;  %v19768_v14 = vld [vmem:[%s22820_s8 + $0x190] ss:$8 sps:$4 sm:$0xff]  }
 0xb36   : > { %14385 = vmatpush1.bf16.msra.mxu0 %v19651_v46  ;;  %v19773_v46 = vld [vmem:[%s22820_s8 + $0x184] ss:$8 sps:$4 sm:$0xff]  }
 0xb37   : > { %14386 = vmatprep.subr.bf16.mxu0 %v19656_v24  ;;  %v19771_v24 = vld [vmem:[%s22820_s8 + $0x180] ss:$8 sps:$4 sm:$0xff]  }
 0xb3a   : > { %14387 = vmatpush2.bf16.msra.mxu0 %v19654_v36 }
 0xb3b   : > { %14388 = vmatprep.subr.bf16.mxu0 %v19659_v20 }
 0xb3e   : > { %14389 = vmatpush2.bf16.msra.mxu0 %v19657_v22 }
 0xb3f   : > { %14390 = vmatprep.subr.bf16.mxu0 %v19662_v31  ;;  %v19776_v31 = vld [vmem:[%s22820_s8 + $0x474] ss:$8 sps:$4 sm:$0xff]  }
 0xb42   : > { %14391 = vmatpush2.bf16.msra.mxu0 %v19660_v58 }
 0xb43   : > { %14392 = vmatprep.subr.bf16.mxu0 %v19665_v4  ;;  %v19774_v4 = vld [vmem:[%s22820_s8 + $0x470] ss:$8 sps:$4 sm:$0xff]  }
 0xb46   : > { %14393 = vmatpush2.bf16.msra.mxu0 %v19663_v61  ;;  %v19780_v61 = vld [vmem:[%s22820_s8 + $0x570] ss:$8 sps:$4 sm:$0xff]  }
 0xb47   : > { %14394 = vmatprep.subr.bf16.mxu0 %v19668_v56  ;;  %v19782_v56 = vld [vmem:[%s22820_s8 + $0x574] ss:$8 sps:$4 sm:$0xff]  }
 0xb4a   : > { %14395 = vmatpush2.bf16.msra.mxu0 %v19666_v62  ;;  %v19785_v62 = vld [vmem:[%s22820_s8 + $0x454] ss:$8 sps:$4 sm:$0xff]  }
 0xb4b   : > { %14396 = vmatprep.subr.bf16.mxu0 %v19671_v19  ;;  %v19788_v19 = vld [vmem:[%s22820_s8 + $0x564] ss:$8 sps:$4 sm:$0xff]  }
 0xb4e   : > { %14397 = vmatpush2.bf16.msra.mxu0 %v19669_v41  ;;  %v19783_v41 = vld [vmem:[%s22820_s8 + $0x450] ss:$8 sps:$4 sm:$0xff]  }
 0xb4f   : > { %14398 = vmatprep.subr.bf16.mxu0 %v19674_v50  ;;  %v19786_v50 = vld [vmem:[%s22820_s8 + $0x560] ss:$8 sps:$4 sm:$0xff]  }
 0xb52   : > { %14399 = vmatpush2.bf16.msra.mxu0 %v19672_v25  ;;  %v19791_v25 = vld [vmem:[%s22820_s8 + $0x444] ss:$8 sps:$4 sm:$0xff]  }
 0xb53   : > { %14400 = vmatprep.subr.bf16.mxu0 %v19677_v26  ;;  %v19794_v26 = vld [vmem:[%s22820_s8 + $0x554] ss:$8 sps:$4 sm:$0xff]  }
 0xb56   : > { %14401 = vmatpush2.bf16.msra.mxu0 %v19675_v17  ;;  %v19789_v17 = vld [vmem:[%s22820_s8 + $0x440] ss:$8 sps:$4 sm:$0xff]  }
 0xb57   : > { %14471 = vmatprep.subr.bf16.mxu0 %v21336_v29  ;;  %v19726_v29 = vld [vmem:[%s22820_s8 + $0x170] ss:$8 sps:$4 sm:$0xff]  }
 0xb59   : > { %14403 = vmatmul.mubr.bf16.vlgmr.msra.gmra.mxu0 %v13424_v54  ;;  %v19792_v54 = vld [vmem:[%s22820_s8 + $0x550] ss:$8 sps:$4 sm:$0xff]  }
 0xb5a   : > { %14472 = vmatpush1.bf16.msra.mxu0 %v21334_v3  ;;  %14489 = vmatprep.mubr.bf16.mxu0 %v22868_v9 }
 0xb5b   : > { %14928 = vmatprep.subr.bf16.mxu0 %v19776_v31  ;;  %v19860_v31 = vld [vmem:[%s22820_s8 + $0x5a4] ss:$8 sps:$4 sm:$0xff]  }
 0xb61   : > { %17846 = vmatmul.mubr.msk.bf16.vlgmr.msra.gmra.mxu0 %vm13338_vm2, %v21672_v0 }
 0xb62   : > { %14929 = vmatpush1.bf16.msra.mxu0 %v19774_v4  ;;  %v19858_v4 = vld [vmem:[%s22820_s8 + $0x5a0] ss:$8 sps:$4 sm:$0xff]  }
 0xb8b   : > { %v21676_v34 = vpop.f32.mrf.mxu1 }
 0xb8c   : > { %v13426_v36 = vpack.c.bf16 %v21676_v34, %v21676_v34  ;;  %v19800_v34 = vld [vmem:[%s22820_s8 + $0x544] ss:$8 sps:$4 sm:$0xff]  }
 0xb8d   : > { %v13419_v49 = vpop.f32.mrf.mxu1 }
 0xb8e   : > { %v13427_v21 = vpack.c.bf16 %v13419_v49, %v13419_v49  ;;  %v19795_v49 = vld [vmem:[%s22820_s8 + $0x430] ss:$8 sps:$4 sm:$0xff]  }
 0xb8f   : > { %v13421_v42 = vpop.f32.mrf.mxu1 }
 0xb90   : > { %v19798_v42 = vld [vmem:[%s22820_s8 + $0x540] ss:$8 sps:$4 sm:$0xff]  }
 0xb91   : > { %v13422_v28 = vpop.f32.mrf.mxu1 }
 0xb92   : > { %v19803_v28 = vld [vmem:[%s22820_s8 + $0x424] ss:$8 sps:$4 sm:$0xff]  }
 0xb93   : > { %v13572_v60 = vpop.f32.mrf.mxu1 }
 0xb94   : > { %v13581_v3 = vpack.c.bf16 %v13572_v60, %v13572_v60  ;;  %v19806_v60 = vld [vmem:[%s22820_s8 + $0x534] ss:$8 sps:$4 sm:$0xff]  }
 0xb95   : > { %v13574_v6 = vpop.f32.mrf.mxu1 }
 0xb96   : > { %v13582_v47 = vpack.c.bf16 %v13574_v6, %v13574_v6  ;;  %v19801_v6 = vld [vmem:[%s22820_s8 + $0x420] ss:$8 sps:$4 sm:$0xff]  }
 0xb97   : > { %v13576_v48 = vpop.f32.mrf.mxu1 }
 0xb98   : > { %14041 = vmatprep.mubr.bf16.mxu1 %v13582_v47  ;;  %v19804_v47 = vld [vmem:[%s22820_s8 + $0x530] ss:$8 sps:$4 sm:$0xff]  }
 0xb99   : > { %v13577_v39 = vpop.f32.mrf.mxu1  ;;  %14042 = vmatmul.mubr.bf16.vlgmr.msra.gmra.mxu1 %v13581_v3  ;;  %v19812_v3 = vld [vmem:[%s22820_s8 + $0x524] ss:$8 sps:$4 sm:$0xff]   ;;  %v19807_v48 = vld [vmem:[%s22820_s8 + $0x410] ss:$8 sps:$4 sm:$0xff]  }
 0xb9a   : > { %14412 = vmatpush1.bf16.msra.mxu1 %v19726_v29  ;;  %14443 = vmatprep.mubr.bf16.mxu1 %v13427_v21  ;;  %v19809_v29 = vld [vmem:[%s22820_s8 + $0x414] ss:$8 sps:$4 sm:$0xff]   ;;  %v19815_v21 = vld [vmem:[%s22820_s8 + $0x404] ss:$8 sps:$4 sm:$0xff]  }
 0xb9b   : > { %14413 = vmatprep.subr.bf16.mxu1 %v19731_v51  ;;  %v19810_v51 = vld [vmem:[%s22820_s8 + $0x520] ss:$8 sps:$4 sm:$0xff]   ;;  %v19818_v39 = vld [vmem:[%s22820_s8 + $0x514] ss:$8 sps:$4 sm:$0xff]  }
 0xb9e   : > { %14414 = vmatpush1.bf16.msra.mxu1 %v19729_v63  ;;  %v19813_v63 = vld [vmem:[%s22820_s8 + $0x400] ss:$8 sps:$4 sm:$0xff]  }
 0xb9f   : > { %14415 = vmatprep.subr.bf16.mxu1 %v19734_v13  ;;  %v19816_v13 = vld [vmem:[%s22820_s8 + $0x510] ss:$8 sps:$4 sm:$0xff]  }
 0xba2   : > { %14416 = vmatpush1.bf16.msra.mxu1 %v19732_v18  ;;  %v19821_v18 = vld [vmem:[%s22820_s8 + $0x4f4] ss:$8 sps:$4 sm:$0xff]  }
 0xba3   : > { %14417 = vmatprep.subr.bf16.mxu1 %v19737_v30  ;;  %v19824_v30 = vld [vmem:[%s22820_s8 + $0x504] ss:$8 sps:$4 sm:$0xff]  }
 0xba6   : > { %14418 = vmatpush1.bf16.msra.mxu1 %v19735_v2  ;;  %v19819_v2 = vld [vmem:[%s22820_s8 + $0x4f0] ss:$8 sps:$4 sm:$0xff]  }
 0xba7   : > { %14419 = vmatprep.subr.bf16.mxu1 %v19740_v44  ;;  %v19822_v44 = vld [vmem:[%s22820_s8 + $0x500] ss:$8 sps:$4 sm:$0xff]  }
 0xbaa   : > { %14420 = vmatpush1.bf16.msra.mxu1 %v19738_v43  ;;  %v19827_v43 = vld [vmem:[%s22820_s8 + $0x4e4] ss:$8 sps:$4 sm:$0xff]  }
 0xbab   : > { %14421 = vmatprep.subr.bf16.mxu1 %v19743_v37  ;;  %v19830_v37 = vld [vmem:[%s22820_s8 + $0x5f4] ss:$8 sps:$4 sm:$0xff]  }
 0xbae   : > { %14422 = vmatpush1.bf16.msra.mxu1 %v19741_v59  ;;  %v19825_v59 = vld [vmem:[%s22820_s8 + $0x4e0] ss:$8 sps:$4 sm:$0xff]  }
 0xbaf   : > { %14423 = vmatprep.subr.bf16.mxu1 %v19746_v57  ;;  %v19828_v57 = vld [vmem:[%s22820_s8 + $0x5f0] ss:$8 sps:$4 sm:$0xff]  }
 0xbb2   : > { %14424 = vmatpush1.bf16.msra.mxu1 %v19744_v35  ;;  %v19833_v35 = vld [vmem:[%s22820_s8 + $0x4d4] ss:$8 sps:$4 sm:$0xff]  }
 0xbb3   : > { %14425 = vmatprep.subr.bf16.mxu1 %v19749_v33  ;;  %v19836_v33 = vld [vmem:[%s22820_s8 + $0x5e4] ss:$8 sps:$4 sm:$0xff]  }
 0xbb6   : > { %14426 = vmatpush1.bf16.msra.mxu1 %v19747_v27  ;;  %v19831_v27 = vld [vmem:[%s22820_s8 + $0x4d0] ss:$8 sps:$4 sm:$0xff]  }
 0xbb7   : > { %14427 = vmatprep.subr.bf16.mxu1 %v19752_v16  ;;  %v19834_v16 = vld [vmem:[%s22820_s8 + $0x5e0] ss:$8 sps:$4 sm:$0xff]  }
 0xbba   : > { %14428 = vmatpush2.bf16.msra.mxu1 %v19750_v1  ;;  %v19839_v1 = vld [vmem:[%s22820_s8 + $0x4c4] ss:$8 sps:$4 sm:$0xff]  }
 0xbbb   : > { %14429 = vmatprep.subr.bf16.mxu1 %v19755_v32  ;;  %v19842_v32 = vld [vmem:[%s22820_s8 + $0x5d4] ss:$8 sps:$4 sm:$0xff]  }
 0xbbe   : > { %14430 = vmatpush2.bf16.msra.mxu1 %v19753_v55  ;;  %v19837_v55 = vld [vmem:[%s22820_s8 + $0x4c0] ss:$8 sps:$4 sm:$0xff]  }
 0xbbf   : > { %14431 = vmatprep.subr.bf16.mxu1 %v19758_v8  ;;  %v19840_v8 = vld [vmem:[%s22820_s8 + $0x5d0] ss:$8 sps:$4 sm:$0xff]  }
 0xbc2   : > { %14432 = vmatpush2.bf16.msra.mxu1 %v19756_v12  ;;  %v19845_v12 = vld [vmem:[%s22820_s8 + $0x4b4] ss:$8 sps:$4 sm:$0xff]  }
 0xbc3   : > { %14433 = vmatprep.subr.bf16.mxu1 %v19761_v45  ;;  %v19848_v45 = vld [vmem:[%s22820_s8 + $0x5c4] ss:$8 sps:$4 sm:$0xff]  }
 0xbc6   : > { %14434 = vmatpush2.bf16.msra.mxu1 %v19759_v11  ;;  %v19843_v11 = vld [vmem:[%s22820_s8 + $0x4b0] ss:$8 sps:$4 sm:$0xff]  }
 0xbc7   : > { %14435 = vmatprep.subr.bf16.mxu1 %v19764_v7  ;;  %v19846_v7 = vld [vmem:[%s22820_s8 + $0x5c0] ss:$8 sps:$4 sm:$0xff]  }
 0xbca   : > { %14436 = vmatpush2.bf16.msra.mxu1 %v19762_v38  ;;  %v19851_v38 = vld [vmem:[%s22820_s8 + $0x4a4] ss:$8 sps:$4 sm:$0xff]  }
 0xbcb   : > { %14437 = vmatprep.subr.bf16.mxu1 %v19767_v52  ;;  %v19854_v52 = vld [vmem:[%s22820_s8 + $0x5b4] ss:$8 sps:$4 sm:$0xff]  }
 0xbce   : > { %14438 = vmatpush2.bf16.msra.mxu1 %v19765_v40  ;;  %v19849_v40 = vld [vmem:[%s22820_s8 + $0x4a0] ss:$8 sps:$4 sm:$0xff]  }
 0xbcf   : > { %14439 = vmatprep.subr.bf16.mxu1 %v19770_v53  ;;  %v19852_v53 = vld [vmem:[%s22820_s8 + $0x5b0] ss:$8 sps:$4 sm:$0xff]  }
 0xbd2   : > { %14440 = vmatpush2.bf16.msra.mxu1 %v19768_v14  ;;  %v19857_v14 = vld [vmem:[%s22820_s8 + $0x494] ss:$8 sps:$4 sm:$0xff]  }
 0xbd3   : > { %14441 = vmatprep.subr.bf16.mxu1 %v19773_v46  ;;  %v19855_v46 = vld [vmem:[%s22820_s8 + $0x490] ss:$8 sps:$4 sm:$0xff]  }
 0xbd6   : > { %14442 = vmatpush2.bf16.msra.mxu1 %v19771_v24  ;;  %v19863_v24 = vld [vmem:[%s22820_s8 + $0x484] ss:$8 sps:$4 sm:$0xff]  }
 0xbd7   : > { %14512 = vmatprep.subr.bf16.mxu1 %v21462_v10 }
 0xbd9   : > { %14444 = vmatmul.mubr.bf16.vlgmr.msra.gmra.mxu1 %v13426_v36  ;;  %v21774_v20 = vpop.f32.mrf.mxu0 }
 0xbda   : > { %14513 = vmatpush1.bf16.msra.mxu1 %v21460_v23  ;;  %14530 = vmatprep.mubr.bf16.mxu1 %v22868_v9  ;;  %v19777_v23 = vld [vmem:[%s22820_s8 + $0x460] ss:$8 sps:$4 sm:$0xff]   ;;  %v19779_v9 = vld [vmem:[%s22820_s8 + $0x464] ss:$8 sps:$4 sm:$0xff]  }
 0xbdb   : > { %v21778_v22 = vpop.f32.mrf.mxu0  ;;  %14930 = vmatprep.subr.bf16.mxu0 %v19779_v9  ;;  %14969 = vmatprep.subr.bf16.mxu1 %v19782_v56  ;;  %v19866_v9 = vld [vmem:[%s22820_s8 + $0x594] ss:$8 sps:$4 sm:$0xff]  }
 0xbdc   : > { %14931 = vmatpush1.bf16.msra.mxu0 %v19777_v23 }
 0xbdd   : > { %v14006_v58 = vpop.f32.mrf.mxu0  ;;  %14932 = vmatprep.subr.bf16.mxu0 %v19785_v62 }
 0xbde   : > { %v19861_v58 = vld [vmem:[%s22820_s8 + $0x480] ss:$8 sps:$4 sm:$0xff]  }
 0xbdf   : > { %v14007_v10 = vpop.f32.mrf.mxu0 }
 0xbe0   : > { %14933 = vmatpush1.bf16.msra.mxu0 %v19783_v41  ;;  %v19867_v41 = vld [vmem:[%s22820_s8 + $0x580] ss:$8 sps:$4 sm:$0xff]  }
 0xbe1   : > { %17847 = vmatmul.mubr.msk.bf16.vlgmr.msra.gmra.mxu1 %vm13338_vm2, %v21672_v0  ;;  %14934 = vmatprep.subr.bf16.mxu0 %v19791_v25  ;;  %v19797_v0 = vld [vmem:[%s22820_s8 + $0x434] ss:$8 sps:$4 sm:$0xff]  }
 0xbe2   : > { %14970 = vmatpush1.bf16.msra.mxu1 %v19780_v61  ;;  %v19864_v61 = vld [vmem:[%s22820_s8 + $0x590] ss:$8 sps:$4 sm:$0xff]  }
 0xbe3   : > { %14971 = vmatprep.subr.bf16.mxu1 %v19788_v19  ;;  %v19869_v19 = vld [vmem:[%s22820_s8 + $0x584] ss:$8 sps:$4 sm:$0xff]  }
 0xbe4   : > { %14935 = vmatpush1.bf16.msra.mxu0 %v19789_v17 }
 0xbe5   : > { %14936 = vmatprep.subr.bf16.mxu0 %v19797_v0  ;;  %v15060_v0 = vld [vmem:[%s22822_s10 + $0xf8] sm:$0xff] }
 0xbe6   : > { %14972 = vmatpush1.bf16.msra.mxu1 %v19786_v50 }
 0xbe7   : > { %14973 = vmatprep.subr.bf16.mxu1 %v19794_v26 }
 0xbe8   : > { %14937 = vmatpush1.bf16.msra.mxu0 %v19795_v49  ;;  %v15059_v49 = vld [vmem:[%s22822_s10 + $0xf0] sm:$0xff] }
 0xbe9   : > { %14938 = vmatprep.subr.bf16.mxu0 %v19803_v28  ;;  %v15043_v28 = vld [vmem:[%s22822_s10 + $0x70] sm:$0xff] }
 0xbea   : > { %14974 = vmatpush1.bf16.msra.mxu1 %v19792_v54 }
 0xbeb   : > { %14975 = vmatprep.subr.bf16.mxu1 %v19800_v34  ;;  %v15044_v34 = vld [vmem:[%s22822_s10 + $0x78] sm:$0xff] }
 0xbec   : > { %14939 = vmatpush1.bf16.msra.mxu0 %v19801_v6  ;;  %v15042_v6 = vld [vmem:[%s22822_s10 + $0x68] sm:$0xff] }
 0xbed   : > { %14940 = vmatprep.subr.bf16.mxu0 %v19809_v29  ;;  %v15041_v29 = vld [vmem:[%s22822_s10 + $0x60] sm:$0xff] }
 0xbee   : > { %14976 = vmatpush1.bf16.msra.mxu1 %v19798_v42  ;;  %v15163_v42 = vld [vmem:[%s22822_s10 + $0x1f8] sm:$0xff] }
 0xbef   : > { %14977 = vmatprep.subr.bf16.mxu1 %v19806_v60  ;;  %v15058_v60 = vld [vmem:[%s22822_s10 + $0xe8] sm:$0xff] }
 0xbf0   : > { %14941 = vmatpush1.bf16.msra.mxu0 %v19807_v48  ;;  %v15040_v48 = vld [vmem:[%s22822_s10 + $0x58] sm:$0xff] }
 0xbf1   : > { %14942 = vmatprep.subr.bf16.mxu0 %v19815_v21  ;;  %v15039_v21 = vld [vmem:[%s22822_s10 + $0x50] sm:$0xff] }
 0xbf2   : > { %14978 = vmatpush1.bf16.msra.mxu1 %v19804_v47  ;;  %v15057_v47 = vld [vmem:[%s22822_s10 + $0xe0] sm:$0xff] }
 0xbf3   : > { %14979 = vmatprep.subr.bf16.mxu1 %v19812_v3  ;;  %v15056_v3 = vld [vmem:[%s22822_s10 + $0xd8] sm:$0xff] }
 0xbf4   : > { %14943 = vmatpush1.bf16.msra.mxu0 %v19813_v63  ;;  %v15038_v63 = vld [vmem:[%s22822_s10 + $0x48] sm:$0xff] }
 0xbf5   : > { %14944 = vmatprep.subr.bf16.mxu0 %v19821_v18  ;;  %v15037_v18 = vld [vmem:[%s22822_s10 + $0x40] sm:$0xff] }
 0xbf6   : > { %14980 = vmatpush1.bf16.msra.mxu1 %v19810_v51  ;;  %v15055_v51 = vld [vmem:[%s22822_s10 + $0xd0] sm:$0xff] }
 0xbf7   : > { %14981 = vmatprep.subr.bf16.mxu1 %v19818_v39  ;;  %v15054_v39 = vld [vmem:[%s22822_s10 + $0xc8] sm:$0xff] }
 0xbf8   : > { %14945 = vmatpush2.bf16.msra.mxu0 %v19819_v2 }
 0xbf9   : > { %14946 = vmatprep.subr.bf16.mxu0 %v19827_v43 }
 0xbfa   : > { %14982 = vmatpush1.bf16.msra.mxu1 %v19816_v13  ;;  %v15053_v13 = vld [vmem:[%s22822_s10 + $0xc0] sm:$0xff] }
 0xbfb   : > { %14983 = vmatprep.subr.bf16.mxu1 %v19824_v30  ;;  %v15052_v30 = vld [vmem:[%s22822_s10 + $0xb8] sm:$0xff] }
 0xbfc   : > { %14947 = vmatpush2.bf16.msra.mxu0 %v19825_v59  ;;  %v15036_v59 = vld [vmem:[%s22822_s10 + $0x38] sm:$0xff] }
 0xbfd   : > { %14948 = vmatprep.subr.bf16.mxu0 %v19833_v35  ;;  %v15035_v35 = vld [vmem:[%s22822_s10 + $0x30] sm:$0xff] }
 0xbfe   : > { %14984 = vmatpush1.bf16.msra.mxu1 %v19822_v44 }
 0xbff   : > { %14985 = vmatprep.subr.bf16.mxu1 %v19830_v37 }
 0xc00   : > { %14949 = vmatpush2.bf16.msra.mxu0 %v19831_v27 }
 0xc01   : > { %14950 = vmatprep.subr.bf16.mxu0 %v19839_v1 }
 0xc02   : > { %14986 = vmatpush2.bf16.msra.mxu1 %v19828_v57  ;;  %v15051_v57 = vld [vmem:[%s22822_s10 + $0xb0] sm:$0xff] }
 0xc03   : > { %14987 = vmatprep.subr.bf16.mxu1 %v19836_v33  ;;  %v15050_v33 = vld [vmem:[%s22822_s10 + $0xa8] sm:$0xff] }
 0xc04   : > { %14951 = vmatpush2.bf16.msra.mxu0 %v19837_v55 }
 0xc05   : > { %14952 = vmatprep.subr.bf16.mxu0 %v19845_v12 }
 0xc06   : > { %14988 = vmatpush2.bf16.msra.mxu1 %v19834_v16 }
 0xc07   : > { %14989 = vmatprep.subr.bf16.mxu1 %v19842_v32 }
 0xc08   : > { %14953 = vmatpush2.bf16.msra.mxu0 %v19843_v11 }
 0xc09   : > { %14954 = vmatprep.subr.bf16.mxu0 %v19851_v38 }
 0xc0a   : > { %14990 = vmatpush2.bf16.msra.mxu1 %v19840_v8 }
 0xc0b   : > { %14991 = vmatprep.subr.bf16.mxu1 %v19848_v45 }
 0xc0c   : > { %14955 = vmatpush2.bf16.msra.mxu0 %v19849_v40 }
 0xc0d   : > { %14956 = vmatprep.subr.bf16.mxu0 %v19857_v14 }
 0xc0e   : > { %14992 = vmatpush2.bf16.msra.mxu1 %v19846_v7 }
 0xc0f   : > { %14993 = vmatprep.subr.bf16.mxu1 %v19854_v52 }
 0xc10   : > { %14957 = vmatpush2.bf16.msra.mxu0 %v19855_v46 }
 0xc11   : > { %14958 = vmatprep.subr.bf16.mxu0 %v19863_v24  ;;  %v15146_v24 = vld [vmem:[%s22822_s10 + $0x170] sm:$0xff] }
 0xc12   : > { %14994 = vmatpush2.bf16.msra.mxu1 %v19852_v53 }
 0xc13   : > { %14995 = vmatprep.subr.bf16.mxu1 %v19860_v31  ;;  %v15145_v31 = vld [vmem:[%s22822_s10 + $0x168] sm:$0xff] }
 0xc14   : > { %14959 = vmatpush2.bf16.msra.mxu0 %v19861_v58  ;;  %v15160_v58 = vld [vmem:[%s22822_s10 + $0x1e0] sm:$0xff] }
 0xc15   : > { %17980 = vmatprep.subr.mxu0 %v15060_v0 }
 0xc16   : > { %14996 = vmatpush2.bf16.msra.mxu1 %v19858_v4  ;;  %v15144_v4 = vld [vmem:[%s22822_s10 + $0x160] sm:$0xff] }
 0xc17   : > { %14997 = vmatprep.subr.bf16.mxu1 %v19866_v9  ;;  %v15158_v9 = vld [vmem:[%s22822_s10 + $0x1d0] sm:$0xff] }
 0xc19   : > { %v21953_v36 = vpop.f32.mrf.mxu0 }
 0xc1a   : > { %14998 = vmatpush2.bf16.msra.mxu1 %v19864_v61  ;;  %v15142_v61 = vld [vmem:[%s22822_s10 + $0x150] sm:$0xff] }
 0xc1b   : > { %v21964_v10 = vpop.f32.mrf.mxu0  ;;  %14999 = vmatprep.subr.bf16.mxu1 %v19869_v19  ;;  %v15156_v19 = vld [vmem:[%s22822_s10 + $0x1c0] sm:$0xff] }
 0xc1d   : > { %v14408_v23 = vpop.f32.mrf.mxu0 }
 0xc1e   : > { %15000 = vmatpush2.bf16.msra.mxu1 %v19867_v41  ;;  %v15143_v23 = vld [vmem:[%s22822_s10 + $0x158] sm:$0xff]  ;;  %v15140_v41 = vld [vmem:[%s22822_s10 + $0x140] sm:$0xff] }
 0xc1f   : > { %v14409_v56 = vpop.f32.mrf.mxu0  ;;  %18015 = vmatprep.subr.mxu1 %v15163_v42  ;;  %v15033_v42 = vld [vmem:[%s22822_s10 + $0x20] sm:$0xff] }
 0xc20   : > { %v15157_v56 = vld [vmem:[%s22822_s10 + $0x1c8] sm:$0xff] }
 0xc21   : > { %v14491_v62 = vpop.f32.mrf.mxu0 }
 0xc22   : > { %v14539_v50 = vpack.c.bf16 %v14491_v62, %v14491_v62  ;;  %v15141_v62 = vld [vmem:[%s22822_s10 + $0x148] sm:$0xff] }
 0xc23   : > { %v14493_v25 = vpop.f32.mrf.mxu0 }
 0xc24   : > { %v14540_v26 = vpack.c.bf16 %v14493_v25, %v14493_v25  ;;  %v15139_v25 = vld [vmem:[%s22822_s10 + $0x138] sm:$0xff] }
 0xc25   : > { %v14495_v17 = vpop.f32.mrf.mxu0 }
 0xc26   : > { %14960 = vmatprep.mubr.bf16.mxu0 %v14540_v26  ;;  %v15154_v26 = vld [vmem:[%s22822_s10 + $0x1b0] sm:$0xff]  ;;  %v15034_v17 = vld [vmem:[%s22822_s10 + $0x28] sm:$0xff] }
 0xc27   : > { %14961 = vmatmul.mubr.bf16.vlgmr.msra.gmra.mxu0 %v14539_v50  ;;  %v14496_v54 = vpop.f32.mrf.mxu0  ;;  %v15155_v50 = vld [vmem:[%s22822_s10 + $0x1b8] sm:$0xff] }
 0xc28   : > { %17981 = vmatpush3.msra.mxu0 %v15044_v34  ;;  %v15138_v54 = vld [vmem:[%s22822_s10 + $0x130] sm:$0xff]  ;;  %v15049_v34 = vld [vmem:[%s22822_s10 + $0xa0] sm:$0xff] }
 0xc29   : > { %17982 = vmatprep.subr.mxu0 %v15059_v49  ;;  %v15153_v49 = vld [vmem:[%s22822_s10 + $0x1a8] sm:$0xff] }
 0xc2a   : > { %17983 = vmatpush3.msra.mxu0 %v15043_v28  ;;  %v15137_v28 = vld [vmem:[%s22822_s10 + $0x128] sm:$0xff] }
 0xc2b   : > { %17984 = vmatprep.subr.mxu0 %v15058_v60 }
 0xc2c   : > { %17985 = vmatpush3.msra.mxu0 %v15042_v6  ;;  %v15048_v6 = vld [vmem:[%s22822_s10 + $0x98] sm:$0xff] }
 0xc2d   : > { %17986 = vmatprep.subr.mxu0 %v15057_v47  ;;  %v15152_v47 = vld [vmem:[%s22822_s10 + $0x1a0] sm:$0xff] }
 0xc2e   : > { %17987 = vmatpush3.msra.mxu0 %v15041_v29  ;;  %v15032_v29 = vld [vmem:[%s22822_s10 + $0x18] sm:$0xff] }
 0xc2f   : > { %17988 = vmatprep.subr.mxu0 %v15056_v3  ;;  %v15136_v3 = vld [vmem:[%s22822_s10 + $0x120] sm:$0xff] }
 0xc30   : > { %17989 = vmatpush3.msra.mxu0 %v15040_v48 }
 0xc31   : > { %17990 = vmatprep.subr.mxu0 %v15055_v51  ;;  %v15047_v51 = vld [vmem:[%s22822_s10 + $0x90] sm:$0xff] }
 0xc32   : > { %17991 = vmatpush3.msra.mxu0 %v15039_v21  ;;  %v15151_v21 = vld [vmem:[%s22822_s10 + $0x198] sm:$0xff] }
 0xc33   : > { %17992 = vmatprep.subr.mxu0 %v15054_v39  ;;  %v15031_v39 = vld [vmem:[%s22822_s10 + $0x10] sm:$0xff] }
 0xc34   : > { %17993 = vmatpush3.msra.mxu0 %v15038_v63  ;;  %v15135_v63 = vld [vmem:[%s22822_s10 + $0x118] sm:$0xff] }
 0xc35   : > { %17994 = vmatprep.subr.mxu0 %v15053_v13 }
 0xc36   : > { %17995 = vmatpush3.msra.mxu0 %v15037_v18  ;;  %v15046_v18 = vld [vmem:[%s22822_s10 + $0x88] sm:$0xff] }
 0xc37   : > { %17996 = vmatprep.subr.mxu0 %v15052_v30  ;;  %v15150_v30 = vld [vmem:[%s22822_s10 + $0x190] sm:$0xff] }
 0xc38   : > { %17997 = vmatpush3.msra.mxu0 %v15036_v59  ;;  %v15029_v59 = vld [vmem:[%s22822_s10] sm:$0xff] }
 0xc39   : > { %17998 = vmatprep.subr.mxu0 %v15051_v57  ;;  %v15133_v57 = vld [vmem:[%s22822_s10 + $0x108] sm:$0xff] }
 0xc3a   : > { %17999 = vmatpush3.msra.mxu0 %v15035_v35  ;;  %v15148_v35 = vld [vmem:[%s22822_s10 + $0x180] sm:$0xff] }
 0xc3b   : > { %18000 = vmatprep.subr.mxu0 %v15050_v33  ;;  %v15272_v33 = vld [vmem:[%s22822_s10 + $0x2f8] sm:$0xff] }
 0xc3c   : > { %18001 = vmatpush3.msra.mxu0 %v15034_v17  ;;  %v15360_v17 = vld [vmem:[%s22822_s10 + $0x360] sm:$0xff] }
 0xc3d   : > { %18002 = vmatprep.subr.mxu0 %v15049_v34  ;;  %v15251_v34 = vld [vmem:[%s22822_s10 + $0x250] sm:$0xff] }
 0xc3e   : > { %18003 = vmatpush3.msra.mxu0 %v15033_v42  ;;  %v15266_v42 = vld [vmem:[%s22822_s10 + $0x2c8] sm:$0xff] }
 0xc3f   : > { %18004 = vmatprep.subr.mxu0 %v15048_v6  ;;  %v15358_v6 = vld [vmem:[%s22822_s10 + $0x350] sm:$0xff] }
 0xc40   : > { %18005 = vmatpush3.msra.mxu0 %v15032_v29  ;;  %v15373_v29 = vld [vmem:[%s22822_s10 + $0x3c8] sm:$0xff] }
 0xc41   : > { %18006 = vmatprep.subr.mxu0 %v15047_v51  ;;  %v15264_v51 = vld [vmem:[%s22822_s10 + $0x2b8] sm:$0xff] }
 0xc42   : > { %18007 = vmatpush3.msra.mxu0 %v15031_v39  ;;  %v15248_v39 = vld [vmem:[%s22822_s10 + $0x238] sm:$0xff] }
 0xc43   : > { %18008 = vmatprep.subr.mxu0 %v15046_v18  ;;  %v15371_v18 = vld [vmem:[%s22822_s10 + $0x3b8] sm:$0xff] }
 0xc59   : > { %v14043_v2 = vpop.f32.mrf.mxu1 }
 0xc5a   : > { %v14044_v27 = vadd.f32 %v14043_v2, %v21774_v20  ;;  %v15147_v20 = vld [vmem:[%s22822_s10 + $0x178] sm:$0xff]  ;;  %v15030_v2 = vld [vmem:[%s22822_s10 + $0x8] sm:$0xff] }
 0xc5b   : > { %v14045_v44 = vpop.f32.mrf.mxu1  ;;  %18009 = vmatpush3.msra.mxu0 %v15030_v2  ;;  %v15355_v2 = vld [vmem:[%s22822_s10 + $0x338] sm:$0xff] }
 0xc5c   : > { %v14046_v16 = vadd.f32 %v14045_v44, %v21778_v22  ;;  %v14405_v1 = vadd.f32 %v21953_v36, %v14044_v27  ;;  %v15162_v22 = vld [vmem:[%s22822_s10 + $0x1f0] sm:$0xff]  ;;  %v15161_v36 = vld [vmem:[%s22822_s10 + $0x1e8] sm:$0xff]  ;;  %v15132_v27 = vld [vmem:[%s22822_s10 + $0x100] sm:$0xff] }
 0xc5d   : > { %v14047_v43 = vpop.f32.mrf.mxu1  ;;  %v15134_v44 = vld [vmem:[%s22822_s10 + $0x110] sm:$0xff] }
 0xc5e   : > { %v14407_v8 = vadd.f32 %v21964_v10, %v14046_v16  ;;  %v15159_v10 = vld [vmem:[%s22822_s10 + $0x1d8] sm:$0xff]  ;;  %v15045_v43 = vld [vmem:[%s22822_s10 + $0x80] sm:$0xff] }
 0xc5f   : > { %v14048_v37 = vpop.f32.mrf.mxu1  ;;  %18010 = vmatprep.subr.mxu0 %v15045_v43  ;;  %v15379_v16 = vld [vmem:[%s22822_s10 + $0x3f8] sm:$0xff]  ;;  %v15370_v43 = vld [vmem:[%s22822_s10 + $0x3b0] sm:$0xff] }
 0xc60   : > { %v15149_v37 = vld [vmem:[%s22822_s10 + $0x188] sm:$0xff]  ;;  %18011 = vmatpush3.msra.mxu0 %v15029_v59  ;;  %v15354_v59 = vld [vmem:[%s22822_s10 + $0x330] sm:$0xff] }
 0xc61   : > { %18050 = vmatprep.subr.mxu0 %v15272_v33  ;;  %v15245_v33 = vld [vmem:[%s22822_s10 + $0x220] sm:$0xff] }
 0xc99   : > { %v14445_v32 = vpop.f32.mrf.mxu1 }
 0xc9a   : > { %v22047_v55 = vadd.f32 %v14445_v32, %v14405_v1  ;;  %v15012_v1 = vld [vmem:[#allocation14] sm:$0x3] }
 0xc9b   : > { %v14447_v12 = vpop.f32.mrf.mxu1 }
 0xc9c   : > { %v22050_v45 = vadd.f32 %v14447_v12, %v14407_v8  ;;  %v15017_v12 = vrot.slane %v15012_v1, %v20879_v5  ;;  %v15256_v5 = vld [vmem:[%s22822_s10 + $0x278] sm:$0xff] }
 0xc9d   : > { %v14449_v11 = vpop.f32.mrf.mxu1 }
 0xc9f   : > { %v14450_v7 = vpop.f32.mrf.mxu1 }
 0xca1   : > { %v14532_v38 = vpop.f32.mrf.mxu1 }
 0xca2   : > { %v14541_v53 = vpack.c.bf16 %v14532_v38, %v14532_v38 }
 0xca3   : > { %v14534_v52 = vpop.f32.mrf.mxu1 }
 0xca4   : > { %v14542_v40 = vpack.c.bf16 %v14534_v52, %v14534_v52  ;;  %v15021_v52 = vrot.slane %v15012_v1, %v20899_v15  ;;  %v15271_v15 = vld [vmem:[%s22822_s10 + $0x2f0] sm:$0xff]  ;;  %v15368_v1 = vld [vmem:[%s22822_s10 + $0x3a0] sm:$0xff] }
 0xca5   : > { %v14536_v14 = vpop.f32.mrf.mxu1 }
 0xca6   : > { %15001 = vmatprep.mubr.bf16.mxu1 %v14542_v40 }
 0xca7   : > { %v14537_v46 = vpop.f32.mrf.mxu1  ;;  %15002 = vmatmul.mubr.bf16.vlgmr.msra.gmra.mxu1 %v14541_v53 }
 0xca8   : > { %18016 = vmatpush3.msra.mxu1 %v15147_v20 }
 0xca9   : > { %18017 = vmatprep.subr.mxu1 %v15162_v22 }
 0xcaa   : > { %18018 = vmatpush3.msra.mxu1 %v15146_v24 }
 0xcab   : > { %18019 = vmatprep.subr.mxu1 %v15161_v36  ;;  %v15255_v36 = vld [vmem:[%s22822_s10 + $0x270] sm:$0xff] }
 0xcac   : > { %18020 = vmatpush3.msra.mxu1 %v15145_v31 }
 0xcad   : > { %18021 = vmatprep.subr.mxu1 %v15160_v58  ;;  %v15363_v58 = vld [vmem:[%s22822_s10 + $0x378] sm:$0xff] }
 0xcae   : > { %18022 = vmatpush3.msra.mxu1 %v15144_v4  ;;  %v15270_v4 = vld [vmem:[%s22822_s10 + $0x2e8] sm:$0xff] }
 0xcaf   : > { %18023 = vmatprep.subr.mxu1 %v15159_v10  ;;  %v15378_v10 = vld [vmem:[%s22822_s10 + $0x3f0] sm:$0xff] }
 0xcb0   : > { %18024 = vmatpush3.msra.mxu1 %v15143_v23 }
 0xcb1   : > { %18025 = vmatprep.subr.mxu1 %v15158_v9  ;;  %v15254_v9 = vld [vmem:[%s22822_s10 + $0x268] sm:$0xff] }
 0xcb2   : > { %18026 = vmatpush3.msra.mxu1 %v15142_v61  ;;  %v15362_v61 = vld [vmem:[%s22822_s10 + $0x370] sm:$0xff] }
 0xcb3   : > { %18027 = vmatprep.subr.mxu1 %v15157_v56  ;;  %v15269_v56 = vld [vmem:[%s22822_s10 + $0x2e0] sm:$0xff] }
 0xcb4   : > { %18028 = vmatpush3.msra.mxu1 %v15141_v62  ;;  %v15377_v62 = vld [vmem:[%s22822_s10 + $0x3e8] sm:$0xff] }
 0xcb5   : > { %18029 = vmatprep.subr.mxu1 %v15156_v19  ;;  %v15253_v19 = vld [vmem:[%s22822_s10 + $0x260] sm:$0xff] }
 0xcb6   : > { %18030 = vmatpush3.msra.mxu1 %v15140_v41  ;;  %v15361_v41 = vld [vmem:[%s22822_s10 + $0x368] sm:$0xff] }
 0xcb7   : > { %18031 = vmatprep.subr.mxu1 %v15155_v50  ;;  %v15268_v50 = vld [vmem:[%s22822_s10 + $0x2d8] sm:$0xff] }
 0xcb8   : > { %18032 = vmatpush3.msra.mxu1 %v15139_v25  ;;  %v15376_v25 = vld [vmem:[%s22822_s10 + $0x3e0] sm:$0xff] }
 0xcb9   : > { %18033 = vmatprep.subr.mxu1 %v15154_v26  ;;  %v15252_v26 = vld [vmem:[%s22822_s10 + $0x258] sm:$0xff] }
 0xcba   : > { %18034 = vmatpush3.msra.mxu1 %v15138_v54  ;;  %v15267_v54 = vld [vmem:[%s22822_s10 + $0x2d0] sm:$0xff] }
 0xcbb   : > { %18035 = vmatprep.subr.mxu1 %v15153_v49  ;;  %v15359_v49 = vld [vmem:[%s22822_s10 + $0x358] sm:$0xff] }
 0xcbc   : > { %18036 = vmatpush3.msra.mxu1 %v15137_v28  ;;  %v15374_v28 = vld [vmem:[%s22822_s10 + $0x3d0] sm:$0xff] }
 0xcbd   : > { %18037 = vmatprep.subr.mxu1 %v15152_v47  ;;  %v15265_v47 = vld [vmem:[%s22822_s10 + $0x2c0] sm:$0xff] }
 0xcbe   : > { %18038 = vmatpush3.msra.mxu1 %v15136_v3  ;;  %v15249_v3 = vld [vmem:[%s22822_s10 + $0x240] sm:$0xff] }
 0xcbf   : > { %18039 = vmatprep.subr.mxu1 %v15151_v21  ;;  %v15372_v21 = vld [vmem:[%s22822_s10 + $0x3c0] sm:$0xff] }
 0xcc0   : > { %18040 = vmatpush3.msra.mxu1 %v15135_v63  ;;  %v15356_v63 = vld [vmem:[%s22822_s10 + $0x340] sm:$0xff] }
 0xcc1   : > { %18041 = vmatprep.subr.mxu1 %v15150_v30  ;;  %v15247_v30 = vld [vmem:[%s22822_s10 + $0x230] sm:$0xff] }
 0xcc2   : > { %18042 = vmatpush3.msra.mxu1 %v15134_v44  ;;  %v15262_v44 = vld [vmem:[%s22822_s10 + $0x2a8] sm:$0xff] }
 0xcc3   : > { %18043 = vmatprep.subr.mxu1 %v15149_v37  ;;  %v15246_v37 = vld [vmem:[%s22822_s10 + $0x228] sm:$0xff] }
 0xcc4   : > { %18044 = vmatpush3.msra.mxu1 %v15133_v57  ;;  %v15261_v57 = vld [vmem:[%s22822_s10 + $0x2a0] sm:$0xff] }
 0xcc5   : > { %18045 = vmatprep.subr.mxu1 %v15148_v35  ;;  %v15369_v35 = vld [vmem:[%s22822_s10 + $0x3a8] sm:$0xff] }
 0xcc6   : > { %18046 = vmatpush3.msra.mxu1 %v15132_v27  ;;  %v15353_v27 = vld [vmem:[%s22822_s10 + $0x328] sm:$0xff] }
 0xcc7   : > { %18085 = vmatprep.subr.mxu1 %v15379_v16  ;;  %v15260_v16 = vld [vmem:[%s22822_s10 + $0x298] sm:$0xff] }
 0xce7   : > { %v14962_v0 = vpop.f32.mrf.mxu0 }
 0xce9   : > { %v14964_v60 = vpop.f32.mrf.mxu0 }
 0xceb   : > { %v14966_v48 = vpop.f32.mrf.mxu0 }
 0xcec   : > { %v15357_v48 = vld [vmem:[%s22822_s10 + $0x348] sm:$0xff] }
 0xced   : > { %v14967_v13 = vpop.f32.mrf.mxu0 }
 0xcee   : > { %v15263_v13 = vld [vmem:[%s22822_s10 + $0x2b0] sm:$0xff] }
 0xd67   : > { %v15003_v32 = vpop.f32.mrf.mxu1 }
 0xd68   : > { %v15004_v8 = vadd.f32 %v15003_v32, %v14962_v0  ;;  %v15375_v0 = vld [vmem:[%s22822_s10 + $0x3d8] sm:$0xff] }
 0xd69   : > { %v15005_v11 = vpop.f32.mrf.mxu1  ;;  %v15244_v32 = vld [vmem:[%s22822_s10 + $0x218] sm:$0xff] }
 0xd6a   : > { %v15010_v7 = vadd.f32 %v15004_v8, %v22047_v55  ;;  %v15006_v38 = vadd.f32 %v15005_v11, %v14964_v60  ;;  %v15250_v60 = vld [vmem:[%s22822_s10 + $0x248] sm:$0xff]  ;;  %v15352_v8 = vld [vmem:[%s22822_s10 + $0x320] sm:$0xff]  ;;  %v15367_v11 = vld [vmem:[%s22822_s10 + $0x398] sm:$0xff] }
 0xd6b   : > { %v15007_v40 = vpop.f32.mrf.mxu1 }
 0xd6c   : > { %v15024_v53 = vadd.f32 %v15017_v12, %v15010_v7  ;;  %v15011_v14 = vadd.f32 %v15006_v38, %v22050_v45  ;;  %v15259_v12 = vld [vmem:[%s22822_s10 + $0x290] sm:$0xff]  ;;  %v15351_v38 = vld [vmem:[%s22822_s10 + $0x318] sm:$0xff] }
 0xd6d   : > { %v15008_v20 = vpop.f32.mrf.mxu1  ;;  %v15243_v7 = vld [vmem:[%s22822_s10 + $0x210] sm:$0xff] }
 0xd6e   : > { %v15025_v22 = vadd.f32 %v15021_v52, %v15011_v14  ;;  %v22188_v46 = vmax.f32 %v15024_v53, 0.0  ;;  %v15258_v52 = vld [vmem:[%s22822_s10 + $0x288] sm:$0xff]  ;;  %v15366_v40 = vld [vmem:[%s22822_s10 + $0x390] sm:$0xff]  ;;  %v15257_v20 = vld [vmem:[%s22822_s10 + $0x280] sm:$0xff] }
 0xd6f   : > { %v15242_v53 = vld [vmem:[%s22822_s10 + $0x208] sm:$0xff]  ;;  %v15350_v14 = vld [vmem:[%s22822_s10 + $0x310] sm:$0xff] }
 0xd70   : > { %v22190_v24 = vmax.f32 %v15025_v22, 0.0  ;;  %v15166_v31 = vrot.slane %v22188_v46, 1  ;;  %v15365_v22 = vld [vmem:[%s22822_s10 + $0x388] sm:$0xff] }
 0xd72   : > { %15125 = vmatprep.mubr.f32.mxu0 %v22190_v24  ;;  %v15167_v55 = vrot.slane %v22190_v24, 1  ;;  %v15274_v45 = vrot.slane %v22190_v24, 2  ;;  %v15381_v23 = vrot.slane %v22190_v24, 3 }
 0xd73   : > { %15126 = vmatmul.mubr.f32.vlgmr.msra.gmra.mxu0 %v22188_v46 }
 0xd74   : > { %18051 = vmatpush3.msra.mxu0 %v15256_v5  ;;  %15234 = vmatprep.mubr.f32.mxu1 %v15167_v55  ;;  %v15241_v5 = vld [vmem:[%s22822_s10 + $0x200] sm:$0xff]  ;;  %v15349_v55 = vld [vmem:[%s22822_s10 + $0x308] sm:$0xff] }
 0xd75   : > { %18052 = vmatprep.subr.mxu0 %v15271_v15  ;;  %15341 = vmatprep.mubr.f32.mxu0 %v15274_v45  ;;  %v15364_v15 = vld [vmem:[%s22822_s10 + $0x380] sm:$0xff]  ;;  %v15273_v45 = vrot.slane %v22188_v46, 2 }
 0xd76   : > { %15235 = vmatmul.mubr.f32.vlgmr.msra.gmra.mxu1 %v15166_v31  ;;  %18053 = vmatpush3.msra.mxu0 %v15255_v36  ;;  %v15486_v36 = vld [vmem:[%s22822_s10 + $0x4f8] sm:$0xff]  ;;  %v15348_v31 = vld [vmem:[%s22822_s10 + $0x300] sm:$0xff] }
 0xd77   : > { %18086 = vmatpush3.msra.mxu1 %v15363_v58  ;;  %18054 = vmatprep.subr.mxu0 %v15270_v4  ;;  %v15470_v58 = vld [vmem:[%s22822_s10 + $0x478] sm:$0xff]  ;;  %v15488_v4 = vrot.slane %v22190_v24, 4 }
 0xd78   : > { %18087 = vmatprep.subr.mxu1 %v15378_v10  ;;  %15448 = vmatprep.mubr.f32.mxu1 %v15381_v23  ;;  %v15485_v10 = vld [vmem:[%s22822_s10 + $0x4f0] sm:$0xff]  ;;  %v15380_v23 = vrot.slane %v22188_v46, 3 }
 0xd79   : > { %18055 = vmatpush3.msra.mxu0 %v15254_v9  ;;  %18088 = vmatpush3.msra.mxu1 %v15362_v61  ;;  %v15593_v9 = vld [vmem:[%s22822_s10 + $0x5f8] sm:$0xff]  ;;  %v15469_v61 = vld [vmem:[%s22822_s10 + $0x470] sm:$0xff] }
 0xd7a   : > { %18056 = vmatprep.subr.mxu0 %v15269_v56  ;;  %18089 = vmatprep.subr.mxu1 %v15377_v62  ;;  %v15577_v56 = vld [vmem:[%s22822_s10 + $0x578] sm:$0xff]  ;;  %v15595_v62 = vrot.slane %v22190_v24, 5 }
 0xd7b   : > { %18057 = vmatpush3.msra.mxu0 %v15253_v19  ;;  %18090 = vmatpush3.msra.mxu1 %v15361_v41  ;;  %v15484_v19 = vld [vmem:[%s22822_s10 + $0x4e8] sm:$0xff]  ;;  %v15592_v41 = vld [vmem:[%s22822_s10 + $0x5f0] sm:$0xff] }
 0xd7c   : > { %18058 = vmatprep.subr.mxu0 %v15268_v50  ;;  %18091 = vmatprep.subr.mxu1 %v15376_v25  ;;  %v15468_v50 = vld [vmem:[%s22822_s10 + $0x468] sm:$0xff]  ;;  %v15576_v25 = vld [vmem:[%s22822_s10 + $0x570] sm:$0xff] }
 0xd7d   : > { %18059 = vmatpush3.msra.mxu0 %v15252_v26  ;;  %18092 = vmatpush3.msra.mxu1 %v15360_v17  ;;  %v15483_v26 = vld [vmem:[%s22822_s10 + $0x4e0] sm:$0xff]  ;;  %v15591_v17 = vld [vmem:[%s22822_s10 + $0x5e8] sm:$0xff] }
 0xd7e   : > { %18060 = vmatprep.subr.mxu0 %v15267_v54  ;;  %18093 = vmatprep.subr.mxu1 %v15375_v0  ;;  %v15467_v54 = vld [vmem:[%s22822_s10 + $0x460] sm:$0xff]  ;;  %v15575_v0 = vld [vmem:[%s22822_s10 + $0x568] sm:$0xff] }
 0xd7f   : > { %18061 = vmatpush3.msra.mxu0 %v15251_v34  ;;  %18094 = vmatpush3.msra.mxu1 %v15359_v49  ;;  %v15482_v34 = vld [vmem:[%s22822_s10 + $0x4d8] sm:$0xff]  ;;  %v15590_v49 = vld [vmem:[%s22822_s10 + $0x5e0] sm:$0xff] }
 0xd80   : > { %18062 = vmatprep.subr.mxu0 %v15266_v42  ;;  %18095 = vmatprep.subr.mxu1 %v15374_v28  ;;  %v15466_v42 = vld [vmem:[%s22822_s10 + $0x458] sm:$0xff]  ;;  %v15574_v28 = vld [vmem:[%s22822_s10 + $0x560] sm:$0xff] }
 0xd81   : > { %18063 = vmatpush3.msra.mxu0 %v15250_v60  ;;  %18096 = vmatpush3.msra.mxu1 %v15358_v6  ;;  %v15481_v60 = vld [vmem:[%s22822_s10 + $0x4d0] sm:$0xff]  ;;  %v15589_v6 = vld [vmem:[%s22822_s10 + $0x5d8] sm:$0xff] }
 0xd82   : > { %18064 = vmatprep.subr.mxu0 %v15265_v47  ;;  %18097 = vmatprep.subr.mxu1 %v15373_v29  ;;  %v15465_v47 = vld [vmem:[%s22822_s10 + $0x450] sm:$0xff]  ;;  %v15573_v29 = vld [vmem:[%s22822_s10 + $0x558] sm:$0xff] }
 0xd83   : > { %18065 = vmatpush3.msra.mxu0 %v15249_v3  ;;  %18098 = vmatpush3.msra.mxu1 %v15357_v48  ;;  %v15480_v3 = vld [vmem:[%s22822_s10 + $0x4c8] sm:$0xff]  ;;  %v15588_v48 = vld [vmem:[%s22822_s10 + $0x5d0] sm:$0xff] }
 0xd84   : > { %18066 = vmatprep.subr.mxu0 %v15264_v51  ;;  %18099 = vmatprep.subr.mxu1 %v15372_v21  ;;  %v15464_v51 = vld [vmem:[%s22822_s10 + $0x448] sm:$0xff]  ;;  %v15572_v21 = vld [vmem:[%s22822_s10 + $0x550] sm:$0xff] }
 0xd85   : > { %18067 = vmatpush3.msra.mxu0 %v15248_v39  ;;  %18100 = vmatpush3.msra.mxu1 %v15356_v63  ;;  %v15479_v39 = vld [vmem:[%s22822_s10 + $0x4c0] sm:$0xff]  ;;  %v15587_v63 = vld [vmem:[%s22822_s10 + $0x5c8] sm:$0xff] }
 0xd86   : > { %18068 = vmatprep.subr.mxu0 %v15263_v13  ;;  %18101 = vmatprep.subr.mxu1 %v15371_v18  ;;  %v15463_v13 = vld [vmem:[%s22822_s10 + $0x440] sm:$0xff]  ;;  %v15571_v18 = vld [vmem:[%s22822_s10 + $0x548] sm:$0xff] }
 0xd87   : > { %18069 = vmatpush3.msra.mxu0 %v15247_v30  ;;  %18102 = vmatpush3.msra.mxu1 %v15355_v2  ;;  %v15478_v30 = vld [vmem:[%s22822_s10 + $0x4b8] sm:$0xff]  ;;  %v15586_v2 = vld [vmem:[%s22822_s10 + $0x5c0] sm:$0xff] }
 0xd88   : > { %18070 = vmatprep.subr.mxu0 %v15262_v44  ;;  %18103 = vmatprep.subr.mxu1 %v15370_v43  ;;  %v15462_v44 = vld [vmem:[%s22822_s10 + $0x438] sm:$0xff]  ;;  %v15570_v43 = vld [vmem:[%s22822_s10 + $0x540] sm:$0xff] }
 0xd89   : > { %18071 = vmatpush3.msra.mxu0 %v15246_v37  ;;  %18104 = vmatpush3.msra.mxu1 %v15354_v59  ;;  %v15477_v37 = vld [vmem:[%s22822_s10 + $0x4b0] sm:$0xff]  ;;  %v15585_v59 = vld [vmem:[%s22822_s10 + $0x5b8] sm:$0xff] }
 0xd8a   : > { %18072 = vmatprep.subr.mxu0 %v15261_v57  ;;  %18105 = vmatprep.subr.mxu1 %v15369_v35  ;;  %v15461_v57 = vld [vmem:[%s22822_s10 + $0x430] sm:$0xff]  ;;  %v15569_v35 = vld [vmem:[%s22822_s10 + $0x538] sm:$0xff] }
 0xd8b   : > { %18073 = vmatpush3.msra.mxu0 %v15245_v33  ;;  %18106 = vmatpush3.msra.mxu1 %v15353_v27  ;;  %v15476_v33 = vld [vmem:[%s22822_s10 + $0x4a8] sm:$0xff]  ;;  %v15584_v27 = vld [vmem:[%s22822_s10 + $0x5b0] sm:$0xff] }
 0xd8c   : > { %18074 = vmatprep.subr.mxu0 %v15260_v16  ;;  %18107 = vmatprep.subr.mxu1 %v15368_v1  ;;  %v15460_v16 = vld [vmem:[%s22822_s10 + $0x428] sm:$0xff]  ;;  %v15568_v1 = vld [vmem:[%s22822_s10 + $0x530] sm:$0xff] }
 0xd8d   : > { %18075 = vmatpush3.msra.mxu0 %v15244_v32  ;;  %18108 = vmatpush3.msra.mxu1 %v15352_v8  ;;  %v15475_v32 = vld [vmem:[%s22822_s10 + $0x4a0] sm:$0xff]  ;;  %v15583_v8 = vld [vmem:[%s22822_s10 + $0x5a8] sm:$0xff] }
 0xd8e   : > { %18076 = vmatprep.subr.mxu0 %v15259_v12  ;;  %18109 = vmatprep.subr.mxu1 %v15367_v11  ;;  %v15459_v12 = vld [vmem:[%s22822_s10 + $0x420] sm:$0xff]  ;;  %v15567_v11 = vld [vmem:[%s22822_s10 + $0x528] sm:$0xff] }
 0xd8f   : > { %18077 = vmatpush3.msra.mxu0 %v15243_v7  ;;  %18110 = vmatpush3.msra.mxu1 %v15351_v38  ;;  %v15474_v7 = vld [vmem:[%s22822_s10 + $0x498] sm:$0xff]  ;;  %v15582_v38 = vld [vmem:[%s22822_s10 + $0x5a0] sm:$0xff] }
 0xd90   : > { %18078 = vmatprep.subr.mxu0 %v15258_v52  ;;  %18111 = vmatprep.subr.mxu1 %v15366_v40  ;;  %v15458_v52 = vld [vmem:[%s22822_s10 + $0x418] sm:$0xff]  ;;  %v15566_v40 = vld [vmem:[%s22822_s10 + $0x520] sm:$0xff] }
 0xd91   : > { %18079 = vmatpush3.msra.mxu0 %v15242_v53  ;;  %18112 = vmatpush3.msra.mxu1 %v15350_v14  ;;  %v15473_v53 = vld [vmem:[%s22822_s10 + $0x490] sm:$0xff]  ;;  %v15581_v14 = vld [vmem:[%s22822_s10 + $0x598] sm:$0xff] }
 0xd92   : > { %18080 = vmatprep.subr.mxu0 %v15257_v20  ;;  %18113 = vmatprep.subr.mxu1 %v15365_v22  ;;  %v15457_v20 = vld [vmem:[%s22822_s10 + $0x410] sm:$0xff]  ;;  %v15565_v22 = vld [vmem:[%s22822_s10 + $0x518] sm:$0xff] }
 0xd93   : > { %18081 = vmatpush3.msra.mxu0 %v15241_v5  ;;  %18114 = vmatpush3.msra.mxu1 %v15349_v55  ;;  %v15472_v5 = vld [vmem:[%s22822_s10 + $0x488] sm:$0xff]  ;;  %v15580_v55 = vld [vmem:[%s22822_s10 + $0x590] sm:$0xff] }
 0xd94   : > { %15342 = vmatmul.mubr.f32.vlgmr.msra.gmra.mxu0 %v15273_v45  ;;  %18115 = vmatprep.subr.mxu1 %v15364_v15  ;;  %v15456_v15 = vld [vmem:[%s22822_s10 + $0x408] sm:$0xff]  ;;  %v15564_v45 = vld [vmem:[%s22822_s10 + $0x510] sm:$0xff] }
 0xd95   : > { %18120 = vmatprep.subr.mxu0 %v15486_v36  ;;  %18116 = vmatpush3.msra.mxu1 %v15348_v31  ;;  %v15471_v36 = vld [vmem:[%s22822_s10 + $0x480] sm:$0xff]  ;;  %v15579_v31 = vld [vmem:[%s22822_s10 + $0x588] sm:$0xff] }
 0xd96   : > { %18121 = vmatpush3.msra.mxu0 %v15470_v58  ;;  %15555 = vmatprep.mubr.f32.mxu0 %v15488_v4  ;;  %v15455_v58 = vld [vmem:[%s22822_s10 + $0x400] sm:$0xff]  ;;  %v15563_v4 = vld [vmem:[%s22822_s10 + $0x508] sm:$0xff] }
 0xd97   : > { %15449 = vmatmul.mubr.f32.vlgmr.msra.gmra.mxu1 %v15380_v23  ;;  %18122 = vmatprep.subr.mxu0 %v15485_v10  ;;  %v15578_v10 = vld [vmem:[%s22822_s10 + $0x580] sm:$0xff]  ;;  %v15487_v23 = vrot.slane %v22188_v46, 4 }
 0xd98   : > { %18155 = vmatprep.subr.mxu1 %v15593_v9  ;;  %18123 = vmatpush3.msra.mxu0 %v15469_v61  ;;  %v15700_v9 = vld [vmem:[%s22822_s10 + $0x6f8] sm:$0xff]  ;;  %v15562_v61 = vld [vmem:[%s22822_s10 + $0x500] sm:$0xff] }
 0xd99   : > { %18156 = vmatpush3.msra.mxu1 %v15577_v56  ;;  %15662 = vmatprep.mubr.f32.mxu1 %v15595_v62  ;;  %v15684_v56 = vld [vmem:[%s22822_s10 + $0x678] sm:$0xff]  ;;  %v15702_v62 = vrot.slane %v22190_v24, 6 }
 0xd9a   : > { %18124 = vmatprep.subr.mxu0 %v15484_v19  ;;  %18157 = vmatprep.subr.mxu1 %v15592_v41  ;;  %v15699_v19 = vld [vmem:[%s22822_s10 + $0x6f0] sm:$0xff]  ;;  %v15594_v41 = vrot.slane %v22188_v46, 5 }
 0xd9b   : > { %18125 = vmatpush3.msra.mxu0 %v15468_v50  ;;  %18158 = vmatpush3.msra.mxu1 %v15576_v25  ;;  %v15807_v50 = vld [vmem:[%s22822_s10 + $0x7f8] sm:$0xff]  ;;  %v15683_v25 = vld [vmem:[%s22822_s10 + $0x670] sm:$0xff] }
 0xd9c   : > { %18126 = vmatprep.subr.mxu0 %v15483_v26  ;;  %18159 = vmatprep.subr.mxu1 %v15591_v17  ;;  %v15791_v26 = vld [vmem:[%s22822_s10 + $0x778] sm:$0xff]  ;;  %v15809_v17 = vrot.slane %v22190_v24, 7  ;;  %v15697_v24 = vld [vmem:[%s22822_s10 + $0x6e0] sm:$0xff] }
 0xd9d   : > { %18127 = vmatpush3.msra.mxu0 %v15467_v54  ;;  %18160 = vmatpush3.msra.mxu1 %v15575_v0  ;;  %v15698_v54 = vld [vmem:[%s22822_s10 + $0x6e8] sm:$0xff]  ;;  %v15806_v0 = vld [vmem:[%s22822_s10 + $0x7f0] sm:$0xff] }
 0xd9e   : > { %18128 = vmatprep.subr.mxu0 %v15482_v34  ;;  %18161 = vmatprep.subr.mxu1 %v15590_v49  ;;  %v15682_v34 = vld [vmem:[%s22822_s10 + $0x668] sm:$0xff]  ;;  %v15790_v49 = vld [vmem:[%s22822_s10 + $0x770] sm:$0xff] }
 0xd9f   : > { %18129 = vmatpush3.msra.mxu0 %v15466_v42  ;;  %18162 = vmatpush3.msra.mxu1 %v15574_v28  ;;  %v15805_v42 = vld [vmem:[%s22822_s10 + $0x7e8] sm:$0xff]  ;;  %v15681_v28 = vld [vmem:[%s22822_s10 + $0x660] sm:$0xff] }
 0xda0   : > { %18130 = vmatprep.subr.mxu0 %v15481_v60  ;;  %18163 = vmatprep.subr.mxu1 %v15589_v6  ;;  %v15789_v60 = vld [vmem:[%s22822_s10 + $0x768] sm:$0xff]  ;;  %v15696_v6 = vld [vmem:[%s22822_s10 + $0x6d8] sm:$0xff] }
 0xda1   : > { %18131 = vmatpush3.msra.mxu0 %v15465_v47  ;;  %18164 = vmatpush3.msra.mxu1 %v15573_v29  ;;  %v15804_v47 = vld [vmem:[%s22822_s10 + $0x7e0] sm:$0xff]  ;;  %v15680_v29 = vld [vmem:[%s22822_s10 + $0x658] sm:$0xff] }
 0xda2   : > { %18132 = vmatprep.subr.mxu0 %v15480_v3  ;;  %18165 = vmatprep.subr.mxu1 %v15588_v48  ;;  %v15788_v3 = vld [vmem:[%s22822_s10 + $0x760] sm:$0xff]  ;;  %v15695_v48 = vld [vmem:[%s22822_s10 + $0x6d0] sm:$0xff] }
 0xda3   : > { %18133 = vmatpush3.msra.mxu0 %v15464_v51  ;;  %18166 = vmatpush3.msra.mxu1 %v15572_v21  ;;  %v15803_v51 = vld [vmem:[%s22822_s10 + $0x7d8] sm:$0xff]  ;;  %v15679_v21 = vld [vmem:[%s22822_s10 + $0x650] sm:$0xff] }
 0xda4   : > { %18134 = vmatprep.subr.mxu0 %v15479_v39  ;;  %18167 = vmatprep.subr.mxu1 %v15587_v63  ;;  %v15787_v39 = vld [vmem:[%s22822_s10 + $0x758] sm:$0xff]  ;;  %v15694_v63 = vld [vmem:[%s22822_s10 + $0x6c8] sm:$0xff] }
 0xda5   : > { %18135 = vmatpush3.msra.mxu0 %v15463_v13  ;;  %18168 = vmatpush3.msra.mxu1 %v15571_v18  ;;  %v15802_v13 = vld [vmem:[%s22822_s10 + $0x7d0] sm:$0xff]  ;;  %v15678_v18 = vld [vmem:[%s22822_s10 + $0x648] sm:$0xff] }
 0xda6   : > { %18136 = vmatprep.subr.mxu0 %v15478_v30  ;;  %18169 = vmatprep.subr.mxu1 %v15586_v2  ;;  %v15786_v30 = vld [vmem:[%s22822_s10 + $0x750] sm:$0xff]  ;;  %v15693_v2 = vld [vmem:[%s22822_s10 + $0x6c0] sm:$0xff] }
 0xda7   : > { %18137 = vmatpush3.msra.mxu0 %v15462_v44  ;;  %18170 = vmatpush3.msra.mxu1 %v15570_v43  ;;  %v15801_v44 = vld [vmem:[%s22822_s10 + $0x7c8] sm:$0xff]  ;;  %v15677_v43 = vld [vmem:[%s22822_s10 + $0x640] sm:$0xff] }
 0xda8   : > { %18138 = vmatprep.subr.mxu0 %v15477_v37  ;;  %18171 = vmatprep.subr.mxu1 %v15585_v59  ;;  %v15785_v37 = vld [vmem:[%s22822_s10 + $0x748] sm:$0xff]  ;;  %v15692_v59 = vld [vmem:[%s22822_s10 + $0x6b8] sm:$0xff] }
 0xda9   : > { %18139 = vmatpush3.msra.mxu0 %v15461_v57  ;;  %18172 = vmatpush3.msra.mxu1 %v15569_v35  ;;  %v15800_v57 = vld [vmem:[%s22822_s10 + $0x7c0] sm:$0xff]  ;;  %v15676_v35 = vld [vmem:[%s22822_s10 + $0x638] sm:$0xff] }
 0xdaa   : > { %18140 = vmatprep.subr.mxu0 %v15476_v33  ;;  %18173 = vmatprep.subr.mxu1 %v15584_v27  ;;  %v15784_v33 = vld [vmem:[%s22822_s10 + $0x740] sm:$0xff]  ;;  %v15691_v27 = vld [vmem:[%s22822_s10 + $0x6b0] sm:$0xff] }
 0xdab   : > { %18141 = vmatpush3.msra.mxu0 %v15460_v16  ;;  %18174 = vmatpush3.msra.mxu1 %v15568_v1  ;;  %v15799_v16 = vld [vmem:[%s22822_s10 + $0x7b8] sm:$0xff]  ;;  %v15675_v1 = vld [vmem:[%s22822_s10 + $0x630] sm:$0xff] }
 0xdac   : > { %18142 = vmatprep.subr.mxu0 %v15475_v32  ;;  %18175 = vmatprep.subr.mxu1 %v15583_v8  ;;  %v15783_v32 = vld [vmem:[%s22822_s10 + $0x738] sm:$0xff]  ;;  %v15690_v8 = vld [vmem:[%s22822_s10 + $0x6a8] sm:$0xff] }
 0xdad   : > { %18143 = vmatpush3.msra.mxu0 %v15459_v12  ;;  %18176 = vmatpush3.msra.mxu1 %v15567_v11  ;;  %v15798_v12 = vld [vmem:[%s22822_s10 + $0x7b0] sm:$0xff]  ;;  %v15674_v11 = vld [vmem:[%s22822_s10 + $0x628] sm:$0xff] }
 0xdae   : > { %18144 = vmatprep.subr.mxu0 %v15474_v7  ;;  %18177 = vmatprep.subr.mxu1 %v15582_v38  ;;  %v15782_v7 = vld [vmem:[%s22822_s10 + $0x730] sm:$0xff]  ;;  %v15689_v38 = vld [vmem:[%s22822_s10 + $0x6a0] sm:$0xff] }
 0xdaf   : > { %18145 = vmatpush3.msra.mxu0 %v15458_v52  ;;  %18178 = vmatpush3.msra.mxu1 %v15566_v40  ;;  %v15797_v52 = vld [vmem:[%s22822_s10 + $0x7a8] sm:$0xff]  ;;  %v15673_v40 = vld [vmem:[%s22822_s10 + $0x620] sm:$0xff] }
 0xdb0   : > { %18146 = vmatprep.subr.mxu0 %v15473_v53  ;;  %18179 = vmatprep.subr.mxu1 %v15581_v14  ;;  %v15781_v53 = vld [vmem:[%s22822_s10 + $0x728] sm:$0xff]  ;;  %v15688_v14 = vld [vmem:[%s22822_s10 + $0x698] sm:$0xff] }
 0xdb1   : > { %18147 = vmatpush3.msra.mxu0 %v15457_v20  ;;  %18180 = vmatpush3.msra.mxu1 %v15565_v22  ;;  %v15796_v20 = vld [vmem:[%s22822_s10 + $0x7a0] sm:$0xff]  ;;  %v15672_v22 = vld [vmem:[%s22822_s10 + $0x618] sm:$0xff] }
 0xdb2   : > { %18148 = vmatprep.subr.mxu0 %v15472_v5  ;;  %18181 = vmatprep.subr.mxu1 %v15580_v55  ;;  %v15780_v5 = vld [vmem:[%s22822_s10 + $0x720] sm:$0xff]  ;;  %v15687_v55 = vld [vmem:[%s22822_s10 + $0x690] sm:$0xff] }
 0xdb3   : > { %18149 = vmatpush3.msra.mxu0 %v15456_v15  ;;  %18182 = vmatpush3.msra.mxu1 %v15564_v45  ;;  %v15795_v15 = vld [vmem:[%s22822_s10 + $0x798] sm:$0xff]  ;;  %v15671_v45 = vld [vmem:[%s22822_s10 + $0x610] sm:$0xff] }
 0xdb4   : > { %18150 = vmatprep.subr.mxu0 %v15471_v36  ;;  %18183 = vmatprep.subr.mxu1 %v15579_v31  ;;  %v15779_v36 = vld [vmem:[%s22822_s10 + $0x718] sm:$0xff]  ;;  %v15686_v31 = vld [vmem:[%s22822_s10 + $0x688] sm:$0xff] }
 0xdb5   : > { %18151 = vmatpush3.msra.mxu0 %v15455_v58  ;;  %18184 = vmatpush3.msra.mxu1 %v15563_v4  ;;  %v15794_v58 = vld [vmem:[%s22822_s10 + $0x790] sm:$0xff]  ;;  %v15670_v4 = vld [vmem:[%s22822_s10 + $0x608] sm:$0xff] }
 0xdb6   : > { %15556 = vmatmul.mubr.f32.vlgmr.msra.gmra.mxu0 %v15487_v23  ;;  %18185 = vmatprep.subr.mxu1 %v15578_v10  ;;  %v15778_v10 = vld [vmem:[%s22822_s10 + $0x710] sm:$0xff]  ;;  %v15685_v23 = vld [vmem:[%s22822_s10 + $0x680] sm:$0xff] }
 0xdb7   : > { %18190 = vmatprep.subr.mxu0 %v15700_v9  ;;  %18186 = vmatpush3.msra.mxu1 %v15562_v61  ;;  %v15793_v9 = vld [vmem:[%s22822_s10 + $0x788] sm:$0xff]  ;;  %v15669_v61 = vld [vmem:[%s22822_s10 + $0x600] sm:$0xff] }
 0xdb8   : > { %18191 = vmatpush3.msra.mxu0 %v15684_v56  ;;  %15769 = vmatprep.mubr.f32.mxu0 %v15702_v62  ;;  %v15777_v56 = vld [vmem:[%s22822_s10 + $0x708] sm:$0xff]  ;;  %v15792_v62 = vld [vmem:[%s22822_s10 + $0x780] sm:$0xff] }
 0xdb9   : > { %15663 = vmatmul.mubr.f32.vlgmr.msra.gmra.mxu1 %v15594_v41  ;;  %18192 = vmatprep.subr.mxu0 %v15699_v19  ;;  %v15701_v19 = vrot.slane %v22188_v46, 6  ;;  %v15776_v41 = vld [vmem:[%s22822_s10 + $0x700] sm:$0xff] }
 0xdba   : > { %18225 = vmatprep.subr.mxu1 %v15807_v50  ;;  %18193 = vmatpush3.msra.mxu0 %v15683_v25  ;;  %v15808_v50 = vrot.slane %v22188_v46, 7 }
 0xdbb   : > { %18226 = vmatpush3.msra.mxu1 %v15791_v26  ;;  %15876 = vmatprep.mubr.f32.mxu1 %v15809_v17 }
 0xdbc   : > { %18194 = vmatprep.subr.mxu0 %v15698_v54  ;;  %18227 = vmatprep.subr.mxu1 %v15806_v0 }
 0xdbd   : > { %18195 = vmatpush3.msra.mxu0 %v15682_v34  ;;  %18228 = vmatpush3.msra.mxu1 %v15790_v49  ;;  %v15028_v34 = vld [vmem:[#allocation16] sm:$0x1] }
 0xdbe   : > { %18196 = vmatprep.subr.mxu0 %v15697_v24  ;;  %18229 = vmatprep.subr.mxu1 %v15805_v42 }
 0xdbf   : > { %18197 = vmatpush3.msra.mxu0 %v15681_v28  ;;  %18230 = vmatpush3.msra.mxu1 %v15789_v60 }
 0xdc0   : > { %18198 = vmatprep.subr.mxu0 %v15696_v6  ;;  %18231 = vmatprep.subr.mxu1 %v15804_v47 }
 0xdc1   : > { %18199 = vmatpush3.msra.mxu0 %v15680_v29  ;;  %18232 = vmatpush3.msra.mxu1 %v15788_v3 }
 0xdc2   : > { %18200 = vmatprep.subr.mxu0 %v15695_v48  ;;  %18233 = vmatprep.subr.mxu1 %v15803_v51 }
 0xdc3   : > { %18201 = vmatpush3.msra.mxu0 %v15679_v21  ;;  %18234 = vmatpush3.msra.mxu1 %v15787_v39 }
 0xdc4   : > { %18202 = vmatprep.subr.mxu0 %v15694_v63  ;;  %18235 = vmatprep.subr.mxu1 %v15802_v13 }
 0xdc5   : > { %18203 = vmatpush3.msra.mxu0 %v15678_v18  ;;  %18236 = vmatpush3.msra.mxu1 %v15786_v30 }
 0xdc6   : > { %18204 = vmatprep.subr.mxu0 %v15693_v2  ;;  %18237 = vmatprep.subr.mxu1 %v15801_v44 }
 0xdc7   : > { %18205 = vmatpush3.msra.mxu0 %v15677_v43  ;;  %18238 = vmatpush3.msra.mxu1 %v15785_v37 }
 0xdc8   : > { %18206 = vmatprep.subr.mxu0 %v15692_v59  ;;  %18239 = vmatprep.subr.mxu1 %v15800_v57 }
 0xdc9   : > { %18207 = vmatpush3.msra.mxu0 %v15676_v35  ;;  %18240 = vmatpush3.msra.mxu1 %v15784_v33 }
 0xdca   : > { %18208 = vmatprep.subr.mxu0 %v15691_v27  ;;  %18241 = vmatprep.subr.mxu1 %v15799_v16 }
 0xdcb   : > { %18209 = vmatpush3.msra.mxu0 %v15675_v1  ;;  %18242 = vmatpush3.msra.mxu1 %v15783_v32 }
 0xdcc   : > { %18210 = vmatprep.subr.mxu0 %v15690_v8  ;;  %18243 = vmatprep.subr.mxu1 %v15798_v12 }
 0xdcd   : > { %18211 = vmatpush3.msra.mxu0 %v15674_v11  ;;  %18244 = vmatpush3.msra.mxu1 %v15782_v7 }
 0xdce   : > { %18212 = vmatprep.subr.mxu0 %v15689_v38  ;;  %18245 = vmatprep.subr.mxu1 %v15797_v52 }
 0xdcf   : > { %18213 = vmatpush3.msra.mxu0 %v15673_v40  ;;  %18246 = vmatpush3.msra.mxu1 %v15781_v53 }
 0xdd0   : > { %18214 = vmatprep.subr.mxu0 %v15688_v14  ;;  %18247 = vmatprep.subr.mxu1 %v15796_v20 }
 0xdd1   : > { %18215 = vmatpush3.msra.mxu0 %v15672_v22  ;;  %18248 = vmatpush3.msra.mxu1 %v15780_v5 }
 0xdd2   : > { %18216 = vmatprep.subr.mxu0 %v15687_v55  ;;  %18249 = vmatprep.subr.mxu1 %v15795_v15 }
 0xdd3   : > { %18217 = vmatpush3.msra.mxu0 %v15671_v45  ;;  %18250 = vmatpush3.msra.mxu1 %v15779_v36 }
 0xdd4   : > { %18218 = vmatprep.subr.mxu0 %v15686_v31  ;;  %18251 = vmatprep.subr.mxu1 %v15794_v58 }
 0xdd5   : > { %18219 = vmatpush3.msra.mxu0 %v15670_v4  ;;  %18252 = vmatpush3.msra.mxu1 %v15778_v10 }
 0xdd6   : > { %18220 = vmatprep.subr.mxu0 %v15685_v23  ;;  %18253 = vmatprep.subr.mxu1 %v15793_v9 }
 0xdd7   : > { %18221 = vmatpush3.msra.mxu0 %v15669_v61  ;;  %18254 = vmatpush3.msra.mxu1 %v15777_v56 }
 0xdd8   : > { %15770 = vmatmul.mubr.f32.vlgmr.msra.gmra.mxu0 %v15701_v19  ;;  %18255 = vmatprep.subr.mxu1 %v15792_v62 }
 0xdd9   : > { %18256 = vmatpush3.msra.mxu1 %v15776_v41 }
 0xdda   : > { %15877 = vmatmul.mubr.f32.vlgmr.msra.gmra.mxu1 %v15808_v50 }
 0xe33   : > { %v18012_v25 = vpop.f32.mrf.mxu0 }
 0xe35   : > { %v18013_v26 = vpop.f32.mrf.mxu0 }
 0xe36   : > { %v18047_v17 = vpop.f32.mrf.mxu1  ;;  %v18014_v0 = vadd.f32 %v18013_v26, %v18012_v25 }
 0xe38   : > { %v18048_v49 = vpop.f32.mrf.mxu1  ;;  %v15131_v28 = vadd.f32 %v18014_v0, %v15028_v34 }
 0xe39   : > { %v18049_v60 = vadd.f32 %v18048_v49, %v18047_v17 }
 0xe3b   : > { %v15240_v3 = vadd.f32 %v18049_v60, %v15131_v28 }
 0xe54   : > { %v18082_v54 = vpop.f32.mrf.mxu0 }
 0xe56   : > { %v18083_v24 = vpop.f32.mrf.mxu0 }
 0xe57   : > { %v18117_v42 = vpop.f32.mrf.mxu1  ;;  %v18084_v47 = vadd.f32 %v18083_v24, %v18082_v54 }
 0xe59   : > { %v18118_v29 = vpop.f32.mrf.mxu1  ;;  %v15347_v51 = vadd.f32 %v18084_v47, %v15240_v3 }
 0xe5a   : > { %v18119_v21 = vadd.f32 %v18118_v29, %v18117_v42 }
 0xe5c   : > { %v15454_v13 = vadd.f32 %v18119_v21, %v15347_v51 }
 0xe76   : > { %v18152_v6 = vpop.f32.mrf.mxu0 }
 0xe78   : > { %v18153_v48 = vpop.f32.mrf.mxu0 }
 0xe79   : > { %v18187_v46 = vpop.f32.mrf.mxu1  ;;  %v18154_v39 = vadd.f32 %v18153_v48, %v18152_v6 }
 0xe7b   : > { %v18188_v63 = vpop.f32.mrf.mxu1  ;;  %v15561_v18 = vadd.f32 %v18154_v39, %v15454_v13 }
 0xe7c   : > { %v18189_v30 = vadd.f32 %v18188_v63, %v18187_v46 }
 0xe7e   : > { %v15668_v37 = vadd.f32 %v18189_v30, %v15561_v18 }
 0xe98   : > { %v18222_v2 = vpop.f32.mrf.mxu0 }
 0xe9a   : > { %v18223_v44 = vpop.f32.mrf.mxu0  ;;  %v18257_v43 = vpop.f32.mrf.mxu1 }
 0xe9b   : > { %v18224_v59 = vadd.f32 %v18223_v44, %v18222_v2 }
 0xe9c   : > { %v18258_v57 = vpop.f32.mrf.mxu1 }
 0xe9d   : > { %v15775_v35 = vadd.f32 %v18224_v59, %v15668_v37  ;;  %v18259_v33 = vadd.f32 %v18258_v57, %v18257_v43 }
 0xe9f   : > { %v15882_v27 = vadd.f32 %v18259_v33, %v15775_v35 }
 0xea1   : > { %15884 = vst.msk [vmem:[%s528_s23] sm:$0x1] %vm15883_vm3, %v15882_v27 }
 0xea2   : > { %20133 = shalt.err (!%p20130_p2)
}
 0xea3   : > { %s20134_s26 = scalar_lea.hbm %s15896_s21, 16  ;;  %s20138_s29 = scalar_lea.hbm %s22824_s12, 32 }
 0xea4   : > { %p20135_p12 = scmp.ne.s32.totalorder %s15896_s21, %s20134_s26  ;;  %p20139_p8 = scmp.lt.s32.totalorder %s15896_s21, %s22824_s12 }
 0xea5   : > { %p20140_p9 = scmp.lt.s32.totalorder %s20138_s29, %s20134_s26 }
 0xea6   : > { %p20136_p4 = pnand %p20135_p12, %p22919_p10 }
 0xea7   : > { %p20141_p5 = por %p20140_p9, %p20139_p8 }
 0xea8   : > { %p20137_p7 = pneg %p20136_p4 }
 0xeaa   : > { %p20142_p6 = pnand %p20141_p5, %p20137_p7 }
 0xeac   : > { %20145 = shalt.err (!%p20142_p6)
}
 0xead   : > { %18296 = dma.vmem_to_hbm [thread:$0]  (%p22919_p10), %s15899_s17, 16, %s15896_s21, %s15886_s14  }
 0xeae PF: > { %s22920_s16 = sld [smem:[#allocation24_spill]]  ;;  %p18348_p11 = scmp.ge.s32.totalorder %s20200_s24, 2 }
 0xeaf   : > { %s22921_s20 = sld [smem:[#allocation28_spill]] }
 0xeb4   : > { %s15910_s19 = sand.u32 1, %s22920_s16  }
 0xeb5   : > { %p22922_p1 = scmp.ne.s32.totalorder %s22921_s20, 0  ;;  %s15911_s15 = scalar_lea.sflag [#allocation4], %s15910_s19 }
 0xeb7   : > { %p18327_p13 = pnand %p18348_p11, %p22922_p1 }
 0xeb9   : > { %p18328_p0 = pneg %p18327_p13 }
 0xebb   : > { %20183 = dma.done.wait (%p18328_p0), %s15911_s15, 16  }
 0xebc   : > { %20185 = vsyncadd (%p18328_p0), %s15911_s15, 4294967280  ;;  %s22923_s24 = sld [smem:[#allocation26_spill]]  ;;  %s22926_s21 = smov %s20192_s22 }
 0xebd   : > { %s22924_s25 = sld [smem:[#allocation25_spill]] }
 0xebe   : > { %s22925_s23 = sld [smem:[#allocation27_spill]] }
 0xec2   : > { %p27_p3 = scmp.ge.s32.totalorder %s22923_s24, 4  }
 0xec3   : > { %s22927_s22 = smov %s22924_s25 }
 0xec4   :  { %29 = sbr.rel (!%p27_p3) target bundleno = 8 (0x8), region = 152 }
 0xec9   :  { %15915 = vsyncpa [#allocation3], 1 }
 0xeca   :  { %15917 = vsyncpa [#allocation3 + $0x1], 1 }
 0xecb   :  { %15918 = vsyncpa [#allocation6], 1 }
 0xecc   :  { %15919 = vsyncpa [#allocation9], 1 }
 0xecd   :  { %15920 = vsyncpa [#allocation12], 1 }
 0xece   :  { %15921 = vsyncpa [#allocation15], 1 }
 0xecf   :  { %15922 = vsyncpa [#allocation4], 1 }
 0xed0   :  { %15924 = vsyncpa [#allocation4 + $0x1], 1 }

</bundles_post_ra>
